<compile_context>
chip_gen: v7x
topology: tpu7x:2x2x1
jax: 0.10.0
libtpu: 0.0.40
codegen_flags: <defaults>
</compile_context>

<pallas_src>
import functools

import jax
import jax.numpy as jnp
from jax import lax
from jax.experimental import pallas as pl
from jax.experimental.pallas import tpu as pltpu

BOARD_CONV_FILTERS = 128
_LANES = 128


def _round_up(x, m):
    return ((x + m - 1) // m) * m


# ------------------------------ fused kernel ------------------------------

def _actor_fused_kernel(x_ref, w1_ref, b1_ref, w2_ref, b2_ref,
                        fw1_ref, fb1_ref, fw2_ref, fb2_ref, o_ref,
                        *, tb, height, width, n_actions):
    """TB boards per grid step.  C = BOARD_CONV_FILTERS = 128.

    x_ref   : (H1*W1, TB, 128) conv1 im2col patches, rows (h1, w1), boards on
              dim 1, patch channels (ky, kx, ci) zero-padded to 128 lanes
    w1_ref  : (128, C)         conv1 weight (rows (ky,kx,ci), zero-padded)
    b1_ref  : (1, C)
    w2_ref  : (9*C, C)         conv2 weight, row blocks ordered (ky, kx)
    b2_ref  : (1, C)
    fw1_ref : (H2*W2*C, 512)   fc1 weight, rows ordered (h2, w2, c)
    fb1_ref : (1, 512)
    fw2_ref : (512, NP)        fc2 weight, zero-padded to NP (=128) lanes
    fb2_ref : (1, NP)
    o_ref   : (TB, NP)         softmax probabilities (padded lanes are 0)
    """
    C = BOARD_CONV_FILTERS
    H1, W1 = height - 2, width - 2
    H2, W2 = height - 4, width - 4
    f32 = jnp.float32

    # ---- conv1 + relu: ONE (H1*W1*TB, 128) @ (128, C) MXU matmul -----------
    patches = x_ref[...].reshape(H1 * W1 * tb, _LANES)
    a1 = jnp.dot(patches, w1_ref[...], preferred_element_type=f32)
    a1 = jnp.maximum(a1 + b1_ref[...], 0.0)          # rows ordered (h1, w1, b)
    a1 = a1.reshape(H1, W1 * tb, C)                  # (h1, w1*b, C)

    # ---- conv2 + relu: 9 taps, one (H2*W2*TB, C) @ (C, C) matmul per tap ---
    # Row layout (h1, w1, b) makes every tap slice contiguous & sublane aligned.
    acc2 = None
    for k in range(9):
        ky, kx = divmod(k, 3)
        lhs = a1[ky:ky + H2, kx * tb:(kx + W2) * tb, :].reshape(H2 * W2 * tb, C)
        d = jnp.dot(lhs, w2_ref[k * C:(k + 1) * C, :], preferred_element_type=f32)
        acc2 = d if acc2 is None else acc2 + d
    a2 = jnp.maximum(acc2 + b2_ref[...], 0.0)        # rows ordered (h2, w2, b)

    # ---- fc1 + relu: sum of H2*W2 (TB, C) @ (C, 512) K-chunk matmuls -------
    h1 = None
    for p in range(H2 * W2):
        d = jnp.dot(a2[p * tb:(p + 1) * tb, :], fw1_ref[p * C:(p + 1) * C, :],
                    preferred_element_type=f32)
        h1 = d if h1 is None else h1 + d
    h1 = jnp.maximum(h1 + fb1_ref[...], 0.0)         # (TB, 512)

    # ---- fc2 + masked softmax over a lane-dense 128-wide slab --------------
    logits = jnp.dot(h1, fw2_ref[...], preferred_element_type=f32) + fb2_ref[...]
    lane = lax.broadcasted_iota(jnp.int32, logits.shape, 1)
    logits = jnp.where(lane < n_actions, logits, jnp.float32(-1e30))
    m = jnp.max(logits, axis=-1, keepdims=True)
    e = jnp.exp(logits - m)
    o_ref[...] = e / jnp.sum(e, axis=-1, keepdims=True)


# --------------------- one-time weight re-layout (hoisted) -----------------

def prepare_params(params, width, height):
    """Re-layout PyTorch-layout parameters ONCE for the fused kernel."""
    (w1, b1, w2, b2, fw1, fb1, fw2, fb2) = params
    C = BOARD_CONV_FILTERS
    H2, W2 = height - 4, width - 4
    NP = _round_up(width, _LANES)
    f32 = jnp.float32

    # conv1: (C, cin, 3, 3) -> rows (ky, kx, ci) zero-padded to 128, cols C
    cin1 = w1.shape[1]
    k1 = 9 * cin1
    w1p = jnp.zeros((_LANES, C), f32).at[:k1, :].set(
        jnp.transpose(w1.astype(f32), (2, 3, 1, 0)).reshape(k1, C))
    # conv2: (C, C, 3, 3) -> rows (ky, kx, ci), cols C
    w2p = jnp.transpose(w2.astype(f32), (2, 3, 1, 0)).reshape(9 * C, C)
    # fc1: PyTorch flatten order (c, h2, w2) -> kernel order (h2, w2, c)
    fw1p = jnp.transpose(fw1.astype(f32).reshape(512, C, H2, W2),
                         (0, 2, 3, 1)).reshape(512, H2 * W2 * C).T
    # fc2: (width, 512) -> (512, NP) zero-padded lane-dense slab
    fw2p = jnp.zeros((512, NP), f32).at[:, :width].set(fw2.astype(f32).T)
    fb2p = jnp.zeros((1, NP), f32).at[0, :width].set(fb2.astype(f32))

    return (w1p, b1.astype(f32).reshape(1, C),
            w2p, b2.astype(f32).reshape(1, C),
            fw1p, fb1.astype(f32).reshape(1, 512),
            fw2p, fb2p)


# ------------------------ conv1 im2col (wrapper side) ----------------------

def _im2col_conv1(x_nchw_f32, height, width):
    """(N, cin, H0, W0) -> (H1*W1, N, 128) patches; last dim ordered
    (ky, kx, ci) in the first 9*cin lanes, zero elsewhere (full MXU K tile)."""
    N, cin = x_nchw_f32.shape[0], x_nchw_f32.shape[1]
    H1, W1 = height - 2, width - 2
    cols = []
    for ky in range(3):
        for kx in range(3):
            for ci in range(cin):
                cols.append(x_nchw_f32[:, ci, ky:ky + H1, kx:kx + W1])
    p = jnp.stack(cols, axis=-1)                 # (N, H1, W1, 9*cin)
    p = jnp.transpose(p, (1, 2, 0, 3))           # (H1, W1, N, 9*cin)
    p = p.reshape(H1 * W1, N, 9 * cin)
    return jnp.pad(p, ((0, 0), (0, 0), (0, _LANES - 9 * cin)))


# ------------------------------ forward wrapper ----------------------------

def actor_forward(x, prepped, *, width, height):
    """Pallas implementation of Actor.forward.  x: (N, 2, height, width) NCHW."""
    (w1p, b1p, w2p, b2p, fw1p, fb1p, fw2p, fb2p) = prepped
    N = x.shape[0]
    H1, W1 = height - 2, width - 2
    NP = fw2p.shape[1]

    # Batch block: TB=16 fills the MXU (conv2 M = H2*W2*TB = 256) while still
    # leaving >= 2 grid steps at N >= 32 so v7x's 2nd TensorCore gets work.
    TB = 16 if N >= 32 else 8
    N_pad = _round_up(N, TB)
    x_f = x.astype(jnp.float32)
    if N_pad != N:
        x_f = jnp.pad(x_f, ((0, N_pad - N), (0, 0), (0, 0), (0, 0)))

    patches = _im2col_conv1(x_f, height, width)      # (H1*W1, N_pad, 128)

    kernel = functools.partial(_actor_fused_kernel, tb=TB,
                               height=height, width=width, n_actions=width)
    probs = pl.pallas_call(
        kernel,
        out_shape=jax.ShapeDtypeStruct((N_pad, NP), jnp.float32),
        grid=(N_pad // TB,),
        in_specs=[
            pl.BlockSpec((H1 * W1, TB, _LANES), lambda i: (0, i, 0)),
            # Weights: constant index maps -> stay resident in VMEM across steps.
            pl.BlockSpec(w1p.shape, lambda i: (0, 0)),
            pl.BlockSpec(b1p.shape, lambda i: (0, 0)),
            pl.BlockSpec(w2p.shape, lambda i: (0, 0)),
            pl.BlockSpec(b2p.shape, lambda i: (0, 0)),
            pl.BlockSpec(fw1p.shape, lambda i: (0, 0)),
            pl.BlockSpec(fb1p.shape, lambda i: (0, 0)),
            pl.BlockSpec(fw2p.shape, lambda i: (0, 0)),
            pl.BlockSpec(fb2p.shape, lambda i: (0, 0)),
        ],
        out_specs=pl.BlockSpec((TB, NP), lambda i: (i, 0)),
        compiler_params=pltpu.CompilerParams(
            dimension_semantics=("parallel",),       # megacore / v7x 2nd TC
            vmem_limit_bytes=32 * 1024 * 1024,
        ),
    )(patches, w1p, b1p, w2p, b2p, fw1p, fb1p, fw2p, fb2p)

    return probs[:N, :width]


# ---------------- pure-JAX reference (PyTorch semantics) -------------------

def ref_forward(x, params):
    (w1, b1, w2, b2, fw1, fb1, fw2, fb2) = params
    dn = ('NCHW', 'OIHW', 'NCHW')
    x = x.astype(jnp.float32)
    y = lax.conv_general_dilated(x, w1, (1, 1), 'VALID', dimension_numbers=dn)
    y = jnp.maximum(y + b1[None, :, None, None], 0.0)
    y = lax.conv_general_dilated(y, w2, (1, 1), 'VALID', dimension_numbers=dn)
    y = jnp.maximum(y + b2[None, :, None, None], 0.0)
    flat = y.reshape(y.shape[0], -1)
    h = jnp.maximum(flat @ fw1.T + fb1, 0.0)
    logits = h @ fw2.T + fb2
    return jax.nn.softmax(logits, axis=1)


# ---------------- deterministic parameter init -----------------------------

def init_params(width, height, key):
    ks = jax.random.split(key, 8)
    fc1_in = (width - 4) * (height - 4) * BOARD_CONV_FILTERS

    def nrm(k, shape, fan_in):
        return (jax.random.normal(k, shape, jnp.float32) / jnp.sqrt(fan_in)).astype(jnp.float32)

    w1 = nrm(ks[0], (BOARD_CONV_FILTERS, 2, 3, 3), 2 * 9)
    b1 = nrm(ks[1], (BOARD_CONV_FILTERS,), 2 * 9)
    w2 = nrm(ks[2], (BOARD_CONV_FILTERS, BOARD_CONV_FILTERS, 3, 3), BOARD_CONV_FILTERS * 9)
    b2 = nrm(ks[3], (BOARD_CONV_FILTERS,), BOARD_CONV_FILTERS * 9)
    fw1 = nrm(ks[4], (512, fc1_in), fc1_in)
    fb1 = nrm(ks[5], (512,), fc1_in)
    fw2 = nrm(ks[6], (width, 512), 512)
    fb2 = nrm(ks[7], (width,), 512)
    return (w1, b1, w2, b2, fw1, fb1, fw2, fb2)


if __name__ == "__main__":
    width, height, batch = 8, 8, 32      # batch=32 -> TB=16, 2 grid steps
    key = jax.random.PRNGKey(0)
    kx_, kp_ = jax.random.split(key)
    x = jax.random.normal(kx_, (batch, 2, height, width), jnp.float32)   # NCHW like PyTorch
    params = init_params(width, height, kp_)
    prepped = prepare_params(params, width, height)   # hoisted, one-time weight re-layout

    fwd = jax.jit(functools.partial(actor_forward, width=width, height=height))
    out = jax.block_until_ready(fwd(x, prepped))

    ref = ref_forward(x, params)
    assert out.shape == (batch, width)
    assert jnp.allclose(jnp.sum(out, axis=1), 1.0, atol=1e-5)
    assert jnp.allclose(out, ref, rtol=1e-4, atol=1e-5), "Pallas output mismatch vs reference"

    print("KERNEL_OK")
</pallas_src>

<mosaic_0001>
module attributes {stable_mosaic.version = 11 : i64} {
  func.func @_actor_fused_kernel(%arg0: i32, %arg1: memref<36x16x128xf32, #tpu.memory_space<vmem>>, %arg2: memref<128x128xf32, #tpu.memory_space<vmem>>, %arg3: memref<1x128xf32, #tpu.memory_space<vmem>>, %arg4: memref<1152x128xf32, #tpu.memory_space<vmem>>, %arg5: memref<1x128xf32, #tpu.memory_space<vmem>>, %arg6: memref<2048x512xf32, #tpu.memory_space<vmem>>, %arg7: memref<1x512xf32, #tpu.memory_space<vmem>>, %arg8: memref<512x128xf32, #tpu.memory_space<vmem>>, %arg9: memref<1x128xf32, #tpu.memory_space<vmem>>, %arg10: memref<16x128xf32, #tpu.memory_space<vmem>>) attributes {dimension_semantics = [#tpu.dimension_semantics<parallel>], iteration_bounds = array<i64: 2>, scalar_prefetch = 0 : i64, scratch_operands = 0 : i64, tpu.core_type = #tpu.core_type<tc>, window_params = [{transform_indices = @transform_0, window_bounds = array<i64: 36, 16, 128>}, {pipeline_mode = #tpu.pipeline_mode<synchronous>, transform_indices = @transform_1, window_bounds = array<i64: 128, 128>}, {pipeline_mode = #tpu.pipeline_mode<synchronous>, transform_indices = @transform_2, window_bounds = array<i64: 1, 128>}, {pipeline_mode = #tpu.pipeline_mode<synchronous>, transform_indices = @transform_3, window_bounds = array<i64: 1152, 128>}, {pipeline_mode = #tpu.pipeline_mode<synchronous>, transform_indices = @transform_4, window_bounds = array<i64: 1, 128>}, {pipeline_mode = #tpu.pipeline_mode<synchronous>, transform_indices = @transform_5, window_bounds = array<i64: 2048, 512>}, {pipeline_mode = #tpu.pipeline_mode<synchronous>, transform_indices = @transform_6, window_bounds = array<i64: 1, 512>}, {pipeline_mode = #tpu.pipeline_mode<synchronous>, transform_indices = @transform_7, window_bounds = array<i64: 512, 128>}, {pipeline_mode = #tpu.pipeline_mode<synchronous>, transform_indices = @transform_8, window_bounds = array<i64: 1, 128>}, {transform_indices = @transform_9, window_bounds = array<i64: 16, 128>}]} {
    %c0 = arith.constant 0 : index
    %c0_0 = arith.constant 0 : index
    %c0_1 = arith.constant 0 : index
    %0 = vector.load %arg1[%c0, %c0_0, %c0_1] : memref<36x16x128xf32, #tpu.memory_space<vmem>>, vector<36x16x128xf32>
    %1 = vector.shape_cast %0 : vector<36x16x128xf32> to vector<576x128xf32>
    %c0_2 = arith.constant 0 : index
    %c0_3 = arith.constant 0 : index
    %2 = vector.load %arg2[%c0_2, %c0_3] : memref<128x128xf32, #tpu.memory_space<vmem>>, vector<128x128xf32>
    %cst = arith.constant dense<0.000000e+00> : vector<576x128xf32>
    %3 = tpu.matmul %1, %2, %cst {dimension_numbers = #tpu.dot_dimension_numbers<[1], [0], [0], [1], [0, 0, 1, 1], [], []>} : vector<576x128xf32>, vector<128x128xf32>, vector<576x128xf32> -> vector<576x128xf32>
    %c0_4 = arith.constant 0 : index
    %c0_5 = arith.constant 0 : index
    %4 = vector.load %arg3[%c0_4, %c0_5] : memref<1x128xf32, #tpu.memory_space<vmem>>, vector<1x128xf32>
    %5 = vector.broadcast %4 : vector<1x128xf32> to vector<576x128xf32>
    %6 = arith.addf %3, %5 : vector<576x128xf32>
    %cst_6 = arith.constant 0.000000e+00 : f32
    %7 = vector.broadcast %cst_6 : f32 to vector<576x128xf32>
    %8 = arith.maximumf %6, %7 : vector<576x128xf32>
    %9 = vector.shape_cast %8 : vector<576x128xf32> to vector<6x96x128xf32>
    %10 = vector.extract_strided_slice %9 {offsets = [0, 0, 0], sizes = [4, 64, 128], strides = [1, 1, 1]} : vector<6x96x128xf32> to vector<4x64x128xf32>
    %11 = vector.shape_cast %10 : vector<4x64x128xf32> to vector<256x128xf32>
    %c0_7 = arith.constant 0 : index
    %c0_8 = arith.constant 0 : index
    %12 = vector.load %arg4[%c0_7, %c0_8] : memref<1152x128xf32, #tpu.memory_space<vmem>>, vector<128x128xf32>
    %cst_9 = arith.constant dense<0.000000e+00> : vector<256x128xf32>
    %13 = tpu.matmul %11, %12, %cst_9 {dimension_numbers = #tpu.dot_dimension_numbers<[1], [0], [0], [1], [0, 0, 1, 1], [], []>} : vector<256x128xf32>, vector<128x128xf32>, vector<256x128xf32> -> vector<256x128xf32>
    %14 = vector.extract_strided_slice %9 {offsets = [0, 16, 0], sizes = [4, 64, 128], strides = [1, 1, 1]} : vector<6x96x128xf32> to vector<4x64x128xf32>
    %15 = vector.shape_cast %14 : vector<4x64x128xf32> to vector<256x128xf32>
    %c128 = arith.constant 128 : index
    %c0_10 = arith.constant 0 : index
    %16 = vector.load %arg4[%c128, %c0_10] : memref<1152x128xf32, #tpu.memory_space<vmem>>, vector<128x128xf32>
    %cst_11 = arith.constant dense<0.000000e+00> : vector<256x128xf32>
    %17 = tpu.matmul %15, %16, %cst_11 {dimension_numbers = #tpu.dot_dimension_numbers<[1], [0], [0], [1], [0, 0, 1, 1], [], []>} : vector<256x128xf32>, vector<128x128xf32>, vector<256x128xf32> -> vector<256x128xf32>
    %18 = arith.addf %13, %17 : vector<256x128xf32>
    %19 = vector.extract_strided_slice %9 {offsets = [0, 32, 0], sizes = [4, 64, 128], strides = [1, 1, 1]} : vector<6x96x128xf32> to vector<4x64x128xf32>
    %20 = vector.shape_cast %19 : vector<4x64x128xf32> to vector<256x128xf32>
    %c256 = arith.constant 256 : index
    %c0_12 = arith.constant 0 : index
    %21 = vector.load %arg4[%c256, %c0_12] : memref<1152x128xf32, #tpu.memory_space<vmem>>, vector<128x128xf32>
    %cst_13 = arith.constant dense<0.000000e+00> : vector<256x128xf32>
    %22 = tpu.matmul %20, %21, %cst_13 {dimension_numbers = #tpu.dot_dimension_numbers<[1], [0], [0], [1], [0, 0, 1, 1], [], []>} : vector<256x128xf32>, vector<128x128xf32>, vector<256x128xf32> -> vector<256x128xf32>
    %23 = arith.addf %18, %22 : vector<256x128xf32>
    %24 = vector.extract_strided_slice %9 {offsets = [1, 0, 0], sizes = [4, 64, 128], strides = [1, 1, 1]} : vector<6x96x128xf32> to vector<4x64x128xf32>
    %25 = vector.shape_cast %24 : vector<4x64x128xf32> to vector<256x128xf32>
    %c384 = arith.constant 384 : index
    %c0_14 = arith.constant 0 : index
    %26 = vector.load %arg4[%c384, %c0_14] : memref<1152x128xf32, #tpu.memory_space<vmem>>, vector<128x128xf32>
    %cst_15 = arith.constant dense<0.000000e+00> : vector<256x128xf32>
    %27 = tpu.matmul %25, %26, %cst_15 {dimension_numbers = #tpu.dot_dimension_numbers<[1], [0], [0], [1], [0, 0, 1, 1], [], []>} : vector<256x128xf32>, vector<128x128xf32>, vector<256x128xf32> -> vector<256x128xf32>
    %28 = arith.addf %23, %27 : vector<256x128xf32>
    %29 = vector.extract_strided_slice %9 {offsets = [1, 16, 0], sizes = [4, 64, 128], strides = [1, 1, 1]} : vector<6x96x128xf32> to vector<4x64x128xf32>
    %30 = vector.shape_cast %29 : vector<4x64x128xf32> to vector<256x128xf32>
    %c512 = arith.constant 512 : index
    %c0_16 = arith.constant 0 : index
    %31 = vector.load %arg4[%c512, %c0_16] : memref<1152x128xf32, #tpu.memory_space<vmem>>, vector<128x128xf32>
    %cst_17 = arith.constant dense<0.000000e+00> : vector<256x128xf32>
    %32 = tpu.matmul %30, %31, %cst_17 {dimension_numbers = #tpu.dot_dimension_numbers<[1], [0], [0], [1], [0, 0, 1, 1], [], []>} : vector<256x128xf32>, vector<128x128xf32>, vector<256x128xf32> -> vector<256x128xf32>
    %33 = arith.addf %28, %32 : vector<256x128xf32>
    %34 = vector.extract_strided_slice %9 {offsets = [1, 32, 0], sizes = [4, 64, 128], strides = [1, 1, 1]} : vector<6x96x128xf32> to vector<4x64x128xf32>
    %35 = vector.shape_cast %34 : vector<4x64x128xf32> to vector<256x128xf32>
    %c640 = arith.constant 640 : index
    %c0_18 = arith.constant 0 : index
    %36 = vector.load %arg4[%c640, %c0_18] : memref<1152x128xf32, #tpu.memory_space<vmem>>, vector<128x128xf32>
    %cst_19 = arith.constant dense<0.000000e+00> : vector<256x128xf32>
    %37 = tpu.matmul %35, %36, %cst_19 {dimension_numbers = #tpu.dot_dimension_numbers<[1], [0], [0], [1], [0, 0, 1, 1], [], []>} : vector<256x128xf32>, vector<128x128xf32>, vector<256x128xf32> -> vector<256x128xf32>
    %38 = arith.addf %33, %37 : vector<256x128xf32>
    %39 = vector.extract_strided_slice %9 {offsets = [2, 0, 0], sizes = [4, 64, 128], strides = [1, 1, 1]} : vector<6x96x128xf32> to vector<4x64x128xf32>
    %40 = vector.shape_cast %39 : vector<4x64x128xf32> to vector<256x128xf32>
    %c768 = arith.constant 768 : index
    %c0_20 = arith.constant 0 : index
    %41 = vector.load %arg4[%c768, %c0_20] : memref<1152x128xf32, #tpu.memory_space<vmem>>, vector<128x128xf32>
    %cst_21 = arith.constant dense<0.000000e+00> : vector<256x128xf32>
    %42 = tpu.matmul %40, %41, %cst_21 {dimension_numbers = #tpu.dot_dimension_numbers<[1], [0], [0], [1], [0, 0, 1, 1], [], []>} : vector<256x128xf32>, vector<128x128xf32>, vector<256x128xf32> -> vector<256x128xf32>
    %43 = arith.addf %38, %42 : vector<256x128xf32>
    %44 = vector.extract_strided_slice %9 {offsets = [2, 16, 0], sizes = [4, 64, 128], strides = [1, 1, 1]} : vector<6x96x128xf32> to vector<4x64x128xf32>
    %45 = vector.shape_cast %44 : vector<4x64x128xf32> to vector<256x128xf32>
    %c896 = arith.constant 896 : index
    %c0_22 = arith.constant 0 : index
    %46 = vector.load %arg4[%c896, %c0_22] : memref<1152x128xf32, #tpu.memory_space<vmem>>, vector<128x128xf32>
    %cst_23 = arith.constant dense<0.000000e+00> : vector<256x128xf32>
    %47 = tpu.matmul %45, %46, %cst_23 {dimension_numbers = #tpu.dot_dimension_numbers<[1], [0], [0], [1], [0, 0, 1, 1], [], []>} : vector<256x128xf32>, vector<128x128xf32>, vector<256x128xf32> -> vector<256x128xf32>
    %48 = arith.addf %43, %47 : vector<256x128xf32>
    %49 = vector.extract_strided_slice %9 {offsets = [2, 32, 0], sizes = [4, 64, 128], strides = [1, 1, 1]} : vector<6x96x128xf32> to vector<4x64x128xf32>
    %50 = vector.shape_cast %49 : vector<4x64x128xf32> to vector<256x128xf32>
    %c1024 = arith.constant 1024 : index
    %c0_24 = arith.constant 0 : index
    %51 = vector.load %arg4[%c1024, %c0_24] : memref<1152x128xf32, #tpu.memory_space<vmem>>, vector<128x128xf32>
    %cst_25 = arith.constant dense<0.000000e+00> : vector<256x128xf32>
    %52 = tpu.matmul %50, %51, %cst_25 {dimension_numbers = #tpu.dot_dimension_numbers<[1], [0], [0], [1], [0, 0, 1, 1], [], []>} : vector<256x128xf32>, vector<128x128xf32>, vector<256x128xf32> -> vector<256x128xf32>
    %53 = arith.addf %48, %52 : vector<256x128xf32>
    %c0_26 = arith.constant 0 : index
    %c0_27 = arith.constant 0 : index
    %54 = vector.load %arg5[%c0_26, %c0_27] : memref<1x128xf32, #tpu.memory_space<vmem>>, vector<1x128xf32>
    %55 = vector.broadcast %54 : vector<1x128xf32> to vector<256x128xf32>
    %56 = arith.addf %53, %55 : vector<256x128xf32>
    %cst_28 = arith.constant 0.000000e+00 : f32
    %57 = vector.broadcast %cst_28 : f32 to vector<256x128xf32>
    %58 = arith.maximumf %56, %57 : vector<256x128xf32>
    %59 = vector.extract_strided_slice %58 {offsets = [0, 0], sizes = [16, 128], strides = [1, 1]} : vector<256x128xf32> to vector<16x128xf32>
    %c0_29 = arith.constant 0 : index
    %c0_30 = arith.constant 0 : index
    %60 = vector.load %arg6[%c0_29, %c0_30] : memref<2048x512xf32, #tpu.memory_space<vmem>>, vector<128x512xf32>
    %cst_31 = arith.constant dense<0.000000e+00> : vector<16x512xf32>
    %61 = tpu.matmul %59, %60, %cst_31 {dimension_numbers = #tpu.dot_dimension_numbers<[1], [0], [0], [1], [0, 0, 1, 1], [], []>} : vector<16x128xf32>, vector<128x512xf32>, vector<16x512xf32> -> vector<16x512xf32>
    %62 = vector.extract_strided_slice %58 {offsets = [16, 0], sizes = [16, 128], strides = [1, 1]} : vector<256x128xf32> to vector<16x128xf32>
    %c128_32 = arith.constant 128 : index
    %c0_33 = arith.constant 0 : index
    %63 = vector.load %arg6[%c128_32, %c0_33] : memref<2048x512xf32, #tpu.memory_space<vmem>>, vector<128x512xf32>
    %cst_34 = arith.constant dense<0.000000e+00> : vector<16x512xf32>
    %64 = tpu.matmul %62, %63, %cst_34 {dimension_numbers = #tpu.dot_dimension_numbers<[1], [0], [0], [1], [0, 0, 1, 1], [], []>} : vector<16x128xf32>, vector<128x512xf32>, vector<16x512xf32> -> vector<16x512xf32>
    %65 = arith.addf %61, %64 : vector<16x512xf32>
    %66 = vector.extract_strided_slice %58 {offsets = [32, 0], sizes = [16, 128], strides = [1, 1]} : vector<256x128xf32> to vector<16x128xf32>
    %c256_35 = arith.constant 256 : index
    %c0_36 = arith.constant 0 : index
    %67 = vector.load %arg6[%c256_35, %c0_36] : memref<2048x512xf32, #tpu.memory_space<vmem>>, vector<128x512xf32>
    %cst_37 = arith.constant dense<0.000000e+00> : vector<16x512xf32>
    %68 = tpu.matmul %66, %67, %cst_37 {dimension_numbers = #tpu.dot_dimension_numbers<[1], [0], [0], [1], [0, 0, 1, 1], [], []>} : vector<16x128xf32>, vector<128x512xf32>, vector<16x512xf32> -> vector<16x512xf32>
    %69 = arith.addf %65, %68 : vector<16x512xf32>
    %70 = vector.extract_strided_slice %58 {offsets = [48, 0], sizes = [16, 128], strides = [1, 1]} : vector<256x128xf32> to vector<16x128xf32>
    %c384_38 = arith.constant 384 : index
    %c0_39 = arith.constant 0 : index
    %71 = vector.load %arg6[%c384_38, %c0_39] : memref<2048x512xf32, #tpu.memory_space<vmem>>, vector<128x512xf32>
    %cst_40 = arith.constant dense<0.000000e+00> : vector<16x512xf32>
    %72 = tpu.matmul %70, %71, %cst_40 {dimension_numbers = #tpu.dot_dimension_numbers<[1], [0], [0], [1], [0, 0, 1, 1], [], []>} : vector<16x128xf32>, vector<128x512xf32>, vector<16x512xf32> -> vector<16x512xf32>
    %73 = arith.addf %69, %72 : vector<16x512xf32>
    %74 = vector.extract_strided_slice %58 {offsets = [64, 0], sizes = [16, 128], strides = [1, 1]} : vector<256x128xf32> to vector<16x128xf32>
    %c512_41 = arith.constant 512 : index
    %c0_42 = arith.constant 0 : index
    %75 = vector.load %arg6[%c512_41, %c0_42] : memref<2048x512xf32, #tpu.memory_space<vmem>>, vector<128x512xf32>
    %cst_43 = arith.constant dense<0.000000e+00> : vector<16x512xf32>
    %76 = tpu.matmul %74, %75, %cst_43 {dimension_numbers = #tpu.dot_dimension_numbers<[1], [0], [0], [1], [0, 0, 1, 1], [], []>} : vector<16x128xf32>, vector<128x512xf32>, vector<16x512xf32> -> vector<16x512xf32>
    %77 = arith.addf %73, %76 : vector<16x512xf32>
    %78 = vector.extract_strided_slice %58 {offsets = [80, 0], sizes = [16, 128], strides = [1, 1]} : vector<256x128xf32> to vector<16x128xf32>
    %c640_44 = arith.constant 640 : index
    %c0_45 = arith.constant 0 : index
    %79 = vector.load %arg6[%c640_44, %c0_45] : memref<2048x512xf32, #tpu.memory_space<vmem>>, vector<128x512xf32>
    %cst_46 = arith.constant dense<0.000000e+00> : vector<16x512xf32>
    %80 = tpu.matmul %78, %79, %cst_46 {dimension_numbers = #tpu.dot_dimension_numbers<[1], [0], [0], [1], [0, 0, 1, 1], [], []>} : vector<16x128xf32>, vector<128x512xf32>, vector<16x512xf32> -> vector<16x512xf32>
    %81 = arith.addf %77, %80 : vector<16x512xf32>
    %82 = vector.extract_strided_slice %58 {offsets = [96, 0], sizes = [16, 128], strides = [1, 1]} : vector<256x128xf32> to vector<16x128xf32>
    %c768_47 = arith.constant 768 : index
    %c0_48 = arith.constant 0 : index
    %83 = vector.load %arg6[%c768_47, %c0_48] : memref<2048x512xf32, #tpu.memory_space<vmem>>, vector<128x512xf32>
    %cst_49 = arith.constant dense<0.000000e+00> : vector<16x512xf32>
    %84 = tpu.matmul %82, %83, %cst_49 {dimension_numbers = #tpu.dot_dimension_numbers<[1], [0], [0], [1], [0, 0, 1, 1], [], []>} : vector<16x128xf32>, vector<128x512xf32>, vector<16x512xf32> -> vector<16x512xf32>
    %85 = arith.addf %81, %84 : vector<16x512xf32>
    %86 = vector.extract_strided_slice %58 {offsets = [112, 0], sizes = [16, 128], strides = [1, 1]} : vector<256x128xf32> to vector<16x128xf32>
    %c896_50 = arith.constant 896 : index
    %c0_51 = arith.constant 0 : index
    %87 = vector.load %arg6[%c896_50, %c0_51] : memref<2048x512xf32, #tpu.memory_space<vmem>>, vector<128x512xf32>
    %cst_52 = arith.constant dense<0.000000e+00> : vector<16x512xf32>
    %88 = tpu.matmul %86, %87, %cst_52 {dimension_numbers = #tpu.dot_dimension_numbers<[1], [0], [0], [1], [0, 0, 1, 1], [], []>} : vector<16x128xf32>, vector<128x512xf32>, vector<16x512xf32> -> vector<16x512xf32>
    %89 = arith.addf %85, %88 : vector<16x512xf32>
    %90 = vector.extract_strided_slice %58 {offsets = [128, 0], sizes = [16, 128], strides = [1, 1]} : vector<256x128xf32> to vector<16x128xf32>
    %c1024_53 = arith.constant 1024 : index
    %c0_54 = arith.constant 0 : index
    %91 = vector.load %arg6[%c1024_53, %c0_54] : memref<2048x512xf32, #tpu.memory_space<vmem>>, vector<128x512xf32>
    %cst_55 = arith.constant dense<0.000000e+00> : vector<16x512xf32>
    %92 = tpu.matmul %90, %91, %cst_55 {dimension_numbers = #tpu.dot_dimension_numbers<[1], [0], [0], [1], [0, 0, 1, 1], [], []>} : vector<16x128xf32>, vector<128x512xf32>, vector<16x512xf32> -> vector<16x512xf32>
    %93 = arith.addf %89, %92 : vector<16x512xf32>
    %94 = vector.extract_strided_slice %58 {offsets = [144, 0], sizes = [16, 128], strides = [1, 1]} : vector<256x128xf32> to vector<16x128xf32>
    %c1152 = arith.constant 1152 : index
    %c0_56 = arith.constant 0 : index
    %95 = vector.load %arg6[%c1152, %c0_56] : memref<2048x512xf32, #tpu.memory_space<vmem>>, vector<128x512xf32>
    %cst_57 = arith.constant dense<0.000000e+00> : vector<16x512xf32>
    %96 = tpu.matmul %94, %95, %cst_57 {dimension_numbers = #tpu.dot_dimension_numbers<[1], [0], [0], [1], [0, 0, 1, 1], [], []>} : vector<16x128xf32>, vector<128x512xf32>, vector<16x512xf32> -> vector<16x512xf32>
    %97 = arith.addf %93, %96 : vector<16x512xf32>
    %98 = vector.extract_strided_slice %58 {offsets = [160, 0], sizes = [16, 128], strides = [1, 1]} : vector<256x128xf32> to vector<16x128xf32>
    %c1280 = arith.constant 1280 : index
    %c0_58 = arith.constant 0 : index
    %99 = vector.load %arg6[%c1280, %c0_58] : memref<2048x512xf32, #tpu.memory_space<vmem>>, vector<128x512xf32>
    %cst_59 = arith.constant dense<0.000000e+00> : vector<16x512xf32>
    %100 = tpu.matmul %98, %99, %cst_59 {dimension_numbers = #tpu.dot_dimension_numbers<[1], [0], [0], [1], [0, 0, 1, 1], [], []>} : vector<16x128xf32>, vector<128x512xf32>, vector<16x512xf32> -> vector<16x512xf32>
    %101 = arith.addf %97, %100 : vector<16x512xf32>
    %102 = vector.extract_strided_slice %58 {offsets = [176, 0], sizes = [16, 128], strides = [1, 1]} : vector<256x128xf32> to vector<16x128xf32>
    %c1408 = arith.constant 1408 : index
    %c0_60 = arith.constant 0 : index
    %103 = vector.load %arg6[%c1408, %c0_60] : memref<2048x512xf32, #tpu.memory_space<vmem>>, vector<128x512xf32>
    %cst_61 = arith.constant dense<0.000000e+00> : vector<16x512xf32>
    %104 = tpu.matmul %102, %103, %cst_61 {dimension_numbers = #tpu.dot_dimension_numbers<[1], [0], [0], [1], [0, 0, 1, 1], [], []>} : vector<16x128xf32>, vector<128x512xf32>, vector<16x512xf32> -> vector<16x512xf32>
    %105 = arith.addf %101, %104 : vector<16x512xf32>
    %106 = vector.extract_strided_slice %58 {offsets = [192, 0], sizes = [16, 128], strides = [1, 1]} : vector<256x128xf32> to vector<16x128xf32>
    %c1536 = arith.constant 1536 : index
    %c0_62 = arith.constant 0 : index
    %107 = vector.load %arg6[%c1536, %c0_62] : memref<2048x512xf32, #tpu.memory_space<vmem>>, vector<128x512xf32>
    %cst_63 = arith.constant dense<0.000000e+00> : vector<16x512xf32>
    %108 = tpu.matmul %106, %107, %cst_63 {dimension_numbers = #tpu.dot_dimension_numbers<[1], [0], [0], [1], [0, 0, 1, 1], [], []>} : vector<16x128xf32>, vector<128x512xf32>, vector<16x512xf32> -> vector<16x512xf32>
    %109 = arith.addf %105, %108 : vector<16x512xf32>
    %110 = vector.extract_strided_slice %58 {offsets = [208, 0], sizes = [16, 128], strides = [1, 1]} : vector<256x128xf32> to vector<16x128xf32>
    %c1664 = arith.constant 1664 : index
    %c0_64 = arith.constant 0 : index
    %111 = vector.load %arg6[%c1664, %c0_64] : memref<2048x512xf32, #tpu.memory_space<vmem>>, vector<128x512xf32>
    %cst_65 = arith.constant dense<0.000000e+00> : vector<16x512xf32>
    %112 = tpu.matmul %110, %111, %cst_65 {dimension_numbers = #tpu.dot_dimension_numbers<[1], [0], [0], [1], [0, 0, 1, 1], [], []>} : vector<16x128xf32>, vector<128x512xf32>, vector<16x512xf32> -> vector<16x512xf32>
    %113 = arith.addf %109, %112 : vector<16x512xf32>
    %114 = vector.extract_strided_slice %58 {offsets = [224, 0], sizes = [16, 128], strides = [1, 1]} : vector<256x128xf32> to vector<16x128xf32>
    %c1792 = arith.constant 1792 : index
    %c0_66 = arith.constant 0 : index
    %115 = vector.load %arg6[%c1792, %c0_66] : memref<2048x512xf32, #tpu.memory_space<vmem>>, vector<128x512xf32>
    %cst_67 = arith.constant dense<0.000000e+00> : vector<16x512xf32>
    %116 = tpu.matmul %114, %115, %cst_67 {dimension_numbers = #tpu.dot_dimension_numbers<[1], [0], [0], [1], [0, 0, 1, 1], [], []>} : vector<16x128xf32>, vector<128x512xf32>, vector<16x512xf32> -> vector<16x512xf32>
    %117 = arith.addf %113, %116 : vector<16x512xf32>
    %118 = vector.extract_strided_slice %58 {offsets = [240, 0], sizes = [16, 128], strides = [1, 1]} : vector<256x128xf32> to vector<16x128xf32>
    %c1920 = arith.constant 1920 : index
    %c0_68 = arith.constant 0 : index
    %119 = vector.load %arg6[%c1920, %c0_68] : memref<2048x512xf32, #tpu.memory_space<vmem>>, vector<128x512xf32>
    %cst_69 = arith.constant dense<0.000000e+00> : vector<16x512xf32>
    %120 = tpu.matmul %118, %119, %cst_69 {dimension_numbers = #tpu.dot_dimension_numbers<[1], [0], [0], [1], [0, 0, 1, 1], [], []>} : vector<16x128xf32>, vector<128x512xf32>, vector<16x512xf32> -> vector<16x512xf32>
    %121 = arith.addf %117, %120 : vector<16x512xf32>
    %c0_70 = arith.constant 0 : index
    %c0_71 = arith.constant 0 : index
    %122 = vector.load %arg7[%c0_70, %c0_71] : memref<1x512xf32, #tpu.memory_space<vmem>>, vector<1x512xf32>
    %123 = vector.broadcast %122 : vector<1x512xf32> to vector<16x512xf32>
    %124 = arith.addf %121, %123 : vector<16x512xf32>
    %cst_72 = arith.constant 0.000000e+00 : f32
    %125 = vector.broadcast %cst_72 : f32 to vector<16x512xf32>
    %126 = arith.maximumf %124, %125 : vector<16x512xf32>
    %c0_73 = arith.constant 0 : index
    %c0_74 = arith.constant 0 : index
    %127 = vector.load %arg8[%c0_73, %c0_74] : memref<512x128xf32, #tpu.memory_space<vmem>>, vector<512x128xf32>
    %cst_75 = arith.constant dense<0.000000e+00> : vector<16x128xf32>
    %128 = tpu.matmul %126, %127, %cst_75 {dimension_numbers = #tpu.dot_dimension_numbers<[1], [0], [0], [1], [0, 0, 1, 1], [], []>} : vector<16x512xf32>, vector<512x128xf32>, vector<16x128xf32> -> vector<16x128xf32>
    %c0_76 = arith.constant 0 : index
    %c0_77 = arith.constant 0 : index
    %129 = vector.load %arg9[%c0_76, %c0_77] : memref<1x128xf32, #tpu.memory_space<vmem>>, vector<1x128xf32>
    %130 = vector.broadcast %129 : vector<1x128xf32> to vector<16x128xf32>
    %131 = arith.addf %128, %130 : vector<16x128xf32>
    %132 = tpu.iota {dimensions = array<i32: 1>} : vector<16x128xi32>
    %c8_i32 = arith.constant 8 : i32
    %133 = vector.broadcast %c8_i32 : i32 to vector<16x128xi32>
    %134 = arith.cmpi slt, %132, %133 : vector<16x128xi32>
    %cst_78 = arith.constant -1.000000e+30 : f32
    %135 = vector.broadcast %cst_78 : f32 to vector<16x128xf32>
    %136 = arith.select %134, %131, %135 : vector<16x128xi1>, vector<16x128xf32>
    %cst_79 = arith.constant dense<0xFF800000> : vector<16xf32>
    %137 = vector.multi_reduction <maximumf>, %136, %cst_79 [1] : vector<16x128xf32> to vector<16xf32>
    %138 = vector.shape_cast %137 : vector<16xf32> to vector<16x1xf32>
    %139 = vector.broadcast %138 : vector<16x1xf32> to vector<16x128xf32>
    %140 = arith.subf %136, %139 : vector<16x128xf32>
    %141 = math.exp %140 : vector<16x128xf32>
    %cst_80 = arith.constant dense<0.000000e+00> : vector<16xf32>
    %142 = vector.multi_reduction <add>, %141, %cst_80 [1] : vector<16x128xf32> to vector<16xf32>
    %143 = vector.shape_cast %142 : vector<16xf32> to vector<16x1xf32>
    %144 = vector.broadcast %143 : vector<16x1xf32> to vector<16x128xf32>
    %145 = arith.divf %141, %144 : vector<16x128xf32>
    %c0_81 = arith.constant 0 : index
    %c0_82 = arith.constant 0 : index
    %146 = vector.load %arg10[%c0_81, %c0_82] : memref<16x128xf32, #tpu.memory_space<vmem>>, vector<16x128xf32>
    tpu.vector_store %arg10[%c0_81, %c0_82], %145 {strides = array<i32>} : memref<16x128xf32, #tpu.memory_space<vmem>>, vector<16x128xf32>,
    return
  }
  func.func @transform_0(%arg0: i32) -> (i32, i32, i32) {
    %c0_i32 = arith.constant 0 : i32
    %c0_i32_0 = arith.constant 0 : i32
    %c0_i32_1 = arith.constant 0 : i32
    return %c0_i32, %arg0, %c0_i32_0 : i32, i32, i32
  }
  func.func @transform_1(%arg0: i32) -> (i32, i32) {
    %c0_i32 = arith.constant 0 : i32
    %c0_i32_0 = arith.constant 0 : i32
    %c0_i32_1 = arith.constant 0 : i32
    return %c0_i32, %c0_i32_0 : i32, i32
  }
  func.func @transform_2(%arg0: i32) -> (i32, i32) {
    %c0_i32 = arith.constant 0 : i32
    %c0_i32_0 = arith.constant 0 : i32
    %c0_i32_1 = arith.constant 0 : i32
    return %c0_i32, %c0_i32_0 : i32, i32
  }
  func.func @transform_3(%arg0: i32) -> (i32, i32) {
    %c0_i32 = arith.constant 0 : i32
    %c0_i32_0 = arith.constant 0 : i32
    %c0_i32_1 = arith.constant 0 : i32
    return %c0_i32, %c0_i32_0 : i32, i32
  }
  func.func @transform_4(%arg0: i32) -> (i32, i32) {
    %c0_i32 = arith.constant 0 : i32
    %c0_i32_0 = arith.constant 0 : i32
    %c0_i32_1 = arith.constant 0 : i32
    return %c0_i32, %c0_i32_0 : i32, i32
  }
  func.func @transform_5(%arg0: i32) -> (i32, i32) {
    %c0_i32 = arith.constant 0 : i32
    %c0_i32_0 = arith.constant 0 : i32
    %c0_i32_1 = arith.constant 0 : i32
    return %c0_i32, %c0_i32_0 : i32, i32
  }
  func.func @transform_6(%arg0: i32) -> (i32, i32) {
    %c0_i32 = arith.constant 0 : i32
    %c0_i32_0 = arith.constant 0 : i32
    %c0_i32_1 = arith.constant 0 : i32
    return %c0_i32, %c0_i32_0 : i32, i32
  }
  func.func @transform_7(%arg0: i32) -> (i32, i32) {
    %c0_i32 = arith.constant 0 : i32
    %c0_i32_0 = arith.constant 0 : i32
    %c0_i32_1 = arith.constant 0 : i32
    return %c0_i32, %c0_i32_0 : i32, i32
  }
  func.func @transform_8(%arg0: i32) -> (i32, i32) {
    %c0_i32 = arith.constant 0 : i32
    %c0_i32_0 = arith.constant 0 : i32
    %c0_i32_1 = arith.constant 0 : i32
    return %c0_i32, %c0_i32_0 : i32, i32
  }
  func.func @transform_9(%arg0: i32) -> (i32, i32) {
    %c0_i32 = arith.constant 0 : i32
    %c0_i32_0 = arith.constant 0 : i32
    return %arg0, %c0_i32 : i32, i32
  }
}

</mosaic_0001>

<bundles_post_ra>
// kernel: actor_forward.1
= control target key start
LH: loop header
LB: loop body
LE: loop exit
PB: predicated region body
PF: predicated region fallthrough
CT: control target
= control target key end

     0   :  { %s13084_s0 = inlined_call_operand.vmem [shape: f32[36,32,128], index: 0, kind: input, shape index: {}]   ;;  %s13085_s1 = inlined_call_operand.hbm [shape: f32[128,128], index: 1, kind: input, shape index: {}]   ;;  %s13086_s2 = inlined_call_operand.hbm [shape: f32[1,128], index: 2, kind: input, shape index: {}]   ;;  %s13087_s3 = inlined_call_operand.hbm [shape: f32[1152,128], index: 3, kind: input, shape index: {}]   ;;  %s13088_s4 = inlined_call_operand.hbm [shape: f32[1,128], index: 4, kind: input, shape index: {}]   ;;  %s13089_s5 = inlined_call_operand.hbm [shape: f32[2048,512], index: 5, kind: input, shape index: {}]   ;;  %s13090_s6 = inlined_call_operand.hbm [shape: f32[1,512], index: 6, kind: input, shape index: {}]   ;;  %s13091_s7 = inlined_call_operand.hbm [shape: f32[512,128], index: 7, kind: input, shape index: {}]   ;;  %s13092_s8 = inlined_call_operand.hbm [shape: f32[1,128], index: 8, kind: input, shape index: {}]   ;;  %s13093_s9 = inlined_call_operand.vmem [shape: f32[32,128], index: 9, kind: output, shape index: {}]  }
   0x1   :  { %13104 = sst [smem:[#allocation38_spill]] %s13086_s2 }
   0x2   :  { %13105 = sst [smem:[#allocation39_spill]] %s13088_s4 }
   0x3   :  { %14 = vsyncpa [#allocation4], 0 }
   0x4   :  { %15 = vsyncpa [#allocation6], 0 }
   0x5   :  { %16 = vsyncpa [#allocation9], 0 }
   0x6   :  { %17 = vsyncpa [#allocation12], 0 }
   0x7   :  { %18 = vsyncpa [#allocation15], 0  ;;  %s11567_s30 = smov 0   ;;  %s11569_s10 = smov 0  }
   0x8   :  { %s11571_s11 = smov 0  }
   0x9 LB: > { %s13097_s12 = sadd.s32 4294967295, %s11502_s11   ;;  %s11584_s13 = sadd.s32 1, %s11502_s11   ;;  %s11502_s11 = sphi %s11571_s11, %s13159_s11   ;;  %s11498_s10 = sphi %s11569_s10, %s13158_s10   ;;  %s11494_s30 = sphi %s11567_s30, %s13157_s30  }
   0xa   : > { %s28_s14 = ssub.s32 %s11502_s11, %s11584_s13  ;;  %s31_s15 = sadd.s32 1, %s11498_s10 }
   0xb   : > { %p29_p0 = scmp.eq.s32.totalorder %s28_s14, 0  ;;  %p38_p1 = scmp.ne.s32.totalorder %s11498_s10, %s11494_s30 }
   0xc   : > { %p39_p2 = scmp.eq.s32.totalorder %s11502_s11, 0  ;;  %p7846_p3 = scmp.ge.s32.totalorder %s11502_s11, 1 }
   0xd   : > { %s11594_s16 = scalar_select %p29_p0, %s11498_s10, %s31_s15  }
   0xe   : > { %p11596_p4 = por %p39_p2, %p38_p1  ;;  %p249_p5 = scmp.lt.s32.totalorder %s11502_s11, 3 }
   0xf   : > { %13106 = sst [smem:[#allocation21_spill]] %s11594_s16  ;;  %p11603_p6 = scmp.eq.s32.totalorder %s13097_s12, 0 }
  0x10   : > { %s13107_s17 = scalar_select %p11596_p4, 1, 0 }
  0x11   : > { %s13108_s18 = scalar_select %p11603_p6, 1, 0 }
  0x12   : > { %p11607_p7 = pnand %p7846_p3, %p249_p5  ;;  %s11504_s20 = smov [#allocation5]  }
  0x13   : > { %s275_s21 = sshll.u32 %s11504_s20, 4  ;;  %s11505_s22 = smov [#allocation8]   ;;  %s276_s21 = int_to_ptr.vmem [resolvable:$true] %s275_s21 }
  0x14   : > { %s13109_s19 = scalar_select %p11607_p7, 1, 0 }
  0x15   : > { %p11149_p8 = pneg %p11607_p7  ;;  %s299_s23 = sshll.u32 %s11505_s22, 4  ;;  %s11619_s23 = int_to_ptr.vmem [resolvable:$true] %s299_s23 }
  0x16   : > { %s11506_s25 = smov [#allocation11]   ;;  %s13111_s2 = sld [smem:[#allocation38_spill]] }
  0x17   : > { %p11615_p9 = pnand %p11603_p6, %p11149_p8  ;;  %s323_s26 = sshll.u32 %s11506_s25, 4  ;;  %s11621_s26 = int_to_ptr.vmem [resolvable:$true] %s323_s26 }
  0x19   : > { %p11631_p11 = pneg %p11615_p9 }
  0x1c   : > { %s11236_s29 = scalar_lea.hbm %s13111_s2, 16 }
  0x1d   : > { %p11237_p10 = scmp.ne.s32.totalorder %s13111_s2, %s11236_s29  ;;  %p11243_p0 = scmp.lt.u32.totalorder %s11236_s29, %s13111_s2 }
  0x1f   : > { %p11239_p12 = pnand %p11631_p11, %p11237_p10 }
  0x21   : > { %p11240_p13 = pneg %p11239_p12 }
  0x23   : > { %p11245_p1 = pnand %p11243_p0, %p11240_p13 }
  0x25   : > { %11248 = shalt.err (!%p11245_p1)
}
  0x26   : > { %s11249_s27 = scalar_lea.vmem %s276_s21, 16  ;;  %s11256_s28 = scalar_lea.vmem %s276_s21, 32 }
  0x27   : > { %p11250_p2 = scmp.ne.s32.totalorder %s276_s21, %s11249_s27  ;;  %p11257_p8 = scmp.lt.s32.totalorder %s276_s21, %s276_s21 }
  0x28   : > { %p11258_p6 = scmp.lt.s32.totalorder %s11256_s28, %s11249_s27 }
  0x29   : > { %p11252_p3 = pnand %p11250_p2, %p11631_p11 }
  0x2a   : > { %p11259_p7 = por %p11258_p6, %p11257_p8 }
  0x2b   : > { %p11253_p5 = pneg %p11252_p3 }
  0x2d   : > { %p11260_p4 = pnand %p11259_p7, %p11253_p5 }
  0x2f   : > { %11263 = shalt.err (!%p11260_p4)
}
  0x30   : > { %11155 = dma.hbm_to_vmem [thread:$0]  (!%p11615_p9), %s13111_s2, 16, %s276_s21, [#allocation6]  }
  0x31   : > { %s13113_s4 = sld [smem:[#allocation39_spill]] }
  0x37   : > { %s11264_s25 = scalar_lea.hbm %s13113_s4, 16 }
  0x38   : > { %p11265_p10 = scmp.ne.s32.totalorder %s13113_s4, %s11264_s25  ;;  %p11271_p4 = scmp.lt.u32.totalorder %s11264_s25, %s13113_s4 }
  0x3a   : > { %p11267_p12 = pnand %p11265_p10, %p11631_p11 }
  0x3c   : > { %p11268_p6 = pneg %p11267_p12 }
  0x3e   : > { %p11273_p7 = pnand %p11271_p4, %p11268_p6 }
  0x40   : > { %11276 = shalt.err (!%p11273_p7)
}
  0x41   : > { %s11277_s21 = scalar_lea.vmem %s11619_s23, 16  ;;  %s11284_s12 = scalar_lea.vmem %s11619_s23, 32 }
  0x42   : > { %p11278_p13 = scmp.ne.s32.totalorder %s11619_s23, %s11277_s21  ;;  %p11285_p2 = scmp.lt.s32.totalorder %s11619_s23, %s11619_s23 }
  0x43   : > { %p11286_p3 = scmp.lt.s32.totalorder %s11284_s12, %s11277_s21 }
  0x44   : > { %p11280_p0 = pnand %p11278_p13, %p11631_p11 }
  0x45   : > { %p11287_p5 = por %p11286_p3, %p11285_p2 }
  0x46   : > { %p11281_p1 = pneg %p11280_p0 }
  0x48   : > { %p11288_p8 = pnand %p11287_p5, %p11281_p1 }
  0x4a   : > { %11291 = shalt.err (!%p11288_p8)
}
  0x4b   : > { %11161 = dma.hbm_to_vmem [thread:$0]  (!%p11615_p9), %s13113_s4, 16, %s11619_s23, [#allocation9]  }
  0x4c   : > { %s11292_s22 = scalar_lea.hbm %s13090_s6, 64 }
  0x4d   : > { %p11293_p10 = scmp.ne.s32.totalorder %s13090_s6, %s11292_s22  ;;  %p11299_p4 = scmp.lt.u32.totalorder %s11292_s22, %s13090_s6 }
  0x4f   : > { %p11295_p12 = pnand %p11293_p10, %p11631_p11 }
  0x51   : > { %p11296_p6 = pneg %p11295_p12 }
  0x53   : > { %p11301_p7 = pnand %p11299_p4, %p11296_p6 }
  0x55   : > { %11304 = shalt.err (!%p11301_p7)
}
  0x56   : > { %s11305_s23 = scalar_lea.vmem %s11621_s26, 64  ;;  %p11313_p2 = scmp.lt.s32.totalorder %s11621_s26, %s11621_s26 }
  0x57   : > { %p11306_p13 = scmp.ne.s32.totalorder %s11621_s26, %s11305_s23  ;;  %p11314_p3 = scmp.lt.s32.totalorder %s11305_s23, %s11305_s23 }
  0x59   : > { %p11308_p0 = pnand %p11306_p13, %p11631_p11  ;;  %p11315_p5 = por %p11314_p3, %p11313_p2 }
  0x5b   : > { %p11309_p1 = pneg %p11308_p0 }
  0x5d   : > { %p11316_p8 = pnand %p11315_p5, %p11309_p1 }
  0x5f   : > { %11319 = shalt.err (!%p11316_p8)
}
  0x60   : > { %11167 = dma.hbm_to_vmem [thread:$0]  (!%p11615_p9), %s13090_s6, 64, %s11621_s26, [#allocation12]  }
  0x61   : > { %s11507_s14 = smov [#allocation3]   ;;  %s11320_s25 = scalar_lea.hbm %s13085_s1, 2048 }
  0x62   : > { %s261_s15 = sshll.u32 %s11507_s14, 4  ;;  %p11321_p10 = scmp.ne.s32.totalorder %s13085_s1, %s11320_s25  ;;  %s262_s15 = int_to_ptr.vmem [resolvable:$true] %s261_s15 }
  0x63   : > { %p11327_p4 = scmp.lt.u32.totalorder %s11320_s25, %s13085_s1 }
  0x64   : > { %p11323_p12 = pnand %p11321_p10, %p11631_p11 }
  0x66   : > { %p11324_p6 = pneg %p11323_p12 }
  0x68   : > { %p11329_p7 = pnand %p11327_p4, %p11324_p6 }
  0x6a   : > { %11332 = shalt.err (!%p11329_p7)
}
  0x6b   : > { %s11333_s26 = scalar_lea.vmem %s262_s15, 2048  ;;  %p11341_p2 = scmp.lt.s32.totalorder %s262_s15, %s262_s15 }
  0x6c   : > { %p11334_p13 = scmp.ne.s32.totalorder %s262_s15, %s11333_s26  ;;  %p11342_p3 = scmp.lt.s32.totalorder %s11333_s26, %s11333_s26 }
  0x6e   : > { %p11336_p0 = pnand %p11334_p13, %p11631_p11  ;;  %p11343_p5 = por %p11342_p3, %p11341_p2 }
  0x70   : > { %p11337_p1 = pneg %p11336_p0 }
  0x72   : > { %p11344_p8 = pnand %p11343_p5, %p11337_p1 }
  0x74   : > { %11347 = shalt.err (!%p11344_p8)
}
  0x75   : > { %s13098_s12 = smov 128   ;;  %s13099_s16 = smov 8  }
  0x76   : > { %11152 = dma.hbm_to_vmem [thread:$0]  (!%p11615_p9), %s13085_s1, 2048, %s262_s15, [#allocation4], %s13098_s12, %s13098_s12, %s13099_s16  }
  0x77   : > { %s11510_s22 = smov [#allocation7]   ;;  %s11511_s27 = smov [#allocation10]  }
  0x78   : > { %s285_s25 = sshll.u32 %s11510_s22, 4  ;;  %s309_s28 = sshll.u32 %s11511_s27, 4  ;;  %s286_s25 = int_to_ptr.vmem [resolvable:$true] %s285_s25  ;;  %s11715_s28 = int_to_ptr.vmem [resolvable:$true] %s309_s28 }
  0x79   : > { %s11348_s26 = scalar_lea.hbm %s13087_s3, 18432 }
  0x7a   : > { %p11349_p10 = scmp.ne.s32.totalorder %s13087_s3, %s11348_s26  ;;  %p11355_p4 = scmp.lt.u32.totalorder %s11348_s26, %s13087_s3 }
  0x7c   : > { %p11351_p12 = pnand %p11349_p10, %p11631_p11 }
  0x7e   : > { %p11352_p6 = pneg %p11351_p12 }
  0x80   : > { %p11357_p7 = pnand %p11355_p4, %p11352_p6 }
  0x82   : > { %11360 = shalt.err (!%p11357_p7)
}
  0x83   : > { %s11361_s29 = scalar_lea.vmem %s286_s25, 18432  ;;  %p11369_p2 = scmp.lt.s32.totalorder %s286_s25, %s286_s25 }
  0x84   : > { %p11362_p13 = scmp.ne.s32.totalorder %s286_s25, %s11361_s29  ;;  %p11370_p3 = scmp.lt.s32.totalorder %s11361_s29, %s11361_s29 }
  0x86   : > { %p11364_p0 = pnand %p11362_p13, %p11631_p11  ;;  %p11371_p5 = por %p11370_p3, %p11369_p2 }
  0x88   : > { %p11365_p1 = pneg %p11364_p0 }
  0x8a   : > { %p11372_p8 = pnand %p11371_p5, %p11365_p1 }
  0x8c   : > { %11375 = shalt.err (!%p11372_p8)
}
  0x8d   : > { %11158 = dma.hbm_to_vmem [thread:$0]  (!%p11615_p9), %s13087_s3, 18432, %s286_s25, [#allocation6], %s13098_s12, %s13098_s12, %s13099_s16  }
  0x8e   : > { %s11376_s21 = scalar_lea.hbm %s13089_s5, 131072 }
  0x8f   : > { %p11377_p10 = scmp.ne.s32.totalorder %s13089_s5, %s11376_s21  ;;  %p11383_p4 = scmp.lt.u32.totalorder %s11376_s21, %s13089_s5 }
  0x91   : > { %p11379_p12 = pnand %p11377_p10, %p11631_p11 }
  0x93   : > { %p11380_p6 = pneg %p11379_p12 }
  0x95   : > { %p11385_p7 = pnand %p11383_p4, %p11380_p6 }
  0x97   : > { %11388 = shalt.err (!%p11385_p7)
}
  0x98   : > { %s11389_s25 = scalar_lea.vmem %s11715_s28, 131072  ;;  %p11397_p2 = scmp.lt.s32.totalorder %s11715_s28, %s11715_s28 }
  0x99   : > { %p11390_p13 = scmp.ne.s32.totalorder %s11715_s28, %s11389_s25  ;;  %p11398_p3 = scmp.lt.s32.totalorder %s11389_s25, %s11389_s25 }
  0x9b   : > { %p11392_p0 = pnand %p11390_p13, %p11631_p11  ;;  %p11399_p5 = por %p11398_p3, %p11397_p2 }
  0x9d   : > { %p11393_p1 = pneg %p11392_p0 }
  0x9f   : > { %p11400_p8 = pnand %p11399_p5, %p11393_p1 }
  0xa1   : > { %11403 = shalt.err (!%p11400_p8)
}
  0xa2   : > { %s11512_s29 = smov 512   ;;  %s11513_s2 = smov 32  }
  0xa3   : > { %11164 = dma.hbm_to_vmem [thread:$0]  (!%p11615_p9), %s13089_s5, 131072, %s11715_s28, [#allocation9], %s11512_s29, %s11512_s29, %s11513_s2  }
  0xa4   : > { %s11514_s27 = smov [#allocation13]   ;;  %s11515_s23 = smov [#allocation14]  }
  0xa5   : > { %s333_s21 = sshll.u32 %s11514_s27, 4  ;;  %s347_s26 = sshll.u32 %s11515_s23, 4  ;;  %s334_s21 = int_to_ptr.vmem [resolvable:$true] %s333_s21  ;;  %s11761_s26 = int_to_ptr.vmem [resolvable:$true] %s347_s26 }
  0xa6   : > { %s11404_s25 = scalar_lea.hbm %s13091_s7, 8192 }
  0xa7   : > { %p11405_p10 = scmp.ne.s32.totalorder %s13091_s7, %s11404_s25  ;;  %p11411_p4 = scmp.lt.u32.totalorder %s11404_s25, %s13091_s7 }
  0xa9   : > { %p11407_p12 = pnand %p11405_p10, %p11631_p11 }
  0xab   : > { %p11408_p6 = pneg %p11407_p12 }
  0xad   : > { %p11413_p7 = pnand %p11411_p4, %p11408_p6 }
  0xaf   : > { %11416 = shalt.err (!%p11413_p7)
}
  0xb0   : > { %s11417_s29 = scalar_lea.vmem %s334_s21, 8192  ;;  %p11425_p2 = scmp.lt.s32.totalorder %s334_s21, %s334_s21 }
  0xb1   : > { %p11418_p13 = scmp.ne.s32.totalorder %s334_s21, %s11417_s29  ;;  %p11426_p3 = scmp.lt.s32.totalorder %s11417_s29, %s11417_s29 }
  0xb3   : > { %p11420_p0 = pnand %p11418_p13, %p11631_p11  ;;  %p11427_p5 = por %p11426_p3, %p11425_p2 }
  0xb5   : > { %p11421_p1 = pneg %p11420_p0 }
  0xb7   : > { %p11428_p8 = pnand %p11427_p5, %p11421_p1 }
  0xb9   : > { %11431 = shalt.err (!%p11428_p8)
}
  0xba   : > { %s13114_s12 = smov 8   ;;  %s13115_s16 = smov 128  }
  0xbb   : > { %11170 = dma.hbm_to_vmem [thread:$0]  (!%p11615_p9), %s13091_s7, 8192, %s334_s21, [#allocation12], %s13115_s16, %s13115_s16, %s13114_s12  }
  0xbc   : > { %s11432_s14 = scalar_lea.hbm %s13092_s8, 16 }
  0xbd   : > { %p11433_p10 = scmp.ne.s32.totalorder %s13092_s8, %s11432_s14  ;;  %p11439_p4 = scmp.lt.u32.totalorder %s11432_s14, %s13092_s8 }
  0xbf   : > { %p11435_p12 = pnand %p11433_p10, %p11631_p11 }
  0xc1   : > { %p11436_p6 = pneg %p11435_p12 }
  0xc3   : > { %p11441_p7 = pnand %p11439_p4, %p11436_p6 }
  0xc5   : > { %11444 = shalt.err (!%p11441_p7)
}
  0xc6   : > { %s11445_s21 = scalar_lea.vmem %s11761_s26, 16  ;;  %s11452_s29 = scalar_lea.vmem %s11761_s26, 32 }
  0xc7   : > { %p11446_p13 = scmp.ne.s32.totalorder %s11761_s26, %s11445_s21  ;;  %p11453_p2 = scmp.lt.s32.totalorder %s11761_s26, %s11761_s26 }
  0xc8   : > { %p11454_p3 = scmp.lt.s32.totalorder %s11452_s29, %s11445_s21 }
  0xc9   : > { %p11448_p0 = pnand %p11446_p13, %p11631_p11 }
  0xca   : > { %p11455_p5 = por %p11454_p3, %p11453_p2 }
  0xcb   : > { %p11449_p1 = pneg %p11448_p0 }
  0xcd   : > { %p11456_p8 = pnand %p11455_p5, %p11449_p1 }
  0xcf   : > { %11459 = shalt.err (!%p11456_p8)
}
  0xd0   : > { %11173 = dma.hbm_to_vmem [thread:$0]  (!%p11615_p9), %s13092_s8, 16, %s11761_s26, [#allocation15]  }
  0xd1   : > { %p7855_p10 = scmp.ge.s32.totalorder %s11502_s11, 2 }
  0xd2   : > { %p13116_p11 = scmp.ne.s32.totalorder (!%p7855_p10), %s13107_s17, 0 }
  0xd3   : > { %354 = sbr.rel (%p7855_p10) target bundleno = 258 (0x102), region = 48 }
  0xda   : > { %357 = sbr.rel (!%p13116_p11) target bundleno = 258 (0x102), region = 52  ;;  %s359_s20 = sand.u32 (%p13116_p11), 1, %s11498_s10  }
  0xdb   : > { %s7874_s2 = sshll.u32 (%p13116_p11), %s11502_s11, 4  ;;  %s11115_s22 = smul.u32 (%p13116_p11), 576, %s359_s20 }
  0xdc   : > { %s11816_s24 = scalar_lea.vmem (%p13116_p11), %s13084_s0, %s7874_s2 }
  0xdd   : > { %v534_v0 = vld [vmem:[%s11816_s24] sm:$0xff] (%p13116_p11)  ;;  %v536_v1 = vld [vmem:[%s11816_s24 + $0x8] sm:$0xff] (%p13116_p11)  ;;  %s11824_s17 = scalar_lea.vmem (%p13116_p11), [#allocation2], %s11115_s22 }
  0xde   : > { %v538_v2 = vld [vmem:[%s11816_s24 + $0x20] sm:$0xff] (%p13116_p11)  ;;  %v540_v3 = vld [vmem:[%s11816_s24 + $0x28] sm:$0xff] (%p13116_p11)  ;;  %535 = vst [vmem:[%s11824_s17] sm:$0xff] (%p13116_p11), %v534_v0  ;;  %537 = vst [vmem:[%s11824_s17 + $0x8] sm:$0xff] (%p13116_p11), %v536_v1 }
  0xdf   : > { %v542_v4 = vld [vmem:[%s11816_s24 + $0x40] sm:$0xff] (%p13116_p11)  ;;  %v544_v5 = vld [vmem:[%s11816_s24 + $0x48] sm:$0xff] (%p13116_p11)  ;;  %539 = vst [vmem:[%s11824_s17 + $0x10] sm:$0xff] (%p13116_p11), %v538_v2  ;;  %541 = vst [vmem:[%s11824_s17 + $0x18] sm:$0xff] (%p13116_p11), %v540_v3 }
  0xe0   : > { %543 = vst [vmem:[%s11824_s17 + $0x20] sm:$0xff] (%p13116_p11), %v542_v4  ;;  %545 = vst [vmem:[%s11824_s17 + $0x28] sm:$0xff] (%p13116_p11), %v544_v5  ;;  %v546_v6 = vld [vmem:[%s11816_s24 + $0x60] sm:$0xff] (%p13116_p11)  ;;  %v548_v7 = vld [vmem:[%s11816_s24 + $0x68] sm:$0xff] (%p13116_p11) }
  0xe1   : > { %v550_v8 = vld [vmem:[%s11816_s24 + $0x80] sm:$0xff]  ;;  %547 = vst [vmem:[%s11824_s17 + $0x30] sm:$0xff] %v546_v6  ;;  %549 = vst [vmem:[%s11824_s17 + $0x38] sm:$0xff] %v548_v7  ;;  %v552_v9 = vld [vmem:[%s11816_s24 + $0x88] sm:$0xff] }
  0xe2   : > { %551 = vst [vmem:[%s11824_s17 + $0x40] sm:$0xff] %v550_v8  ;;  %v554_v10 = vld [vmem:[%s11816_s24 + $0xa0] sm:$0xff]  ;;  %v556_v11 = vld [vmem:[%s11816_s24 + $0xa8] sm:$0xff]  ;;  %553 = vst [vmem:[%s11824_s17 + $0x48] sm:$0xff] %v552_v9 }
  0xe3   : > { %555 = vst [vmem:[%s11824_s17 + $0x50] sm:$0xff] %v554_v10  ;;  %557 = vst [vmem:[%s11824_s17 + $0x58] sm:$0xff] %v556_v11  ;;  %v558_v12 = vld [vmem:[%s11816_s24 + $0xc0] sm:$0xff]  ;;  %v560_v13 = vld [vmem:[%s11816_s24 + $0xc8] sm:$0xff] }
  0xe4   : > { %v562_v14 = vld [vmem:[%s11816_s24 + $0xe0] sm:$0xff]  ;;  %559 = vst [vmem:[%s11824_s17 + $0x60] sm:$0xff] %v558_v12  ;;  %561 = vst [vmem:[%s11824_s17 + $0x68] sm:$0xff] %v560_v13  ;;  %v564_v15 = vld [vmem:[%s11816_s24 + $0xe8] sm:$0xff] }
  0xe5   : > { %563 = vst [vmem:[%s11824_s17 + $0x70] sm:$0xff] %v562_v14  ;;  %v566_v16 = vld [vmem:[%s11816_s24 + $0x100] sm:$0xff]  ;;  %v568_v17 = vld [vmem:[%s11816_s24 + $0x108] sm:$0xff]  ;;  %565 = vst [vmem:[%s11824_s17 + $0x78] sm:$0xff] %v564_v15 }
  0xe6   : > { %567 = vst [vmem:[%s11824_s17 + $0x80] sm:$0xff] %v566_v16  ;;  %569 = vst [vmem:[%s11824_s17 + $0x88] sm:$0xff] %v568_v17  ;;  %v570_v18 = vld [vmem:[%s11816_s24 + $0x120] sm:$0xff]  ;;  %v572_v19 = vld [vmem:[%s11816_s24 + $0x128] sm:$0xff] }
  0xe7   : > { %v574_v20 = vld [vmem:[%s11816_s24 + $0x140] sm:$0xff]  ;;  %571 = vst [vmem:[%s11824_s17 + $0x90] sm:$0xff] %v570_v18  ;;  %573 = vst [vmem:[%s11824_s17 + $0x98] sm:$0xff] %v572_v19  ;;  %v576_v21 = vld [vmem:[%s11816_s24 + $0x148] sm:$0xff] }
  0xe8   : > { %575 = vst [vmem:[%s11824_s17 + $0xa0] sm:$0xff] %v574_v20  ;;  %v578_v22 = vld [vmem:[%s11816_s24 + $0x160] sm:$0xff]  ;;  %v580_v23 = vld [vmem:[%s11816_s24 + $0x168] sm:$0xff]  ;;  %577 = vst [vmem:[%s11824_s17 + $0xa8] sm:$0xff] %v576_v21 }
  0xe9   : > { %579 = vst [vmem:[%s11824_s17 + $0xb0] sm:$0xff] %v578_v22  ;;  %581 = vst [vmem:[%s11824_s17 + $0xb8] sm:$0xff] %v580_v23  ;;  %v582_v24 = vld [vmem:[%s11816_s24 + $0x180] sm:$0xff]  ;;  %v584_v25 = vld [vmem:[%s11816_s24 + $0x188] sm:$0xff] }
  0xea   : > { %v586_v26 = vld [vmem:[%s11816_s24 + $0x1a0] sm:$0xff]  ;;  %583 = vst [vmem:[%s11824_s17 + $0xc0] sm:$0xff] %v582_v24  ;;  %585 = vst [vmem:[%s11824_s17 + $0xc8] sm:$0xff] %v584_v25  ;;  %v588_v27 = vld [vmem:[%s11816_s24 + $0x1a8] sm:$0xff] }
  0xeb   : > { %587 = vst [vmem:[%s11824_s17 + $0xd0] sm:$0xff] %v586_v26  ;;  %v590_v28 = vld [vmem:[%s11816_s24 + $0x1c0] sm:$0xff]  ;;  %v592_v29 = vld [vmem:[%s11816_s24 + $0x1c8] sm:$0xff]  ;;  %589 = vst [vmem:[%s11824_s17 + $0xd8] sm:$0xff] %v588_v27 }
  0xec   : > { %591 = vst [vmem:[%s11824_s17 + $0xe0] sm:$0xff] %v590_v28  ;;  %593 = vst [vmem:[%s11824_s17 + $0xe8] sm:$0xff] %v592_v29  ;;  %v594_v30 = vld [vmem:[%s11816_s24 + $0x1e0] sm:$0xff]  ;;  %v596_v31 = vld [vmem:[%s11816_s24 + $0x1e8] sm:$0xff] }
  0xed   : > { %v598_v32 = vld [vmem:[%s11816_s24 + $0x200] sm:$0xff]  ;;  %595 = vst [vmem:[%s11824_s17 + $0xf0] sm:$0xff] %v594_v30  ;;  %597 = vst [vmem:[%s11824_s17 + $0xf8] sm:$0xff] %v596_v31  ;;  %v600_v33 = vld [vmem:[%s11816_s24 + $0x208] sm:$0xff] }
  0xee   : > { %599 = vst [vmem:[%s11824_s17 + $0x100] sm:$0xff] %v598_v32  ;;  %v602_v34 = vld [vmem:[%s11816_s24 + $0x220] sm:$0xff]  ;;  %v604_v35 = vld [vmem:[%s11816_s24 + $0x228] sm:$0xff]  ;;  %601 = vst [vmem:[%s11824_s17 + $0x108] sm:$0xff] %v600_v33 }
  0xef   : > { %603 = vst [vmem:[%s11824_s17 + $0x110] sm:$0xff] %v602_v34  ;;  %605 = vst [vmem:[%s11824_s17 + $0x118] sm:$0xff] %v604_v35  ;;  %v606_v36 = vld [vmem:[%s11816_s24 + $0x240] sm:$0xff]  ;;  %v608_v37 = vld [vmem:[%s11816_s24 + $0x248] sm:$0xff] }
  0xf0   : > { %v610_v38 = vld [vmem:[%s11816_s24 + $0x260] sm:$0xff]  ;;  %607 = vst [vmem:[%s11824_s17 + $0x120] sm:$0xff] %v606_v36  ;;  %609 = vst [vmem:[%s11824_s17 + $0x128] sm:$0xff] %v608_v37  ;;  %v612_v39 = vld [vmem:[%s11816_s24 + $0x268] sm:$0xff] }
  0xf1   : > { %611 = vst [vmem:[%s11824_s17 + $0x130] sm:$0xff] %v610_v38  ;;  %v614_v40 = vld [vmem:[%s11816_s24 + $0x280] sm:$0xff]  ;;  %v616_v41 = vld [vmem:[%s11816_s24 + $0x288] sm:$0xff]  ;;  %613 = vst [vmem:[%s11824_s17 + $0x138] sm:$0xff] %v612_v39 }
  0xf2   : > { %615 = vst [vmem:[%s11824_s17 + $0x140] sm:$0xff] %v614_v40  ;;  %617 = vst [vmem:[%s11824_s17 + $0x148] sm:$0xff] %v616_v41  ;;  %v618_v42 = vld [vmem:[%s11816_s24 + $0x2a0] sm:$0xff]  ;;  %v620_v43 = vld [vmem:[%s11816_s24 + $0x2a8] sm:$0xff] }
  0xf3   : > { %v622_v44 = vld [vmem:[%s11816_s24 + $0x2c0] sm:$0xff]  ;;  %619 = vst [vmem:[%s11824_s17 + $0x150] sm:$0xff] %v618_v42  ;;  %621 = vst [vmem:[%s11824_s17 + $0x158] sm:$0xff] %v620_v43  ;;  %v624_v45 = vld [vmem:[%s11816_s24 + $0x2c8] sm:$0xff] }
  0xf4   : > { %623 = vst [vmem:[%s11824_s17 + $0x160] sm:$0xff] %v622_v44  ;;  %v626_v46 = vld [vmem:[%s11816_s24 + $0x2e0] sm:$0xff]  ;;  %v628_v47 = vld [vmem:[%s11816_s24 + $0x2e8] sm:$0xff]  ;;  %625 = vst [vmem:[%s11824_s17 + $0x168] sm:$0xff] %v624_v45 }
  0xf5   : > { %627 = vst [vmem:[%s11824_s17 + $0x170] sm:$0xff] %v626_v46  ;;  %629 = vst [vmem:[%s11824_s17 + $0x178] sm:$0xff] %v628_v47  ;;  %v630_v48 = vld [vmem:[%s11816_s24 + $0x300] sm:$0xff]  ;;  %v632_v49 = vld [vmem:[%s11816_s24 + $0x308] sm:$0xff] }
  0xf6   : > { %v634_v50 = vld [vmem:[%s11816_s24 + $0x320] sm:$0xff]  ;;  %631 = vst [vmem:[%s11824_s17 + $0x180] sm:$0xff] %v630_v48  ;;  %633 = vst [vmem:[%s11824_s17 + $0x188] sm:$0xff] %v632_v49  ;;  %v636_v51 = vld [vmem:[%s11816_s24 + $0x328] sm:$0xff] }
  0xf7   : > { %635 = vst [vmem:[%s11824_s17 + $0x190] sm:$0xff] %v634_v50  ;;  %v638_v52 = vld [vmem:[%s11816_s24 + $0x340] sm:$0xff]  ;;  %v640_v53 = vld [vmem:[%s11816_s24 + $0x348] sm:$0xff]  ;;  %637 = vst [vmem:[%s11824_s17 + $0x198] sm:$0xff] %v636_v51 }
  0xf8   : > { %639 = vst [vmem:[%s11824_s17 + $0x1a0] sm:$0xff] %v638_v52  ;;  %641 = vst [vmem:[%s11824_s17 + $0x1a8] sm:$0xff] %v640_v53  ;;  %v642_v54 = vld [vmem:[%s11816_s24 + $0x360] sm:$0xff]  ;;  %v644_v55 = vld [vmem:[%s11816_s24 + $0x368] sm:$0xff] }
  0xf9   : > { %v646_v56 = vld [vmem:[%s11816_s24 + $0x380] sm:$0xff]  ;;  %643 = vst [vmem:[%s11824_s17 + $0x1b0] sm:$0xff] %v642_v54  ;;  %645 = vst [vmem:[%s11824_s17 + $0x1b8] sm:$0xff] %v644_v55  ;;  %v648_v57 = vld [vmem:[%s11816_s24 + $0x388] sm:$0xff] }
  0xfa   : > { %647 = vst [vmem:[%s11824_s17 + $0x1c0] sm:$0xff] %v646_v56  ;;  %v650_v58 = vld [vmem:[%s11816_s24 + $0x3a0] sm:$0xff]  ;;  %v652_v59 = vld [vmem:[%s11816_s24 + $0x3a8] sm:$0xff]  ;;  %649 = vst [vmem:[%s11824_s17 + $0x1c8] sm:$0xff] %v648_v57 }
  0xfb   : > { %651 = vst [vmem:[%s11824_s17 + $0x1d0] sm:$0xff] %v650_v58  ;;  %653 = vst [vmem:[%s11824_s17 + $0x1d8] sm:$0xff] %v652_v59  ;;  %v654_v60 = vld [vmem:[%s11816_s24 + $0x3c0] sm:$0xff]  ;;  %v656_v61 = vld [vmem:[%s11816_s24 + $0x3c8] sm:$0xff] }
  0xfc   : > { %v658_v62 = vld [vmem:[%s11816_s24 + $0x3e0] sm:$0xff]  ;;  %655 = vst [vmem:[%s11824_s17 + $0x1e0] sm:$0xff] %v654_v60  ;;  %657 = vst [vmem:[%s11824_s17 + $0x1e8] sm:$0xff] %v656_v61  ;;  %v660_v63 = vld [vmem:[%s11816_s24 + $0x3e8] sm:$0xff] }
  0xfd   : > { %659 = vst [vmem:[%s11824_s17 + $0x1f0] sm:$0xff] %v658_v62  ;;  %v662_v0 = vld [vmem:[%s11816_s24 + $0x400] sm:$0xff]  ;;  %v664_v1 = vld [vmem:[%s11816_s24 + $0x408] sm:$0xff]  ;;  %661 = vst [vmem:[%s11824_s17 + $0x1f8] sm:$0xff] %v660_v63 }
  0xfe   : > { %663 = vst [vmem:[%s11824_s17 + $0x200] sm:$0xff] %v662_v0  ;;  %665 = vst [vmem:[%s11824_s17 + $0x208] sm:$0xff] %v664_v1  ;;  %v666_v2 = vld [vmem:[%s11816_s24 + $0x420] sm:$0xff]  ;;  %v668_v3 = vld [vmem:[%s11816_s24 + $0x428] sm:$0xff] }
  0xff   : > { %v670_v4 = vld [vmem:[%s11816_s24 + $0x440] sm:$0xff]  ;;  %667 = vst [vmem:[%s11824_s17 + $0x210] sm:$0xff] %v666_v2  ;;  %669 = vst [vmem:[%s11824_s17 + $0x218] sm:$0xff] %v668_v3  ;;  %v672_v5 = vld [vmem:[%s11816_s24 + $0x448] sm:$0xff] }
 0x100   : > { %671 = vst [vmem:[%s11824_s17 + $0x220] sm:$0xff] %v670_v4  ;;  %v674_v6 = vld [vmem:[%s11816_s24 + $0x460] sm:$0xff]  ;;  %v676_v7 = vld [vmem:[%s11816_s24 + $0x468] sm:$0xff]  ;;  %673 = vst [vmem:[%s11824_s17 + $0x228] sm:$0xff] %v672_v5 }
 0x101   : > { %675 = vst [vmem:[%s11824_s17 + $0x230] sm:$0xff] %v674_v6  ;;  %677 = vst [vmem:[%s11824_s17 + $0x238] sm:$0xff] %v676_v7 }
 0x102 PF: > { %p13117_p9 = scmp.ne.s32.totalorder %s13109_s19, 0 }
 0x104   : > { %686 = sbr.rel (%p13117_p9) target bundleno = 2917 (0xb65), region = 90 }
 0x10b   : > { %s689_s26 = sand.u32 1, %s11494_s30   ;;  %p13118_p12 = scmp.ne.s32.totalorder %s13108_s18, 0 }
 0x10c   : > { %s11116_s14 = smul.u32 576, %s689_s26 }
 0x10e   : > { %s11967_s15 = scalar_lea.vmem [#allocation2], %s11116_s14 }
 0x10f   : > { %11473 = dma.done.wait (%p13118_p12), [#allocation4], 2048  }
 0x110   : > { %11475 = vsyncadd (%p13118_p12), [#allocation4], 4294965248 }
 0x111   : > { %11477 = dma.done.wait (%p13118_p12), [#allocation6], 18448  }
 0x112   : > { %11479 = vsyncadd (%p13118_p12), [#allocation6], 4294948848 }
 0x113   : > { %11481 = dma.done.wait (%p13118_p12), [#allocation9], 131088  }
 0x114   : > { %11483 = vsyncadd (%p13118_p12), [#allocation9], 4294836208 }
 0x115   : > { %11485 = dma.done.wait (%p13118_p12), [#allocation12], 8256  }
 0x116   : > { %11487 = vsyncadd (%p13118_p12), [#allocation12], 4294959040 }
 0x117   : > { %11489 = dma.done.wait (%p13118_p12), [#allocation15], 16  }
 0x118   : > { %11491 = vsyncadd (%p13118_p12), [#allocation15], 4294967280  ;;  %v835_v8 = vld [vmem:[#allocation3] sm:$0xff]  ;;  %v836_v9 = vld [vmem:[#allocation3 + $0x8] sm:$0xff]  ;;  %s13155_s30 = sadd.s32 4294967295, %s11502_s11  }
 0x119   : > { %v837_v10 = vld [vmem:[#allocation3 + $0x10] sm:$0xff]  ;;  %v9331_v11 = vpack.c.bf16 %v836_v9, %v835_v8  ;;  %v838_v12 = vld [vmem:[#allocation3 + $0x18] sm:$0xff]  ;;  %v839_v14 = vld [vmem:[#allocation3 + $0x20] sm:$0xff]  ;;  %s7867_s18 = sshll.u32 %s13155_s30, 1 }
 0x11a   : > { %v9335_v13 = vpack.c.bf16 %v838_v12, %v837_v10  ;;  %v840_v15 = vld [vmem:[#allocation3 + $0x28] sm:$0xff]  ;;  %v763_v17 = vld [vmem:[%s11967_s15] sm:$0xff]  ;;  %v841_v18 = vld [vmem:[#allocation3 + $0x30] sm:$0xff]  ;;  %p758_p6 = scmp.lt.s32.totalorder %s7867_s18, 3 }
 0x11b   : > { %9332 = vmatprep.subr.bf16.mxu1 %v9331_v11  ;;  %v9339_v16 = vpack.c.bf16 %v840_v15, %v839_v14  ;;  %v842_v19 = vld [vmem:[#allocation3 + $0x38] sm:$0xff]  ;;  %8503 = vmatprep.mubr.f32.mxu1 %v763_v17  ;;  %v843_v21 = vld [vmem:[#allocation3 + $0x40] sm:$0xff]  ;;  %v844_v22 = vld [vmem:[#allocation3 + $0x48] sm:$0xff] }
 0x11c   : > { %9334 = vmatpush3.bf16.msra.mxu1 %v9331_v11  ;;  %v9343_v20 = vpack.c.bf16 %v842_v19, %v841_v18  ;;  %v9347_v23 = vpack.c.bf16 %v844_v22, %v843_v21  ;;  %v845_v24 = vld [vmem:[#allocation3 + $0x50] sm:$0xff]  ;;  %v846_v25 = vld [vmem:[#allocation3 + $0x58] sm:$0xff]  ;;  %v847_v27 = vld [vmem:[#allocation3 + $0x60] sm:$0xff]  ;;  %s13161_s18 = smov (!%p758_p6, %s7867_s18), 3 }
 0x11d   : > { %9336 = vmatprep.subr.bf16.mxu1 %v9335_v13  ;;  %v9351_v26 = vpack.c.bf16 %v846_v25, %v845_v24  ;;  %v848_v28 = vld [vmem:[#allocation3 + $0x68] sm:$0xff]  ;;  %v849_v30 = vld [vmem:[#allocation3 + $0x70] sm:$0xff]  ;;  %v850_v31 = vld [vmem:[#allocation3 + $0x78] sm:$0xff]  ;;  %s7868_s19 = sshll.u32 %s13161_s18, 3 }
 0x11e   : > { %v9355_v29 = vpack.c.bf16 %v848_v28, %v847_v27  ;;  %v9359_v32 = vpack.c.bf16 %v850_v31, %v849_v30  ;;  %v1371_v33 = vld [vmem:[#allocation7 + $0x80] sm:$0xff]  ;;  %v1372_v34 = vld [vmem:[#allocation7 + $0x88] sm:$0xff]  ;;  %v1373_v36 = vld [vmem:[#allocation7 + $0x90] sm:$0xff]  ;;  %s761_s28 = scalar_lea.vmem %s13093_s9, %s7868_s19 }
 0x11f   : > { %v9363_v35 = vpack.c.bf16 %v1372_v34, %v1371_v33  ;;  %v1374_v37 = vld [vmem:[#allocation7 + $0x98] sm:$0xff]  ;;  %v764_v38 = vld [vmem:[%s11967_s15 + $0x8] sm:$0xff]  ;;  %v765_v39 = vld [vmem:[%s11967_s15 + $0x10] sm:$0xff] }
 0x120   : > { %9338 = vmatpush3.bf16.msra.mxu1 %v9335_v13  ;;  %v9367_v40 = vpack.c.bf16 %v1374_v37, %v1373_v36  ;;  %v1375_v41 = vld [vmem:[#allocation7 + $0xa0] sm:$0xff]  ;;  %v1376_v42 = vld [vmem:[#allocation7 + $0xa8] sm:$0xff]  ;;  %v766_v43 = vld [vmem:[%s11967_s15 + $0x18] sm:$0xff] }
 0x121   : > { %9340 = vmatprep.subr.bf16.mxu1 %v9339_v16  ;;  %v767_v44 = vld [vmem:[%s11967_s15 + $0x20] sm:$0xff]  ;;  %v9371_v45 = vpack.c.bf16 %v1376_v42, %v1375_v41  ;;  %v1377_v46 = vld [vmem:[#allocation7 + $0xb0] sm:$0xff]  ;;  %v768_v48 = vld [vmem:[%s11967_s15 + $0x28] sm:$0xff] }
 0x122   : > { %v1378_v47 = vld [vmem:[#allocation7 + $0xb8] sm:$0xff]  ;;  %v769_v49 = vld [vmem:[%s11967_s15 + $0x30] sm:$0xff]  ;;  %v1379_v51 = vld [vmem:[#allocation7 + $0xc0] sm:$0xff] }
 0x123   : > { %v9375_v50 = vpack.c.bf16 %v1378_v47, %v1377_v46  ;;  %v1380_v52 = vld [vmem:[#allocation7 + $0xc8] sm:$0xff]  ;;  %v770_v53 = vld [vmem:[%s11967_s15 + $0x38] sm:$0xff]  ;;  %v771_v54 = vld [vmem:[%s11967_s15 + $0x40] sm:$0xff] }
 0x124   : > { %9342 = vmatpush3.bf16.msra.mxu1 %v9339_v16  ;;  %v9379_v55 = vpack.c.bf16 %v1380_v52, %v1379_v51  ;;  %v1381_v56 = vld [vmem:[#allocation7 + $0xd0] sm:$0xff]  ;;  %v1382_v57 = vld [vmem:[#allocation7 + $0xd8] sm:$0xff]  ;;  %v772_v58 = vld [vmem:[%s11967_s15 + $0x48] sm:$0xff] }
 0x125   : > { %9344 = vmatprep.subr.bf16.mxu1 %v9343_v20  ;;  %v773_v59 = vld [vmem:[%s11967_s15 + $0x50] sm:$0xff]  ;;  %v9383_v60 = vpack.c.bf16 %v1382_v57, %v1381_v56  ;;  %v1383_v61 = vld [vmem:[#allocation7 + $0xe0] sm:$0xff]  ;;  %v774_v63 = vld [vmem:[%s11967_s15 + $0x58] sm:$0xff] }
 0x126   : > { %v1384_v62 = vld [vmem:[#allocation7 + $0xe8] sm:$0xff]  ;;  %v775_v0 = vld [vmem:[%s11967_s15 + $0x60] sm:$0xff]  ;;  %v778_v4 = vld [vmem:[%s11967_s15 + $0x78] sm:$0xff] }
 0x127   : > { %v9387_v1 = vpack.c.bf16 %v1384_v62, %v1383_v61  ;;  %v776_v2 = vld [vmem:[%s11967_s15 + $0x68] sm:$0xff]  ;;  %v777_v3 = vld [vmem:[%s11967_s15 + $0x70] sm:$0xff]  ;;  %v779_v5 = vld [vmem:[%s11967_s15 + $0x80] sm:$0xff] }
 0x128   : > { %9346 = vmatpush3.bf16.msra.mxu1 %v9343_v20  ;;  %v780_v6 = vld [vmem:[%s11967_s15 + $0x88] sm:$0xff]  ;;  %v781_v7 = vld [vmem:[%s11967_s15 + $0x90] sm:$0xff]  ;;  %v782_v8 = vld [vmem:[%s11967_s15 + $0x98] sm:$0xff] }
 0x129   : > { %9348 = vmatprep.subr.bf16.mxu1 %v9347_v23  ;;  %v783_v9 = vld [vmem:[%s11967_s15 + $0xa0] sm:$0xff]  ;;  %v784_v10 = vld [vmem:[%s11967_s15 + $0xa8] sm:$0xff]  ;;  %v785_v11 = vld [vmem:[%s11967_s15 + $0xb0] sm:$0xff] }
 0x12a   : > { %v786_v12 = vld [vmem:[%s11967_s15 + $0xb8] sm:$0xff]  ;;  %v787_v13 = vld [vmem:[%s11967_s15 + $0xc0] sm:$0xff]  ;;  %v788_v14 = vld [vmem:[%s11967_s15 + $0xc8] sm:$0xff] }
 0x12b   : > { %v789_v15 = vld [vmem:[%s11967_s15 + $0xd0] sm:$0xff]  ;;  %v790_v16 = vld [vmem:[%s11967_s15 + $0xd8] sm:$0xff]  ;;  %v791_v17 = vld [vmem:[%s11967_s15 + $0xe0] sm:$0xff] }
 0x12c   : > { %9350 = vmatpush3.bf16.msra.mxu1 %v9347_v23  ;;  %v792_v18 = vld [vmem:[%s11967_s15 + $0xe8] sm:$0xff]  ;;  %v793_v19 = vld [vmem:[%s11967_s15 + $0xf0] sm:$0xff]  ;;  %v794_v20 = vld [vmem:[%s11967_s15 + $0xf8] sm:$0xff] }
 0x12d   : > { %9352 = vmatprep.subr.bf16.mxu1 %v9351_v26  ;;  %v795_v21 = vld [vmem:[%s11967_s15 + $0x100] sm:$0xff]  ;;  %v796_v22 = vld [vmem:[%s11967_s15 + $0x108] sm:$0xff]  ;;  %v797_v23 = vld [vmem:[%s11967_s15 + $0x110] sm:$0xff] }
 0x12e   : > { %v798_v24 = vld [vmem:[%s11967_s15 + $0x118] sm:$0xff]  ;;  %v799_v25 = vld [vmem:[%s11967_s15 + $0x120] sm:$0xff]  ;;  %v801_v27 = vld [vmem:[%s11967_s15 + $0x130] sm:$0xff] }
 0x12f   : > { %v802_v28 = vld [vmem:[%s11967_s15 + $0x138] sm:$0xff]  ;;  %v804_v30 = vld [vmem:[%s11967_s15 + $0x148] sm:$0xff]  ;;  %v805_v31 = vld [vmem:[%s11967_s15 + $0x150] sm:$0xff] }
 0x130   : > { %9354 = vmatpush3.bf16.msra.mxu1 %v9351_v26  ;;  %v800_v26 = vld [vmem:[%s11967_s15 + $0x128] sm:$0xff]  ;;  %v807_v33 = vld [vmem:[%s11967_s15 + $0x160] sm:$0xff]  ;;  %v1385_v36 = vld [vmem:[#allocation7 + $0xf0] sm:$0xff] }
 0x131   : > { %9356 = vmatprep.subr.bf16.mxu1 %v9355_v29  ;;  %v808_v34 = vld [vmem:[%s11967_s15 + $0x168] sm:$0xff]  ;;  %v1386_v37 = vld [vmem:[#allocation7 + $0xf8] sm:$0xff]  ;;  %v813_v42 = vld [vmem:[%s11967_s15 + $0x190] sm:$0xff] }
 0x132   : > { %v812_v41 = vld [vmem:[%s11967_s15 + $0x188] sm:$0xff]  ;;  %v817_v46 = vld [vmem:[%s11967_s15 + $0x1b0] sm:$0xff]  ;;  %v818_v47 = vld [vmem:[%s11967_s15 + $0x1b8] sm:$0xff] }
 0x133   : > { %v822_v51 = vld [vmem:[%s11967_s15 + $0x1d8] sm:$0xff]  ;;  %v823_v52 = vld [vmem:[%s11967_s15 + $0x1e0] sm:$0xff]  ;;  %v1356_v56 = vld [vmem:[#allocation7 + $0x8] sm:$0xff] }
 0x134   : > { %9358 = vmatpush3.bf16.msra.mxu1 %v9355_v29  ;;  %v803_v29 = vld [vmem:[%s11967_s15 + $0x140] sm:$0xff]  ;;  %v829_v61 = vld [vmem:[%s11967_s15 + $0x210] sm:$0xff]  ;;  %v830_v62 = vld [vmem:[%s11967_s15 + $0x218] sm:$0xff] }
 0x135   : > { %9360 = vmatprep.subr.bf16.mxu1 %v9359_v32 }
 0x138   : > { %9362 = vmatpush3.bf16.msra.mxu1 %v9359_v32  ;;  %v806_v32 = vld [vmem:[%s11967_s15 + $0x158] sm:$0xff] }
 0x139   : > { %9364 = vmatprep.subr.bf16.mxu1 %v9363_v35 }
 0x13b   : > { %8504 = vmatmul.mubr.f32.vlgmr.msra.gmra.mrb[0].mxu1 %v764_v38  ;;  %v9391_v38 = vpack.c.bf16 %v1386_v37, %v1385_v36  ;;  %v1363_v37 = vld [vmem:[#allocation7 + $0x40] sm:$0xff] }
 0x13c   : > { %8506 = vmatprep.mubr.f32.mxu1 %v765_v39  ;;  %9366 = vmatpush3.bf16.msra.mxu1 %v9363_v35  ;;  %v809_v35 = vld [vmem:[%s11967_s15 + $0x170] sm:$0xff]  ;;  %v810_v39 = vld [vmem:[%s11967_s15 + $0x178] sm:$0xff] }
 0x13d   : > { %9368 = vmatprep.subr.bf16.mxu1 %v9367_v40 }
 0x13f   : > { %8507 = vmatmul.mubr.f32.gmra.mrb[2].mxu1 %v766_v43  ;;  %v814_v43 = vld [vmem:[%s11967_s15 + $0x198] sm:$0xff] }
 0x140   : > { %8509 = vmatprep.mubr.f32.mxu1 %v767_v44  ;;  %9370 = vmatpush3.bf16.msra.mxu1 %v9367_v40  ;;  %v811_v40 = vld [vmem:[%s11967_s15 + $0x180] sm:$0xff] }
 0x141   : > { %9372 = vmatprep.subr.bf16.mxu1 %v9371_v45  ;;  %v815_v44 = vld [vmem:[%s11967_s15 + $0x1a0] sm:$0xff] }
 0x143   : > { %8510 = vmatmul.mubr.f32.gmra.mrb[4].mxu1 %v768_v48  ;;  %v819_v48 = vld [vmem:[%s11967_s15 + $0x1c0] sm:$0xff] }
 0x144   : > { %8512 = vmatprep.mubr.f32.mxu1 %v769_v49  ;;  %9374 = vmatpush3.bf16.msra.mxu1 %v9371_v45  ;;  %v816_v45 = vld [vmem:[%s11967_s15 + $0x1a8] sm:$0xff] }
 0x145   : > { %9376 = vmatprep.subr.bf16.mxu1 %v9375_v50  ;;  %v820_v49 = vld [vmem:[%s11967_s15 + $0x1c8] sm:$0xff] }
 0x147   : > { %8513 = vmatmul.mubr.f32.gmra.mrb[6].mxu1 %v770_v53  ;;  %v824_v53 = vld [vmem:[%s11967_s15 + $0x1e8] sm:$0xff] }
 0x148   : > { %8515 = vmatprep.mubr.f32.mxu1 %v771_v54  ;;  %9378 = vmatpush3.bf16.msra.mxu1 %v9375_v50  ;;  %v821_v50 = vld [vmem:[%s11967_s15 + $0x1d0] sm:$0xff] }
 0x149   : > { %9380 = vmatprep.subr.bf16.mxu1 %v9379_v55  ;;  %v825_v54 = vld [vmem:[%s11967_s15 + $0x1f0] sm:$0xff] }
 0x14b   : > { %8516 = vmatmul.mubr.f32.gmra.mrb[8].mxu1 %v772_v58  ;;  %v826_v58 = vld [vmem:[%s11967_s15 + $0x1f8] sm:$0xff] }
 0x14c   : > { %8518 = vmatprep.mubr.f32.mxu1 %v773_v59  ;;  %9382 = vmatpush3.bf16.msra.mxu1 %v9379_v55  ;;  %v1355_v55 = vld [vmem:[#allocation7] sm:$0xff] }
 0x14d   : > { %9384 = vmatprep.subr.bf16.mxu1 %v9383_v60  ;;  %v9395_v57 = vpack.c.bf16 %v1356_v56, %v1355_v55  ;;  %v827_v59 = vld [vmem:[%s11967_s15 + $0x200] sm:$0xff]  ;;  %v1369_v56 = vld [vmem:[#allocation7 + $0x70] sm:$0xff] }
 0x14f   : > { %8519 = vmatmul.mubr.f32.gmra.mrb[10].mxu1 %v774_v63  ;;  %v831_v63 = vld [vmem:[%s11967_s15 + $0x220] sm:$0xff] }
 0x150   : > { %8521 = vmatprep.mubr.f32.mxu1 %v775_v0  ;;  %9386 = vmatpush3.bf16.msra.mxu1 %v9383_v60  ;;  %v828_v60 = vld [vmem:[%s11967_s15 + $0x208] sm:$0xff] }
 0x151   : > { %9388 = vmatprep.subr.bf16.mxu1 %v9387_v1  ;;  %v832_v0 = vld [vmem:[%s11967_s15 + $0x228] sm:$0xff] }
 0x153   : > { %8522 = vmatmul.mubr.f32.gmra.mrb[12].mxu1 %v776_v2  ;;  %v834_v2 = vld [vmem:[%s11967_s15 + $0x238] sm:$0xff] }
 0x154   : > { %8524 = vmatprep.mubr.f32.mxu1 %v777_v3  ;;  %9390 = vmatpush3.bf16.msra.mxu1 %v9387_v1  ;;  %v833_v1 = vld [vmem:[%s11967_s15 + $0x230] sm:$0xff] }
 0x155   : > { %9392 = vmatprep.subr.bf16.mxu1 %v9391_v38 }
 0x157   : > { %8525 = vmatmul.mubr.f32.gmra.mrb[14].mxu1 %v778_v4 }
 0x158   : > { %8527 = vmatprep.mubr.f32.mxu1 %v779_v5  ;;  %9394 = vmatpush3.bf16.msra.mxu1 %v9391_v38  ;;  %v12065_v5 = vld [vmem:[#allocation5] ss:$0 sm:$0xff]  ;;  %v1364_v38 = vld [vmem:[#allocation7 + $0x48] sm:$0xff] }
 0x159   : > { %9396 = vmatprep.subr.bf16.mxu1 %v9395_v57 }
 0x15b   : > { %8528 = vmatmul.mubr.f32.gmra.mrb[16].mxu1 %v780_v6 }
 0x15c   : > { %8530 = vmatprep.mubr.f32.mxu1 %v781_v7 }
 0x15f   : > { %8531 = vmatmul.mubr.f32.gmra.mrb[18].mxu1 %v782_v8 }
 0x160   : > { %8533 = vmatprep.mubr.f32.mxu1 %v783_v9 }
 0x163   : > { %8534 = vmatmul.mubr.f32.gmra.mrb[20].mxu1 %v784_v10  ;;  %v1357_v10 = vld [vmem:[#allocation7 + $0x10] sm:$0xff] }
 0x164   : > { %8536 = vmatprep.mubr.f32.mxu1 %v785_v11  ;;  %v1358_v11 = vld [vmem:[#allocation7 + $0x18] sm:$0xff] }
 0x167   : > { %8537 = vmatmul.mubr.f32.gmra.mrb[22].mxu1 %v786_v12 }
 0x168   : > { %8539 = vmatprep.mubr.f32.mxu1 %v787_v13 }
 0x16b   : > { %8540 = vmatmul.mubr.f32.gmra.mrb[24].mxu1 %v788_v14 }
 0x16c   : > { %8542 = vmatprep.mubr.f32.mxu1 %v789_v15 }
 0x16f   : > { %8543 = vmatmul.mubr.f32.gmra.mrb[26].mxu1 %v790_v16 }
 0x170   : > { %8545 = vmatprep.mubr.f32.mxu1 %v791_v17  ;;  %v9399_v17 = vpack.c.bf16 %v1358_v11, %v1357_v10 }
 0x173   : > { %8546 = vmatmul.mubr.f32.gmra.mrb[28].mxu1 %v792_v18 }
 0x174   : > { %8548 = vmatprep.mubr.f32.mxu1 %v793_v19  ;;  %v1359_v19 = vld [vmem:[#allocation7 + $0x20] sm:$0xff] }
 0x177   : > { %8549 = vmatmul.mubr.f32.gmra.mrb[30].mxu1 %v794_v20  ;;  %v1360_v20 = vld [vmem:[#allocation7 + $0x28] sm:$0xff] }
 0x178   : > { %8551 = vmatprep.mubr.f32.mxu1 %v795_v21 }
 0x17b   : > { %8552 = vmatmul.mubr.f32.gmra.mrb[32].mxu1 %v796_v22 }
 0x17c   : > { %8554 = vmatprep.mubr.f32.mxu1 %v797_v23 }
 0x17f   : > { %8555 = vmatmul.mubr.f32.gmra.mrb[34].mxu1 %v798_v24 }
 0x180   : > { %8557 = vmatprep.mubr.f32.mxu1 %v799_v25 }
 0x183   : > { %8558 = vmatmul.mubr.f32.gmra.mrb[36].mxu1 %v800_v26  ;;  %v9403_v26 = vpack.c.bf16 %v1360_v20, %v1359_v19 }
 0x184   : > { %8560 = vmatprep.mubr.f32.mxu1 %v801_v27 }
 0x187   : > { %8561 = vmatmul.mubr.f32.gmra.mrb[38].mxu1 %v802_v28  ;;  %v1361_v28 = vld [vmem:[#allocation7 + $0x30] sm:$0xff] }
 0x188   : > { %8563 = vmatprep.mubr.f32.mxu1 %v803_v29  ;;  %v1362_v29 = vld [vmem:[#allocation7 + $0x38] sm:$0xff] }
 0x18b   : > { %8564 = vmatmul.mubr.f32.gmra.mrb[40].mxu1 %v804_v30 }
 0x18c   : > { %8566 = vmatprep.mubr.f32.mxu1 %v805_v31 }
 0x18f   : > { %8567 = vmatmul.mubr.f32.gmra.mrb[42].mxu1 %v806_v32 }
 0x190   : > { %8569 = vmatprep.mubr.f32.mxu1 %v807_v33 }
 0x193   : > { %8570 = vmatmul.mubr.f32.gmra.mrb[44].mxu1 %v808_v34 }
 0x194   : > { %8572 = vmatprep.mubr.f32.mxu1 %v809_v35  ;;  %v9407_v35 = vpack.c.bf16 %v1362_v29, %v1361_v28 }
 0x197   : > { %8573 = vmatmul.mubr.f32.gmra.mrb[46].mxu1 %v810_v39 }
 0x198   : > { %8575 = vmatprep.mubr.f32.mxu1 %v811_v40 }
 0x19b   : > { %8576 = vmatmul.mubr.f32.gmra.mrb[48].mxu1 %v812_v41 }
 0x19c   : > { %8578 = vmatprep.mubr.f32.mxu1 %v813_v42 }
 0x19f   : > { %8579 = vmatmul.mubr.f32.gmra.mrb[50].mxu1 %v814_v43  ;;  %v9411_v43 = vpack.c.bf16 %v1364_v38, %v1363_v37 }
 0x1a0   : > { %8581 = vmatprep.mubr.f32.mxu1 %v815_v44  ;;  %v1365_v44 = vld [vmem:[#allocation7 + $0x50] sm:$0xff] }
 0x1a3   : > { %8582 = vmatmul.mubr.f32.gmra.mrb[52].mxu1 %v816_v45  ;;  %v1366_v45 = vld [vmem:[#allocation7 + $0x58] sm:$0xff] }
 0x1a4   : > { %8584 = vmatprep.mubr.f32.mxu1 %v817_v46 }
 0x1a7   : > { %8585 = vmatmul.mubr.f32.gmra.mrb[54].mxu1 %v818_v47 }
 0x1a8   : > { %8587 = vmatprep.mubr.f32.mxu1 %v819_v48  ;;  %v9415_v48 = vpack.c.bf16 %v1366_v45, %v1365_v44 }
 0x1ab   : > { %8588 = vmatmul.mubr.f32.gmra.mrb[56].mxu1 %v820_v49  ;;  %v1367_v49 = vld [vmem:[#allocation7 + $0x60] sm:$0xff] }
 0x1ac   : > { %8590 = vmatprep.mubr.f32.mxu1 %v821_v50  ;;  %v1368_v50 = vld [vmem:[#allocation7 + $0x68] sm:$0xff] }
 0x1af   : > { %8591 = vmatmul.mubr.f32.gmra.mrb[58].mxu1 %v822_v51 }
 0x1b0   : > { %8593 = vmatprep.mubr.f32.mxu1 %v823_v52 }
 0x1b3   : > { %8594 = vmatmul.mubr.f32.gmra.mrb[60].mxu1 %v824_v53 }
 0x1b4   : > { %8596 = vmatprep.mubr.f32.mxu1 %v825_v54  ;;  %v9419_v54 = vpack.c.bf16 %v1368_v50, %v1367_v49 }
 0x1b7   : > { %8597 = vmatmul.mubr.f32.gmra.mrb[62].mxu1 %v826_v58 }
 0x1b8   : > { %8599 = vmatprep.mubr.f32.mxu1 %v827_v59 }
 0x1bb   : > { %8600 = vmatmul.mubr.f32.gmra.mrb[64].mxu1 %v828_v60 }
 0x1bc   : > { %8602 = vmatprep.mubr.f32.mxu1 %v829_v61 }
 0x1bf   : > { %8603 = vmatmul.mubr.f32.gmra.mrb[66].mxu1 %v830_v62 }
 0x1c0   : > { %8605 = vmatprep.mubr.f32.mxu1 %v831_v63 }
 0x1c3   : > { %8606 = vmatmul.mubr.f32.gmra.mrb[68].mxu1 %v832_v0 }
 0x1c4   : > { %8608 = vmatprep.mubr.f32.mxu1 %v833_v1  ;;  %v1837_v1 = vld [vmem:[#allocation7 + $0x100] sm:$0xff] }
 0x1c7   : > { %8609 = vmatmul.mubr.f32.gmra.mrb[70].mxu1 %v834_v2  ;;  %v1838_v2 = vld [vmem:[#allocation7 + $0x108] sm:$0xff] }
 0x20e   : > { %v12061_v3 = vpop.f32.mrb[0].mxu1 }
 0x20f   : > { %v12063_v4 = vpop.f32.mrb[1].mxu1 }
 0x212   : > { %v8508_v6 = vpop.f32.mrb[2].mxu1 }
 0x213   : > { %v12068_v7 = vadd.f32 %v8508_v6, %v12065_v5  ;;  %v934_v8 = vpop.f32.mrb[3].mxu1 }
 0x214   : > { %v12071_v9 = vadd.f32 %v12065_v5, %v934_v8 }
 0x215   : > { %v1286_v14 = vmax.f32 %v12068_v7, 0.0 }
 0x216   : > { %v1285_v12 = vmax.f32 %v12071_v9, 0.0  ;;  %v8511_v13 = vpop.f32.mrb[4].mxu1 }
 0x217   : > { %v950_v15 = vadd.f32 %v8511_v13, %v12065_v5  ;;  %v944_v16 = vpop.f32.mrb[5].mxu1 }
 0x218   : > { %v945_v18 = vadd.f32 %v12065_v5, %v944_v16  ;;  %8643 = vmatprep.mubr.f32.mxu1 %v1285_v12 }
 0x219   : > { %8644 = vmatmul.mubr.f32.vlgmr.msra.gmra.mrb[72].mxu1 %v1286_v14  ;;  %v12083_v23 = vmax.f32 %v950_v15, 0.0  ;;  %v12130_v15 = vpack.c.bf16 %v1838_v2, %v1837_v1 }
 0x21a   : > { %v12081_v21 = vmax.f32 %v945_v18, 0.0  ;;  %v8514_v22 = vpop.f32.mrb[6].mxu1  ;;  %9398 = vmatpush3.bf16.msra.mxu1 %v9395_v57  ;;  %v1370_v57 = vld [vmem:[#allocation7 + $0x78] sm:$0xff] }
 0x21b   : > { %v960_v24 = vadd.f32 %v8514_v22, %v12065_v5  ;;  %v954_v25 = vpop.f32.mrb[7].mxu1  ;;  %9400 = vmatprep.subr.bf16.mxu1 %v9399_v17  ;;  %v9423_v63 = vpack.c.bf16 %v1370_v57, %v1369_v56 }
 0x21c   : > { %v955_v27 = vadd.f32 %v12065_v5, %v954_v25  ;;  %8646 = vmatprep.mubr.f32.mxu1 %v12081_v21 }
 0x21d   : > { %8647 = vmatmul.mubr.f32.gmra.mrb[74].mxu1 %v12083_v23  ;;  %v12091_v32 = vmax.f32 %v960_v24, 0.0 }
 0x21e   : > { %v12089_v30 = vmax.f32 %v955_v27, 0.0  ;;  %v8517_v31 = vpop.f32.mrb[8].mxu1  ;;  %9402 = vmatpush3.bf16.msra.mxu1 %v9399_v17 }
 0x21f   : > { %v12094_v33 = vadd.f32 %v8517_v31, %v12065_v5  ;;  %v964_v34 = vpop.f32.mrb[9].mxu1  ;;  %9404 = vmatprep.subr.bf16.mxu1 %v9403_v26 }
 0x220   : > { %v12097_v36 = vadd.f32 %v12065_v5, %v964_v34  ;;  %8649 = vmatprep.mubr.f32.mxu1 %v12089_v30 }
 0x221   : > { %8650 = vmatmul.mubr.f32.gmra.mrb[76].mxu1 %v12091_v32  ;;  %v13100_v41 = vmax.f32 %v12094_v33, 0.0 }
 0x222   : > { %v13101_v39 = vmax.f32 %v12097_v36, 0.0  ;;  %v12102_v40 = vpop.f32.mrb[10].mxu1  ;;  %9406 = vmatpush3.bf16.msra.mxu1 %v9403_v26 }
 0x223   : > { %v12105_v42 = vpop.f32.mrb[11].mxu1  ;;  %9408 = vmatprep.subr.bf16.mxu1 %v9407_v35 }
 0x224   : > { %8652 = vmatprep.mubr.f32.mxu1 %v13101_v39  ;;  %v1844_v39 = vld [vmem:[#allocation7 + $0x138] sm:$0xff] }
 0x225   : > { %8653 = vmatmul.mubr.f32.gmra.mrb[78].mxu1 %v13100_v41 }
 0x226   : > { %v12111_v46 = vpop.f32.mrb[12].mxu1  ;;  %9410 = vmatpush3.bf16.msra.mxu1 %v9407_v35 }
 0x227   : > { %v12113_v47 = vpop.f32.mrb[13].mxu1  ;;  %9412 = vmatprep.subr.bf16.mxu1 %v9411_v43 }
 0x22a   : > { %v8526_v51 = vpop.f32.mrb[14].mxu1  ;;  %9414 = vmatpush3.bf16.msra.mxu1 %v9411_v43 }
 0x22b   : > { %v1000_v52 = vadd.f32 %v8526_v51, %v12065_v5  ;;  %v994_v53 = vpop.f32.mrb[15].mxu1  ;;  %9416 = vmatprep.subr.bf16.mxu1 %v9415_v48 }
 0x22c   : > { %v995_v55 = vadd.f32 %v12065_v5, %v994_v53 }
 0x22d   : > { %v12119_v60 = vmax.f32 %v1000_v52, 0.0 }
 0x22e   : > { %v12117_v58 = vmax.f32 %v995_v55, 0.0  ;;  %v8529_v59 = vpop.f32.mrb[16].mxu1  ;;  %9418 = vmatpush3.bf16.msra.mxu1 %v9415_v48 }
 0x22f   : > { %v1010_v61 = vadd.f32 %v8529_v59, %v12065_v5  ;;  %v1004_v62 = vpop.f32.mrb[17].mxu1  ;;  %9420 = vmatprep.subr.bf16.mxu1 %v9419_v54 }
 0x230   : > { %v1005_v0 = vadd.f32 %v12065_v5, %v1004_v62  ;;  %8655 = vmatprep.mubr.f32.mxu1 %v12117_v58 }
 0x231   : > { %8656 = vmatmul.mubr.f32.gmra.mrb[80].mxu1 %v12119_v60  ;;  %v12127_v10 = vmax.f32 %v1010_v61, 0.0 }
 0x232   : > { %v12125_v6 = vmax.f32 %v1005_v0, 0.0  ;;  %v8532_v8 = vpop.f32.mrb[18].mxu1  ;;  %9422 = vmatpush3.bf16.msra.mxu1 %v9419_v54 }
 0x233   : > { %v1020_v11 = vadd.f32 %v8532_v8, %v12065_v5  ;;  %v1014_v13 = vpop.f32.mrb[19].mxu1  ;;  %9424 = vmatprep.subr.bf16.mxu1 %v9423_v63 }
 0x234   : > { %v1015_v16 = vadd.f32 %v12065_v5, %v1014_v13  ;;  %8658 = vmatprep.mubr.f32.mxu1 %v12125_v6 }
 0x235   : > { %8659 = vmatmul.mubr.f32.gmra.mrb[82].mxu1 %v12127_v10  ;;  %v12137_v19 = vmax.f32 %v1020_v11, 0.0 }
 0x236   : > { %v12135_v17 = vmax.f32 %v1015_v16, 0.0  ;;  %v8535_v18 = vpop.f32.mrb[20].mxu1  ;;  %9426 = vmatpush3.bf16.msra.mxu1 %v9423_v63 }
 0x237   : > { %v1030_v20 = vadd.f32 %v8535_v18, %v12065_v5  ;;  %v1024_v22 = vpop.f32.mrb[21].mxu1  ;;  %9428 = vmatprep.subr.bf16.mxu1 %v12130_v15 }
 0x238   : > { %v1025_v24 = vadd.f32 %v12065_v5, %v1024_v22  ;;  %8661 = vmatprep.mubr.f32.mxu1 %v12135_v17 }
 0x239   : > { %8662 = vmatmul.mubr.f32.gmra.mrb[84].mxu1 %v12137_v19  ;;  %v12148_v27 = vmax.f32 %v1030_v20, 0.0 }
 0x23a   : > { %v12144_v25 = vmax.f32 %v1025_v24, 0.0  ;;  %v12146_v26 = vpop.f32.mrb[22].mxu1 }
 0x23b   : > { %v12150_v28 = vpop.f32.mrb[23].mxu1 }
 0x23c   : > { %8664 = vmatprep.mubr.f32.mxu1 %v12144_v25 }
 0x23d   : > { %8665 = vmatmul.mubr.f32.gmra.mrb[86].mxu1 %v12148_v27 }
 0x23e   : > { %v12154_v29 = vpop.f32.mrb[24].mxu1 }
 0x23f   : > { %v12156_v31 = vpop.f32.mrb[25].mxu1 }
 0x242   : > { %v8544_v34 = vpop.f32.mrb[26].mxu1 }
 0x243   : > { %v1060_v35 = vadd.f32 %v8544_v34, %v12065_v5  ;;  %v1054_v37 = vpop.f32.mrb[27].mxu1 }
 0x244   : > { %v1055_v38 = vadd.f32 %v12065_v5, %v1054_v37 }
 0x245   : > { %v12162_v45 = vmax.f32 %v1060_v35, 0.0 }
 0x246   : > { %v12160_v43 = vmax.f32 %v1055_v38, 0.0  ;;  %v8547_v44 = vpop.f32.mrb[28].mxu1 }
 0x247   : > { %v1070_v48 = vadd.f32 %v8547_v44, %v12065_v5  ;;  %v1064_v49 = vpop.f32.mrb[29].mxu1 }
 0x248   : > { %v1065_v50 = vadd.f32 %v12065_v5, %v1064_v49  ;;  %8667 = vmatprep.mubr.f32.mxu1 %v12160_v43 }
 0x249   : > { %8668 = vmatmul.mubr.f32.gmra.mrb[88].mxu1 %v12162_v45  ;;  %v12170_v53 = vmax.f32 %v1070_v48, 0.0 }
 0x24a   : > { %v12168_v51 = vmax.f32 %v1065_v50, 0.0  ;;  %v8550_v52 = vpop.f32.mrb[30].mxu1 }
 0x24b   : > { %v1080_v54 = vadd.f32 %v8550_v52, %v12065_v5  ;;  %v1074_v55 = vpop.f32.mrb[31].mxu1 }
 0x24c   : > { %v1075_v56 = vadd.f32 %v12065_v5, %v1074_v55  ;;  %8670 = vmatprep.mubr.f32.mxu1 %v12168_v51 }
 0x24d   : > { %8671 = vmatmul.mubr.f32.gmra.mrb[90].mxu1 %v12170_v53  ;;  %v12178_v61 = vmax.f32 %v1080_v54, 0.0 }
 0x24e   : > { %v12176_v57 = vmax.f32 %v1075_v56, 0.0  ;;  %v8553_v59 = vpop.f32.mrb[32].mxu1 }
 0x24f   : > { %v1090_v62 = vadd.f32 %v8553_v59, %v12065_v5  ;;  %v1084_v63 = vpop.f32.mrb[33].mxu1 }
 0x250   : > { %v1085_v0 = vadd.f32 %v12065_v5, %v1084_v63  ;;  %8673 = vmatprep.mubr.f32.mxu1 %v12176_v57 }
 0x251   : > { %8674 = vmatmul.mubr.f32.gmra.mrb[92].mxu1 %v12178_v61  ;;  %v12188_v8 = vmax.f32 %v1090_v62, 0.0 }
 0x252   : > { %v12184_v1 = vmax.f32 %v1085_v0, 0.0  ;;  %v12186_v2 = vpop.f32.mrb[34].mxu1 }
 0x253   : > { %v12190_v11 = vpop.f32.mrb[35].mxu1 }
 0x254   : > { %8676 = vmatprep.mubr.f32.mxu1 %v12184_v1 }
 0x255   : > { %8677 = vmatmul.mubr.f32.gmra.mrb[94].mxu1 %v12188_v8 }
 0x256   : > { %v12194_v13 = vpop.f32.mrb[36].mxu1 }
 0x257   : > { %v12196_v16 = vpop.f32.mrb[37].mxu1 }
 0x25a   : > { %v8562_v18 = vpop.f32.mrb[38].mxu1 }
 0x25b   : > { %v1120_v20 = vadd.f32 %v8562_v18, %v12065_v5  ;;  %v1114_v22 = vpop.f32.mrb[39].mxu1 }
 0x25c   : > { %v1115_v24 = vadd.f32 %v12065_v5, %v1114_v22 }
 0x25d   : > { %v12202_v37 = vmax.f32 %v1120_v20, 0.0  ;;  %v925_v20 = vadd.f32 %v12065_v5, %v12063_v4  ;;  %v1839_v4 = vld [vmem:[#allocation7 + $0x110] sm:$0xff] }
 0x25e   : > { %v12200_v34 = vmax.f32 %v1115_v24, 0.0  ;;  %v8565_v35 = vpop.f32.mrb[40].mxu1 }
 0x25f   : > { %v1130_v38 = vadd.f32 %v8565_v35, %v12065_v5  ;;  %v1124_v44 = vpop.f32.mrb[41].mxu1 }
 0x260   : > { %v1125_v48 = vadd.f32 %v12065_v5, %v1124_v44  ;;  %8679 = vmatprep.mubr.f32.mxu1 %v12200_v34 }
 0x261   : > { %8680 = vmatmul.mubr.f32.gmra.mrb[96].mxu1 %v12202_v37  ;;  %v12210_v52 = vmax.f32 %v1130_v38, 0.0  ;;  %v930_v38 = vadd.f32 %v12061_v3, %v12065_v5  ;;  %v1842_v3 = vld [vmem:[#allocation7 + $0x128] sm:$0xff] }
 0x262   : > { %v12208_v49 = vmax.f32 %v1125_v48, 0.0  ;;  %v8568_v50 = vpop.f32.mrb[42].mxu1 }
 0x263   : > { %v1140_v54 = vadd.f32 %v8568_v50, %v12065_v5  ;;  %v1134_v55 = vpop.f32.mrb[43].mxu1  ;;  %v1283_v50 = vmax.f32 %v925_v20, 0.0 }
 0x264   : > { %v1135_v56 = vadd.f32 %v12065_v5, %v1134_v55  ;;  %8682 = vmatprep.mubr.f32.mxu1 %v12208_v49 }
 0x265   : > { %8683 = vmatmul.mubr.f32.gmra.mrb[98].mxu1 %v12210_v52  ;;  %v12218_v63 = vmax.f32 %v1140_v54, 0.0  ;;  %v1840_v54 = vld [vmem:[#allocation7 + $0x118] sm:$0xff] }
 0x266   : > { %v12216_v59 = vmax.f32 %v1135_v56, 0.0  ;;  %v8571_v62 = vpop.f32.mrb[44].mxu1  ;;  %v1284_v56 = vmax.f32 %v930_v38, 0.0 }
 0x267   : > { %v1150_v0 = vadd.f32 %v8571_v62, %v12065_v5  ;;  %v1144_v18 = vpop.f32.mrb[45].mxu1  ;;  %v9431_v62 = vpack.c.bf16 %v1840_v54, %v1839_v4  ;;  %v1845_v4 = vld [vmem:[#allocation7 + $0x140] sm:$0xff]  ;;  %v1846_v54 = vld [vmem:[#allocation7 + $0x148] sm:$0xff] }
 0x268   : > { %v1145_v22 = vadd.f32 %v12065_v5, %v1144_v18  ;;  %8685 = vmatprep.mubr.f32.mxu1 %v12216_v59 }
 0x269   : > { %8686 = vmatmul.mubr.f32.gmra.mrb[100].mxu1 %v12218_v63  ;;  %v12232_v44 = vmax.f32 %v1150_v0, 0.0 }
 0x26a   : > { %v12226_v24 = vmax.f32 %v1145_v22, 0.0  ;;  %v12228_v35 = vpop.f32.mrb[46].mxu1  ;;  %v1841_v22 = vld [vmem:[#allocation7 + $0x120] sm:$0xff] }
 0x26b   : > { %v12234_v48 = vpop.f32.mrb[47].mxu1  ;;  %v9435_v20 = vpack.c.bf16 %v1842_v3, %v1841_v22  ;;  %v1848_v22 = vld [vmem:[#allocation7 + $0x158] sm:$0xff] }
 0x26c   : > { %8688 = vmatprep.mubr.f32.mxu1 %v12226_v24 }
 0x26d   : > { %8689 = vmatmul.mubr.f32.gmra.mrb[102].mxu1 %v12232_v44 }
 0x26e   : > { %8723 = vmatprep.mubr.f32.mxu1 %v1283_v50  ;;  %v12238_v55 = vpop.f32.mrb[48].mxu1  ;;  %v1843_v50 = vld [vmem:[#allocation7 + $0x130] sm:$0xff] }
 0x26f   : > { %v12240_v18 = vpop.f32.mrb[49].mxu1 }
 0x271   : > { %8724 = vmatmul.mubr.f32.vlgmr.msra.gmra.mrb[72].mxu1 %v1284_v56 }
 0x272   : > { %9430 = vmatpush3.bf16.msra.mxu1 %v12130_v15  ;;  %8726 = vmatprep.mubr.f32.mxu1 %v1285_v12  ;;  %v12245_v0 = vpop.f32.mrb[50].mxu1  ;;  %v9439_v15 = vpack.c.bf16 %v1844_v39, %v1843_v50  ;;  %v12258_v12 = vadd.f32 %v12065_v5, %v12113_v47  ;;  %v9443_v39 = vpack.c.bf16 %v1846_v54, %v1845_v4  ;;  %v1849_v4 = vld [vmem:[#allocation7 + $0x160] sm:$0xff]  ;;  %v1850_v54 = vld [vmem:[#allocation7 + $0x168] sm:$0xff] }
 0x273   : > { %9432 = vmatprep.subr.bf16.mxu1 %v9431_v62  ;;  %v12247_v41 = vpop.f32.mrb[51].mxu1 }
 0x274   : > { %v13102_v47 = vmax.f32 %v12258_v12, 0.0 }
 0x275   : > { %8727 = vmatmul.mubr.f32.gmra.mrb[74].mxu1 %v1286_v14  ;;  %v12266_v14 = vadd.f32 %v12111_v46, %v12065_v5 }
 0x276   : > { %8729 = vmatprep.mubr.f32.mxu1 %v12081_v21  ;;  %9434 = vmatpush3.bf16.msra.mxu1 %v9431_v62  ;;  %v12252_v38 = vpop.f32.mrb[52].mxu1  ;;  %v1847_v62 = vld [vmem:[#allocation7 + $0x150] sm:$0xff] }
 0x277   : > { %9436 = vmatprep.subr.bf16.mxu1 %v9435_v20  ;;  %v12254_v9 = vpop.f32.mrb[53].mxu1  ;;  %v9447_v46 = vpack.c.bf16 %v1848_v22, %v1847_v62 }
 0x279   : > { %8730 = vmatmul.mubr.f32.gmra.mrb[76].mxu1 %v12083_v23 }
 0x27a   : > { %8732 = vmatprep.mubr.f32.mxu1 %v12089_v30  ;;  %9438 = vmatpush3.bf16.msra.mxu1 %v9435_v20  ;;  %v12262_v7 = vpop.f32.mrb[54].mxu1  ;;  %v13103_v20 = vmax.f32 %v12266_v14, 0.0 }
 0x27b   : > { %13119 = vst [vmem:[#allocation22_spill] sm:$0xff] %v12262_v7  ;;  %9440 = vmatprep.subr.bf16.mxu1 %v9439_v15  ;;  %v12268_v56 = vpop.f32.mrb[55].mxu1 }
 0x27c   : > { %13120 = vst [vmem:[#allocation23_spill] sm:$0xff] %v12268_v56  ;;  %v1852_v56 = vld [vmem:[#allocation7 + $0x178] sm:$0xff] }
 0x27d   : > { %8733 = vmatmul.mubr.f32.gmra.mrb[78].mxu1 %v12091_v32 }
 0x27e   : > { %8735 = vmatprep.mubr.f32.mxu1 %v13102_v47  ;;  %9442 = vmatpush3.bf16.msra.mxu1 %v9439_v15  ;;  %v12274_v3 = vpop.f32.mrb[56].mxu1  ;;  %v9451_v15 = vpack.c.bf16 %v1850_v54, %v1849_v4  ;;  %v2111_v4 = vld [vmem:[#allocation7 + $0x188] sm:$0xff] }
 0x27f   : > { %13121 = vst [vmem:[#allocation24_spill] sm:$0xff] %v12274_v3  ;;  %9444 = vmatprep.subr.bf16.mxu1 %v9443_v39  ;;  %v12277_v50 = vpop.f32.mrb[57].mxu1  ;;  %v1851_v3 = vld [vmem:[#allocation7 + $0x170] sm:$0xff] }
 0x280   : > { %v9455_v22 = vpack.c.bf16 %v1852_v56, %v1851_v3 }
 0x281   : > { %8736 = vmatmul.mubr.f32.gmra.mrb[80].mxu1 %v13103_v20 }
 0x282   : > { %8738 = vmatprep.mubr.f32.mxu1 %v12117_v58  ;;  %9446 = vmatpush3.bf16.msra.mxu1 %v9443_v39  ;;  %v12282_v7 = vpop.f32.mrb[58].mxu1  ;;  %v1045_v39 = vadd.f32 %v12065_v5, %v12156_v31 }
 0x283   : > { %13122 = vst [vmem:[#allocation25_spill] sm:$0xff] %v12282_v7  ;;  %9448 = vmatprep.subr.bf16.mxu1 %v9447_v46  ;;  %v12284_v47 = vpop.f32.mrb[59].mxu1  ;;  %v2110_v7 = vld [vmem:[#allocation7 + $0x180] sm:$0xff] }
 0x284   : > { %v12302_v3 = vmax.f32 %v1045_v39, 0.0 }
 0x285   : > { %8739 = vmatmul.mubr.f32.gmra.mrb[82].mxu1 %v12119_v60 }
 0x286   : > { %8741 = vmatprep.mubr.f32.mxu1 %v12125_v6  ;;  %9450 = vmatpush3.bf16.msra.mxu1 %v9447_v46  ;;  %v12288_v62 = vpop.f32.mrb[60].mxu1  ;;  %v1050_v46 = vadd.f32 %v12154_v29, %v12065_v5 }
 0x287   : > { %13123 = vst [vmem:[#allocation26_spill] sm:$0xff] %v12288_v62  ;;  %9452 = vmatprep.subr.bf16.mxu1 %v9451_v15  ;;  %v12290_v20 = vpop.f32.mrb[61].mxu1  ;;  %v9459_v62 = vpack.c.bf16 %v2111_v4, %v2110_v7  ;;  %v1105_v4 = vadd.f32 %v12065_v5, %v12196_v16  ;;  %v2113_v16 = vld [vmem:[#allocation7 + $0x198] sm:$0xff] }
 0x288   : > { %13124 = vst [vmem:[#allocation27_spill] sm:$0xff] %v12290_v20  ;;  %v12308_v20 = vmax.f32 %v1050_v46, 0.0 }
 0x289   : > { %8742 = vmatmul.mubr.f32.gmra.mrb[84].mxu1 %v12127_v10 }
 0x28a   : > { %8744 = vmatprep.mubr.f32.mxu1 %v12135_v17  ;;  %9454 = vmatpush3.bf16.msra.mxu1 %v9451_v15  ;;  %v12296_v54 = vpop.f32.mrb[62].mxu1 }
 0x28b   : > { %13125 = vst [vmem:[#allocation28_spill] sm:$0xff] %v12296_v54  ;;  %9456 = vmatprep.subr.bf16.mxu1 %v9455_v22  ;;  %v12300_v56 = vpop.f32.mrb[63].mxu1  ;;  %v2117_v54 = vld [vmem:[#allocation7 + $0x1b8] sm:$0xff] }
 0x28c   : > { %13126 = vst [vmem:[#allocation29_spill] sm:$0xff] %v12300_v56  ;;  %v13135_v56 = vmax.f32 %v12097_v36, 0.0  ;;  %v2121_v36 = vld [vmem:[#allocation7 + $0x1d8] sm:$0xff] }
 0x28d   : > { %8745 = vmatmul.mubr.f32.gmra.mrb[86].mxu1 %v12137_v19 }
 0x28e   : > { %8747 = vmatprep.mubr.f32.mxu1 %v12302_v3  ;;  %9458 = vmatpush3.bf16.msra.mxu1 %v9455_v22  ;;  %v12306_v31 = vpop.f32.mrb[64].mxu1 }
 0x28f   : > { %13127 = vst [vmem:[#allocation30_spill] sm:$0xff] %v12306_v31  ;;  %9460 = vmatprep.subr.bf16.mxu1 %v9459_v62  ;;  %v12310_v15 = vpop.f32.mrb[65].mxu1  ;;  %v12334_v31 = vmax.f32 %v1105_v4, 0.0  ;;  %v2114_v4 = vld [vmem:[#allocation7 + $0x1a0] sm:$0xff] }
 0x290   : > { %13128 = vst [vmem:[#allocation31_spill] sm:$0xff] %v12310_v15  ;;  %v2116_v15 = vld [vmem:[#allocation7 + $0x1b0] sm:$0xff] }
 0x291   : > { %8748 = vmatmul.mubr.f32.gmra.mrb[88].mxu1 %v12308_v20 }
 0x292   : > { %8750 = vmatprep.mubr.f32.mxu1 %v12160_v43  ;;  %v12314_v29 = vpop.f32.mrb[66].mxu1 }
 0x293   : > { %13129 = vst [vmem:[#allocation32_spill] sm:$0xff] %v12314_v29  ;;  %v12316_v7 = vpop.f32.mrb[67].mxu1  ;;  %v1110_v29 = vadd.f32 %v12194_v13, %v12065_v5  ;;  %v2112_v13 = vld [vmem:[#allocation7 + $0x190] sm:$0xff] }
 0x294   : > { %13130 = vst [vmem:[#allocation33_spill] sm:$0xff] %v12316_v7 }
 0x295   : > { %8751 = vmatmul.mubr.f32.gmra.mrb[90].mxu1 %v12162_v45 }
 0x296   : > { %8753 = vmatprep.mubr.f32.mxu1 %v12168_v51  ;;  %v12320_v22 = vpop.f32.mrb[68].mxu1 }
 0x297   : > { %13131 = vst [vmem:[#allocation34_spill] sm:$0xff] %v12320_v22  ;;  %v12322_v39 = vpop.f32.mrb[69].mxu1  ;;  %v12338_v22 = vmax.f32 %v1110_v29, 0.0  ;;  %v9463_v29 = vpack.c.bf16 %v2113_v16, %v2112_v13  ;;  %v2119_v13 = vld [vmem:[#allocation7 + $0x1c8] sm:$0xff]  ;;  %v2120_v16 = vld [vmem:[#allocation7 + $0x1d0] sm:$0xff] }
 0x298   : > { %13132 = vst [vmem:[#allocation35_spill] sm:$0xff] %v12322_v39  ;;  %v975_v39 = vadd.f32 %v12065_v5, %v12105_v42 }
 0x299   : > { %8754 = vmatmul.mubr.f32.gmra.mrb[92].mxu1 %v12170_v53 }
 0x29a   : > { %8756 = vmatprep.mubr.f32.mxu1 %v12176_v57  ;;  %v12328_v46 = vpop.f32.mrb[70].mxu1 }
 0x29b   : > { %13133 = vst [vmem:[#allocation36_spill] sm:$0xff] %v12328_v46  ;;  %v12332_v7 = vpop.f32.mrb[71].mxu1  ;;  %v2115_v46 = vld [vmem:[#allocation7 + $0x1a8] sm:$0xff] }
 0x29c   : > { %13134 = vst [vmem:[#allocation37_spill] sm:$0xff] %v12332_v7  ;;  %v9467_v7 = vpack.c.bf16 %v2115_v46, %v2114_v4  ;;  %v13136_v46 = vmax.f32 %v12094_v33, 0.0 }
 0x29d   : > { %8757 = vmatmul.mubr.f32.gmra.mrb[94].mxu1 %v12178_v61 }
 0x29e   : > { %8759 = vmatprep.mubr.f32.mxu1 %v12334_v31 }
 0x2a1   : > { %8760 = vmatmul.mubr.f32.gmra.mrb[96].mxu1 %v12338_v22 }
 0x2a2   : > { %8762 = vmatprep.mubr.f32.mxu1 %v12200_v34 }
 0x2a5   : > { %8763 = vmatmul.mubr.f32.gmra.mrb[98].mxu1 %v12202_v37 }
 0x2a6   : > { %8765 = vmatprep.mubr.f32.mxu1 %v12208_v49 }
 0x2a9   : > { %8766 = vmatmul.mubr.f32.gmra.mrb[100].mxu1 %v12210_v52 }
 0x2aa   : > { %8768 = vmatprep.mubr.f32.mxu1 %v12216_v59 }
 0x2ad   : > { %8769 = vmatmul.mubr.f32.gmra.mrb[102].mxu1 %v12218_v63 }
 0x2ae   : > { %8803 = vmatprep.mubr.f32.mxu1 %v12081_v21  ;;  %v980_v21 = vadd.f32 %v12102_v40, %v12065_v5  ;;  %v9479_v40 = vpack.c.bf16 %v2121_v36, %v2120_v16  ;;  %v2385_v36 = vld [vmem:[#allocation7 + $0x210] sm:$0xff] }
 0x2b0   : > { %v1294_v42 = vmax.f32 %v980_v21, 0.0 }
 0x2b1   : > { %8804 = vmatmul.mubr.f32.vlgmr.msra.gmra.mrb[72].mxu1 %v12083_v23  ;;  %v9471_v23 = vpack.c.bf16 %v2117_v54, %v2116_v15  ;;  %v2122_v54 = vld [vmem:[#allocation7 + $0x1e0] sm:$0xff]  ;;  %v12364_v15 = vadd.f32 %v12065_v5, %v12150_v28 }
 0x2b2   : > { %9462 = vmatpush3.bf16.msra.mxu1 %v9459_v62  ;;  %8806 = vmatprep.mubr.f32.mxu1 %v12089_v30  ;;  %v1293_v62 = vmax.f32 %v975_v39, 0.0  ;;  %v2118_v30 = vld [vmem:[#allocation7 + $0x1c0] sm:$0xff]  ;;  %v2125_v39 = vld [vmem:[#allocation7 + $0x1f8] sm:$0xff] }
 0x2b3   : > { %9464 = vmatprep.subr.bf16.mxu1 %v9463_v29  ;;  %v1305_v21 = vmax.f32 %v12364_v15, 0.0  ;;  %v2943_v15 = vld [vmem:[#allocation7 + $0x370] sm:$0xff] }
 0x2b5   : > { %8807 = vmatmul.mubr.f32.gmra.mrb[74].mxu1 %v12091_v32  ;;  %v9475_v32 = vpack.c.bf16 %v2119_v13, %v2118_v30  ;;  %v1100_v13 = vadd.f32 %v12186_v2, %v12065_v5  ;;  %v1160_v2 = vadd.f32 %v12228_v35, %v12065_v5  ;;  %v13138_v35 = vmax.f32 %v12266_v14, 0.0 }
 0x2b6   : > { %8809 = vmatprep.mubr.f32.mxu1 %v13135_v56  ;;  %9466 = vmatpush3.bf16.msra.mxu1 %v9463_v29  ;;  %v2123_v56 = vld [vmem:[#allocation7 + $0x1e8] sm:$0xff]  ;;  %v12370_v29 = vadd.f32 %v12146_v26, %v12065_v5  ;;  %v1095_v26 = vadd.f32 %v12065_v5, %v12190_v11  ;;  %v1155_v11 = vadd.f32 %v12065_v5, %v12234_v48  ;;  %v13137_v48 = vmax.f32 %v12258_v12, 0.0 }
 0x2b7   : > { %9468 = vmatprep.subr.bf16.mxu1 %v9467_v7  ;;  %v9483_v33 = vpack.c.bf16 %v2123_v56, %v2122_v54  ;;  %v12408_v16 = vmax.f32 %v1160_v2, 0.0  ;;  %v2387_v56 = vld [vmem:[#allocation7 + $0x220] sm:$0xff]  ;;  %v2396_v2 = vld [vmem:[#allocation7 + $0x268] sm:$0xff] }
 0x2b8   : > { %v1306_v28 = vmax.f32 %v12370_v29, 0.0 }
 0x2b9   : > { %8810 = vmatmul.mubr.f32.gmra.mrb[76].mxu1 %v13136_v46  ;;  %v12388_v46 = vmax.f32 %v1095_v26, 0.0  ;;  %v2394_v26 = vld [vmem:[#allocation7 + $0x258] sm:$0xff] }
 0x2ba   : > { %8812 = vmatprep.mubr.f32.mxu1 %v1293_v62  ;;  %9470 = vmatpush3.bf16.msra.mxu1 %v9467_v7  ;;  %v2124_v7 = vld [vmem:[#allocation7 + $0x1f0] sm:$0xff]  ;;  %v2384_v62 = vld [vmem:[#allocation7 + $0x208] sm:$0xff] }
 0x2bb   : > { %9472 = vmatprep.subr.bf16.mxu1 %v9471_v23  ;;  %v9487_v4 = vpack.c.bf16 %v2125_v39, %v2124_v7  ;;  %v2389_v39 = vld [vmem:[#allocation7 + $0x230] sm:$0xff] }
 0x2bd   : > { %8813 = vmatmul.mubr.f32.gmra.mrb[78].mxu1 %v1294_v42  ;;  %v12392_v42 = vmax.f32 %v1100_v13, 0.0 }
 0x2be   : > { %8815 = vmatprep.mubr.f32.mxu1 %v12125_v6  ;;  %9474 = vmatpush3.bf16.msra.mxu1 %v9471_v23  ;;  %v2383_v23 = vld [vmem:[#allocation7 + $0x200] sm:$0xff] }
 0x2bf   : > { %9476 = vmatprep.subr.bf16.mxu1 %v9475_v32  ;;  %v9491_v30 = vpack.c.bf16 %v2384_v62, %v2383_v23  ;;  %v2391_v23 = vld [vmem:[#allocation7 + $0x240] sm:$0xff]  ;;  %v2392_v62 = vld [vmem:[#allocation7 + $0x248] sm:$0xff] }
 0x2c0   : > { %v9507_v14 = vpack.c.bf16 %v2392_v62, %v2391_v23  ;;  %v1180_v23 = vadd.f32 %v12245_v0, %v12065_v5 }
 0x2c1   : > { %8816 = vmatmul.mubr.f32.gmra.mrb[80].mxu1 %v12127_v10 }
 0x2c2   : > { %8818 = vmatprep.mubr.f32.mxu1 %v12135_v17  ;;  %9478 = vmatpush3.bf16.msra.mxu1 %v9475_v32  ;;  %v12404_v32 = vmax.f32 %v1155_v11, 0.0  ;;  %v2395_v11 = vld [vmem:[#allocation7 + $0x260] sm:$0xff] }
 0x2c3   : > { %9480 = vmatprep.subr.bf16.mxu1 %v9479_v40 }
 0x2c5   : > { %8819 = vmatmul.mubr.f32.gmra.mrb[82].mxu1 %v12137_v19 }
 0x2c6   : > { %8821 = vmatprep.mubr.f32.mxu1 %v12144_v25  ;;  %9482 = vmatpush3.bf16.msra.mxu1 %v9479_v40  ;;  %v2386_v40 = vld [vmem:[#allocation7 + $0x218] sm:$0xff] }
 0x2c7   : > { %9484 = vmatprep.subr.bf16.mxu1 %v9483_v33  ;;  %v9495_v54 = vpack.c.bf16 %v2386_v40, %v2385_v36  ;;  %v9515_v36 = vpack.c.bf16 %v2396_v2, %v2395_v11  ;;  %v2397_v40 = vld [vmem:[#allocation7 + $0x270] sm:$0xff] }
 0x2c9   : > { %8822 = vmatmul.mubr.f32.gmra.mrb[84].mxu1 %v12148_v27 }
 0x2ca   : > { %8824 = vmatprep.mubr.f32.mxu1 %v1305_v21  ;;  %9486 = vmatpush3.bf16.msra.mxu1 %v9483_v33  ;;  %v2388_v33 = vld [vmem:[#allocation7 + $0x228] sm:$0xff] }
 0x2cb   : > { %9488 = vmatprep.subr.bf16.mxu1 %v9487_v4  ;;  %v9499_v7 = vpack.c.bf16 %v2388_v33, %v2387_v56  ;;  %v2656_v56 = vld [vmem:[#allocation7 + $0x280] sm:$0xff]  ;;  %v2657_v33 = vld [vmem:[#allocation7 + $0x288] sm:$0xff] }
 0x2cd   : > { %8825 = vmatmul.mubr.f32.gmra.mrb[86].mxu1 %v1306_v28 }
 0x2ce   : > { %8827 = vmatprep.mubr.f32.mxu1 %v12168_v51  ;;  %9490 = vmatpush3.bf16.msra.mxu1 %v9487_v4  ;;  %v2390_v4 = vld [vmem:[#allocation7 + $0x238] sm:$0xff] }
 0x2cf   : > { %9492 = vmatprep.subr.bf16.mxu1 %v9491_v30  ;;  %v9503_v12 = vpack.c.bf16 %v2390_v4, %v2389_v39  ;;  %v12442_v39 = vadd.f32 %v12238_v55, %v12065_v5  ;;  %v1185_v55 = vadd.f32 %v12065_v5, %v12254_v9 }
 0x2d1   : > { %8828 = vmatmul.mubr.f32.gmra.mrb[88].mxu1 %v12170_v53 }
 0x2d2   : > { %8830 = vmatprep.mubr.f32.mxu1 %v12176_v57 }
 0x2d5   : > { %8831 = vmatmul.mubr.f32.gmra.mrb[90].mxu1 %v12178_v61 }
 0x2d6   : > { %8833 = vmatprep.mubr.f32.mxu1 %v12184_v1 }
 0x2d9   : > { %8834 = vmatmul.mubr.f32.gmra.mrb[92].mxu1 %v12188_v8 }
 0x2da   : > { %8836 = vmatprep.mubr.f32.mxu1 %v12388_v46 }
 0x2dd   : > { %8837 = vmatmul.mubr.f32.gmra.mrb[94].mxu1 %v12392_v42 }
 0x2de   : > { %8839 = vmatprep.mubr.f32.mxu1 %v12208_v49 }
 0x2e1   : > { %8840 = vmatmul.mubr.f32.gmra.mrb[96].mxu1 %v12210_v52 }
 0x2e2   : > { %8842 = vmatprep.mubr.f32.mxu1 %v12216_v59 }
 0x2e5   : > { %8843 = vmatmul.mubr.f32.gmra.mrb[98].mxu1 %v12218_v63 }
 0x2e6   : > { %8845 = vmatprep.mubr.f32.mxu1 %v12226_v24 }
 0x2e9   : > { %8846 = vmatmul.mubr.f32.gmra.mrb[100].mxu1 %v12232_v44 }
 0x2ea   : > { %8848 = vmatprep.mubr.f32.mxu1 %v12404_v32 }
 0x2ed   : > { %8849 = vmatmul.mubr.f32.gmra.mrb[102].mxu1 %v12408_v16 }
 0x2ee   : > { %8883 = vmatprep.mubr.f32.mxu1 %v13137_v48  ;;  %v2398_v48 = vld [vmem:[#allocation7 + $0x278] sm:$0xff] }
 0x2f1   : > { %8884 = vmatmul.mubr.f32.vlgmr.msra.gmra.mrb[72].mxu1 %v13138_v35  ;;  %v9523_v35 = vpack.c.bf16 %v2657_v33, %v2656_v56  ;;  %v2661_v56 = vld [vmem:[#allocation7 + $0x2a8] sm:$0xff]  ;;  %v2662_v33 = vld [vmem:[#allocation7 + $0x2b0] sm:$0xff] }
 0x2f2   : > { %9494 = vmatpush3.bf16.msra.mxu1 %v9491_v30  ;;  %8886 = vmatprep.mubr.f32.mxu1 %v12117_v58  ;;  %v2393_v30 = vld [vmem:[#allocation7 + $0x250] sm:$0xff] }
 0x2f3   : > { %9496 = vmatprep.subr.bf16.mxu1 %v9495_v54  ;;  %v9511_v13 = vpack.c.bf16 %v2394_v26, %v2393_v30  ;;  %v12464_v30 = vmax.f32 %v1185_v55, 0.0  ;;  %v13139_v26 = vld [vmem:[#allocation23_spill] sm:$0xff]  ;;  %v2665_v55 = vld [vmem:[#allocation7 + $0x2c8] sm:$0xff] }
 0x2f4   : > { %v1195_v0 = vadd.f32 %v12065_v5, %v13139_v26 }
 0x2f5   : > { %8887 = vmatmul.mubr.f32.gmra.mrb[74].mxu1 %v12119_v60 }
 0x2f6   : > { %8889 = vmatprep.mubr.f32.mxu1 %v12125_v6  ;;  %9498 = vmatpush3.bf16.msra.mxu1 %v9495_v54  ;;  %v9519_v54 = vpack.c.bf16 %v2398_v48, %v2397_v40  ;;  %v12474_v2 = vmax.f32 %v1195_v0, 0.0  ;;  %v2659_v40 = vld [vmem:[#allocation7 + $0x298] sm:$0xff]  ;;  %v2668_v0 = vld [vmem:[#allocation7 + $0x2e0] sm:$0xff] }
 0x2f7   : > { %9500 = vmatprep.subr.bf16.mxu1 %v9499_v7 }
 0x2f9   : > { %8890 = vmatmul.mubr.f32.gmra.mrb[76].mxu1 %v12127_v10 }
 0x2fa   : > { %8892 = vmatprep.mubr.f32.mxu1 %v12135_v17  ;;  %9502 = vmatpush3.bf16.msra.mxu1 %v9499_v7  ;;  %v12436_v7 = vadd.f32 %v12065_v5, %v12240_v18  ;;  %v1332_v18 = vmax.f32 %v12442_v39, 0.0 }
 0x2fb   : > { %9504 = vmatprep.subr.bf16.mxu1 %v9503_v12 }
 0x2fc   : > { %v1331_v4 = vmax.f32 %v12436_v7, 0.0  ;;  %v13144_v7 = vld [vmem:[#allocation26_spill] sm:$0xff] }
 0x2fd   : > { %8893 = vmatmul.mubr.f32.gmra.mrb[78].mxu1 %v12137_v19 }
 0x2fe   : > { %8895 = vmatprep.mubr.f32.mxu1 %v12302_v3  ;;  %9506 = vmatpush3.bf16.msra.mxu1 %v9503_v12  ;;  %v1175_v12 = vadd.f32 %v12065_v5, %v12247_v41  ;;  %v12460_v41 = vmax.f32 %v1180_v23, 0.0 }
 0x2ff   : > { %9508 = vmatprep.subr.bf16.mxu1 %v9507_v14 }
 0x300   : > { %v12453_v62 = vmax.f32 %v1175_v12, 0.0  ;;  %v2663_v12 = vld [vmem:[#allocation7 + $0x2b8] sm:$0xff] }
 0x301   : > { %8896 = vmatmul.mubr.f32.gmra.mrb[80].mxu1 %v12308_v20  ;;  %v9535_v23 = vpack.c.bf16 %v2663_v12, %v2662_v33  ;;  %v12508_v33 = vld [vmem:[#allocation5] ss:$0 sm:$0xff] }
 0x302   : > { %8898 = vmatprep.mubr.f32.mxu1 %v12160_v43  ;;  %9510 = vmatpush3.bf16.msra.mxu1 %v9507_v14  ;;  %v1190_v14 = vadd.f32 %v12252_v38, %v12065_v5  ;;  %v1205_v12 = vadd.f32 %v12508_v33, %v12277_v50 }
 0x303   : > { %9512 = vmatprep.subr.bf16.mxu1 %v9511_v13 }
 0x304   : > { %v12470_v9 = vmax.f32 %v1190_v14, 0.0  ;;  %v2667_v14 = vld [vmem:[#allocation7 + $0x2d8] sm:$0xff] }
 0x305   : > { %8899 = vmatmul.mubr.f32.gmra.mrb[82].mxu1 %v12162_v45 }
 0x306   : > { %8901 = vmatprep.mubr.f32.mxu1 %v12168_v51  ;;  %9514 = vmatpush3.bf16.msra.mxu1 %v9511_v13  ;;  %v13140_v13 = vld [vmem:[#allocation22_spill] sm:$0xff] }
 0x307   : > { %9516 = vmatprep.subr.bf16.mxu1 %v9515_v36  ;;  %v1200_v11 = vadd.f32 %v13140_v13, %v12065_v5  ;;  %v2669_v13 = vld [vmem:[#allocation7 + $0x2e8] sm:$0xff] }
 0x309   : > { %8902 = vmatmul.mubr.f32.gmra.mrb[84].mxu1 %v12170_v53  ;;  %v12478_v38 = vmax.f32 %v1200_v11, 0.0  ;;  %v9547_v11 = vpack.c.bf16 %v2669_v13, %v2668_v0  ;;  %v2934_v0 = vld [vmem:[#allocation7 + $0x328] sm:$0xff] }
 0x30a   : > { %8904 = vmatprep.mubr.f32.mxu1 %v12176_v57  ;;  %9518 = vmatpush3.bf16.msra.mxu1 %v9515_v36  ;;  %v2658_v36 = vld [vmem:[#allocation7 + $0x290] sm:$0xff] }
 0x30b   : > { %9520 = vmatprep.subr.bf16.mxu1 %v9519_v54  ;;  %v9527_v48 = vpack.c.bf16 %v2659_v40, %v2658_v36  ;;  %v2670_v36 = vld [vmem:[#allocation7 + $0x2f0] sm:$0xff]  ;;  %v2671_v40 = vld [vmem:[#allocation7 + $0x2f8] sm:$0xff] }
 0x30d   : > { %8905 = vmatmul.mubr.f32.gmra.mrb[86].mxu1 %v12178_v61 }
 0x30e   : > { %8907 = vmatprep.mubr.f32.mxu1 %v12334_v31  ;;  %9522 = vmatpush3.bf16.msra.mxu1 %v9519_v54  ;;  %v2660_v54 = vld [vmem:[#allocation7 + $0x2a0] sm:$0xff] }
 0x30f   : > { %9524 = vmatprep.subr.bf16.mxu1 %v9523_v35  ;;  %v9531_v5 = vpack.c.bf16 %v2661_v56, %v2660_v54  ;;  %v2929_v54 = vld [vmem:[#allocation7 + $0x300] sm:$0xff]  ;;  %v2930_v56 = vld [vmem:[#allocation7 + $0x308] sm:$0xff] }
 0x311   : > { %8908 = vmatmul.mubr.f32.gmra.mrb[88].mxu1 %v12338_v22 }
 0x312   : > { %8910 = vmatprep.mubr.f32.mxu1 %v12200_v34 }
 0x315   : > { %8911 = vmatmul.mubr.f32.gmra.mrb[90].mxu1 %v12202_v37 }
 0x316   : > { %8913 = vmatprep.mubr.f32.mxu1 %v12208_v49 }
 0x319   : > { %8914 = vmatmul.mubr.f32.gmra.mrb[92].mxu1 %v12210_v52 }
 0x31a   : > { %8916 = vmatprep.mubr.f32.mxu1 %v12216_v59 }
 0x31d   : > { %8917 = vmatmul.mubr.f32.gmra.mrb[94].mxu1 %v12218_v63 }
 0x31e   : > { %8919 = vmatprep.mubr.f32.mxu1 %v1331_v4 }
 0x321   : > { %8920 = vmatmul.mubr.f32.gmra.mrb[96].mxu1 %v1332_v18 }
 0x322   : > { %8922 = vmatprep.mubr.f32.mxu1 %v12453_v62 }
 0x325   : > { %8923 = vmatmul.mubr.f32.gmra.mrb[98].mxu1 %v12460_v41 }
 0x326   : > { %8925 = vmatprep.mubr.f32.mxu1 %v12464_v30 }
 0x329   : > { %8926 = vmatmul.mubr.f32.gmra.mrb[100].mxu1 %v12470_v9 }
 0x32a   : > { %8928 = vmatprep.mubr.f32.mxu1 %v12474_v2 }
 0x32d   : > { %8929 = vmatmul.mubr.f32.gmra.mrb[102].mxu1 %v12478_v38 }
 0x32e   : > { %8963 = vmatprep.mubr.f32.mxu1 %v12117_v58  ;;  %v2664_v58 = vld [vmem:[#allocation7 + $0x2c0] sm:$0xff] }
 0x331   : > { %8964 = vmatmul.mubr.f32.vlgmr.msra.gmra.mrb[72].mxu1 %v12119_v60  ;;  %v9539_v60 = vpack.c.bf16 %v2665_v55, %v2664_v58  ;;  %v12516_v55 = vmax.f32 %v1205_v12, 0.0 }
 0x332   : > { %9526 = vmatpush3.bf16.msra.mxu1 %v9523_v35  ;;  %8966 = vmatprep.mubr.f32.mxu1 %v12125_v6  ;;  %v2666_v35 = vld [vmem:[#allocation7 + $0x2d0] sm:$0xff] }
 0x333   : > { %9528 = vmatprep.subr.bf16.mxu1 %v9527_v48  ;;  %v9543_v26 = vpack.c.bf16 %v2667_v14, %v2666_v35  ;;  %v2931_v35 = vld [vmem:[#allocation7 + $0x310] sm:$0xff]  ;;  %v2932_v14 = vld [vmem:[#allocation7 + $0x318] sm:$0xff] }
 0x334   : > { %v9559_v50 = vpack.c.bf16 %v2932_v14, %v2931_v35 }
 0x335   : > { %8967 = vmatmul.mubr.f32.gmra.mrb[74].mxu1 %v12127_v10 }
 0x336   : > { %8969 = vmatprep.mubr.f32.mxu1 %v12135_v17  ;;  %9530 = vmatpush3.bf16.msra.mxu1 %v9527_v48  ;;  %v9551_v48 = vpack.c.bf16 %v2671_v40, %v2670_v36  ;;  %v2936_v36 = vld [vmem:[#allocation7 + $0x338] sm:$0xff] }
 0x337   : > { %9532 = vmatprep.subr.bf16.mxu1 %v9531_v5 }
 0x339   : > { %8970 = vmatmul.mubr.f32.gmra.mrb[76].mxu1 %v12137_v19 }
 0x33a   : > { %8972 = vmatprep.mubr.f32.mxu1 %v12144_v25  ;;  %9534 = vmatpush3.bf16.msra.mxu1 %v9531_v5  ;;  %v9555_v5 = vpack.c.bf16 %v2930_v56, %v2929_v54  ;;  %v2940_v54 = vld [vmem:[#allocation7 + $0x358] sm:$0xff]  ;;  %v2942_v56 = vld [vmem:[#allocation7 + $0x368] sm:$0xff] }
 0x33b   : > { %9536 = vmatprep.subr.bf16.mxu1 %v9535_v23 }
 0x33d   : > { %8973 = vmatmul.mubr.f32.gmra.mrb[78].mxu1 %v12148_v27 }
 0x33e   : > { %8975 = vmatprep.mubr.f32.mxu1 %v12160_v43  ;;  %9538 = vmatpush3.bf16.msra.mxu1 %v9535_v23  ;;  %v13141_v23 = vld [vmem:[#allocation24_spill] sm:$0xff] }
 0x33f   : > { %9540 = vmatprep.subr.bf16.mxu1 %v9539_v60  ;;  %v1210_v58 = vadd.f32 %v12508_v33, %v13141_v23  ;;  %v12554_v23 = vadd.f32 %v12508_v33, %v12284_v47  ;;  %v3205_v47 = vld [vmem:[#allocation7 + $0x398] sm:$0xff] }
 0x341   : > { %8976 = vmatmul.mubr.f32.gmra.mrb[80].mxu1 %v12162_v45  ;;  %v1341_v14 = vmax.f32 %v12554_v23, 0.0  ;;  %v4295_v23 = vld [vmem:[#allocation10 + $0x540] sm:$0xff] }
 0x342   : > { %8978 = vmatprep.mubr.f32.mxu1 %v12168_v51  ;;  %9542 = vmatpush3.bf16.msra.mxu1 %v9539_v60  ;;  %v12520_v60 = vmax.f32 %v1210_v58, 0.0  ;;  %v13142_v58 = vld [vmem:[#allocation25_spill] sm:$0xff] }
 0x343   : > { %9544 = vmatprep.subr.bf16.mxu1 %v9543_v26  ;;  %v12560_v35 = vadd.f32 %v12508_v33, %v13142_v58 }
 0x345   : > { %8979 = vmatmul.mubr.f32.gmra.mrb[82].mxu1 %v12170_v53 }
 0x346   : > { %8981 = vmatprep.mubr.f32.mxu1 %v12176_v57  ;;  %9546 = vmatpush3.bf16.msra.mxu1 %v9543_v26  ;;  %v2933_v26 = vld [vmem:[#allocation7 + $0x320] sm:$0xff] }
 0x347   : > { %9548 = vmatprep.subr.bf16.mxu1 %v9547_v11  ;;  %v9563_v13 = vpack.c.bf16 %v2934_v0, %v2933_v26  ;;  %v3204_v26 = vld [vmem:[#allocation7 + $0x390] sm:$0xff] }
 0x348   : > { %v9591_v0 = vpack.c.bf16 %v3205_v47, %v3204_v26  ;;  %v13145_v26 = vld [vmem:[#allocation29_spill] sm:$0xff]  ;;  %v13146_v47 = vld [vmem:[#allocation28_spill] sm:$0xff] }
 0x349   : > { %8982 = vmatmul.mubr.f32.gmra.mrb[84].mxu1 %v12178_v61  ;;  %v12600_v39 = vadd.f32 %v12508_v33, %v13145_v26  ;;  %v4264_v26 = vld [vmem:[#allocation10 + $0x448] sm:$0xff] }
 0x34a   : > { %8984 = vmatprep.mubr.f32.mxu1 %v12184_v1  ;;  %9550 = vmatpush3.bf16.msra.mxu1 %v9547_v11  ;;  %v2935_v11 = vld [vmem:[#allocation7 + $0x330] sm:$0xff] }
 0x34b   : > { %9552 = vmatprep.subr.bf16.mxu1 %v9551_v48  ;;  %v9567_v40 = vpack.c.bf16 %v2936_v36, %v2935_v11  ;;  %v3207_v11 = vld [vmem:[#allocation7 + $0x3a8] sm:$0xff] }
 0x34d   : > { %8985 = vmatmul.mubr.f32.gmra.mrb[86].mxu1 %v12188_v8 }
 0x34e   : > { %8987 = vmatprep.mubr.f32.mxu1 %v12200_v34  ;;  %9554 = vmatpush3.bf16.msra.mxu1 %v9551_v48  ;;  %v2938_v48 = vld [vmem:[#allocation7 + $0x348] sm:$0xff] }
 0x34f   : > { %9556 = vmatprep.subr.bf16.mxu1 %v9555_v5 }
 0x351   : > { %8988 = vmatmul.mubr.f32.gmra.mrb[88].mxu1 %v12202_v37 }
 0x352   : > { %8990 = vmatprep.mubr.f32.mxu1 %v12208_v49 }
 0x355   : > { %8991 = vmatmul.mubr.f32.gmra.mrb[90].mxu1 %v12210_v52 }
 0x356   : > { %8993 = vmatprep.mubr.f32.mxu1 %v12216_v59 }
 0x359   : > { %8994 = vmatmul.mubr.f32.gmra.mrb[92].mxu1 %v12218_v63 }
 0x35a   : > { %8996 = vmatprep.mubr.f32.mxu1 %v12226_v24 }
 0x35d   : > { %8997 = vmatmul.mubr.f32.gmra.mrb[94].mxu1 %v12232_v44 }
 0x35e   : > { %8999 = vmatprep.mubr.f32.mxu1 %v12453_v62 }
 0x361   : > { %9000 = vmatmul.mubr.f32.gmra.mrb[96].mxu1 %v12460_v41 }
 0x362   : > { %9002 = vmatprep.mubr.f32.mxu1 %v12464_v30 }
 0x365   : > { %9003 = vmatmul.mubr.f32.gmra.mrb[98].mxu1 %v12470_v9 }
 0x366   : > { %9005 = vmatprep.mubr.f32.mxu1 %v12474_v2 }
 0x369   : > { %9006 = vmatmul.mubr.f32.gmra.mrb[100].mxu1 %v12478_v38 }
 0x36a   : > { %9008 = vmatprep.mubr.f32.mxu1 %v12516_v55 }
 0x36d   : > { %9009 = vmatmul.mubr.f32.gmra.mrb[102].mxu1 %v12520_v60 }
 0x36e   : > { %9043 = vmatprep.mubr.f32.mxu1 %v12125_v6  ;;  %v2937_v6 = vld [vmem:[#allocation7 + $0x340] sm:$0xff] }
 0x371   : > { %9044 = vmatmul.mubr.f32.vlgmr.msra.gmra.mrb[72].mxu1 %v12127_v10  ;;  %v9571_v10 = vpack.c.bf16 %v2938_v48, %v2937_v6  ;;  %v3209_v6 = vld [vmem:[#allocation7 + $0x3b8] sm:$0xff] }
 0x372   : > { %9558 = vmatpush3.bf16.msra.mxu1 %v9555_v5  ;;  %9046 = vmatprep.mubr.f32.mxu1 %v12135_v17  ;;  %v2939_v17 = vld [vmem:[#allocation7 + $0x350] sm:$0xff]  ;;  %v3203_v5 = vld [vmem:[#allocation7 + $0x388] sm:$0xff] }
 0x373   : > { %9560 = vmatprep.subr.bf16.mxu1 %v9559_v50 }
 0x375   : > { %9047 = vmatmul.mubr.f32.gmra.mrb[74].mxu1 %v12137_v19  ;;  %v9575_v19 = vpack.c.bf16 %v2940_v54, %v2939_v17  ;;  %v3212_v17 = vld [vmem:[#allocation7 + $0x3d0] sm:$0xff]  ;;  %v3213_v54 = vld [vmem:[#allocation7 + $0x3d8] sm:$0xff] }
 0x376   : > { %9049 = vmatprep.mubr.f32.mxu1 %v12144_v25  ;;  %9562 = vmatpush3.bf16.msra.mxu1 %v9559_v50  ;;  %v2941_v25 = vld [vmem:[#allocation7 + $0x360] sm:$0xff]  ;;  %v1342_v50 = vmax.f32 %v12560_v35, 0.0 }
 0x377   : > { %9564 = vmatprep.subr.bf16.mxu1 %v9563_v13  ;;  %v4299_v35 = vld [vmem:[#allocation10 + $0x560] sm:$0xff] }
 0x379   : > { %9050 = vmatmul.mubr.f32.gmra.mrb[76].mxu1 %v12148_v27  ;;  %v9579_v27 = vpack.c.bf16 %v2942_v56, %v2941_v25  ;;  %v3214_v25 = vld [vmem:[#allocation7 + $0x3e0] sm:$0xff]  ;;  %v3215_v56 = vld [vmem:[#allocation7 + $0x3e8] sm:$0xff] }
 0x37a   : > { %9052 = vmatprep.mubr.f32.mxu1 %v1305_v21  ;;  %9566 = vmatpush3.bf16.msra.mxu1 %v9563_v13  ;;  %v2944_v21 = vld [vmem:[#allocation7 + $0x378] sm:$0xff]  ;;  %v3206_v13 = vld [vmem:[#allocation7 + $0x3a0] sm:$0xff] }
 0x37b   : > { %9568 = vmatprep.subr.bf16.mxu1 %v9567_v40  ;;  %v9583_v29 = vpack.c.bf16 %v2944_v21, %v2943_v15  ;;  %v9595_v36 = vpack.c.bf16 %v3207_v11, %v3206_v13  ;;  %v3216_v15 = vld [vmem:[#allocation7 + $0x3f0] sm:$0xff]  ;;  %v3217_v21 = vld [vmem:[#allocation7 + $0x3f8] sm:$0xff]  ;;  %v1345_v13 = vmax.f32 %v12600_v39, 0.0 }
 0x37c   : > { %v13147_v11 = vld [vmem:[#allocation31_spill] sm:$0xff] }
 0x37d   : > { %9053 = vmatmul.mubr.f32.gmra.mrb[78].mxu1 %v1306_v28  ;;  %v3202_v28 = vld [vmem:[#allocation7 + $0x380] sm:$0xff] }
 0x37e   : > { %9055 = vmatprep.mubr.f32.mxu1 %v12168_v51  ;;  %9570 = vmatpush3.bf16.msra.mxu1 %v9567_v40  ;;  %v9587_v12 = vpack.c.bf16 %v3203_v5, %v3202_v28  ;;  %v3208_v40 = vld [vmem:[#allocation7 + $0x3b0] sm:$0xff]  ;;  %v3476_v28 = vld [vmem:[#allocation7 + $0x408] sm:$0xff] }
 0x37f   : > { %9572 = vmatprep.subr.bf16.mxu1 %v9571_v10  ;;  %v9599_v48 = vpack.c.bf16 %v3209_v6, %v3208_v40  ;;  %v13143_v5 = vld [vmem:[#allocation27_spill] sm:$0xff]  ;;  %v13148_v6 = vld [vmem:[#allocation30_spill] sm:$0xff] }
 0x381   : > { %9056 = vmatmul.mubr.f32.gmra.mrb[80].mxu1 %v12170_v53 }
 0x382   : > { %9058 = vmatprep.mubr.f32.mxu1 %v12176_v57  ;;  %9574 = vmatpush3.bf16.msra.mxu1 %v9571_v10  ;;  %v3211_v10 = vld [vmem:[#allocation7 + $0x3c8] sm:$0xff] }
 0x383   : > { %9576 = vmatprep.subr.bf16.mxu1 %v9575_v19 }
 0x385   : > { %9059 = vmatmul.mubr.f32.gmra.mrb[82].mxu1 %v12178_v61 }
 0x386   : > { %9061 = vmatprep.mubr.f32.mxu1 %v12184_v1  ;;  %9578 = vmatpush3.bf16.msra.mxu1 %v9575_v19  ;;  %v9607_v19 = vpack.c.bf16 %v3213_v54, %v3212_v17  ;;  %v13150_v54 = vld [vmem:[#allocation32_spill] sm:$0xff] }
 0x387   : > { %9580 = vmatprep.subr.bf16.mxu1 %v9579_v27 }
 0x389   : > { %9062 = vmatmul.mubr.f32.gmra.mrb[84].mxu1 %v12188_v8 }
 0x38a   : > { %9064 = vmatprep.mubr.f32.mxu1 %v12388_v46  ;;  %9582 = vmatpush3.bf16.msra.mxu1 %v9579_v27  ;;  %v9611_v27 = vpack.c.bf16 %v3215_v56, %v3214_v25 }
 0x38b   : > { %9584 = vmatprep.subr.bf16.mxu1 %v9583_v29 }
 0x38d   : > { %9065 = vmatmul.mubr.f32.gmra.mrb[86].mxu1 %v12392_v42 }
 0x38e   : > { %9067 = vmatprep.mubr.f32.mxu1 %v12208_v49  ;;  %9586 = vmatpush3.bf16.msra.mxu1 %v9583_v29  ;;  %v3475_v29 = vld [vmem:[#allocation7 + $0x400] sm:$0xff] }
 0x38f   : > { %9588 = vmatprep.subr.bf16.mxu1 %v9587_v12 }
 0x391   : > { %9068 = vmatmul.mubr.f32.gmra.mrb[88].mxu1 %v12210_v52 }
 0x392   : > { %9070 = vmatprep.mubr.f32.mxu1 %v12216_v59 }
 0x395   : > { %9071 = vmatmul.mubr.f32.gmra.mrb[90].mxu1 %v12218_v63 }
 0x396   : > { %9073 = vmatprep.mubr.f32.mxu1 %v12226_v24 }
 0x399   : > { %9074 = vmatmul.mubr.f32.gmra.mrb[92].mxu1 %v12232_v44 }
 0x39a   : > { %9076 = vmatprep.mubr.f32.mxu1 %v12404_v32 }
 0x39d   : > { %9077 = vmatmul.mubr.f32.gmra.mrb[94].mxu1 %v12408_v16 }
 0x39e   : > { %9079 = vmatprep.mubr.f32.mxu1 %v12464_v30 }
 0x3a1   : > { %9080 = vmatmul.mubr.f32.gmra.mrb[96].mxu1 %v12470_v9 }
 0x3a2   : > { %9082 = vmatprep.mubr.f32.mxu1 %v12474_v2 }
 0x3a5   : > { %9083 = vmatmul.mubr.f32.gmra.mrb[98].mxu1 %v12478_v38 }
 0x3a6   : > { %9085 = vmatprep.mubr.f32.mxu1 %v12516_v55 }
 0x3a9   : > { %9086 = vmatmul.mubr.f32.gmra.mrb[100].mxu1 %v12520_v60 }
 0x3aa   : > { %9088 = vmatprep.mubr.f32.mxu1 %v1341_v14 }
 0x3ad   : > { %9089 = vmatmul.mubr.f32.gmra.mrb[102].mxu1 %v1342_v50 }
 0x3ae   : > { %9123 = vmatprep.mubr.f32.mxu1 %v12302_v3  ;;  %v3210_v3 = vld [vmem:[#allocation7 + $0x3c0] sm:$0xff] }
 0x3b1   : > { %9124 = vmatmul.mubr.f32.vlgmr.msra.gmra.mrb[72].mxu1 %v12308_v20  ;;  %v9603_v20 = vpack.c.bf16 %v3211_v10, %v3210_v3  ;;  %v13149_v10 = vld [vmem:[#allocation33_spill] sm:$0xff] }
 0x3b2   : > { %9590 = vmatpush3.bf16.msra.mxu1 %v9587_v12  ;;  %9126 = vmatprep.mubr.f32.mxu1 %v12160_v43  ;;  %v1225_v12 = vadd.f32 %v12508_v33, %v13143_v5  ;;  %v3480_v5 = vld [vmem:[#allocation7 + $0x428] sm:$0xff] }
 0x3b3   : > { %9592 = vmatprep.subr.bf16.mxu1 %v9591_v0 }
 0x3b4   : > { %v1343_v58 = vmax.f32 %v1225_v12, 0.0 }
 0x3b5   : > { %9127 = vmatmul.mubr.f32.gmra.mrb[74].mxu1 %v12162_v45 }
 0x3b6   : > { %9129 = vmatprep.mubr.f32.mxu1 %v12168_v51  ;;  %9594 = vmatpush3.bf16.msra.mxu1 %v9591_v0  ;;  %v12605_v0 = vadd.f32 %v12508_v33, %v13146_v47 }
 0x3b7   : > { %9596 = vmatprep.subr.bf16.mxu1 %v9595_v36 }
 0x3b8   : > { %v1346_v40 = vmax.f32 %v12605_v0, 0.0 }
 0x3b9   : > { %9130 = vmatmul.mubr.f32.gmra.mrb[76].mxu1 %v12170_v53 }
 0x3ba   : > { %9132 = vmatprep.mubr.f32.mxu1 %v12176_v57  ;;  %9598 = vmatpush3.bf16.msra.mxu1 %v9595_v36  ;;  %v1245_v36 = vadd.f32 %v12508_v33, %v13147_v11  ;;  %v3481_v11 = vld [vmem:[#allocation7 + $0x430] sm:$0xff] }
 0x3bb   : > { %9600 = vmatprep.subr.bf16.mxu1 %v9599_v48 }
 0x3bc   : > { %v12615_v3 = vmax.f32 %v1245_v36, 0.0  ;;  %v4263_v36 = vld [vmem:[#allocation10 + $0x440] sm:$0xff] }
 0x3bd   : > { %9133 = vmatmul.mubr.f32.gmra.mrb[78].mxu1 %v12178_v61 }
 0x3be   : > { %9135 = vmatprep.mubr.f32.mxu1 %v12334_v31  ;;  %9602 = vmatpush3.bf16.msra.mxu1 %v9599_v48  ;;  %v9615_v31 = vpack.c.bf16 %v3217_v21, %v3216_v15  ;;  %v1250_v48 = vadd.f32 %v12508_v33, %v13148_v6  ;;  %v3478_v15 = vld [vmem:[#allocation7 + $0x418] sm:$0xff]  ;;  %v4267_v6 = vld [vmem:[#allocation10 + $0x460] sm:$0xff] }
 0x3bf   : > { %9604 = vmatprep.subr.bf16.mxu1 %v9603_v20 }
 0x3c0   : > { %v12622_v17 = vmax.f32 %v1250_v48, 0.0  ;;  %v3482_v48 = vld [vmem:[#allocation7 + $0x438] sm:$0xff] }
 0x3c1   : > { %9136 = vmatmul.mubr.f32.gmra.mrb[80].mxu1 %v12338_v22  ;;  %v9619_v22 = vpack.c.bf16 %v3476_v28, %v3475_v29  ;;  %v4256_v29 = vld [vmem:[#allocation10 + $0x408] sm:$0xff] }
 0x3c2   : > { %9138 = vmatprep.mubr.f32.mxu1 %v12200_v34  ;;  %9606 = vmatpush3.bf16.msra.mxu1 %v9603_v20  ;;  %v1255_v20 = vadd.f32 %v12508_v33, %v13149_v10  ;;  %v4260_v28 = vld [vmem:[#allocation10 + $0x428] sm:$0xff]  ;;  %v9785_v10 = vpack.c.bf16 %v4267_v6, %v4263_v36  ;;  %v4287_v6 = vld [vmem:[#allocation10 + $0x500] sm:$0xff] }
 0x3c3   : > { %9608 = vmatprep.subr.bf16.mxu1 %v9607_v19  ;;  %v9779_v12 = vpack.c.bf16 %v4260_v28, %v4256_v29  ;;  %v3483_v29 = vld [vmem:[#allocation7 + $0x440] sm:$0xff]  ;;  %v3484_v28 = vld [vmem:[#allocation7 + $0x448] sm:$0xff] }
 0x3c4   : > { %v12626_v25 = vmax.f32 %v1255_v20, 0.0  ;;  %v4272_v20 = vld [vmem:[#allocation10 + $0x488] sm:$0xff] }
 0x3c5   : > { %9139 = vmatmul.mubr.f32.gmra.mrb[82].mxu1 %v12202_v37  ;;  %9780 = vmatprep.subr.bf16.mxu0 %v9779_v12 }
 0x3c6   : > { %9141 = vmatprep.mubr.f32.mxu1 %v12208_v49  ;;  %9610 = vmatpush3.bf16.msra.mxu1 %v9607_v19  ;;  %v1260_v19 = vadd.f32 %v12508_v33, %v13150_v54  ;;  %v4276_v54 = vld [vmem:[#allocation10 + $0x4a8] sm:$0xff] }
 0x3c7   : > { %9612 = vmatprep.subr.bf16.mxu1 %v9611_v27 }
 0x3c8   : > { %v12630_v56 = vmax.f32 %v1260_v19, 0.0  ;;  %v4275_v19 = vld [vmem:[#allocation10 + $0x4a0] sm:$0xff] }
 0x3c9   : > { %9142 = vmatmul.mubr.f32.gmra.mrb[84].mxu1 %v12210_v52 }
 0x3ca   : > { %9144 = vmatprep.mubr.f32.mxu1 %v12216_v59  ;;  %9614 = vmatpush3.bf16.msra.mxu1 %v9611_v27  ;;  %v3477_v27 = vld [vmem:[#allocation7 + $0x410] sm:$0xff] }
 0x3cb   : > { %9616 = vmatprep.subr.bf16.mxu1 %v9615_v31  ;;  %v9623_v21 = vpack.c.bf16 %v3478_v15, %v3477_v27  ;;  %v9631_v27 = vpack.c.bf16 %v3482_v48, %v3481_v11  ;;  %v4280_v15 = vld [vmem:[#allocation10 + $0x4c8] sm:$0xff]  ;;  %v3486_v11 = vld [vmem:[#allocation7 + $0x458] sm:$0xff]  ;;  %v4291_v48 = vld [vmem:[#allocation10 + $0x520] sm:$0xff] }
 0x3cd   : > { %9145 = vmatmul.mubr.f32.gmra.mrb[86].mxu1 %v12218_v63 }
 0x3ce   : > { %9147 = vmatprep.mubr.f32.mxu1 %v1331_v4  ;;  %9618 = vmatpush3.bf16.msra.mxu1 %v9615_v31  ;;  %v1230_v4 = vadd.f32 %v12508_v33, %v13144_v7  ;;  %v3479_v31 = vld [vmem:[#allocation7 + $0x420] sm:$0xff] }
 0x3cf   : > { %9620 = vmatprep.subr.bf16.mxu1 %v9619_v22  ;;  %v4255_v7 = vld [vmem:[#allocation10 + $0x400] sm:$0xff]  ;;  %v9627_v47 = vpack.c.bf16 %v3480_v5, %v3479_v31  ;;  %v4284_v31 = vld [vmem:[#allocation10 + $0x4e8] sm:$0xff] }
 0x3d0   : > { %v9791_v12 = vpack.c.bf16 %v4284_v31, %v4280_v15  ;;  %v3888_v15 = vld [vmem:[#allocation10 + $0x228] sm:$0xff] }
 0x3d1   : > { %9148 = vmatmul.mubr.f32.gmra.mrb[88].mxu1 %v1332_v18  ;;  %v1344_v18 = vmax.f32 %v1230_v4, 0.0  ;;  %v4259_v4 = vld [vmem:[#allocation10 + $0x420] sm:$0xff] }
 0x3d2   : > { %9150 = vmatprep.mubr.f32.mxu1 %v12453_v62  ;;  %v13152_v31 = vld [vmem:[#allocation34_spill] sm:$0xff] }
 0x3d5   : > { %9151 = vmatmul.mubr.f32.gmra.mrb[90].mxu1 %v12460_v41 }
 0x3d6   : > { %9153 = vmatprep.mubr.f32.mxu1 %v12464_v30 }
 0x3d9   : > { %9154 = vmatmul.mubr.f32.gmra.mrb[92].mxu1 %v12470_v9 }
 0x3da   : > { %9156 = vmatprep.mubr.f32.mxu1 %v12474_v2 }
 0x3dd   : > { %9157 = vmatmul.mubr.f32.gmra.mrb[94].mxu1 %v12478_v38 }
 0x3de   : > { %9159 = vmatprep.mubr.f32.mxu1 %v1343_v58  ;;  %v9781_v58 = vpack.c.bf16 %v4259_v4, %v4255_v7  ;;  %v4279_v7 = vld [vmem:[#allocation10 + $0x4c0] sm:$0xff] }
 0x3df   : > { %v4283_v4 = vld [vmem:[#allocation10 + $0x4e0] sm:$0xff] }
 0x3e0   : > { %9782 = vmatpush1.bf16.msra.mxu0 %v9781_v58  ;;  %v4288_v58 = vld [vmem:[#allocation10 + $0x508] sm:$0xff] }
 0x3e1   : > { %9160 = vmatmul.mubr.f32.gmra.mrb[96].mxu1 %v1344_v18  ;;  %v4268_v18 = vld [vmem:[#allocation10 + $0x468] sm:$0xff] }
 0x3e2   : > { %9162 = vmatprep.mubr.f32.mxu1 %v1345_v13 }
 0x3e5   : > { %9163 = vmatmul.mubr.f32.gmra.mrb[98].mxu1 %v1346_v40 }
 0x3e6   : > { %9165 = vmatprep.mubr.f32.mxu1 %v12615_v3 }
 0x3e9   : > { %9166 = vmatmul.mubr.f32.gmra.mrb[100].mxu1 %v12622_v17 }
 0x3ea   : > { %9168 = vmatprep.mubr.f32.mxu1 %v12626_v25 }
 0x3ed   : > { %9169 = vmatmul.mubr.f32.gmra.mrb[102].mxu1 %v12630_v56 }
 0x3ee   : > { %9203 = vmatprep.mubr.f32.mxu1 %v12160_v43  ;;  %v9783_v43 = vpack.c.bf16 %v4268_v18, %v4264_v26  ;;  %v9635_v26 = vpack.c.bf16 %v3484_v28, %v3483_v29  ;;  %v3485_v18 = vld [vmem:[#allocation7 + $0x450] sm:$0xff]  ;;  %v12670_v29 = vadd.f32 %v12508_v33, %v13152_v31  ;;  %v4303_v31 = vld [vmem:[#allocation10 + $0x580] sm:$0xff] }
 0x3ef   : > { %v3892_v28 = vld [vmem:[#allocation10 + $0x248] sm:$0xff] }
 0x3f0   : > { %9784 = vmatprep.subr.bf16.mxu0 %v9783_v43  ;;  %v9793_v43 = vpack.c.bf16 %v4283_v4, %v4279_v7  ;;  %v1352_v0 = vmax.f32 %v12670_v29, 0.0  ;;  %v3891_v4 = vld [vmem:[#allocation10 + $0x240] sm:$0xff] }
 0x3f1   : > { %9204 = vmatmul.mubr.f32.vlgmr.msra.gmra.mrb[72].mxu1 %v12162_v45  ;;  %v9787_v45 = vpack.c.bf16 %v4276_v54, %v4272_v20  ;;  %9786 = vmatpush1.bf16.msra.mxu0 %v9785_v10  ;;  %v9639_v10 = vpack.c.bf16 %v3486_v11, %v3485_v18  ;;  %v3488_v20 = vld [vmem:[#allocation7 + $0x468] sm:$0xff]  ;;  %v9797_v54 = vpack.c.bf16 %v4291_v48, %v4287_v6 }
 0x3f2   : > { %9622 = vmatpush3.bf16.msra.mxu1 %v9619_v22  ;;  %9206 = vmatprep.mubr.f32.mxu1 %v12168_v51  ;;  %v4271_v22 = vld [vmem:[#allocation10 + $0x480] sm:$0xff]  ;;  %v3908_v6 = vld [vmem:[#allocation10 + $0x2c8] sm:$0xff] }
 0x3f3   : > { %9624 = vmatprep.subr.bf16.mxu1 %v9623_v21  ;;  %v9789_v5 = vpack.c.bf16 %v4275_v19, %v4271_v22  ;;  %9788 = vmatprep.subr.bf16.mxu0 %v9787_v45  ;;  %v3489_v22 = vld [vmem:[#allocation7 + $0x470] sm:$0xff]  ;;  %v3490_v19 = vld [vmem:[#allocation7 + $0x478] sm:$0xff]  ;;  %v4307_v29 = vld [vmem:[#allocation10 + $0x5a0] sm:$0xff] }
 0x3f4   : > { %v3912_v48 = vld [vmem:[#allocation10 + $0x2e8] sm:$0xff] }
 0x3f5   : > { %9207 = vmatmul.mubr.f32.gmra.mrb[74].mxu1 %v12170_v53  ;;  %9790 = vmatpush1.bf16.msra.mxu0 %v9789_v5  ;;  %v3896_v5 = vld [vmem:[#allocation10 + $0x268] sm:$0xff] }
 0x3f6   : > { %9209 = vmatprep.mubr.f32.mxu1 %v12176_v57  ;;  %9626 = vmatpush3.bf16.msra.mxu1 %v9623_v21  ;;  %v4292_v21 = vld [vmem:[#allocation10 + $0x528] sm:$0xff]  ;;  %v9655_v7 = vpack.c.bf16 %v3896_v5, %v3892_v28 }
 0x3f7   : > { %9628 = vmatprep.subr.bf16.mxu1 %v9627_v47  ;;  %9792 = vmatprep.subr.bf16.mxu0 %v9791_v12  ;;  %v9795_v36 = vpack.c.bf16 %v4292_v21, %v4288_v58  ;;  %v3895_v58 = vld [vmem:[#allocation10 + $0x260] sm:$0xff]  ;;  %v3900_v21 = vld [vmem:[#allocation10 + $0x288] sm:$0xff] }
 0x3f8   : > { %v9657_v18 = vpack.c.bf16 %v3895_v58, %v3891_v4  ;;  %v4316_v5 = vld [vmem:[#allocation10 + $0x5e8] sm:$0xff]  ;;  %v4315_v4 = vld [vmem:[#allocation10 + $0x5e0] sm:$0xff]  ;;  %v11516_v58 = vmov 0.0  }
 0x3f9   : > { %9210 = vmatmul.mubr.f32.gmra.mrb[76].mxu1 %v12178_v61  ;;  %9794 = vmatpush1.bf16.msra.mxu0 %v9793_v43  ;;  %v3899_v43 = vld [vmem:[#allocation10 + $0x280] sm:$0xff] }
 0x3fa   : > { %9212 = vmatprep.mubr.f32.mxu1 %v12184_v1  ;;  %9630 = vmatpush3.bf16.msra.mxu1 %v9627_v47  ;;  %v3487_v47 = vld [vmem:[#allocation7 + $0x460] sm:$0xff] }
 0x3fb   : > { %9632 = vmatprep.subr.bf16.mxu1 %v9631_v27  ;;  %9796 = vmatprep.subr.bf16.mxu0 %v9795_v36  ;;  %v9643_v45 = vpack.c.bf16 %v3488_v20, %v3487_v47  ;;  %v3903_v36 = vld [vmem:[#allocation10 + $0x2a0] sm:$0xff]  ;;  %v3916_v20 = vld [vmem:[#allocation10 + $0x308] sm:$0xff] }
 0x3fc   : > { %v3907_v47 = vld [vmem:[#allocation10 + $0x2c0] sm:$0xff]  ;;  %4383 = vmatprep.mubr.f32.mxu0 %v11516_v58 }
 0x3fd   : > { %9213 = vmatmul.mubr.f32.gmra.mrb[78].mxu1 %v12188_v8  ;;  %9798 = vmatpush1.bf16.msra.mxu0 %v9797_v54 }
 0x3fe   : > { %9215 = vmatprep.mubr.f32.mxu1 %v12200_v34  ;;  %9634 = vmatpush3.bf16.msra.mxu1 %v9631_v27  ;;  %v9647_v34 = vpack.c.bf16 %v3490_v19, %v3489_v22  ;;  %v3884_v27 = vld [vmem:[#allocation10 + $0x208] sm:$0xff]  ;;  %v3915_v22 = vld [vmem:[#allocation10 + $0x300] sm:$0xff] }
 0x3ff   : > { %9636 = vmatprep.subr.bf16.mxu1 %v9635_v26  ;;  %v3924_v19 = vld [vmem:[#allocation10 + $0x348] sm:$0xff] }
 0x401   : > { %9216 = vmatmul.mubr.f32.gmra.mrb[80].mxu1 %v12202_v37  ;;  %v9651_v37 = vpack.c.bf16 %v3888_v15, %v3884_v27  ;;  %v3923_v15 = vld [vmem:[#allocation10 + $0x340] sm:$0xff] }
 0x402   : > { %9218 = vmatprep.mubr.f32.mxu1 %v12208_v49  ;;  %9638 = vmatpush3.bf16.msra.mxu1 %v9635_v26  ;;  %v3904_v26 = vld [vmem:[#allocation10 + $0x2a8] sm:$0xff] }
 0x403   : > { %9640 = vmatprep.subr.bf16.mxu1 %v9639_v10  ;;  %v9659_v11 = vpack.c.bf16 %v3904_v26, %v3900_v21  ;;  %v4258_v26 = vld [vmem:[#allocation10 + $0x418] sm:$0xff] }
 0x405   : > { %9219 = vmatmul.mubr.f32.gmra.mrb[82].mxu1 %v12210_v52 }
 0x406   : > { %9221 = vmatprep.mubr.f32.mxu1 %v12216_v59  ;;  %9642 = vmatpush3.bf16.msra.mxu1 %v9639_v10  ;;  %v9663_v10 = vpack.c.bf16 %v3912_v48, %v3908_v6 }
 0x407   : > { %9644 = vmatprep.subr.bf16.mxu1 %v9643_v45 }
 0x409   : > { %9222 = vmatmul.mubr.f32.gmra.mrb[84].mxu1 %v12218_v63 }
 0x40a   : > { %9224 = vmatprep.mubr.f32.mxu1 %v12226_v24  ;;  %9646 = vmatpush3.bf16.msra.mxu1 %v9643_v45 }
 0x40b   : > { %9648 = vmatprep.subr.bf16.mxu1 %v9647_v34 }
 0x40d   : > { %9225 = vmatmul.mubr.f32.gmra.mrb[86].mxu1 %v12232_v44 }
 0x40e   : > { %9227 = vmatprep.mubr.f32.mxu1 %v12453_v62  ;;  %9650 = vmatpush3.bf16.msra.mxu1 %v9647_v34  ;;  %v13151_v62 = vld [vmem:[#allocation35_spill] sm:$0xff] }
 0x40f   : > { %9652 = vmatprep.subr.bf16.mxu1 %v9651_v37  ;;  %v3943_v37 = vld [vmem:[#allocation10 + $0x3e0] sm:$0xff] }
 0x411   : > { %9228 = vmatmul.mubr.f32.gmra.mrb[88].mxu1 %v12460_v41  ;;  %v12664_v41 = vadd.f32 %v12508_v33, %v13151_v62 }
 0x412   : > { %9230 = vmatprep.mubr.f32.mxu1 %v12464_v30 }
 0x413   : > { %v1351_v39 = vmax.f32 %v12664_v41, 0.0 }
 0x415   : > { %9231 = vmatmul.mubr.f32.gmra.mrb[90].mxu1 %v12470_v9 }
 0x416   : > { %9233 = vmatprep.mubr.f32.mxu1 %v12474_v2 }
 0x419   : > { %9234 = vmatmul.mubr.f32.gmra.mrb[92].mxu1 %v12478_v38 }
 0x41a   : > { %9236 = vmatprep.mubr.f32.mxu1 %v12516_v55 }
 0x41d   : > { %9237 = vmatmul.mubr.f32.gmra.mrb[94].mxu1 %v12520_v60 }
 0x41e   : > { %9239 = vmatprep.mubr.f32.mxu1 %v1345_v13  ;;  %v3883_v13 = vld [vmem:[#allocation10 + $0x200] sm:$0xff] }
 0x421   : > { %9240 = vmatmul.mubr.f32.gmra.mrb[96].mxu1 %v1346_v40  ;;  %v3887_v40 = vld [vmem:[#allocation10 + $0x220] sm:$0xff] }
 0x422   : > { %9242 = vmatprep.mubr.f32.mxu1 %v12615_v3  ;;  %v9653_v12 = vpack.c.bf16 %v3887_v40, %v3883_v13  ;;  %v3890_v13 = vld [vmem:[#allocation10 + $0x238] sm:$0xff]  ;;  %v4312_v40 = vld [vmem:[#allocation10 + $0x5c8] sm:$0xff] }
 0x425   : > { %9243 = vmatmul.mubr.f32.gmra.mrb[98].mxu1 %v12622_v17 }
 0x426   : > { %9245 = vmatprep.mubr.f32.mxu1 %v12626_v25 }
 0x429   : > { %9246 = vmatmul.mubr.f32.gmra.mrb[100].mxu1 %v12630_v56 }
 0x42a   : > { %9248 = vmatprep.mubr.f32.mxu1 %v1351_v39 }
 0x42d   : > { %9249 = vmatmul.mubr.f32.gmra.mrb[102].mxu1 %v1352_v0 }
 0x42e   : > { %9283 = vmatprep.mubr.f32.mxu1 %v12168_v51  ;;  %v9661_v51 = vpack.c.bf16 %v3903_v36, %v3899_v43  ;;  %v12719_v43 = vld [vmem:[#allocation8] ss:$0 sm:$0xff] }
 0x431   : > { %9284 = vmatmul.mubr.f32.vlgmr.msra.gmra.mrb[72].mxu1 %v12170_v53  ;;  %v3911_v53 = vld [vmem:[#allocation10 + $0x2e0] sm:$0xff] }
 0x432   : > { %9286 = vmatprep.mubr.f32.mxu1 %v12176_v57  ;;  %9654 = vmatpush1.bf16.msra.mxu1 %v9653_v12  ;;  %v3920_v57 = vld [vmem:[#allocation10 + $0x328] sm:$0xff]  ;;  %v9665_v54 = vpack.c.bf16 %v3911_v53, %v3907_v47  ;;  %v9807_v12 = vpack.c.bf16 %v4316_v5, %v4312_v40  ;;  %v3885_v47 = vld [vmem:[#allocation10 + $0x210] sm:$0xff] }
 0x433   : > { %9656 = vmatprep.subr.bf16.mxu1 %v9655_v7  ;;  %v9667_v45 = vpack.c.bf16 %v3920_v57, %v3916_v20  ;;  %v4311_v7 = vld [vmem:[#allocation10 + $0x5c0] sm:$0xff]  ;;  %v3889_v53 = vld [vmem:[#allocation10 + $0x230] sm:$0xff]  ;;  %v3894_v57 = vld [vmem:[#allocation10 + $0x258] sm:$0xff] }
 0x434   : > { %v9809_v21 = vpack.c.bf16 %v4315_v4, %v4311_v7  ;;  %v4277_v5 = vld [vmem:[#allocation10 + $0x4b0] sm:$0xff] }
 0x435   : > { %9287 = vmatmul.mubr.f32.gmra.mrb[74].mxu1 %v12178_v61  ;;  %v3919_v61 = vld [vmem:[#allocation10 + $0x320] sm:$0xff] }
 0x436   : > { %9289 = vmatprep.mubr.f32.mxu1 %v12184_v1  ;;  %9658 = vmatpush1.bf16.msra.mxu1 %v9657_v18  ;;  %v3928_v1 = vld [vmem:[#allocation10 + $0x368] sm:$0xff]  ;;  %v9669_v34 = vpack.c.bf16 %v3919_v61, %v3915_v22  ;;  %v4262_v18 = vld [vmem:[#allocation10 + $0x438] sm:$0xff]  ;;  %v9685_v22 = vpack.c.bf16 %v3889_v53, %v3885_v47  ;;  %v3893_v61 = vld [vmem:[#allocation10 + $0x250] sm:$0xff] }
 0x437   : > { %9660 = vmatprep.subr.bf16.mxu1 %v9659_v11  ;;  %v9671_v27 = vpack.c.bf16 %v3928_v1, %v3924_v19  ;;  %v9811_v11 = vpack.c.bf16 %v4262_v18, %v4258_v26  ;;  %v4282_v26 = vld [vmem:[#allocation10 + $0x4d8] sm:$0xff]  ;;  %v3921_v47 = vld [vmem:[#allocation10 + $0x330] sm:$0xff] }
 0x438   : > { %v4286_v18 = vld [vmem:[#allocation10 + $0x4f8] sm:$0xff] }
 0x439   : > { %9290 = vmatmul.mubr.f32.gmra.mrb[76].mxu1 %v12188_v8  ;;  %v3927_v8 = vld [vmem:[#allocation10 + $0x360] sm:$0xff] }
 0x43a   : > { %9292 = vmatprep.mubr.f32.mxu1 %v12388_v46  ;;  %9662 = vmatpush1.bf16.msra.mxu1 %v9661_v51  ;;  %v9673_v46 = vpack.c.bf16 %v3927_v8, %v3923_v15  ;;  %v3897_v15 = vld [vmem:[#allocation10 + $0x270] sm:$0xff] }
 0x43b   : > { %9664 = vmatprep.subr.bf16.mxu1 %v9663_v10  ;;  %v4257_v8 = vld [vmem:[#allocation10 + $0x410] sm:$0xff] }
 0x43d   : > { %9293 = vmatmul.mubr.f32.gmra.mrb[78].mxu1 %v12392_v42  ;;  %v3932_v42 = vld [vmem:[#allocation10 + $0x388] sm:$0xff] }
 0x43e   : > { %9295 = vmatprep.mubr.f32.mxu1 %v12208_v49  ;;  %9666 = vmatpush1.bf16.msra.mxu1 %v9665_v54  ;;  %v13153_v49 = vld [vmem:[#allocation37_spill] sm:$0xff] }
 0x43f   : > { %9668 = vmatprep.subr.bf16.mxu1 %v9667_v45  ;;  %v3898_v54 = vld [vmem:[#allocation10 + $0x278] sm:$0xff] }
 0x441   : > { %9296 = vmatmul.mubr.f32.gmra.mrb[80].mxu1 %v12210_v52  ;;  %v1275_v52 = vadd.f32 %v12508_v33, %v13153_v49 }
 0x442   : > { %9298 = vmatprep.mubr.f32.mxu1 %v12216_v59  ;;  %9670 = vmatpush1.bf16.msra.mxu1 %v9669_v34  ;;  %v13154_v59 = vld [vmem:[#allocation36_spill] sm:$0xff] }
 0x443   : > { %9672 = vmatprep.subr.bf16.mxu1 %v9671_v27  ;;  %v9687_v27 = vpack.c.bf16 %v3898_v54, %v3894_v57  ;;  %v9823_v57 = vpack.c.bf16 %v4286_v18, %v4282_v26  ;;  %v4281_v54 = vld [vmem:[#allocation10 + $0x4d0] sm:$0xff]  ;;  %v4310_v26 = vld [vmem:[#allocation10 + $0x5b8] sm:$0xff] }
 0x445   : > { %9299 = vmatmul.mubr.f32.gmra.mrb[82].mxu1 %v12218_v63  ;;  %v1280_v63 = vadd.f32 %v12508_v33, %v13154_v59  ;;  %v9801_v33 = vpack.c.bf16 %v4299_v35, %v4295_v23  ;;  %v3906_v59 = vld [vmem:[#allocation10 + $0x2b8] sm:$0xff]  ;;  %v4265_v23 = vld [vmem:[#allocation10 + $0x450] sm:$0xff] }
 0x446   : > { %9301 = vmatprep.mubr.f32.mxu1 %v12226_v24  ;;  %9674 = vmatpush1.bf16.msra.mxu1 %v9673_v46  ;;  %v1353_v24 = vmax.f32 %v1275_v52, 0.0  ;;  %v4261_v46 = vld [vmem:[#allocation10 + $0x430] sm:$0xff]  ;;  %v3902_v52 = vld [vmem:[#allocation10 + $0x298] sm:$0xff] }
 0x447   : > { %v4269_v35 = vld [vmem:[#allocation10 + $0x470] sm:$0xff] }
 0x449   : > { %9302 = vmatmul.mubr.f32.gmra.mrb[84].mxu1 %v12232_v44  ;;  %v1354_v44 = vmax.f32 %v1280_v63, 0.0 }
 0x44a   : > { %9304 = vmatprep.mubr.f32.mxu1 %v12404_v32  ;;  %v3936_v32 = vld [vmem:[#allocation10 + $0x3a8] sm:$0xff] }
 0x44d   : > { %9305 = vmatmul.mubr.f32.gmra.mrb[86].mxu1 %v12408_v16  ;;  %v4296_v16 = vld [vmem:[#allocation10 + $0x548] sm:$0xff] }
 0x44e   : > { %9307 = vmatprep.mubr.f32.mxu1 %v12464_v30  ;;  %v9675_v30 = vpack.c.bf16 %v3936_v32, %v3932_v42  ;;  %v9689_v42 = vpack.c.bf16 %v3897_v15, %v3893_v61  ;;  %v9813_v32 = vpack.c.bf16 %v4261_v46, %v4257_v8  ;;  %v3926_v61 = vld [vmem:[#allocation10 + $0x358] sm:$0xff] }
 0x44f   : > { %v3930_v15 = vld [vmem:[#allocation10 + $0x378] sm:$0xff] }
 0x450   : > { %9676 = vmatprep.subr.bf16.mxu1 %v9675_v30  ;;  %v3905_v30 = vld [vmem:[#allocation10 + $0x2b0] sm:$0xff]  ;;  %v4290_v8 = vld [vmem:[#allocation10 + $0x518] sm:$0xff] }
 0x451   : > { %9308 = vmatmul.mubr.f32.gmra.mrb[88].mxu1 %v12470_v9  ;;  %v4300_v9 = vld [vmem:[#allocation10 + $0x568] sm:$0xff]  ;;  %v4294_v46 = vld [vmem:[#allocation10 + $0x538] sm:$0xff] }
 0x452   : > { %9310 = vmatprep.mubr.f32.mxu1 %v12474_v2  ;;  %v3931_v2 = vld [vmem:[#allocation10 + $0x380] sm:$0xff] }
 0x455   : > { %9311 = vmatmul.mubr.f32.gmra.mrb[90].mxu1 %v12478_v38  ;;  %v3935_v38 = vld [vmem:[#allocation10 + $0x3a0] sm:$0xff] }
 0x456   : > { %9313 = vmatprep.mubr.f32.mxu1 %v12516_v55  ;;  %v9799_v55 = vpack.c.bf16 %v4300_v9, %v4296_v16  ;;  %v3901_v16 = vld [vmem:[#allocation10 + $0x290] sm:$0xff] }
 0x458   : > { %9800 = vmatprep.subr.bf16.mxu0 %v9799_v55 }
 0x459   : > { %9314 = vmatmul.mubr.f32.gmra.mrb[92].mxu1 %v12520_v60  ;;  %v9677_v60 = vpack.c.bf16 %v3935_v38, %v3931_v2  ;;  %9802 = vmatpush1.bf16.msra.mxu0 %v9801_v33  ;;  %v3910_v33 = vld [vmem:[#allocation10 + $0x2d8] sm:$0xff] }
 0x45a   : > { %9316 = vmatprep.mubr.f32.mxu1 %v1341_v14  ;;  %v3940_v14 = vld [vmem:[#allocation10 + $0x3c8] sm:$0xff] }
 0x45b   : > { %9678 = vmatpush1.bf16.msra.mxu1 %v9677_v60  ;;  %v9691_v60 = vpack.c.bf16 %v3906_v59, %v3902_v52 }
 0x45d   : > { %9317 = vmatmul.mubr.f32.gmra.mrb[94].mxu1 %v1342_v50  ;;  %v3944_v50 = vld [vmem:[#allocation10 + $0x3e8] sm:$0xff] }
 0x45e   : > { %9319 = vmatprep.mubr.f32.mxu1 %v12615_v3  ;;  %v4304_v3 = vld [vmem:[#allocation10 + $0x588] sm:$0xff] }
 0x461   : > { %9320 = vmatmul.mubr.f32.gmra.mrb[96].mxu1 %v12622_v17  ;;  %v9679_v17 = vpack.c.bf16 %v3944_v50, %v3940_v14 }
 0x462   : > { %9322 = vmatprep.mubr.f32.mxu1 %v12626_v25  ;;  %v4308_v25 = vld [vmem:[#allocation10 + $0x5a8] sm:$0xff] }
 0x463   : > { %v9803_v62 = vpack.c.bf16 %v4308_v25, %v4304_v3  ;;  %9680 = vmatprep.subr.bf16.mxu1 %v9679_v17  ;;  %v3914_v17 = vld [vmem:[#allocation10 + $0x2f8] sm:$0xff] }
 0x464   : > { %v4274_v25 = vld [vmem:[#allocation10 + $0x498] sm:$0xff] }
 0x465   : > { %9323 = vmatmul.mubr.f32.gmra.mrb[98].mxu1 %v12630_v56  ;;  %v3939_v56 = vld [vmem:[#allocation10 + $0x3c0] sm:$0xff]  ;;  %9804 = vmatprep.subr.bf16.mxu0 %v9803_v62  ;;  %v9693_v62 = vpack.c.bf16 %v3905_v30, %v3901_v16  ;;  %v9827_v16 = vpack.c.bf16 %v4294_v46, %v4290_v8  ;;  %v4289_v30 = vld [vmem:[#allocation10 + $0x510] sm:$0xff]  ;;  %v3824_v8 = vld [vmem:[#allocation10 + $0x28] sm:$0xff] }
 0x466   : > { %9325 = vmatprep.mubr.f32.mxu1 %v1351_v39  ;;  %v9681_v41 = vpack.c.bf16 %v3943_v37, %v3939_v56  ;;  %v9805_v39 = vpack.c.bf16 %v4307_v29, %v4303_v31  ;;  %v4278_v56 = vld [vmem:[#allocation10 + $0x4b8] sm:$0xff]  ;;  %v3909_v31 = vld [vmem:[#allocation10 + $0x2d0] sm:$0xff] }
 0x467   : > { %v3913_v29 = vld [vmem:[#allocation10 + $0x2f0] sm:$0xff]  ;;  %v9819_v40 = vpack.c.bf16 %v4278_v56, %v4274_v25  ;;  %v4314_v46 = vld [vmem:[#allocation10 + $0x5d8] sm:$0xff] }
 0x468   : > { %9682 = vmatpush1.bf16.msra.mxu1 %v9681_v41  ;;  %9806 = vmatpush1.bf16.msra.mxu0 %v9805_v39  ;;  %v9817_v41 = vpack.c.bf16 %v4269_v35, %v4265_v23 }
 0x469   : > { %9326 = vmatmul.mubr.f32.gmra.mrb[100].mxu1 %v1352_v0  ;;  %v3886_v0 = vld [vmem:[#allocation10 + $0x218] sm:$0xff]  ;;  %9808 = vmatprep.subr.bf16.mxu0 %v9807_v12 }
 0x46a   : > { %9328 = vmatprep.mubr.f32.mxu1 %v1353_v24  ;;  %v9683_v28 = vpack.c.bf16 %v3890_v13, %v3886_v0  ;;  %v4266_v24 = vld [vmem:[#allocation10 + $0x458] sm:$0xff]  ;;  %v9695_v13 = vpack.c.bf16 %v3914_v17, %v3910_v33 }
 0x46b   : > { %v3918_v12 = vld [vmem:[#allocation10 + $0x318] sm:$0xff] }
 0x46c   : > { %9684 = vmatprep.subr.bf16.mxu1 %v9683_v28  ;;  %9810 = vmatpush1.bf16.msra.mxu0 %v9809_v21  ;;  %v4273_v28 = vld [vmem:[#allocation10 + $0x490] sm:$0xff]  ;;  %v3922_v21 = vld [vmem:[#allocation10 + $0x338] sm:$0xff] }
 0x46d   : > { %9329 = vmatmul.mubr.f32.gmra.mrb[102].mxu1 %v1354_v44  ;;  %9812 = vmatprep.subr.bf16.mxu0 %v9811_v11  ;;  %v4270_v44 = vld [vmem:[#allocation10 + $0x478] sm:$0xff] }
 0x46e   : > { %4011 = vmatprep.mubr.f32.mxu1 %v11516_v58  ;;  %v9815_v3 = vpack.c.bf16 %v4270_v44, %v4266_v24  ;;  %v3925_v24 = vld [vmem:[#allocation10 + $0x350] sm:$0xff]  ;;  %v3938_v33 = vld [vmem:[#allocation10 + $0x3b8] sm:$0xff] }
 0x46f   : > { %v3929_v44 = vld [vmem:[#allocation10 + $0x370] sm:$0xff] }
 0x470   : > { %v9705_v25 = vpack.c.bf16 %v3929_v44, %v3925_v24 }
 0x504   : > { %v9285_v36 = vpop.f32.mrb[72].mxu1 }
 0x505   : > { %v12722_v6 = vadd.f32 %v9285_v36, %v12719_v43  ;;  %v3557_v48 = vpop.f32.mrb[73].mxu1  ;;  %v9697_v36 = vpack.c.bf16 %v3913_v29, %v3909_v31 }
 0x506   : > { %v12725_v51 = vadd.f32 %v12719_v43, %v3557_v48  ;;  %v9821_v48 = vpack.c.bf16 %v4277_v5, %v4273_v28  ;;  %v3942_v28 = vld [vmem:[#allocation10 + $0x3d8] sm:$0xff] }
 0x508   : > { %v9288_v10 = vpop.f32.mrb[74].mxu1 }
 0x509   : > { %v3567_v20 = vpop.f32.mrb[75].mxu1  ;;  %v12731_v19 = vadd.f32 %v9288_v10, %v12719_v43  ;;  %v3917_v10 = vld [vmem:[#allocation10 + $0x310] sm:$0xff] }
 0x50a   : > { %v12728_v45 = vadd.f32 %v12719_v43, %v3567_v20  ;;  %v9699_v20 = vpack.c.bf16 %v3922_v21, %v3918_v12  ;;  %v9701_v52 = vpack.c.bf16 %v3921_v47, %v3917_v10  ;;  %v4306_v21 = vld [vmem:[#allocation10 + $0x598] sm:$0xff]  ;;  %v3941_v10 = vld [vmem:[#allocation10 + $0x3d0] sm:$0xff] }
 0x50b   : > { %v3790_v9 = vmax.f32 %v12731_v19, 0.0  ;;  %v3945_v47 = vld [vmem:[#allocation10 + $0x3f0] sm:$0xff] }
 0x50c   : > { %v3789_v1 = vmax.f32 %v12728_v45, 0.0  ;;  %v9291_v34 = vpop.f32.mrb[76].mxu1  ;;  %v9713_v24 = vpack.c.bf16 %v3945_v47, %v3941_v10  ;;  %v3840_v10 = vld [vmem:[#allocation10 + $0xa8] sm:$0xff] }
 0x50d   : > { %v3577_v49 = vpop.f32.mrb[77].mxu1  ;;  %v12742_v2 = vadd.f32 %v9291_v34, %v12719_v43 }
 0x50e   : > { %v12735_v63 = vadd.f32 %v12719_v43, %v3577_v49  ;;  %4012 = vmatmul.mubr.f32.vlgmr.msra.gmra.mrb[104].mxu1 %v3789_v1 }
 0x50f   : > { %9686 = vmatpush1.bf16.msra.mxu1 %v9685_v22  ;;  %4017 = vmatprep.mubr.f32.mxu1 %v11516_v58  ;;  %v3792_v39 = vmax.f32 %v12742_v2, 0.0  ;;  %v4285_v22 = vld [vmem:[#allocation10 + $0x4f0] sm:$0xff]  ;;  %v3864_v2 = vld [vmem:[#allocation10 + $0x168] sm:$0xff] }
 0x510   : > { %v3791_v38 = vmax.f32 %v12735_v63, 0.0  ;;  %v9294_v55 = vpop.f32.mrb[78].mxu1  ;;  %9688 = vmatprep.subr.bf16.mxu1 %v9687_v27  ;;  %v9825_v59 = vpack.c.bf16 %v4285_v22, %v4281_v54  ;;  %v4305_v54 = vld [vmem:[#allocation10 + $0x590] sm:$0xff] }
 0x511   : > { %v12746_v14 = vadd.f32 %v9294_v55, %v12719_v43  ;;  %v3587_v50 = vpop.f32.mrb[79].mxu1  ;;  %v4293_v55 = vld [vmem:[#allocation10 + $0x530] sm:$0xff] }
 0x512   : > { %v12749_v37 = vadd.f32 %v12719_v43, %v3587_v50  ;;  %4018 = vmatmul.mubr.f32.gmra.mrb[106].mxu1 %v3790_v9  ;;  %4384 = vmatmul.mubr.f32.vlgmr.msra.gmra.mrb[0].mxu0 %v3791_v38  ;;  %v4298_v50 = vld [vmem:[#allocation10 + $0x558] sm:$0xff]  ;;  %v9829_v56 = vpack.c.bf16 %v4293_v55, %v4289_v30  ;;  %v4309_v22 = vld [vmem:[#allocation10 + $0x5b0] sm:$0xff]  ;;  %v3823_v55 = vld [vmem:[#allocation10 + $0x20] sm:$0xff] }
 0x513   : > { %9690 = vmatpush1.bf16.msra.mxu1 %v9689_v42  ;;  %9814 = vmatpush1.bf16.msra.mxu0 %v9813_v32  ;;  %v9703_v32 = vpack.c.bf16 %v3930_v15, %v3926_v61  ;;  %v3820_v61 = vld [vmem:[#allocation10 + $0x8] sm:$0xff]  ;;  %v9837_v44 = vpack.c.bf16 %v4309_v22, %v4305_v54  ;;  %v3835_v22 = vld [vmem:[#allocation10 + $0x80] sm:$0xff] }
 0x514   : > { %v9297_v0 = vpop.f32.mrb[80].mxu1  ;;  %9692 = vmatprep.subr.bf16.mxu1 %v9691_v60  ;;  %4389 = vmatprep.mubr.f32.mxu0 %v11516_v58  ;;  %v3934_v60 = vld [vmem:[#allocation10 + $0x398] sm:$0xff] }
 0x515   : > { %v12758_v7 = vadd.f32 %v9297_v0, %v12719_v43  ;;  %v3597_v4 = vpop.f32.mrb[81].mxu1  ;;  %9816 = vmatprep.subr.bf16.mxu0 %v9815_v3  ;;  %4088 = vmatprep.mubr.f32.mxu1 %v11516_v58  ;;  %v4302_v3 = vld [vmem:[#allocation10 + $0x578] sm:$0xff]  ;;  %v9707_v29 = vpack.c.bf16 %v3938_v33, %v3934_v60  ;;  %v4313_v60 = vld [vmem:[#allocation10 + $0x5d0] sm:$0xff] }
 0x516   : > { %v12762_v11 = vadd.f32 %v12719_v43, %v3597_v4  ;;  %4390 = vmatmul.mubr.f32.gmra.mrb[2].mxu0 %v3792_v39  ;;  %v9831_v0 = vpack.c.bf16 %v4302_v3, %v4298_v50  ;;  %v3946_v4 = vld [vmem:[#allocation10 + $0x3f8] sm:$0xff]  ;;  %v3828_v3 = vld [vmem:[#allocation10 + $0x48] sm:$0xff] }
 0x517   : > { %9694 = vmatpush1.bf16.msra.mxu1 %v9693_v62  ;;  %9818 = vmatpush1.bf16.msra.mxu0 %v9817_v41  ;;  %v3933_v62 = vld [vmem:[#allocation10 + $0x390] sm:$0xff] }
 0x518   : > { %v9300_v53 = vpop.f32.mrb[82].mxu1  ;;  %9696 = vmatprep.subr.bf16.mxu1 %v9695_v13  ;;  %9820 = vmatprep.subr.bf16.mxu0 %v9819_v40  ;;  %v3937_v41 = vld [vmem:[#allocation10 + $0x3b0] sm:$0xff] }
 0x519   : > { %v12767_v34 = vadd.f32 %v9300_v53, %v12719_v43  ;;  %v3607_v27 = vpop.f32.mrb[83].mxu1  ;;  %4460 = vmatprep.mubr.f32.mxu0 %v11516_v58  ;;  %v4297_v13 = vld [vmem:[#allocation10 + $0x550] sm:$0xff] }
 0x51a   : > { %v12771_v49 = vadd.f32 %v12719_v43, %v3607_v27  ;;  %v4301_v40 = vld [vmem:[#allocation10 + $0x570] sm:$0xff] }
 0x51b   : > { %9698 = vmatpush1.bf16.msra.mxu1 %v9697_v36  ;;  %9822 = vmatpush1.bf16.msra.mxu0 %v9821_v48  ;;  %v9709_v36 = vpack.c.bf16 %v3937_v41, %v3933_v62  ;;  %v9833_v48 = vpack.c.bf16 %v4301_v40, %v4297_v13  ;;  %v4482_v62 = vld [vmem:[#allocation10 + $0x608] sm:$0xff] }
 0x51c   : > { %v9303_v42 = vpop.f32.mrb[84].mxu1  ;;  %9700 = vmatprep.subr.bf16.mxu1 %v9699_v20  ;;  %9824 = vmatprep.subr.bf16.mxu0 %v9823_v57  ;;  %v9711_v20 = vpack.c.bf16 %v3946_v4, %v3942_v28  ;;  %v9835_v57 = vpack.c.bf16 %v4310_v26, %v4306_v21  ;;  %v4486_v41 = vld [vmem:[#allocation10 + $0x628] sm:$0xff]  ;;  %v3831_v28 = vld [vmem:[#allocation10 + $0x60] sm:$0xff] }
 0x51d   : > { %v12774_v23 = vadd.f32 %v9303_v42, %v12719_v43  ;;  %v3617_v35 = vpop.f32.mrb[85].mxu1  ;;  %v3819_v42 = vld [vmem:[#allocation10] sm:$0xff] }
 0x51e   : > { %v12777_v17 = vadd.f32 %v12719_v43, %v3617_v35  ;;  %v4317_v35 = vld [vmem:[#allocation10 + $0x5f0] sm:$0xff]  ;;  %v4485_v4 = vld [vmem:[#allocation10 + $0x620] sm:$0xff] }
 0x51f   : > { %9702 = vmatpush1.bf16.msra.mxu1 %v9701_v52  ;;  %9826 = vmatpush1.bf16.msra.mxu0 %v9825_v59  ;;  %v4318_v52 = vld [vmem:[#allocation10 + $0x5f8] sm:$0xff] }
 0x520   : > { %v9306_v31 = vpop.f32.mrb[86].mxu1  ;;  %9704 = vmatprep.subr.bf16.mxu1 %v9703_v32  ;;  %9828 = vmatprep.subr.bf16.mxu0 %v9827_v16  ;;  %v9715_v16 = vpack.c.bf16 %v3824_v8, %v3820_v61  ;;  %v9839_v30 = vpack.c.bf16 %v4318_v52, %v4314_v46  ;;  %v3839_v61 = vld [vmem:[#allocation10 + $0xa0] sm:$0xff] }
 0x521   : > { %v12780_v5 = vadd.f32 %v9306_v31, %v12719_v43  ;;  %v3627_v12 = vpop.f32.mrb[87].mxu1  ;;  %v9717_v31 = vpack.c.bf16 %v3823_v55, %v3819_v42  ;;  %v4489_v46 = vld [vmem:[#allocation10 + $0x640] sm:$0xff]  ;;  %v3848_v42 = vld [vmem:[#allocation10 + $0xe8] sm:$0xff]  ;;  %v9725_v55 = vpack.c.bf16 %v3839_v61, %v3835_v22 }
 0x522   : > { %v12783_v18 = vadd.f32 %v12719_v43, %v3627_v12  ;;  %v4481_v12 = vld [vmem:[#allocation10 + $0x600] sm:$0xff]  ;;  %v4518_v22 = vld [vmem:[#allocation10 + $0x728] sm:$0xff] }
 0x523   : > { %9706 = vmatpush1.bf16.msra.mxu1 %v9705_v25  ;;  %9830 = vmatpush1.bf16.msra.mxu0 %v9829_v56  ;;  %v3832_v25 = vld [vmem:[#allocation10 + $0x68] sm:$0xff]  ;;  %v9845_v54 = vpack.c.bf16 %v4485_v4, %v4481_v12  ;;  %v4493_v52 = vld [vmem:[#allocation10 + $0x660] sm:$0xff] }
 0x524   : > { %v9309_v53 = vpop.f32.mrb[88].mxu1  ;;  %9708 = vmatprep.subr.bf16.mxu1 %v9707_v29  ;;  %9832 = vmatprep.subr.bf16.mxu0 %v9831_v0  ;;  %v9841_v29 = vpack.c.bf16 %v4317_v35, %v4313_v60  ;;  %v3827_v0 = vld [vmem:[#allocation10 + $0x40] sm:$0xff]  ;;  %v9719_v40 = vpack.c.bf16 %v3832_v25, %v3828_v3  ;;  %v9849_v60 = vpack.c.bf16 %v4493_v52, %v4489_v46 }
 0x525   : > { %v12786_v27 = vadd.f32 %v9309_v53, %v12719_v43  ;;  %v3637_v15 = vpop.f32.mrb[89].mxu1  ;;  %v4490_v53 = vld [vmem:[#allocation10 + $0x648] sm:$0xff]  ;;  %v3843_v35 = vld [vmem:[#allocation10 + $0xc0] sm:$0xff] }
 0x526   : > { %v12789_v59 = vadd.f32 %v12719_v43, %v3637_v15  ;;  %v3851_v12 = vld [vmem:[#allocation10 + $0x100] sm:$0xff] }
 0x527   : > { %9710 = vmatpush1.bf16.msra.mxu1 %v9709_v36  ;;  %9834 = vmatpush1.bf16.msra.mxu0 %v9833_v48  ;;  %v9843_v36 = vpack.c.bf16 %v4486_v41, %v4482_v62  ;;  %v3836_v48 = vld [vmem:[#allocation10 + $0x88] sm:$0xff]  ;;  %v4497_v41 = vld [vmem:[#allocation10 + $0x680] sm:$0xff] }
 0x528   : > { %v9312_v32 = vpop.f32.mrb[90].mxu1  ;;  %9712 = vmatprep.subr.bf16.mxu1 %v9711_v20  ;;  %9836 = vmatprep.subr.bf16.mxu0 %v9835_v57  ;;  %v4494_v20 = vld [vmem:[#allocation10 + $0x668] sm:$0xff]  ;;  %v9721_v57 = vpack.c.bf16 %v3831_v28, %v3827_v0  ;;  %v9723_v8 = vpack.c.bf16 %v3840_v10, %v3836_v48  ;;  %v3855_v4 = vld [vmem:[#allocation10 + $0x120] sm:$0xff] }
 0x529   : > { %v12792_v33 = vadd.f32 %v9312_v32, %v12719_v43  ;;  %v3647_v50 = vpop.f32.mrb[91].mxu1  ;;  %v4498_v32 = vld [vmem:[#allocation10 + $0x688] sm:$0xff]  ;;  %v4505_v10 = vld [vmem:[#allocation10 + $0x6c0] sm:$0xff] }
 0x52a   : > { %v12795_v56 = vadd.f32 %v12719_v43, %v3647_v50  ;;  %v3847_v50 = vld [vmem:[#allocation10 + $0xe0] sm:$0xff]  ;;  %v4510_v0 = vld [vmem:[#allocation10 + $0x6e8] sm:$0xff] }
 0x52b   : > { %9714 = vmatpush1.bf16.msra.mxu1 %v9713_v24  ;;  %9838 = vmatpush1.bf16.msra.mxu0 %v9837_v44  ;;  %v3844_v24 = vld [vmem:[#allocation10 + $0xc8] sm:$0xff]  ;;  %v3859_v46 = vld [vmem:[#allocation10 + $0x140] sm:$0xff] }
 0x52c   : > { %v9315_v13 = vpop.f32.mrb[92].mxu1  ;;  %9716 = vmatprep.subr.bf16.mxu1 %v9715_v16  ;;  %9840 = vmatprep.subr.bf16.mxu0 %v9839_v30  ;;  %v4502_v16 = vld [vmem:[#allocation10 + $0x6a8] sm:$0xff]  ;;  %v9727_v25 = vpack.c.bf16 %v3848_v42, %v3844_v24  ;;  %v3863_v52 = vld [vmem:[#allocation10 + $0x160] sm:$0xff] }
 0x52d   : > { %v12798_v21 = vadd.f32 %v9315_v13, %v12719_v43  ;;  %v3657_v26 = vpop.f32.mrb[93].mxu1  ;;  %v9851_v62 = vpack.c.bf16 %v4502_v16, %v4498_v32  ;;  %v4513_v42 = vld [vmem:[#allocation10 + $0x700] sm:$0xff]  ;;  %v3868_v16 = vld [vmem:[#allocation10 + $0x188] sm:$0xff] }
 0x52e   : > { %v12801_v47 = vadd.f32 %v12719_v43, %v3657_v26  ;;  %4089 = vmatmul.mubr.f32.vlgmr.msra.gmra.mrb[108].mxu1 %v3789_v1  ;;  %v9847_v1 = vpack.c.bf16 %v4494_v20, %v4490_v53  ;;  %v4509_v53 = vld [vmem:[#allocation10 + $0x6e0] sm:$0xff]  ;;  %v3860_v20 = vld [vmem:[#allocation10 + $0x148] sm:$0xff] }
 0x52f   : > { %9718 = vmatpush1.bf16.msra.mxu1 %v9717_v31  ;;  %9842 = vmatpush1.bf16.msra.mxu0 %v9841_v29  ;;  %v4501_v31 = vld [vmem:[#allocation10 + $0x6a0] sm:$0xff]  ;;  %v3852_v29 = vld [vmem:[#allocation10 + $0x108] sm:$0xff] }
 0x530   : > { %v9318_v15 = vpop.f32.mrb[94].mxu1  ;;  %4094 = vmatprep.mubr.f32.mxu1 %v11516_v58  ;;  %9720 = vmatprep.subr.bf16.mxu1 %v9719_v40  ;;  %v9729_v40 = vpack.c.bf16 %v3847_v50, %v3843_v35  ;;  %v9853_v28 = vpack.c.bf16 %v4501_v31, %v4497_v41  ;;  %v4517_v32 = vld [vmem:[#allocation10 + $0x720] sm:$0xff]  ;;  %v3872_v35 = vld [vmem:[#allocation10 + $0x1a8] sm:$0xff] }
 0x531   : > { %v12807_v44 = vadd.f32 %v9318_v15, %v12719_v43  ;;  %v3667_v45 = vpop.f32.mrb[95].mxu1  ;;  %9844 = vmatprep.subr.bf16.mxu0 %v9843_v36  ;;  %v9733_v15 = vpack.c.bf16 %v3855_v4, %v3851_v12  ;;  %v4522_v50 = vld [vmem:[#allocation10 + $0x748] sm:$0xff]  ;;  %v9861_v41 = vpack.c.bf16 %v4517_v32, %v4513_v42  ;;  %v3867_v31 = vld [vmem:[#allocation10 + $0x180] sm:$0xff]  ;;  %v3821_v42 = vld [vmem:[#allocation10 + $0x10] sm:$0xff] }
 0x532   : > { %v12810_v30 = vadd.f32 %v12719_v43, %v3667_v45  ;;  %4095 = vmatmul.mubr.f32.gmra.mrb[110].mxu1 %v3790_v9  ;;  %4461 = vmatmul.mubr.f32.vlgmr.msra.gmra.mrb[4].mxu0 %v3791_v38  ;;  %v3856_v9 = vld [vmem:[#allocation10 + $0x128] sm:$0xff]  ;;  %v9735_v45 = vpack.c.bf16 %v3864_v2, %v3860_v20  ;;  %v3879_v2 = vld [vmem:[#allocation10 + $0x1e0] sm:$0xff] }
 0x533   : > { %9722 = vmatpush1.bf16.msra.mxu1 %v9721_v57  ;;  %9846 = vmatpush1.bf16.msra.mxu0 %v9845_v54  ;;  %v4506_v38 = vld [vmem:[#allocation10 + $0x6c8] sm:$0xff]  ;;  %v9731_v36 = vpack.c.bf16 %v3856_v9, %v3852_v29  ;;  %v3871_v29 = vld [vmem:[#allocation10 + $0x1a0] sm:$0xff]  ;;  %v9739_v9 = vpack.c.bf16 %v3872_v35, %v3868_v16 }
 0x534   : > { %v9321_v3 = vpop.f32.mrb[96].mxu1  ;;  %4466 = vmatprep.mubr.f32.mxu0 %v11516_v58  ;;  %9724 = vmatprep.subr.bf16.mxu1 %v9723_v8  ;;  %v9855_v48 = vpack.c.bf16 %v4510_v0, %v4506_v38  ;;  %v9857_v8 = vpack.c.bf16 %v4509_v53, %v4505_v10  ;;  %v4521_v0 = vld [vmem:[#allocation10 + $0x740] sm:$0xff]  ;;  %v9741_v53 = vpack.c.bf16 %v3871_v29, %v3867_v31  ;;  %v4488_v31 = vld [vmem:[#allocation10 + $0x638] sm:$0xff] }
 0x535   : > { %v12818_v19 = vadd.f32 %v9321_v3, %v12719_v43  ;;  %v3677_v63 = vpop.f32.mrb[97].mxu1  ;;  %9848 = vmatprep.subr.bf16.mxu0 %v9847_v1  ;;  %4165 = vmatprep.mubr.f32.mxu1 %v11516_v58  ;;  %v4526_v3 = vld [vmem:[#allocation10 + $0x768] sm:$0xff]  ;;  %v4537_v35 = vld [vmem:[#allocation10 + $0x7c0] sm:$0xff] }
 0x536   : > { %v12822_v13 = vadd.f32 %v12719_v43, %v3677_v63  ;;  %4467 = vmatmul.mubr.f32.gmra.mrb[6].mxu0 %v3792_v39  ;;  %v4514_v39 = vld [vmem:[#allocation10 + $0x708] sm:$0xff]  ;;  %v9863_v38 = vpack.c.bf16 %v4526_v3, %v4522_v50  ;;  %v4541_v50 = vld [vmem:[#allocation10 + $0x7e0] sm:$0xff]  ;;  %v3830_v3 = vld [vmem:[#allocation10 + $0x58] sm:$0xff] }
 0x537   : > { %9726 = vmatpush1.bf16.msra.mxu1 %v9725_v55  ;;  %9850 = vmatpush1.bf16.msra.mxu0 %v9849_v60  ;;  %v9859_v1 = vpack.c.bf16 %v4518_v22, %v4514_v39 }
 0x538   : > { %v9324_v26 = vpop.f32.mrb[98].mxu1  ;;  %9728 = vmatprep.subr.bf16.mxu1 %v9727_v25  ;;  %9852 = vmatprep.subr.bf16.mxu0 %v9851_v62  ;;  %v9737_v62 = vpack.c.bf16 %v3863_v52, %v3859_v46  ;;  %v3822_v46 = vld [vmem:[#allocation10 + $0x18] sm:$0xff] }
 0x539   : > { %v12827_v57 = vadd.f32 %v9324_v26, %v12719_v43  ;;  %v3687_v54 = vpop.f32.mrb[99].mxu1  ;;  %4609 = vmatprep.mubr.f32.mxu0 %v11516_v58  ;;  %v3880_v26 = vld [vmem:[#allocation10 + $0x1e8] sm:$0xff]  ;;  %v3826_v52 = vld [vmem:[#allocation10 + $0x38] sm:$0xff] }
 0x53a   : > { %v12831_v61 = vadd.f32 %v12719_v43, %v3687_v54  ;;  %v3875_v54 = vld [vmem:[#allocation10 + $0x1c0] sm:$0xff]  ;;  %v9747_v32 = vpack.c.bf16 %v3826_v52, %v3822_v46  ;;  %v4491_v52 = vld [vmem:[#allocation10 + $0x650] sm:$0xff] }
 0x53b   : > { %9730 = vmatpush1.bf16.msra.mxu1 %v9729_v40  ;;  %9854 = vmatpush1.bf16.msra.mxu0 %v9853_v28  ;;  %v4525_v40 = vld [vmem:[#allocation10 + $0x760] sm:$0xff]  ;;  %v3876_v28 = vld [vmem:[#allocation10 + $0x1c8] sm:$0xff] }
 0x53c   : > { %v9327_v24 = vpop.f32.mrb[100].mxu1  ;;  %9732 = vmatprep.subr.bf16.mxu1 %v9731_v36  ;;  %9856 = vmatprep.subr.bf16.mxu0 %v9855_v48  ;;  %v4530_v36 = vld [vmem:[#allocation10 + $0x788] sm:$0xff]  ;;  %v9865_v20 = vpack.c.bf16 %v4525_v40, %v4521_v0  ;;  %v9743_v39 = vpack.c.bf16 %v3880_v26, %v3876_v28  ;;  %v3833_v40 = vld [vmem:[#allocation10 + $0x70] sm:$0xff] }
 0x53d   : > { %v12834_v55 = vadd.f32 %v9327_v24, %v12719_v43  ;;  %v3697_v60 = vpop.f32.mrb[101].mxu1  ;;  %v4534_v48 = vld [vmem:[#allocation10 + $0x7a8] sm:$0xff]  ;;  %v4483_v28 = vld [vmem:[#allocation10 + $0x610] sm:$0xff] }
 0x53e   : > { %v12837_v25 = vadd.f32 %v12719_v43, %v3697_v60  ;;  %v9867_v22 = vpack.c.bf16 %v4534_v48, %v4530_v36  ;;  %v4538_v24 = vld [vmem:[#allocation10 + $0x7c8] sm:$0xff]  ;;  %v3825_v60 = vld [vmem:[#allocation10 + $0x30] sm:$0xff]  ;;  %v3838_v36 = vld [vmem:[#allocation10 + $0x98] sm:$0xff] }
 0x53f   : > { %9734 = vmatpush1.bf16.msra.mxu1 %v9733_v15  ;;  %9858 = vmatpush1.bf16.msra.mxu0 %v9857_v8  ;;  %v4529_v15 = vld [vmem:[#allocation10 + $0x780] sm:$0xff]  ;;  %v9749_v29 = vpack.c.bf16 %v3825_v60, %v3821_v42  ;;  %v3842_v48 = vld [vmem:[#allocation10 + $0xb8] sm:$0xff] }
 0x540   : > { %v9330_v63 = vpop.f32.mrb[102].mxu1  ;;  %9736 = vmatprep.subr.bf16.mxu1 %v9735_v45  ;;  %9860 = vmatprep.subr.bf16.mxu0 %v9859_v1  ;;  %v4533_v8 = vld [vmem:[#allocation10 + $0x7a0] sm:$0xff]  ;;  %v4542_v45 = vld [vmem:[#allocation10 + $0x7e8] sm:$0xff]  ;;  %v9755_v46 = vpack.c.bf16 %v3842_v48, %v3838_v36  ;;  %v4500_v42 = vld [vmem:[#allocation10 + $0x698] sm:$0xff] }
 0x541   : > { %v12840_v12 = vadd.f32 %v9330_v63, %v12719_v43  ;;  %v3707_v4 = vpop.f32.mrb[103].mxu1  ;;  %v9869_v1 = vpack.c.bf16 %v4533_v8, %v4529_v15  ;;  %v9871_v16 = vpack.c.bf16 %v4542_v45, %v4538_v24  ;;  %v9873_v63 = vpack.c.bf16 %v4541_v50, %v4537_v35  ;;  %v4495_v24 = vld [vmem:[#allocation10 + $0x670] sm:$0xff]  ;;  %v3846_v45 = vld [vmem:[#allocation10 + $0xd8] sm:$0xff] }
 0x542   : > { %v12843_v10 = vadd.f32 %v12719_v43, %v3707_v4  ;;  %v9745_v43 = vpack.c.bf16 %v3879_v2, %v3875_v54  ;;  %v4487_v4 = vld [vmem:[#allocation10 + $0x630] sm:$0xff]  ;;  %v3788_v15 = vmax.f32 %v12722_v6, 0.0  ;;  %v3793_v8 = vmax.f32 %v12749_v37, 0.0  ;;  %v4731_v37 = vld [vmem:[#allocation10 + $0x8c0] sm:$0xff] }
 0x543   : > { %9738 = vmatpush1.bf16.msra.mxu1 %v9737_v62  ;;  %9862 = vmatpush1.bf16.msra.mxu0 %v9861_v41  ;;  %v3834_v62 = vld [vmem:[#allocation10 + $0x78] sm:$0xff]  ;;  %v9877_v2 = vpack.c.bf16 %v4487_v4, %v4483_v28  ;;  %v9881_v60 = vpack.c.bf16 %v4495_v24, %v4491_v52  ;;  %v3845_v35 = vld [vmem:[#allocation10 + $0xd0] sm:$0xff] }
 0x544   : > { %9740 = vmatprep.subr.bf16.mxu1 %v9739_v9  ;;  %9864 = vmatprep.subr.bf16.mxu0 %v9863_v38  ;;  %v4484_v41 = vld [vmem:[#allocation10 + $0x618] sm:$0xff]  ;;  %v3829_v9 = vld [vmem:[#allocation10 + $0x50] sm:$0xff]  ;;  %v3787_v38 = vmax.f32 %v12725_v51, 0.0  ;;  %v9751_v0 = vpack.c.bf16 %v3834_v62, %v3830_v3  ;;  %v3794_v3 = vmax.f32 %v12746_v14, 0.0 }
 0x545   : > { %v9875_v26 = vpack.c.bf16 %v4488_v31, %v4484_v41  ;;  %v9753_v54 = vpack.c.bf16 %v3833_v40, %v3829_v9  ;;  %v3849_v50 = vld [vmem:[#allocation10 + $0xf0] sm:$0xff]  ;;  %v3858_v9 = vld [vmem:[#allocation10 + $0x138] sm:$0xff] }
 0x546   : > { %v4499_v31 = vld [vmem:[#allocation10 + $0x690] sm:$0xff]  ;;  %v4512_v40 = vld [vmem:[#allocation10 + $0x6f8] sm:$0xff]  ;;  %v9761_v28 = vpack.c.bf16 %v3849_v50, %v3845_v35 }
 0x547   : > { %9742 = vmatpush1.bf16.msra.mxu1 %v9741_v53  ;;  %9866 = vmatpush1.bf16.msra.mxu0 %v9865_v20  ;;  %v4492_v53 = vld [vmem:[#allocation10 + $0x658] sm:$0xff]  ;;  %v3857_v36 = vld [vmem:[#allocation10 + $0x130] sm:$0xff] }
 0x548   : > { %9744 = vmatprep.subr.bf16.mxu1 %v9743_v39  ;;  %9868 = vmatprep.subr.bf16.mxu0 %v9867_v22  ;;  %v4496_v20 = vld [vmem:[#allocation10 + $0x678] sm:$0xff]  ;;  %v3837_v39 = vld [vmem:[#allocation10 + $0x90] sm:$0xff] }
 0x549   : > { %v3841_v22 = vld [vmem:[#allocation10 + $0xb0] sm:$0xff]  ;;  %v3874_v35 = vld [vmem:[#allocation10 + $0x1b8] sm:$0xff] }
 0x54a   : > { %v4524_v50 = vld [vmem:[#allocation10 + $0x758] sm:$0xff] }
 0x54b   : > { %9746 = vmatpush1.bf16.msra.mxu1 %v9745_v43  ;;  %9870 = vmatpush1.bf16.msra.mxu0 %v9869_v1  ;;  %v9879_v43 = vpack.c.bf16 %v4496_v20, %v4492_v53  ;;  %v3850_v1 = vld [vmem:[#allocation10 + $0xf8] sm:$0xff]  ;;  %v4507_v20 = vld [vmem:[#allocation10 + $0x6d0] sm:$0xff] }
 0x54c   : > { %9748 = vmatprep.subr.bf16.mxu1 %v9747_v32  ;;  %9872 = vmatprep.subr.bf16.mxu0 %v9871_v16  ;;  %v4504_v32 = vld [vmem:[#allocation10 + $0x6b8] sm:$0xff]  ;;  %v9757_v16 = vpack.c.bf16 %v3841_v22, %v3837_v39  ;;  %v9759_v62 = vpack.c.bf16 %v3850_v1, %v3846_v45  ;;  %v3861_v45 = vld [vmem:[#allocation10 + $0x150] sm:$0xff] }
 0x54d   : > { %v9883_v41 = vpack.c.bf16 %v4504_v32, %v4500_v42  ;;  %v3866_v39 = vld [vmem:[#allocation10 + $0x178] sm:$0xff]  ;;  %v4515_v32 = vld [vmem:[#allocation10 + $0x710] sm:$0xff] }
 0x54e   : > { %4166 = vmatmul.mubr.f32.vlgmr.msra.gmra.mrb[104].mxu1 %v3787_v38  ;;  %v4516_v22 = vld [vmem:[#allocation10 + $0x718] sm:$0xff] }
 0x54f   : > { %9750 = vmatpush1.bf16.msra.mxu1 %v9749_v29  ;;  %9874 = vmatpush1.bf16.msra.mxu0 %v9873_v63  ;;  %v4503_v29 = vld [vmem:[#allocation10 + $0x6b0] sm:$0xff]  ;;  %v3854_v63 = vld [vmem:[#allocation10 + $0x118] sm:$0xff] }
 0x550   : > { %4171 = vmatprep.mubr.f32.mxu1 %v11516_v58  ;;  %9752 = vmatprep.subr.bf16.mxu1 %v9751_v0  ;;  %v4508_v0 = vld [vmem:[#allocation10 + $0x6d8] sm:$0xff]  ;;  %v9885_v4 = vpack.c.bf16 %v4503_v29, %v4499_v31  ;;  %v9763_v48 = vpack.c.bf16 %v3858_v9, %v3854_v63  ;;  %v3869_v29 = vld [vmem:[#allocation10 + $0x190] sm:$0xff] }
 0x551   : > { %9876 = vmatprep.subr.bf16.mxu0 %v9875_v26  ;;  %v3853_v26 = vld [vmem:[#allocation10 + $0x110] sm:$0xff]  ;;  %v9887_v53 = vpack.c.bf16 %v4512_v40, %v4508_v0 }
 0x552   : > { %4172 = vmatmul.mubr.f32.gmra.mrb[106].mxu1 %v3788_v15  ;;  %4610 = vmatmul.mubr.f32.vlgmr.msra.gmra.mrb[0].mxu0 %v3793_v8  ;;  %v9765_v52 = vpack.c.bf16 %v3857_v36, %v3853_v26  ;;  %v3873_v63 = vld [vmem:[#allocation10 + $0x1b0] sm:$0xff]  ;;  %v3882_v26 = vld [vmem:[#allocation10 + $0x1f8] sm:$0xff] }
 0x553   : > { %9754 = vmatpush1.bf16.msra.mxu1 %v9753_v54  ;;  %9878 = vmatpush1.bf16.msra.mxu0 %v9877_v2  ;;  %v4511_v54 = vld [vmem:[#allocation10 + $0x6f0] sm:$0xff]  ;;  %v3862_v2 = vld [vmem:[#allocation10 + $0x158] sm:$0xff] }
 0x554   : > { %4615 = vmatprep.mubr.f32.mxu0 %v11516_v58  ;;  %9756 = vmatprep.subr.bf16.mxu1 %v9755_v46  ;;  %v4520_v46 = vld [vmem:[#allocation10 + $0x738] sm:$0xff]  ;;  %v9889_v24 = vpack.c.bf16 %v4511_v54, %v4507_v20  ;;  %v9767_v1 = vpack.c.bf16 %v3866_v39, %v3862_v2  ;;  %v4523_v40 = vld [vmem:[#allocation10 + $0x750] sm:$0xff] }
 0x555   : > { %9880 = vmatprep.subr.bf16.mxu0 %v9879_v43  ;;  %4242 = vmatprep.mubr.f32.mxu1 %v11516_v58  ;;  %v3865_v43 = vld [vmem:[#allocation10 + $0x170] sm:$0xff]  ;;  %v9891_v42 = vpack.c.bf16 %v4520_v46, %v4516_v22  ;;  %v4532_v36 = vld [vmem:[#allocation10 + $0x798] sm:$0xff] }
 0x556   : > { %4616 = vmatmul.mubr.f32.gmra.mrb[2].mxu0 %v3794_v3  ;;  %v3877_v54 = vld [vmem:[#allocation10 + $0x1d0] sm:$0xff] }
 0x557   : > { %9758 = vmatpush1.bf16.msra.mxu1 %v9757_v16  ;;  %9882 = vmatpush1.bf16.msra.mxu0 %v9881_v60  ;;  %v4519_v16 = vld [vmem:[#allocation10 + $0x730] sm:$0xff]  ;;  %v3870_v60 = vld [vmem:[#allocation10 + $0x198] sm:$0xff] }
 0x558   : > { %9760 = vmatprep.subr.bf16.mxu1 %v9759_v62  ;;  %9884 = vmatprep.subr.bf16.mxu0 %v9883_v41  ;;  %v4528_v62 = vld [vmem:[#allocation10 + $0x778] sm:$0xff]  ;;  %v9769_v41 = vpack.c.bf16 %v3865_v43, %v3861_v45  ;;  %v9893_v31 = vpack.c.bf16 %v4519_v16, %v4515_v32  ;;  %v9771_v9 = vpack.c.bf16 %v3874_v35, %v3870_v60  ;;  %v3881_v22 = vld [vmem:[#allocation10 + $0x1f0] sm:$0xff]  ;;  %v4708_v60 = vld [vmem:[#allocation10 + $0x808] sm:$0xff] }
 0x559   : > { %4686 = vmatprep.mubr.f32.mxu0 %v11516_v58  ;;  %v9895_v0 = vpack.c.bf16 %v4528_v62, %v4524_v50  ;;  %v4531_v46 = vld [vmem:[#allocation10 + $0x790] sm:$0xff]  ;;  %v4544_v45 = vld [vmem:[#allocation10 + $0x7f8] sm:$0xff]  ;;  %v9777_v43 = vpack.c.bf16 %v3881_v22, %v3877_v54  ;;  %v4712_v35 = vld [vmem:[#allocation10 + $0x828] sm:$0xff] }
 0x55a   : > { %v4539_v32 = vld [vmem:[#allocation10 + $0x7d0] sm:$0xff]  ;;  %v9907_v62 = vpack.c.bf16 %v4712_v35, %v4708_v60  ;;  %v4755_v35 = vld [vmem:[#allocation10 + $0x980] sm:$0xff] }
 0x55b   : > { %9762 = vmatpush1.bf16.msra.mxu1 %v9761_v28  ;;  %9886 = vmatpush1.bf16.msra.mxu0 %v9885_v4  ;;  %v4527_v28 = vld [vmem:[#allocation10 + $0x770] sm:$0xff]  ;;  %v3878_v4 = vld [vmem:[#allocation10 + $0x1d8] sm:$0xff] }
 0x55c   : > { %9764 = vmatprep.subr.bf16.mxu1 %v9763_v48  ;;  %9888 = vmatprep.subr.bf16.mxu0 %v9887_v53  ;;  %v4536_v48 = vld [vmem:[#allocation10 + $0x7b8] sm:$0xff]  ;;  %v9773_v53 = vpack.c.bf16 %v3873_v63, %v3869_v29  ;;  %v9897_v20 = vpack.c.bf16 %v4527_v28, %v4523_v40  ;;  %v9775_v2 = vpack.c.bf16 %v3882_v26, %v3878_v4  ;;  %v4543_v16 = vld [vmem:[#allocation10 + $0x7f0] sm:$0xff]  ;;  %v4716_v29 = vld [vmem:[#allocation10 + $0x848] sm:$0xff] }
 0x55d   : > { %v9899_v39 = vpack.c.bf16 %v4536_v48, %v4532_v36  ;;  %v9905_v50 = vpack.c.bf16 %v4543_v16, %v4539_v32  ;;  %v4720_v63 = vld [vmem:[#allocation10 + $0x868] sm:$0xff]  ;;  %v4715_v40 = vld [vmem:[#allocation10 + $0x840] sm:$0xff] }
 0x55e   : > { %v4719_v28 = vld [vmem:[#allocation10 + $0x860] sm:$0xff]  ;;  %v4724_v4 = vld [vmem:[#allocation10 + $0x888] sm:$0xff] }
 0x55f   : > { %9766 = vmatpush1.bf16.msra.mxu1 %v9765_v52  ;;  %9890 = vmatpush1.bf16.msra.mxu0 %v9889_v24  ;;  %v4535_v52 = vld [vmem:[#allocation10 + $0x7b0] sm:$0xff]  ;;  %v4540_v24 = vld [vmem:[#allocation10 + $0x7d8] sm:$0xff]  ;;  %v4728_v26 = vld [vmem:[#allocation10 + $0x8a8] sm:$0xff]  ;;  %v9913_v51 = vpack.c.bf16 %v4719_v28, %v4715_v40 }
 0x560   : > { %9768 = vmatprep.subr.bf16.mxu1 %v9767_v1  ;;  %9892 = vmatprep.subr.bf16.mxu0 %v9891_v42  ;;  %v9901_v1 = vpack.c.bf16 %v4535_v52, %v4531_v46  ;;  %v9903_v42 = vpack.c.bf16 %v4544_v45, %v4540_v24  ;;  %v4723_v36 = vld [vmem:[#allocation10 + $0x880] sm:$0xff]  ;;  %v4748_v24 = vld [vmem:[#allocation10 + $0x948] sm:$0xff]  ;;  %v4714_v40 = vld [vmem:[#allocation10 + $0x838] sm:$0xff] }
 0x561   : > { %v4727_v48 = vld [vmem:[#allocation10 + $0x8a0] sm:$0xff]  ;;  %v4752_v45 = vld [vmem:[#allocation10 + $0x968] sm:$0xff] }
 0x562   : > { %v9917_v54 = vpack.c.bf16 %v4727_v48, %v4723_v36  ;;  %v4739_v46 = vld [vmem:[#allocation10 + $0x900] sm:$0xff]  ;;  %v4760_v32 = vld [vmem:[#allocation10 + $0x9a8] sm:$0xff]  ;;  %v4722_v36 = vld [vmem:[#allocation10 + $0x878] sm:$0xff] }
 0x563   : > { %9770 = vmatpush1.bf16.msra.mxu1 %v9769_v41  ;;  %9894 = vmatpush1.bf16.msra.mxu0 %v9893_v31  ;;  %v4707_v41 = vld [vmem:[#allocation10 + $0x800] sm:$0xff] }
 0x564   : > { %9772 = vmatprep.subr.bf16.mxu1 %v9771_v9  ;;  %9896 = vmatprep.subr.bf16.mxu0 %v9895_v0  ;;  %v4711_v31 = vld [vmem:[#allocation10 + $0x820] sm:$0xff]  ;;  %v9911_v0 = vpack.c.bf16 %v4720_v63, %v4716_v29 }
 0x565   : > { %v9909_v9 = vpack.c.bf16 %v4711_v31, %v4707_v41  ;;  %v4743_v52 = vld [vmem:[#allocation10 + $0x920] sm:$0xff]  ;;  %v4768_v41 = vld [vmem:[#allocation10 + $0x9e8] sm:$0xff] }
 0x566   : > { %v9925_v14 = vpack.c.bf16 %v4743_v52, %v4739_v46  ;;  %v4763_v63 = vld [vmem:[#allocation10 + $0x9c0] sm:$0xff]  ;;  %v4729_v46 = vld [vmem:[#allocation10 + $0x8b0] sm:$0xff]  ;;  %v4734_v52 = vld [vmem:[#allocation10 + $0x8d8] sm:$0xff] }
 0x567   : > { %9774 = vmatpush1.bf16.msra.mxu1 %v9773_v53  ;;  %9898 = vmatpush1.bf16.msra.mxu0 %v9897_v20  ;;  %v4732_v53 = vld [vmem:[#allocation10 + $0x8c8] sm:$0xff] }
 0x568   : > { %9776 = vmatprep.subr.bf16.mxu1 %v9775_v2  ;;  %9900 = vmatprep.subr.bf16.mxu0 %v9899_v39  ;;  %v4736_v20 = vld [vmem:[#allocation10 + $0x8e8] sm:$0xff] }
 0x569   : > { %v9919_v6 = vpack.c.bf16 %v4736_v20, %v4732_v53  ;;  %v4744_v2 = vld [vmem:[#allocation10 + $0x928] sm:$0xff]  ;;  %v3795_v53 = vmax.f32 %v12762_v11, 0.0 }
 0x56b   : > { %9778 = vmatpush1.bf16.msra.mxu1 %v9777_v43  ;;  %9902 = vmatpush1.bf16.msra.mxu0 %v9901_v1  ;;  %v4747_v43 = vld [vmem:[#allocation10 + $0x940] sm:$0xff] }
 0x56c   : > { %9904 = vmatprep.subr.bf16.mxu0 %v9903_v42  ;;  %v4751_v1 = vld [vmem:[#allocation10 + $0x960] sm:$0xff]  ;;  %v4756_v42 = vld [vmem:[#allocation10 + $0x988] sm:$0xff] }
 0x56d   : > { %v9929_v16 = vpack.c.bf16 %v4751_v1, %v4747_v43  ;;  %v9931_v60 = vpack.c.bf16 %v4760_v32, %v4756_v42  ;;  %v4737_v43 = vld [vmem:[#allocation10 + $0x8f0] sm:$0xff]  ;;  %v4742_v1 = vld [vmem:[#allocation10 + $0x918] sm:$0xff] }
 0x56e   : > { %4243 = vmatmul.mubr.f32.vlgmr.msra.gmra.mrb[108].mxu1 %v3787_v38  ;;  %v9915_v38 = vpack.c.bf16 %v4728_v26, %v4724_v4  ;;  %v4709_v26 = vld [vmem:[#allocation10 + $0x810] sm:$0xff]  ;;  %v4746_v42 = vld [vmem:[#allocation10 + $0x938] sm:$0xff] }
 0x56f   : > { %9906 = vmatpush1.bf16.msra.mxu0 %v9905_v50  ;;  %4248 = vmatprep.mubr.f32.mxu1 %v11516_v58  ;;  %v4759_v50 = vld [vmem:[#allocation10 + $0x9a0] sm:$0xff] }
 0x570   : > { %9908 = vmatprep.subr.bf16.mxu0 %v9907_v62  ;;  %v4764_v62 = vld [vmem:[#allocation10 + $0x9c8] sm:$0xff]  ;;  %v9933_v31 = vpack.c.bf16 %v4759_v50, %v4755_v35  ;;  %v4745_v35 = vld [vmem:[#allocation10 + $0x930] sm:$0xff]  ;;  %v4750_v50 = vld [vmem:[#allocation10 + $0x958] sm:$0xff] }
 0x571   : > { %v9935_v29 = vpack.c.bf16 %v4768_v41, %v4764_v62  ;;  %v4754_v62 = vld [vmem:[#allocation10 + $0x978] sm:$0xff] }
 0x572   : > { %4249 = vmatmul.mubr.f32.gmra.mrb[110].mxu1 %v3788_v15  ;;  %4687 = vmatmul.mubr.f32.vlgmr.msra.gmra.mrb[4].mxu0 %v3793_v8  ;;  %v4735_v15 = vld [vmem:[#allocation10 + $0x8e0] sm:$0xff]  ;;  %v4740_v8 = vld [vmem:[#allocation10 + $0x908] sm:$0xff] }
 0x573   : > { %9910 = vmatpush1.bf16.msra.mxu0 %v9909_v9  ;;  %4692 = vmatprep.mubr.f32.mxu0 %v11516_v58  ;;  %v9921_v39 = vpack.c.bf16 %v4735_v15, %v4731_v37  ;;  %v9923_v22 = vpack.c.bf16 %v4744_v2, %v4740_v8  ;;  %v4767_v9 = vld [vmem:[#allocation10 + $0x9e0] sm:$0xff]  ;;  %v4726_v37 = vld [vmem:[#allocation10 + $0x898] sm:$0xff]  ;;  %v3796_v2 = vmax.f32 %v12758_v7, 0.0 }
 0x574   : > { %9912 = vmatprep.subr.bf16.mxu0 %v9911_v0  ;;  %v4710_v0 = vld [vmem:[#allocation10 + $0x818] sm:$0xff]  ;;  %v9937_v28 = vpack.c.bf16 %v4767_v9, %v4763_v63  ;;  %v4753_v63 = vld [vmem:[#allocation10 + $0x970] sm:$0xff] }
 0x575   : > { %v9939_v4 = vpack.c.bf16 %v4714_v40, %v4710_v0  ;;  %v4730_v15 = vld [vmem:[#allocation10 + $0x8b8] sm:$0xff] }
 0x576   : > { %4693 = vmatmul.mubr.f32.gmra.mrb[6].mxu0 %v3794_v3  ;;  %v9927_v3 = vpack.c.bf16 %v4752_v45, %v4748_v24  ;;  %v4738_v24 = vld [vmem:[#allocation10 + $0x8f8] sm:$0xff] }
 0x577   : > { %9914 = vmatpush1.bf16.msra.mxu0 %v9913_v51  ;;  %4835 = vmatprep.mubr.f32.mxu0 %v11516_v58  ;;  %v4713_v51 = vld [vmem:[#allocation10 + $0x830] sm:$0xff]  ;;  %v4758_v9 = vld [vmem:[#allocation10 + $0x998] sm:$0xff] }
 0x578   : > { %9916 = vmatprep.subr.bf16.mxu0 %v9915_v38  ;;  %v4718_v38 = vld [vmem:[#allocation10 + $0x858] sm:$0xff]  ;;  %v9941_v48 = vpack.c.bf16 %v4713_v51, %v4709_v26  ;;  %v4761_v26 = vld [vmem:[#allocation10 + $0x9b0] sm:$0xff] }
 0x579   : > { %v9943_v20 = vpack.c.bf16 %v4722_v36, %v4718_v38  ;;  %v4762_v0 = vld [vmem:[#allocation10 + $0x9b8] sm:$0xff] }
 0x57a   : > { %v4766_v51 = vld [vmem:[#allocation10 + $0x9d8] sm:$0xff] }
 0x57b   : > { %9918 = vmatpush1.bf16.msra.mxu0 %v9917_v54  ;;  %v4717_v54 = vld [vmem:[#allocation10 + $0x850] sm:$0xff]  ;;  %v4770_v38 = vld [vmem:[#allocation10 + $0x9f8] sm:$0xff] }
 0x57c   : > { %9920 = vmatprep.subr.bf16.mxu0 %v9919_v6  ;;  %v4721_v6 = vld [vmem:[#allocation10 + $0x870] sm:$0xff] }
 0x57d   : > { %v9945_v8 = vpack.c.bf16 %v4721_v6, %v4717_v54  ;;  %v4769_v54 = vld [vmem:[#allocation10 + $0x9f0] sm:$0xff]  ;;  %v4934_v6 = vld [vmem:[#allocation10 + $0xa08] sm:$0xff] }
 0x57f   : > { %9922 = vmatpush1.bf16.msra.mxu0 %v9921_v39  ;;  %v9947_v39 = vpack.c.bf16 %v4730_v15, %v4726_v37  ;;  %v4938_v37 = vld [vmem:[#allocation10 + $0xa28] sm:$0xff] }
 0x580   : > { %9924 = vmatprep.subr.bf16.mxu0 %v9923_v22  ;;  %v4725_v22 = vld [vmem:[#allocation10 + $0x890] sm:$0xff] }
 0x581   : > { %v9949_v45 = vpack.c.bf16 %v4729_v46, %v4725_v22  ;;  %v4937_v22 = vld [vmem:[#allocation10 + $0xa20] sm:$0xff]  ;;  %v4942_v46 = vld [vmem:[#allocation10 + $0xa48] sm:$0xff] }
 0x583   : > { %9926 = vmatpush1.bf16.msra.mxu0 %v9925_v14  ;;  %v9951_v14 = vpack.c.bf16 %v4738_v24, %v4734_v52  ;;  %v4946_v52 = vld [vmem:[#allocation10 + $0xa68] sm:$0xff] }
 0x584   : > { %9928 = vmatprep.subr.bf16.mxu0 %v9927_v3  ;;  %v4733_v3 = vld [vmem:[#allocation10 + $0x8d0] sm:$0xff] }
 0x585   : > { %v9953_v32 = vpack.c.bf16 %v4737_v43, %v4733_v3  ;;  %v4945_v3 = vld [vmem:[#allocation10 + $0xa60] sm:$0xff]  ;;  %v4950_v43 = vld [vmem:[#allocation10 + $0xa88] sm:$0xff] }
 0x587   : > { %9930 = vmatpush1.bf16.msra.mxu0 %v9929_v16  ;;  %v9955_v16 = vpack.c.bf16 %v4746_v42, %v4742_v1  ;;  %v4954_v1 = vld [vmem:[#allocation10 + $0xaa8] sm:$0xff] }
 0x588   : > { %9932 = vmatprep.subr.bf16.mxu0 %v9931_v60  ;;  %v4741_v60 = vld [vmem:[#allocation10 + $0x910] sm:$0xff] }
 0x589   : > { %v9957_v41 = vpack.c.bf16 %v4745_v35, %v4741_v60  ;;  %v4953_v60 = vld [vmem:[#allocation10 + $0xaa0] sm:$0xff]  ;;  %v4958_v35 = vld [vmem:[#allocation10 + $0xac8] sm:$0xff] }
 0x58b   : > { %9934 = vmatpush1.bf16.msra.mxu0 %v9933_v31  ;;  %v9959_v31 = vpack.c.bf16 %v4754_v62, %v4750_v50  ;;  %v4962_v50 = vld [vmem:[#allocation10 + $0xae8] sm:$0xff] }
 0x58c   : > { %9936 = vmatprep.subr.bf16.mxu0 %v9935_v29  ;;  %v4749_v29 = vld [vmem:[#allocation10 + $0x950] sm:$0xff]  ;;  %v9983_v11 = vpack.c.bf16 %v4962_v50, %v4958_v35 }
 0x58d   : > { %v9961_v40 = vpack.c.bf16 %v4753_v63, %v4749_v29  ;;  %v4970_v29 = vld [vmem:[#allocation10 + $0xb28] sm:$0xff]  ;;  %v4943_v35 = vld [vmem:[#allocation10 + $0xa50] sm:$0xff] }
 0x58e   : > { %v4947_v50 = vld [vmem:[#allocation10 + $0xa70] sm:$0xff] }
 0x58f   : > { %9938 = vmatpush1.bf16.msra.mxu0 %v9937_v28  ;;  %v9963_v28 = vpack.c.bf16 %v4762_v0, %v4758_v9  ;;  %v4965_v0 = vld [vmem:[#allocation10 + $0xb00] sm:$0xff] }
 0x590   : > { %9940 = vmatprep.subr.bf16.mxu0 %v9939_v4  ;;  %v4757_v4 = vld [vmem:[#allocation10 + $0x990] sm:$0xff] }
 0x591   : > { %v9965_v36 = vpack.c.bf16 %v4761_v26, %v4757_v4  ;;  %v4978_v4 = vld [vmem:[#allocation10 + $0xb68] sm:$0xff]  ;;  %v4973_v26 = vld [vmem:[#allocation10 + $0xb40] sm:$0xff] }
 0x592   : > { %4836 = vmatmul.mubr.f32.vlgmr.msra.gmra.mrb[0].mxu0 %v3795_v53 }
 0x593   : > { %9942 = vmatpush1.bf16.msra.mxu0 %v9941_v48  ;;  %4841 = vmatprep.mubr.f32.mxu0 %v11516_v58  ;;  %v9967_v48 = vpack.c.bf16 %v4770_v38, %v4766_v51  ;;  %v4977_v51 = vld [vmem:[#allocation10 + $0xb60] sm:$0xff]  ;;  %v4982_v38 = vld [vmem:[#allocation10 + $0xb88] sm:$0xff] }
 0x594   : > { %9944 = vmatprep.subr.bf16.mxu0 %v9943_v20  ;;  %v4765_v20 = vld [vmem:[#allocation10 + $0x9d0] sm:$0xff] }
 0x595   : > { %v9969_v15 = vpack.c.bf16 %v4769_v54, %v4765_v20  ;;  %v4981_v54 = vld [vmem:[#allocation10 + $0xb80] sm:$0xff] }
 0x596   : > { %4842 = vmatmul.mubr.f32.gmra.mrb[2].mxu0 %v3796_v2 }
 0x597   : > { %9946 = vmatpush1.bf16.msra.mxu0 %v9945_v8  ;;  %4912 = vmatprep.mubr.f32.mxu0 %v11516_v58  ;;  %v9971_v8 = vpack.c.bf16 %v4938_v37, %v4934_v6  ;;  %v4985_v6 = vld [vmem:[#allocation10 + $0xba0] sm:$0xff]  ;;  %v4990_v37 = vld [vmem:[#allocation10 + $0xbc8] sm:$0xff] }
 0x598   : > { %9948 = vmatprep.subr.bf16.mxu0 %v9947_v39  ;;  %v4933_v39 = vld [vmem:[#allocation10 + $0xa00] sm:$0xff] }
 0x599   : > { %v9973_v24 = vpack.c.bf16 %v4937_v22, %v4933_v39  ;;  %v4989_v22 = vld [vmem:[#allocation10 + $0xbc0] sm:$0xff] }
 0x59b   : > { %9950 = vmatpush1.bf16.msra.mxu0 %v9949_v45  ;;  %v9975_v45 = vpack.c.bf16 %v4946_v52, %v4942_v46  ;;  %v4993_v46 = vld [vmem:[#allocation10 + $0xbe0] sm:$0xff]  ;;  %v4936_v52 = vld [vmem:[#allocation10 + $0xa18] sm:$0xff] }
 0x59c   : > { %9952 = vmatprep.subr.bf16.mxu0 %v9951_v14  ;;  %v4941_v14 = vld [vmem:[#allocation10 + $0xa40] sm:$0xff] }
 0x59d   : > { %v9977_v42 = vpack.c.bf16 %v4945_v3, %v4941_v14  ;;  %v4935_v3 = vld [vmem:[#allocation10 + $0xa10] sm:$0xff] }
 0x59f   : > { %9954 = vmatpush1.bf16.msra.mxu0 %v9953_v32  ;;  %v9979_v32 = vpack.c.bf16 %v4954_v1, %v4950_v43  ;;  %v4939_v43 = vld [vmem:[#allocation10 + $0xa30] sm:$0xff]  ;;  %v4944_v1 = vld [vmem:[#allocation10 + $0xa58] sm:$0xff] }
 0x5a0   : > { %9956 = vmatprep.subr.bf16.mxu0 %v9955_v16  ;;  %v4949_v16 = vld [vmem:[#allocation10 + $0xa80] sm:$0xff] }
 0x5a1   : > { %v9981_v62 = vpack.c.bf16 %v4953_v60, %v4949_v16  ;;  %v3797_v16 = vmax.f32 %v12771_v49, 0.0 }
 0x5a3   : > { %9958 = vmatpush1.bf16.msra.mxu0 %v9957_v41  ;;  %v4961_v41 = vld [vmem:[#allocation10 + $0xae0] sm:$0xff] }
 0x5a4   : > { %9960 = vmatprep.subr.bf16.mxu0 %v9959_v31  ;;  %v4966_v31 = vld [vmem:[#allocation10 + $0xb08] sm:$0xff] }
 0x5a5   : > { %v9987_v9 = vpack.c.bf16 %v4970_v29, %v4966_v31  ;;  %v4951_v29 = vld [vmem:[#allocation10 + $0xa90] sm:$0xff] }
 0x5a7   : > { %9962 = vmatpush1.bf16.msra.mxu0 %v9961_v40  ;;  %v4969_v40 = vld [vmem:[#allocation10 + $0xb20] sm:$0xff] }
 0x5a8   : > { %9964 = vmatprep.subr.bf16.mxu0 %v9963_v28  ;;  %v4974_v28 = vld [vmem:[#allocation10 + $0xb48] sm:$0xff]  ;;  %v9989_v7 = vpack.c.bf16 %v4969_v40, %v4965_v0  ;;  %v4964_v0 = vld [vmem:[#allocation10 + $0xaf8] sm:$0xff] }
 0x5ab   : > { %9966 = vmatpush1.bf16.msra.mxu0 %v9965_v36  ;;  %v4986_v36 = vld [vmem:[#allocation10 + $0xba8] sm:$0xff] }
 0x5ac   : > { %9968 = vmatprep.subr.bf16.mxu0 %v9967_v48  ;;  %v9993_v48 = vpack.c.bf16 %v4977_v51, %v4973_v26  ;;  %v9995_v20 = vpack.c.bf16 %v4986_v36, %v4982_v38  ;;  %v4972_v26 = vld [vmem:[#allocation10 + $0xb38] sm:$0xff]  ;;  %v4967_v36 = vld [vmem:[#allocation10 + $0xb10] sm:$0xff] }
 0x5af   : > { %9970 = vmatpush1.bf16.msra.mxu0 %v9969_v15  ;;  %v4994_v15 = vld [vmem:[#allocation10 + $0xbe8] sm:$0xff] }
 0x5b0   : > { %9972 = vmatprep.subr.bf16.mxu0 %v9971_v8  ;;  %v9997_v8 = vpack.c.bf16 %v4985_v6, %v4981_v54  ;;  %v9999_v39 = vpack.c.bf16 %v4994_v15, %v4990_v37  ;;  %v4980_v54 = vld [vmem:[#allocation10 + $0xb78] sm:$0xff]  ;;  %v4975_v15 = vld [vmem:[#allocation10 + $0xb50] sm:$0xff] }
 0x5b2   : > { %4913 = vmatmul.mubr.f32.vlgmr.msra.gmra.mrb[4].mxu0 %v3795_v53  ;;  %v4957_v53 = vld [vmem:[#allocation10 + $0xac0] sm:$0xff] }
 0x5b3   : > { %9974 = vmatpush1.bf16.msra.mxu0 %v9973_v24  ;;  %4918 = vmatprep.mubr.f32.mxu0 %v11516_v58  ;;  %v9985_v63 = vpack.c.bf16 %v4961_v41, %v4957_v53  ;;  %v4940_v24 = vld [vmem:[#allocation10 + $0xa38] sm:$0xff]  ;;  %v10009_v53 = vpack.c.bf16 %v4947_v50, %v4943_v35  ;;  %v3798_v41 = vmax.f32 %v12767_v34, 0.0  ;;  %v5164_v35 = vld [vmem:[#allocation10 + $0xc28] sm:$0xff] }
 0x5b4   : > { %9976 = vmatprep.subr.bf16.mxu0 %v9975_v45  ;;  %v10001_v45 = vpack.c.bf16 %v4993_v46, %v4989_v22  ;;  %v10003_v14 = vpack.c.bf16 %v4940_v24, %v4936_v52  ;;  %v4988_v22 = vld [vmem:[#allocation10 + $0xbb8] sm:$0xff]  ;;  %v4983_v24 = vld [vmem:[#allocation10 + $0xb90] sm:$0xff] }
 0x5b6   : > { %4919 = vmatmul.mubr.f32.gmra.mrb[6].mxu0 %v3796_v2  ;;  %v9991_v2 = vpack.c.bf16 %v4978_v4, %v4974_v28  ;;  %v4959_v4 = vld [vmem:[#allocation10 + $0xad0] sm:$0xff] }
 0x5b7   : > { %9978 = vmatpush1.bf16.msra.mxu0 %v9977_v42  ;;  %5061 = vmatprep.mubr.f32.mxu0 %v11516_v58  ;;  %v4948_v42 = vld [vmem:[#allocation10 + $0xa78] sm:$0xff] }
 0x5b8   : > { %9980 = vmatprep.subr.bf16.mxu0 %v9979_v32  ;;  %v10005_v32 = vpack.c.bf16 %v4939_v43, %v4935_v3  ;;  %v10007_v60 = vpack.c.bf16 %v4948_v42, %v4944_v1  ;;  %v4996_v3 = vld [vmem:[#allocation10 + $0xbf8] sm:$0xff]  ;;  %v4991_v42 = vld [vmem:[#allocation10 + $0xbd0] sm:$0xff] }
 0x5bb   : > { %9982 = vmatpush1.bf16.msra.mxu0 %v9981_v62  ;;  %v4952_v62 = vld [vmem:[#allocation10 + $0xa98] sm:$0xff] }
 0x5bc   : > { %9984 = vmatprep.subr.bf16.mxu0 %v9983_v11  ;;  %v4956_v11 = vld [vmem:[#allocation10 + $0xab8] sm:$0xff] }
 0x5bd   : > { %v10011_v31 = vpack.c.bf16 %v4956_v11, %v4952_v62  ;;  %v5159_v11 = vld [vmem:[#allocation10 + $0xc00] sm:$0xff] }
 0x5bf   : > { %9986 = vmatpush1.bf16.msra.mxu0 %v9985_v63  ;;  %v4955_v63 = vld [vmem:[#allocation10 + $0xab0] sm:$0xff] }
 0x5c0   : > { %9988 = vmatprep.subr.bf16.mxu0 %v9987_v9  ;;  %v4960_v9 = vld [vmem:[#allocation10 + $0xad8] sm:$0xff]  ;;  %v10013_v40 = vpack.c.bf16 %v4955_v63, %v4951_v29  ;;  %v5172_v29 = vld [vmem:[#allocation10 + $0xc68] sm:$0xff] }
 0x5c1   : > { %v10015_v28 = vpack.c.bf16 %v4964_v0, %v4960_v9  ;;  %v5167_v0 = vld [vmem:[#allocation10 + $0xc40] sm:$0xff] }
 0x5c3   : > { %9990 = vmatpush1.bf16.msra.mxu0 %v9989_v7  ;;  %v4963_v7 = vld [vmem:[#allocation10 + $0xaf0] sm:$0xff] }
 0x5c4   : > { %9992 = vmatprep.subr.bf16.mxu0 %v9991_v2  ;;  %v4968_v2 = vld [vmem:[#allocation10 + $0xb18] sm:$0xff]  ;;  %v10017_v51 = vpack.c.bf16 %v4963_v7, %v4959_v4  ;;  %v5180_v4 = vld [vmem:[#allocation10 + $0xca8] sm:$0xff] }
 0x5c5   : > { %v10019_v38 = vpack.c.bf16 %v4972_v26, %v4968_v2  ;;  %v5175_v26 = vld [vmem:[#allocation10 + $0xc80] sm:$0xff] }
 0x5c7   : > { %9994 = vmatpush1.bf16.msra.mxu0 %v9993_v48  ;;  %v4971_v48 = vld [vmem:[#allocation10 + $0xb30] sm:$0xff] }
 0x5c8   : > { %9996 = vmatprep.subr.bf16.mxu0 %v9995_v20  ;;  %v4976_v20 = vld [vmem:[#allocation10 + $0xb58] sm:$0xff]  ;;  %v10021_v6 = vpack.c.bf16 %v4971_v48, %v4967_v36  ;;  %v5188_v36 = vld [vmem:[#allocation10 + $0xce8] sm:$0xff] }
 0x5c9   : > { %v10023_v37 = vpack.c.bf16 %v4980_v54, %v4976_v20  ;;  %v5187_v20 = vld [vmem:[#allocation10 + $0xce0] sm:$0xff]  ;;  %v5192_v54 = vld [vmem:[#allocation10 + $0xd08] sm:$0xff] }
 0x5cb   : > { %9998 = vmatpush1.bf16.msra.mxu0 %v9997_v8  ;;  %v4979_v8 = vld [vmem:[#allocation10 + $0xb70] sm:$0xff] }
 0x5cc   : > { %10000 = vmatprep.subr.bf16.mxu0 %v9999_v39  ;;  %v4984_v39 = vld [vmem:[#allocation10 + $0xb98] sm:$0xff]  ;;  %v10025_v46 = vpack.c.bf16 %v4979_v8, %v4975_v15  ;;  %v5191_v8 = vld [vmem:[#allocation10 + $0xd00] sm:$0xff] }
 0x5cd   : > { %v10027_v52 = vpack.c.bf16 %v4988_v22, %v4984_v39  ;;  %v5195_v39 = vld [vmem:[#allocation10 + $0xd20] sm:$0xff]  ;;  %v5200_v22 = vld [vmem:[#allocation10 + $0xd48] sm:$0xff] }
 0x5ce   : > { %v10053_v34 = vpack.c.bf16 %v5195_v39, %v5191_v8  ;;  %v5185_v39 = vld [vmem:[#allocation10 + $0xcd0] sm:$0xff] }
 0x5cf   : > { %10002 = vmatpush1.bf16.msra.mxu0 %v10001_v45  ;;  %v4987_v45 = vld [vmem:[#allocation10 + $0xbb0] sm:$0xff] }
 0x5d0   : > { %10004 = vmatprep.subr.bf16.mxu0 %v10003_v14  ;;  %v4992_v14 = vld [vmem:[#allocation10 + $0xbd8] sm:$0xff]  ;;  %v10029_v43 = vpack.c.bf16 %v4987_v45, %v4983_v24  ;;  %v5203_v24 = vld [vmem:[#allocation10 + $0xd60] sm:$0xff]  ;;  %v5208_v45 = vld [vmem:[#allocation10 + $0xd88] sm:$0xff] }
 0x5d1   : > { %v10031_v1 = vpack.c.bf16 %v4996_v3, %v4992_v14  ;;  %v5212_v14 = vld [vmem:[#allocation10 + $0xda8] sm:$0xff] }
 0x5d2   : > { %5062 = vmatmul.mubr.f32.vlgmr.msra.gmra.mrb[0].mxu0 %v3797_v16 }
 0x5d3   : > { %10006 = vmatpush1.bf16.msra.mxu0 %v10005_v32  ;;  %5067 = vmatprep.mubr.f32.mxu0 %v11516_v58  ;;  %v4995_v32 = vld [vmem:[#allocation10 + $0xbf0] sm:$0xff] }
 0x5d4   : > { %10008 = vmatprep.subr.bf16.mxu0 %v10007_v60  ;;  %v5160_v60 = vld [vmem:[#allocation10 + $0xc08] sm:$0xff]  ;;  %v10033_v50 = vpack.c.bf16 %v4995_v32, %v4991_v42  ;;  %v5211_v42 = vld [vmem:[#allocation10 + $0xda0] sm:$0xff] }
 0x5d5   : > { %v10035_v62 = vpack.c.bf16 %v5164_v35, %v5160_v60  ;;  %v5216_v32 = vld [vmem:[#allocation10 + $0xdc8] sm:$0xff] }
 0x5d6   : > { %5068 = vmatmul.mubr.f32.gmra.mrb[2].mxu0 %v3798_v41  ;;  %v5220_v60 = vld [vmem:[#allocation10 + $0xde8] sm:$0xff] }
 0x5d7   : > { %10010 = vmatpush1.bf16.msra.mxu0 %v10009_v53  ;;  %5138 = vmatprep.mubr.f32.mxu0 %v11516_v58  ;;  %v5163_v53 = vld [vmem:[#allocation10 + $0xc20] sm:$0xff] }
 0x5d8   : > { %10012 = vmatprep.subr.bf16.mxu0 %v10011_v31  ;;  %v5168_v31 = vld [vmem:[#allocation10 + $0xc48] sm:$0xff]  ;;  %v10037_v63 = vpack.c.bf16 %v5163_v53, %v5159_v11  ;;  %v5219_v11 = vld [vmem:[#allocation10 + $0xde0] sm:$0xff]  ;;  %v5162_v53 = vld [vmem:[#allocation10 + $0xc18] sm:$0xff] }
 0x5d9   : > { %v10039_v9 = vpack.c.bf16 %v5172_v29, %v5168_v31  ;;  %v5166_v31 = vld [vmem:[#allocation10 + $0xc38] sm:$0xff] }
 0x5db   : > { %10014 = vmatpush1.bf16.msra.mxu0 %v10013_v40  ;;  %v5171_v40 = vld [vmem:[#allocation10 + $0xc60] sm:$0xff] }
 0x5dc   : > { %10016 = vmatprep.subr.bf16.mxu0 %v10015_v28  ;;  %v5176_v28 = vld [vmem:[#allocation10 + $0xc88] sm:$0xff]  ;;  %v10041_v7 = vpack.c.bf16 %v5171_v40, %v5167_v0  ;;  %v5165_v0 = vld [vmem:[#allocation10 + $0xc30] sm:$0xff]  ;;  %v5170_v40 = vld [vmem:[#allocation10 + $0xc58] sm:$0xff] }
 0x5dd   : > { %v10043_v2 = vpack.c.bf16 %v5180_v4, %v5176_v28  ;;  %v5174_v28 = vld [vmem:[#allocation10 + $0xc78] sm:$0xff] }
 0x5df   : > { %10018 = vmatpush1.bf16.msra.mxu0 %v10017_v51  ;;  %v5179_v51 = vld [vmem:[#allocation10 + $0xca0] sm:$0xff] }
 0x5e0   : > { %10020 = vmatprep.subr.bf16.mxu0 %v10019_v38  ;;  %v5184_v38 = vld [vmem:[#allocation10 + $0xcc8] sm:$0xff]  ;;  %v10045_v48 = vpack.c.bf16 %v5179_v51, %v5175_v26  ;;  %v5169_v26 = vld [vmem:[#allocation10 + $0xc50] sm:$0xff] }
 0x5e1   : > { %v10047_v49 = vpack.c.bf16 %v5188_v36, %v5184_v38  ;;  %v5173_v51 = vld [vmem:[#allocation10 + $0xc70] sm:$0xff]  ;;  %v5178_v38 = vld [vmem:[#allocation10 + $0xc98] sm:$0xff] }
 0x5e2   : > { %v5182_v36 = vld [vmem:[#allocation10 + $0xcb8] sm:$0xff] }
 0x5e3   : > { %10022 = vmatpush1.bf16.msra.mxu0 %v10021_v6  ;;  %v5196_v6 = vld [vmem:[#allocation10 + $0xd28] sm:$0xff] }
 0x5e4   : > { %10024 = vmatprep.subr.bf16.mxu0 %v10023_v37  ;;  %v10051_v15 = vpack.c.bf16 %v5196_v6, %v5192_v54  ;;  %v5181_v54 = vld [vmem:[#allocation10 + $0xcb0] sm:$0xff]  ;;  %v5186_v6 = vld [vmem:[#allocation10 + $0xcd8] sm:$0xff] }
 0x5e7   : > { %10026 = vmatpush1.bf16.msra.mxu0 %v10025_v46  ;;  %v5204_v46 = vld [vmem:[#allocation10 + $0xd68] sm:$0xff] }
 0x5e8   : > { %10028 = vmatprep.subr.bf16.mxu0 %v10027_v52  ;;  %v5199_v52 = vld [vmem:[#allocation10 + $0xd40] sm:$0xff] }
 0x5e9   : > { %v10057_v3 = vpack.c.bf16 %v5203_v24, %v5199_v52  ;;  %v5193_v24 = vld [vmem:[#allocation10 + $0xd10] sm:$0xff] }
 0x5eb   : > { %10030 = vmatpush1.bf16.msra.mxu0 %v10029_v43  ;;  %v10059_v43 = vpack.c.bf16 %v5212_v14, %v5208_v45  ;;  %v5197_v45 = vld [vmem:[#allocation10 + $0xd30] sm:$0xff]  ;;  %v5202_v14 = vld [vmem:[#allocation10 + $0xd58] sm:$0xff] }
 0x5ec   : > { %10032 = vmatprep.subr.bf16.mxu0 %v10031_v1  ;;  %v5207_v1 = vld [vmem:[#allocation10 + $0xd80] sm:$0xff] }
 0x5ed   : > { %v10061_v35 = vpack.c.bf16 %v5211_v42, %v5207_v1  ;;  %v5201_v42 = vld [vmem:[#allocation10 + $0xd50] sm:$0xff] }
 0x5ef   : > { %10034 = vmatpush1.bf16.msra.mxu0 %v10033_v50  ;;  %v10063_v50 = vpack.c.bf16 %v5220_v60, %v5216_v32  ;;  %v5205_v32 = vld [vmem:[#allocation10 + $0xd70] sm:$0xff] }
 0x5f0   : > { %10036 = vmatprep.subr.bf16.mxu0 %v10035_v62  ;;  %v5215_v62 = vld [vmem:[#allocation10 + $0xdc0] sm:$0xff] }
 0x5f1   : > { %v10065_v29 = vpack.c.bf16 %v5219_v11, %v5215_v62  ;;  %v10089_v11 = vpack.c.bf16 %v5205_v32, %v5201_v42  ;;  %v5422_v42 = vld [vmem:[#allocation10 + $0xf28] sm:$0xff] }
 0x5f2   : > { %5139 = vmatmul.mubr.f32.vlgmr.msra.gmra.mrb[4].mxu0 %v3797_v16  ;;  %v5183_v16 = vld [vmem:[#allocation10 + $0xcc0] sm:$0xff] }
 0x5f3   : > { %10038 = vmatpush1.bf16.msra.mxu0 %v10037_v63  ;;  %5144 = vmatprep.mubr.f32.mxu0 %v11516_v58  ;;  %v10049_v37 = vpack.c.bf16 %v5187_v20, %v5183_v16  ;;  %v10067_v63 = vpack.c.bf16 %v5166_v31, %v5162_v53  ;;  %v10075_v16 = vpack.c.bf16 %v5182_v36, %v5178_v38  ;;  %v5177_v20 = vld [vmem:[#allocation10 + $0xc90] sm:$0xff]  ;;  %v5390_v38 = vld [vmem:[#allocation10 + $0xe28] sm:$0xff] }
 0x5f4   : > { %10040 = vmatprep.subr.bf16.mxu0 %v10039_v9  ;;  %v5161_v9 = vld [vmem:[#allocation10 + $0xc10] sm:$0xff] }
 0x5f5   : > { %v10069_v4 = vpack.c.bf16 %v5165_v0, %v5161_v9  ;;  %v5209_v31 = vld [vmem:[#allocation10 + $0xd90] sm:$0xff]  ;;  %v5218_v9 = vld [vmem:[#allocation10 + $0xdd8] sm:$0xff] }
 0x5f6   : > { %5145 = vmatmul.mubr.f32.gmra.mrb[6].mxu0 %v3798_v41  ;;  %v10055_v41 = vpack.c.bf16 %v5204_v46, %v5200_v22  ;;  %v5189_v22 = vld [vmem:[#allocation10 + $0xcf0] sm:$0xff]  ;;  %v5194_v46 = vld [vmem:[#allocation10 + $0xd18] sm:$0xff] }
 0x5f7   : > { %10042 = vmatpush1.bf16.msra.mxu0 %v10041_v7  ;;  %5287 = vmatprep.mubr.f32.mxu0 %v11516_v58  ;;  %v3799_v7 = vmax.f32 %v12777_v17, 0.0  ;;  %v5222_v0 = vld [vmem:[#allocation10 + $0xdf8] sm:$0xff] }
 0x5f8   : > { %10044 = vmatprep.subr.bf16.mxu0 %v10043_v2  ;;  %v10071_v2 = vpack.c.bf16 %v5174_v28, %v5170_v40 }
 0x5fb   : > { %10046 = vmatpush1.bf16.msra.mxu0 %v10045_v48  ;;  %v10073_v48 = vpack.c.bf16 %v5173_v51, %v5169_v26  ;;  %v5221_v26 = vld [vmem:[#allocation10 + $0xdf0] sm:$0xff]  ;;  %v5386_v51 = vld [vmem:[#allocation10 + $0xe08] sm:$0xff] }
 0x5fc   : > { %10048 = vmatprep.subr.bf16.mxu0 %v10047_v49  ;;  %v3800_v49 = vmax.f32 %v12774_v23, 0.0 }
 0x5ff   : > { %10050 = vmatpush1.bf16.msra.mxu0 %v10049_v37  ;;  %v5190_v37 = vld [vmem:[#allocation10 + $0xcf8] sm:$0xff] }
 0x600   : > { %10052 = vmatprep.subr.bf16.mxu0 %v10051_v15  ;;  %v10077_v15 = vpack.c.bf16 %v5181_v54, %v5177_v20  ;;  %v10079_v8 = vpack.c.bf16 %v5190_v37, %v5186_v6  ;;  %v5389_v20 = vld [vmem:[#allocation10 + $0xe20] sm:$0xff]  ;;  %v5394_v54 = vld [vmem:[#allocation10 + $0xe48] sm:$0xff] }
 0x601   : > { %v5398_v6 = vld [vmem:[#allocation10 + $0xe68] sm:$0xff] }
 0x603   : > { %10054 = vmatpush1.bf16.msra.mxu0 %v10053_v34  ;;  %v5198_v34 = vld [vmem:[#allocation10 + $0xd38] sm:$0xff] }
 0x604   : > { %10056 = vmatprep.subr.bf16.mxu0 %v10055_v41  ;;  %v10081_v41 = vpack.c.bf16 %v5189_v22, %v5185_v39  ;;  %v10083_v52 = vpack.c.bf16 %v5198_v34, %v5194_v46  ;;  %v5397_v39 = vld [vmem:[#allocation10 + $0xe60] sm:$0xff]  ;;  %v5402_v22 = vld [vmem:[#allocation10 + $0xe88] sm:$0xff] }
 0x605   : > { %v5406_v46 = vld [vmem:[#allocation10 + $0xea8] sm:$0xff] }
 0x607   : > { %10058 = vmatpush1.bf16.msra.mxu0 %v10057_v3  ;;  %v5206_v3 = vld [vmem:[#allocation10 + $0xd78] sm:$0xff] }
 0x608   : > { %10060 = vmatprep.subr.bf16.mxu0 %v10059_v43  ;;  %v10085_v43 = vpack.c.bf16 %v5197_v45, %v5193_v24  ;;  %v10087_v1 = vpack.c.bf16 %v5206_v3, %v5202_v14  ;;  %v5405_v24 = vld [vmem:[#allocation10 + $0xea0] sm:$0xff]  ;;  %v5410_v45 = vld [vmem:[#allocation10 + $0xec8] sm:$0xff] }
 0x609   : > { %v5414_v14 = vld [vmem:[#allocation10 + $0xee8] sm:$0xff] }
 0x60a   : > { %v10111_v17 = vpack.c.bf16 %v5414_v14, %v5410_v45  ;;  %v5400_v45 = vld [vmem:[#allocation10 + $0xe78] sm:$0xff] }
 0x60b   : > { %10062 = vmatpush1.bf16.msra.mxu0 %v10061_v35  ;;  %v5210_v35 = vld [vmem:[#allocation10 + $0xd98] sm:$0xff] }
 0x60c   : > { %10064 = vmatprep.subr.bf16.mxu0 %v10063_v50  ;;  %v5214_v50 = vld [vmem:[#allocation10 + $0xdb8] sm:$0xff] }
 0x60d   : > { %v10091_v53 = vpack.c.bf16 %v5214_v50, %v5210_v35  ;;  %v5417_v50 = vld [vmem:[#allocation10 + $0xf00] sm:$0xff] }
 0x60f   : > { %10066 = vmatpush1.bf16.msra.mxu0 %v10065_v29  ;;  %v5213_v29 = vld [vmem:[#allocation10 + $0xdb0] sm:$0xff] }
 0x610   : > { %10068 = vmatprep.subr.bf16.mxu0 %v10067_v63  ;;  %v10093_v28 = vpack.c.bf16 %v5213_v29, %v5209_v31  ;;  %v5430_v31 = vld [vmem:[#allocation10 + $0xf68] sm:$0xff]  ;;  %v5425_v29 = vld [vmem:[#allocation10 + $0xf40] sm:$0xff] }
 0x612   : > { %5288 = vmatmul.mubr.f32.vlgmr.msra.gmra.mrb[0].mxu0 %v3799_v7 }
 0x613   : > { %10070 = vmatpush1.bf16.msra.mxu0 %v10069_v4  ;;  %5293 = vmatprep.mubr.f32.mxu0 %v11516_v58  ;;  %v10095_v4 = vpack.c.bf16 %v5222_v0, %v5218_v9  ;;  %v5429_v9 = vld [vmem:[#allocation10 + $0xf60] sm:$0xff] }
 0x614   : > { %10072 = vmatprep.subr.bf16.mxu0 %v10071_v2  ;;  %v5217_v2 = vld [vmem:[#allocation10 + $0xdd0] sm:$0xff] }
 0x615   : > { %v10097_v36 = vpack.c.bf16 %v5221_v26, %v5217_v2  ;;  %v10121_v26 = vpack.c.bf16 %v5429_v9, %v5425_v29  ;;  %v5411_v9 = vld [vmem:[#allocation10 + $0xed0] sm:$0xff] }
 0x616   : > { %5294 = vmatmul.mubr.f32.gmra.mrb[2].mxu0 %v3800_v49 }
 0x617   : > { %10074 = vmatpush1.bf16.msra.mxu0 %v10073_v48  ;;  %5364 = vmatprep.mubr.f32.mxu0 %v11516_v58  ;;  %v10099_v48 = vpack.c.bf16 %v5390_v38, %v5386_v51  ;;  %v5433_v38 = vld [vmem:[#allocation10 + $0xf80] sm:$0xff] }
 0x618   : > { %10076 = vmatprep.subr.bf16.mxu0 %v10075_v16  ;;  %v5385_v16 = vld [vmem:[#allocation10 + $0xe00] sm:$0xff] }
 0x619   : > { %v10101_v37 = vpack.c.bf16 %v5389_v20, %v5385_v16  ;;  %v5442_v16 = vld [vmem:[#allocation10 + $0xfc8] sm:$0xff] }
 0x61a   : > { %v5446_v20 = vld [vmem:[#allocation10 + $0xfe8] sm:$0xff] }
 0x61b   : > { %10078 = vmatpush1.bf16.msra.mxu0 %v10077_v15  ;;  %v10103_v15 = vpack.c.bf16 %v5398_v6, %v5394_v54 }
 0x61c   : > { %10080 = vmatprep.subr.bf16.mxu0 %v10079_v8  ;;  %v5393_v8 = vld [vmem:[#allocation10 + $0xe40] sm:$0xff] }
 0x61d   : > { %v10105_v34 = vpack.c.bf16 %v5397_v39, %v5393_v8  ;;  %v5445_v8 = vld [vmem:[#allocation10 + $0xfe0] sm:$0xff]  ;;  %v5388_v39 = vld [vmem:[#allocation10 + $0xe18] sm:$0xff] }
 0x61f   : > { %10082 = vmatpush1.bf16.msra.mxu0 %v10081_v41  ;;  %v10107_v41 = vpack.c.bf16 %v5406_v46, %v5402_v22  ;;  %v5392_v22 = vld [vmem:[#allocation10 + $0xe38] sm:$0xff] }
 0x620   : > { %10084 = vmatprep.subr.bf16.mxu0 %v10083_v52  ;;  %v5401_v52 = vld [vmem:[#allocation10 + $0xe80] sm:$0xff] }
 0x621   : > { %v12908_v60 = vpop.f32.mrb[104].mxu1  ;;  %v10109_v3 = vpack.c.bf16 %v5405_v24, %v5401_v52  ;;  %v5391_v52 = vld [vmem:[#allocation10 + $0xe30] sm:$0xff]  ;;  %v5396_v24 = vld [vmem:[#allocation10 + $0xe58] sm:$0xff] }
 0x622   : > { %v12910_v62 = vpop.f32.mrb[105].mxu1 }
 0x623   : > { %10086 = vmatpush1.bf16.msra.mxu0 %v10085_v43  ;;  %v5413_v43 = vld [vmem:[#allocation10 + $0xee0] sm:$0xff] }
 0x624   : > { %10088 = vmatprep.subr.bf16.mxu0 %v10087_v1  ;;  %v5418_v1 = vld [vmem:[#allocation10 + $0xf08] sm:$0xff] }
 0x625   : > { %v12912_v63 = vpop.f32.mrb[106].mxu1  ;;  %v10115_v35 = vpack.c.bf16 %v5422_v42, %v5418_v1  ;;  %v5404_v1 = vld [vmem:[#allocation10 + $0xe98] sm:$0xff] }
 0x626   : > { %v12914_v40 = vpop.f32.mrb[107].mxu1  ;;  %v5408_v42 = vld [vmem:[#allocation10 + $0xeb8] sm:$0xff] }
 0x627   : > { %10090 = vmatpush1.bf16.msra.mxu0 %v10089_v11  ;;  %v5421_v11 = vld [vmem:[#allocation10 + $0xf20] sm:$0xff] }
 0x628   : > { %10092 = vmatprep.subr.bf16.mxu0 %v10091_v53  ;;  %v5426_v53 = vld [vmem:[#allocation10 + $0xf48] sm:$0xff]  ;;  %v10117_v23 = vpack.c.bf16 %v5421_v11, %v5417_v50  ;;  %v10139_v50 = vpack.c.bf16 %v5408_v42, %v5404_v1  ;;  %v5403_v11 = vld [vmem:[#allocation10 + $0xe90] sm:$0xff] }
 0x629   : > { %v5447_v1 = vld [vmem:[#allocation10 + $0xff0] sm:$0xff]  ;;  %v5612_v42 = vld [vmem:[#allocation10 + $0x1008] sm:$0xff] }
 0x62b   : > { %10094 = vmatpush1.bf16.msra.mxu0 %v10093_v28  ;;  %v5434_v28 = vld [vmem:[#allocation10 + $0xf88] sm:$0xff] }
 0x62c   : > { %10096 = vmatprep.subr.bf16.mxu0 %v10095_v4  ;;  %v5438_v4 = vld [vmem:[#allocation10 + $0xfa8] sm:$0xff] }
 0x62d   : > { %v10123_v51 = vpack.c.bf16 %v5438_v4, %v5434_v28  ;;  %v5415_v28 = vld [vmem:[#allocation10 + $0xef0] sm:$0xff]  ;;  %v5420_v4 = vld [vmem:[#allocation10 + $0xf18] sm:$0xff] }
 0x62f   : > { %10098 = vmatpush1.bf16.msra.mxu0 %v10097_v36  ;;  %v5437_v36 = vld [vmem:[#allocation10 + $0xfa0] sm:$0xff] }
 0x630   : > { %10100 = vmatprep.subr.bf16.mxu0 %v10099_v48  ;;  %v10125_v6 = vpack.c.bf16 %v5437_v36, %v5433_v38  ;;  %v5419_v36 = vld [vmem:[#allocation10 + $0xf10] sm:$0xff] }
 0x632   : > { %5365 = vmatmul.mubr.f32.vlgmr.msra.gmra.mrb[4].mxu0 %v3799_v7  ;;  %v5409_v7 = vld [vmem:[#allocation10 + $0xec0] sm:$0xff] }
 0x633   : > { %10102 = vmatpush1.bf16.msra.mxu0 %v10101_v37  ;;  %5370 = vmatprep.mubr.f32.mxu0 %v11516_v58  ;;  %v10113_v32 = vpack.c.bf16 %v5413_v43, %v5409_v7  ;;  %v10127_v37 = vpack.c.bf16 %v5446_v20, %v5442_v16  ;;  %v5395_v7 = vld [vmem:[#allocation10 + $0xe50] sm:$0xff]  ;;  %v5428_v20 = vld [vmem:[#allocation10 + $0xf58] sm:$0xff] }
 0x634   : > { %10104 = vmatprep.subr.bf16.mxu0 %v10103_v15  ;;  %v5441_v15 = vld [vmem:[#allocation10 + $0xfc0] sm:$0xff]  ;;  %v5399_v43 = vld [vmem:[#allocation10 + $0xe70] sm:$0xff] }
 0x635   : > { %v10129_v46 = vpack.c.bf16 %v5445_v8, %v5441_v15  ;;  %v5423_v16 = vld [vmem:[#allocation10 + $0xf30] sm:$0xff] }
 0x636   : > { %5371 = vmatmul.mubr.f32.gmra.mrb[6].mxu0 %v3800_v49  ;;  %v10119_v49 = vpack.c.bf16 %v5430_v31, %v5426_v53  ;;  %v5407_v53 = vld [vmem:[#allocation10 + $0xeb0] sm:$0xff]  ;;  %v5412_v31 = vld [vmem:[#allocation10 + $0xed8] sm:$0xff] }
 0x637   : > { %10106 = vmatpush1.bf16.msra.mxu0 %v10105_v34  ;;  %5513 = vmatprep.mubr.f32.mxu0 %v11516_v58  ;;  %v10131_v34 = vpack.c.bf16 %v5392_v22, %v5388_v39  ;;  %v5427_v8 = vld [vmem:[#allocation10 + $0xf50] sm:$0xff]  ;;  %v5436_v22 = vld [vmem:[#allocation10 + $0xf98] sm:$0xff] }
 0x638   : > { %10108 = vmatprep.subr.bf16.mxu0 %v10107_v41  ;;  %v5387_v41 = vld [vmem:[#allocation10 + $0xe10] sm:$0xff] }
 0x639   : > { %v10133_v14 = vpack.c.bf16 %v5391_v52, %v5387_v41  ;;  %v5431_v39 = vld [vmem:[#allocation10 + $0xf70] sm:$0xff] }
 0x63a   : > { %v5435_v52 = vld [vmem:[#allocation10 + $0xf90] sm:$0xff] }
 0x63b   : > { %10110 = vmatpush1.bf16.msra.mxu0 %v10109_v3  ;;  %v3801_v3 = vmax.f32 %v12783_v18, 0.0 }
 0x63c   : > { %10112 = vmatprep.subr.bf16.mxu0 %v10111_v17  ;;  %v10135_v17 = vpack.c.bf16 %v5400_v45, %v5396_v24  ;;  %v5439_v24 = vld [vmem:[#allocation10 + $0xfb0] sm:$0xff]  ;;  %v5444_v45 = vld [vmem:[#allocation10 + $0xfd8] sm:$0xff] }
 0x63f   : > { %10114 = vmatpush1.bf16.msra.mxu0 %v10113_v32  ;;  %v10137_v32 = vpack.c.bf16 %v5399_v43, %v5395_v7  ;;  %v5443_v43 = vld [vmem:[#allocation10 + $0xfd0] sm:$0xff] }
 0x640   : > { %10116 = vmatprep.subr.bf16.mxu0 %v10115_v35  ;;  %v3802_v35 = vmax.f32 %v12780_v5, 0.0 }
 0x641   : > { %v12922_v0 = vpop.f32.mrb[108].mxu1 }
 0x642   : > { %v12924_v2 = vpop.f32.mrb[109].mxu1 }
 0x643   : > { %10118 = vmatpush1.bf16.msra.mxu0 %v10117_v23  ;;  %v5416_v23 = vld [vmem:[#allocation10 + $0xef8] sm:$0xff] }
 0x644   : > { %10120 = vmatprep.subr.bf16.mxu0 %v10119_v49  ;;  %v10141_v49 = vpack.c.bf16 %v5407_v53, %v5403_v11  ;;  %v10143_v29 = vpack.c.bf16 %v5416_v23, %v5412_v31  ;;  %v5611_v53 = vld [vmem:[#allocation10 + $0x1000] sm:$0xff]  ;;  %v5620_v23 = vld [vmem:[#allocation10 + $0x1048] sm:$0xff] }
 0x645   : > { %v12926_v48 = vpop.f32.mrb[110].mxu1  ;;  %v5615_v31 = vld [vmem:[#allocation10 + $0x1020] sm:$0xff] }
 0x646   : > { %v12928_v54 = vpop.f32.mrb[111].mxu1 }
 0x647   : > { %10122 = vmatpush1.bf16.msra.mxu0 %v10121_v26  ;;  %v5424_v26 = vld [vmem:[#allocation10 + $0xf38] sm:$0xff] }
 0x648   : > { %10124 = vmatprep.subr.bf16.mxu0 %v10123_v51  ;;  %v10145_v51 = vpack.c.bf16 %v5415_v28, %v5411_v9  ;;  %v10147_v38 = vpack.c.bf16 %v5424_v26, %v5420_v4  ;;  %v5619_v28 = vld [vmem:[#allocation10 + $0x1040] sm:$0xff]  ;;  %v5628_v26 = vld [vmem:[#allocation10 + $0x1088] sm:$0xff] }
 0x649   : > { %v5623_v4 = vld [vmem:[#allocation10 + $0x1060] sm:$0xff] }
 0x64b   : > { %10126 = vmatpush1.bf16.msra.mxu0 %v10125_v6  ;;  %v5432_v6 = vld [vmem:[#allocation10 + $0xf78] sm:$0xff] }
 0x64c   : > { %10128 = vmatprep.subr.bf16.mxu0 %v10127_v37  ;;  %v10149_v37 = vpack.c.bf16 %v5423_v16, %v5419_v36  ;;  %v10151_v15 = vpack.c.bf16 %v5432_v6, %v5428_v20  ;;  %v5627_v16 = vld [vmem:[#allocation10 + $0x1080] sm:$0xff]  ;;  %v5636_v6 = vld [vmem:[#allocation10 + $0x10c8] sm:$0xff] }
 0x64d   : > { %v5631_v20 = vld [vmem:[#allocation10 + $0x10a0] sm:$0xff] }
 0x64f   : > { %10130 = vmatpush1.bf16.msra.mxu0 %v10129_v46  ;;  %v5440_v46 = vld [vmem:[#allocation10 + $0xfb8] sm:$0xff] }
 0x650   : > { %10132 = vmatprep.subr.bf16.mxu0 %v10131_v34  ;;  %v10153_v34 = vpack.c.bf16 %v5431_v39, %v5427_v8  ;;  %v10155_v41 = vpack.c.bf16 %v5440_v46, %v5436_v22  ;;  %v5639_v8 = vld [vmem:[#allocation10 + $0x10e0] sm:$0xff]  ;;  %v5644_v39 = vld [vmem:[#allocation10 + $0x1108] sm:$0xff] }
 0x651   : > { %v5648_v22 = vld [vmem:[#allocation10 + $0x1128] sm:$0xff] }
 0x652   : > { %5514 = vmatmul.mubr.f32.vlgmr.msra.gmra.mrb[0].mxu0 %v3801_v3 }
 0x653   : > { %10134 = vmatpush1.bf16.msra.mxu0 %v10133_v14  ;;  %5519 = vmatprep.mubr.f32.mxu0 %v11516_v58  ;;  %v5448_v14 = vld [vmem:[#allocation10 + $0xff8] sm:$0xff] }
 0x654   : > { %10136 = vmatprep.subr.bf16.mxu0 %v10135_v17  ;;  %v10157_v17 = vpack.c.bf16 %v5439_v24, %v5435_v52  ;;  %v10159_v7 = vpack.c.bf16 %v5448_v14, %v5444_v45  ;;  %v5647_v52 = vld [vmem:[#allocation10 + $0x1120] sm:$0xff]  ;;  %v5652_v24 = vld [vmem:[#allocation10 + $0x1148] sm:$0xff] }
 0x655   : > { %v5656_v45 = vld [vmem:[#allocation10 + $0x1168] sm:$0xff]  ;;  %v5651_v14 = vld [vmem:[#allocation10 + $0x1140] sm:$0xff] }
 0x656   : > { %5520 = vmatmul.mubr.f32.gmra.mrb[2].mxu0 %v3802_v35 }
 0x657   : > { %10138 = vmatpush1.bf16.msra.mxu0 %v10137_v32  ;;  %5590 = vmatprep.mubr.f32.mxu0 %v11516_v58  ;;  %v5616_v32 = vld [vmem:[#allocation10 + $0x1028] sm:$0xff] }
 0x658   : > { %10140 = vmatprep.subr.bf16.mxu0 %v10139_v50  ;;  %v10161_v50 = vpack.c.bf16 %v5447_v1, %v5443_v43  ;;  %v10163_v11 = vpack.c.bf16 %v5616_v32, %v5612_v42  ;;  %v5664_v43 = vld [vmem:[#allocation10 + $0x11a8] sm:$0xff]  ;;  %v5659_v32 = vld [vmem:[#allocation10 + $0x1180] sm:$0xff] }
 0x65b   : > { %10142 = vmatpush1.bf16.msra.mxu0 %v10141_v49  ;;  %v5624_v49 = vld [vmem:[#allocation10 + $0x1068] sm:$0xff] }
 0x65c   : > { %10144 = vmatprep.subr.bf16.mxu0 %v10143_v29  ;;  %v10165_v29 = vpack.c.bf16 %v5615_v31, %v5611_v53  ;;  %v10167_v9 = vpack.c.bf16 %v5624_v49, %v5620_v23  ;;  %v5672_v53 = vld [vmem:[#allocation10 + $0x11e8] sm:$0xff]  ;;  %v5667_v49 = vld [vmem:[#allocation10 + $0x11c0] sm:$0xff] }
 0x65f   : > { %10146 = vmatpush1.bf16.msra.mxu0 %v10145_v51  ;;  %v5632_v51 = vld [vmem:[#allocation10 + $0x10a8] sm:$0xff] }
 0x660   : > { %10148 = vmatprep.subr.bf16.mxu0 %v10147_v38  ;;  %v10169_v38 = vpack.c.bf16 %v5623_v4, %v5619_v28  ;;  %v10171_v36 = vpack.c.bf16 %v5632_v51, %v5628_v26  ;;  %v5618_v28 = vld [vmem:[#allocation10 + $0x1038] sm:$0xff]  ;;  %v5613_v51 = vld [vmem:[#allocation10 + $0x1010] sm:$0xff] }
 0x663   : > { %10150 = vmatpush1.bf16.msra.mxu0 %v10149_v37  ;;  %v5640_v37 = vld [vmem:[#allocation10 + $0x10e8] sm:$0xff] }
 0x664   : > { %10152 = vmatprep.subr.bf16.mxu0 %v10151_v15  ;;  %v10173_v15 = vpack.c.bf16 %v5631_v20, %v5627_v16  ;;  %v10175_v18 = vpack.c.bf16 %v5640_v37, %v5636_v6  ;;  %v5626_v16 = vld [vmem:[#allocation10 + $0x1078] sm:$0xff]  ;;  %v3803_v6 = vmax.f32 %v12789_v59, 0.0 }
 0x667   : > { %10154 = vmatpush1.bf16.msra.mxu0 %v10153_v34  ;;  %v10179_v34 = vpack.c.bf16 %v5648_v22, %v5644_v39  ;;  %v3804_v22 = vmax.f32 %v12786_v27, 0.0 }
 0x668   : > { %10156 = vmatprep.subr.bf16.mxu0 %v10155_v41  ;;  %v5643_v41 = vld [vmem:[#allocation10 + $0x1100] sm:$0xff] }
 0x669   : > { %v10181_v5 = vpack.c.bf16 %v5647_v52, %v5643_v41  ;;  %v5633_v41 = vld [vmem:[#allocation10 + $0x10b0] sm:$0xff]  ;;  %v5638_v52 = vld [vmem:[#allocation10 + $0x10d8] sm:$0xff] }
 0x66b   : > { %10158 = vmatpush1.bf16.msra.mxu0 %v10157_v17  ;;  %v5655_v17 = vld [vmem:[#allocation10 + $0x1160] sm:$0xff] }
 0x66c   : > { %10160 = vmatprep.subr.bf16.mxu0 %v10159_v7  ;;  %v5660_v7 = vld [vmem:[#allocation10 + $0x1188] sm:$0xff]  ;;  %v10185_v1 = vpack.c.bf16 %v5655_v17, %v5651_v14  ;;  %v5641_v14 = vld [vmem:[#allocation10 + $0x10f0] sm:$0xff]  ;;  %v5646_v17 = vld [vmem:[#allocation10 + $0x1118] sm:$0xff] }
 0x66d   : > { %v10187_v42 = vpack.c.bf16 %v5664_v43, %v5660_v7  ;;  %v5650_v7 = vld [vmem:[#allocation10 + $0x1138] sm:$0xff] }
 0x66f   : > { %10162 = vmatpush1.bf16.msra.mxu0 %v10161_v50  ;;  %v5663_v50 = vld [vmem:[#allocation10 + $0x11a0] sm:$0xff] }
 0x670   : > { %10164 = vmatprep.subr.bf16.mxu0 %v10163_v11  ;;  %v5668_v11 = vld [vmem:[#allocation10 + $0x11c8] sm:$0xff]  ;;  %v10189_v31 = vpack.c.bf16 %v5663_v50, %v5659_v32  ;;  %v5649_v32 = vld [vmem:[#allocation10 + $0x1130] sm:$0xff]  ;;  %v5654_v50 = vld [vmem:[#allocation10 + $0x1158] sm:$0xff] }
 0x671   : > { %v10191_v23 = vpack.c.bf16 %v5672_v53, %v5668_v11  ;;  %v5658_v11 = vld [vmem:[#allocation10 + $0x1178] sm:$0xff] }
 0x672   : > { %5591 = vmatmul.mubr.f32.vlgmr.msra.gmra.mrb[4].mxu0 %v3801_v3  ;;  %v5635_v3 = vld [vmem:[#allocation10 + $0x10c0] sm:$0xff] }
 0x673   : > { %10166 = vmatpush1.bf16.msra.mxu0 %v10165_v29  ;;  %5596 = vmatprep.mubr.f32.mxu0 %v11516_v58  ;;  %v10177_v46 = vpack.c.bf16 %v5639_v8, %v5635_v3  ;;  %v5671_v29 = vld [vmem:[#allocation10 + $0x11e0] sm:$0xff]  ;;  %v5630_v3 = vld [vmem:[#allocation10 + $0x1098] sm:$0xff] }
 0x674   : > { %10168 = vmatprep.subr.bf16.mxu0 %v10167_v9  ;;  %v5614_v9 = vld [vmem:[#allocation10 + $0x1018] sm:$0xff]  ;;  %v10193_v4 = vpack.c.bf16 %v5671_v29, %v5667_v49  ;;  %v5657_v49 = vld [vmem:[#allocation10 + $0x1170] sm:$0xff] }
 0x675   : > { %v10195_v26 = vpack.c.bf16 %v5618_v28, %v5614_v9  ;;  %v5634_v8 = vld [vmem:[#allocation10 + $0x10b8] sm:$0xff] }
 0x676   : > { %5597 = vmatmul.mubr.f32.gmra.mrb[6].mxu0 %v3802_v35  ;;  %v10183_v35 = vpack.c.bf16 %v5656_v45, %v5652_v24  ;;  %v5642_v24 = vld [vmem:[#allocation10 + $0x10f8] sm:$0xff] }
 0x677   : > { %10170 = vmatpush1.bf16.msra.mxu0 %v10169_v38  ;;  %5739 = vmatprep.mubr.f32.mxu0 %v11516_v58  ;;  %v5617_v38 = vld [vmem:[#allocation10 + $0x1030] sm:$0xff]  ;;  %v5662_v29 = vld [vmem:[#allocation10 + $0x1198] sm:$0xff] }
 0x678   : > { %10172 = vmatprep.subr.bf16.mxu0 %v10171_v36  ;;  %v5622_v36 = vld [vmem:[#allocation10 + $0x1058] sm:$0xff]  ;;  %v10197_v20 = vpack.c.bf16 %v5617_v38, %v5613_v51  ;;  %v5665_v51 = vld [vmem:[#allocation10 + $0x11b0] sm:$0xff] }
 0x679   : > { %v10199_v37 = vpack.c.bf16 %v5626_v16, %v5622_v36  ;;  %v5666_v9 = vld [vmem:[#allocation10 + $0x11b8] sm:$0xff] }
 0x67a   : > { %v5670_v38 = vld [vmem:[#allocation10 + $0x11d8] sm:$0xff] }
 0x67b   : > { %10174 = vmatpush1.bf16.msra.mxu0 %v10173_v15  ;;  %v5621_v15 = vld [vmem:[#allocation10 + $0x1050] sm:$0xff]  ;;  %v5674_v36 = vld [vmem:[#allocation10 + $0x11f8] sm:$0xff] }
 0x67c   : > { %10176 = vmatprep.subr.bf16.mxu0 %v10175_v18  ;;  %v5625_v18 = vld [vmem:[#allocation10 + $0x1070] sm:$0xff] }
 0x67d   : > { %v10201_v39 = vpack.c.bf16 %v5625_v18, %v5621_v15  ;;  %v5673_v15 = vld [vmem:[#allocation10 + $0x11f0] sm:$0xff]  ;;  %v5838_v18 = vld [vmem:[#allocation10 + $0x1208] sm:$0xff] }
 0x67f   : > { %10178 = vmatpush1.bf16.msra.mxu0 %v10177_v46  ;;  %v10203_v46 = vpack.c.bf16 %v5634_v8, %v5630_v3  ;;  %v5842_v3 = vld [vmem:[#allocation10 + $0x1228] sm:$0xff] }
 0x680   : > { %10180 = vmatprep.subr.bf16.mxu0 %v10179_v34  ;;  %v5629_v34 = vld [vmem:[#allocation10 + $0x1090] sm:$0xff] }
 0x681   : > { %v10205_v45 = vpack.c.bf16 %v5633_v41, %v5629_v34  ;;  %v5841_v34 = vld [vmem:[#allocation10 + $0x1220] sm:$0xff]  ;;  %v5846_v41 = vld [vmem:[#allocation10 + $0x1248] sm:$0xff] }
 0x683   : > { %10182 = vmatpush1.bf16.msra.mxu0 %v10181_v5  ;;  %v10207_v5 = vpack.c.bf16 %v5642_v24, %v5638_v52  ;;  %v5850_v52 = vld [vmem:[#allocation10 + $0x1268] sm:$0xff] }
 0x684   : > { %10184 = vmatprep.subr.bf16.mxu0 %v10183_v35  ;;  %v5637_v35 = vld [vmem:[#allocation10 + $0x10d0] sm:$0xff] }
 0x685   : > { %v10209_v43 = vpack.c.bf16 %v5641_v14, %v5637_v35  ;;  %v5849_v35 = vld [vmem:[#allocation10 + $0x1260] sm:$0xff]  ;;  %v5854_v14 = vld [vmem:[#allocation10 + $0x1288] sm:$0xff] }
 0x687   : > { %10186 = vmatpush1.bf16.msra.mxu0 %v10185_v1  ;;  %v10211_v1 = vpack.c.bf16 %v5650_v7, %v5646_v17  ;;  %v5858_v17 = vld [vmem:[#allocation10 + $0x12a8] sm:$0xff] }
 0x688   : > { %10188 = vmatprep.subr.bf16.mxu0 %v10187_v42  ;;  %v5645_v42 = vld [vmem:[#allocation10 + $0x1110] sm:$0xff] }
 0x689   : > { %v10213_v53 = vpack.c.bf16 %v5649_v32, %v5645_v42  ;;  %v5857_v42 = vld [vmem:[#allocation10 + $0x12a0] sm:$0xff]  ;;  %v5862_v32 = vld [vmem:[#allocation10 + $0x12c8] sm:$0xff] }
 0x68b   : > { %10190 = vmatpush1.bf16.msra.mxu0 %v10189_v31  ;;  %v10215_v31 = vpack.c.bf16 %v5658_v11, %v5654_v50  ;;  %v5866_v50 = vld [vmem:[#allocation10 + $0x12e8] sm:$0xff] }
 0x68c   : > { %10192 = vmatprep.subr.bf16.mxu0 %v10191_v23  ;;  %v5653_v23 = vld [vmem:[#allocation10 + $0x1150] sm:$0xff]  ;;  %v10239_v59 = vpack.c.bf16 %v5866_v50, %v5862_v32 }
 0x68d   : > { %v10217_v28 = vpack.c.bf16 %v5657_v49, %v5653_v23  ;;  %v5874_v23 = vld [vmem:[#allocation10 + $0x1328] sm:$0xff]  ;;  %v5847_v32 = vld [vmem:[#allocation10 + $0x1250] sm:$0xff] }
 0x68e   : > { %v5851_v50 = vld [vmem:[#allocation10 + $0x1270] sm:$0xff] }
 0x68f   : > { %10194 = vmatpush1.bf16.msra.mxu0 %v10193_v4  ;;  %v10219_v4 = vpack.c.bf16 %v5666_v9, %v5662_v29  ;;  %v5869_v9 = vld [vmem:[#allocation10 + $0x1300] sm:$0xff] }
 0x690   : > { %10196 = vmatprep.subr.bf16.mxu0 %v10195_v26  ;;  %v5661_v26 = vld [vmem:[#allocation10 + $0x1190] sm:$0xff] }
 0x691   : > { %v10221_v16 = vpack.c.bf16 %v5665_v51, %v5661_v26  ;;  %v5882_v26 = vld [vmem:[#allocation10 + $0x1368] sm:$0xff]  ;;  %v5877_v51 = vld [vmem:[#allocation10 + $0x1340] sm:$0xff] }
 0x692   : > { %5740 = vmatmul.mubr.f32.vlgmr.msra.gmra.mrb[0].mxu0 %v3803_v6 }
 0x693   : > { %10198 = vmatpush1.bf16.msra.mxu0 %v10197_v20  ;;  %5745 = vmatprep.mubr.f32.mxu0 %v11516_v58  ;;  %v10223_v20 = vpack.c.bf16 %v5674_v36, %v5670_v38  ;;  %v5881_v38 = vld [vmem:[#allocation10 + $0x1360] sm:$0xff]  ;;  %v5886_v36 = vld [vmem:[#allocation10 + $0x1388] sm:$0xff] }
 0x694   : > { %10200 = vmatprep.subr.bf16.mxu0 %v10199_v37  ;;  %v5669_v37 = vld [vmem:[#allocation10 + $0x11d0] sm:$0xff] }
 0x695   : > { %v10225_v8 = vpack.c.bf16 %v5673_v15, %v5669_v37  ;;  %v5885_v15 = vld [vmem:[#allocation10 + $0x1380] sm:$0xff] }
 0x696   : > { %5746 = vmatmul.mubr.f32.gmra.mrb[2].mxu0 %v3804_v22 }
 0x697   : > { %10202 = vmatpush1.bf16.msra.mxu0 %v10201_v39  ;;  %5816 = vmatprep.mubr.f32.mxu0 %v11516_v58  ;;  %v10227_v39 = vpack.c.bf16 %v5842_v3, %v5838_v18  ;;  %v5889_v18 = vld [vmem:[#allocation10 + $0x13a0] sm:$0xff]  ;;  %v5894_v3 = vld [vmem:[#allocation10 + $0x13c8] sm:$0xff] }
 0x698   : > { %10204 = vmatprep.subr.bf16.mxu0 %v10203_v46  ;;  %v5837_v46 = vld [vmem:[#allocation10 + $0x1200] sm:$0xff] }
 0x699   : > { %v10229_v24 = vpack.c.bf16 %v5841_v34, %v5837_v46  ;;  %v5893_v34 = vld [vmem:[#allocation10 + $0x13c0] sm:$0xff] }
 0x69b   : > { %10206 = vmatpush1.bf16.msra.mxu0 %v10205_v45  ;;  %v10231_v45 = vpack.c.bf16 %v5850_v52, %v5846_v41  ;;  %v5897_v41 = vld [vmem:[#allocation10 + $0x13e0] sm:$0xff]  ;;  %v5840_v52 = vld [vmem:[#allocation10 + $0x1218] sm:$0xff] }
 0x69c   : > { %10208 = vmatprep.subr.bf16.mxu0 %v10207_v5  ;;  %v5845_v5 = vld [vmem:[#allocation10 + $0x1240] sm:$0xff] }
 0x69d   : > { %v10233_v7 = vpack.c.bf16 %v5849_v35, %v5845_v5  ;;  %v5839_v35 = vld [vmem:[#allocation10 + $0x1210] sm:$0xff] }
 0x69f   : > { %10210 = vmatpush1.bf16.msra.mxu0 %v10209_v43  ;;  %v10235_v43 = vpack.c.bf16 %v5858_v17, %v5854_v14  ;;  %v5843_v14 = vld [vmem:[#allocation10 + $0x1230] sm:$0xff]  ;;  %v5848_v17 = vld [vmem:[#allocation10 + $0x1258] sm:$0xff] }
 0x6a0   : > { %10212 = vmatprep.subr.bf16.mxu0 %v10211_v1  ;;  %v5853_v1 = vld [vmem:[#allocation10 + $0x1280] sm:$0xff] }
 0x6a1   : > { %v10237_v11 = vpack.c.bf16 %v5857_v42, %v5853_v1  ;;  %v3805_v1 = vmax.f32 %v12795_v56, 0.0 }
 0x6a3   : > { %10214 = vmatpush1.bf16.msra.mxu0 %v10213_v53  ;;  %v5865_v53 = vld [vmem:[#allocation10 + $0x12e0] sm:$0xff] }
 0x6a4   : > { %10216 = vmatprep.subr.bf16.mxu0 %v10215_v31  ;;  %v5870_v31 = vld [vmem:[#allocation10 + $0x1308] sm:$0xff] }
 0x6a5   : > { %v10243_v29 = vpack.c.bf16 %v5874_v23, %v5870_v31  ;;  %v5855_v23 = vld [vmem:[#allocation10 + $0x1290] sm:$0xff] }
 0x6a7   : > { %10218 = vmatpush1.bf16.msra.mxu0 %v10217_v28  ;;  %v5873_v28 = vld [vmem:[#allocation10 + $0x1320] sm:$0xff] }
 0x6a8   : > { %10220 = vmatprep.subr.bf16.mxu0 %v10219_v4  ;;  %v5878_v4 = vld [vmem:[#allocation10 + $0x1348] sm:$0xff]  ;;  %v10245_v27 = vpack.c.bf16 %v5873_v28, %v5869_v9  ;;  %v5868_v9 = vld [vmem:[#allocation10 + $0x12f8] sm:$0xff] }
 0x6ab   : > { %10222 = vmatpush1.bf16.msra.mxu0 %v10221_v16  ;;  %v5890_v16 = vld [vmem:[#allocation10 + $0x13a8] sm:$0xff] }
 0x6ac   : > { %10224 = vmatprep.subr.bf16.mxu0 %v10223_v20  ;;  %v10249_v20 = vpack.c.bf16 %v5881_v38, %v5877_v51  ;;  %v10251_v37 = vpack.c.bf16 %v5890_v16, %v5886_v36  ;;  %v5876_v51 = vld [vmem:[#allocation10 + $0x1338] sm:$0xff]  ;;  %v5871_v16 = vld [vmem:[#allocation10 + $0x1310] sm:$0xff] }
 0x6af   : > { %10226 = vmatpush1.bf16.msra.mxu0 %v10225_v8  ;;  %v5898_v8 = vld [vmem:[#allocation10 + $0x13e8] sm:$0xff] }
 0x6b0   : > { %10228 = vmatprep.subr.bf16.mxu0 %v10227_v39  ;;  %v10253_v39 = vpack.c.bf16 %v5889_v18, %v5885_v15  ;;  %v10255_v46 = vpack.c.bf16 %v5898_v8, %v5894_v3  ;;  %v5884_v15 = vld [vmem:[#allocation10 + $0x1378] sm:$0xff]  ;;  %v5879_v8 = vld [vmem:[#allocation10 + $0x1350] sm:$0xff] }
 0x6b2   : > { %5817 = vmatmul.mubr.f32.vlgmr.msra.gmra.mrb[4].mxu0 %v3803_v6  ;;  %v5861_v6 = vld [vmem:[#allocation10 + $0x12c0] sm:$0xff] }
 0x6b3   : > { %10230 = vmatpush1.bf16.msra.mxu0 %v10229_v24  ;;  %5822 = vmatprep.mubr.f32.mxu0 %v11516_v58  ;;  %v10241_v49 = vpack.c.bf16 %v5865_v53, %v5861_v6  ;;  %v5844_v24 = vld [vmem:[#allocation10 + $0x1238] sm:$0xff]  ;;  %v10265_v6 = vpack.c.bf16 %v5851_v50, %v5847_v32  ;;  %v3806_v53 = vmax.f32 %v12792_v33, 0.0  ;;  %v6068_v32 = vld [vmem:[#allocation10 + $0x1428] sm:$0xff] }
 0x6b4   : > { %10232 = vmatprep.subr.bf16.mxu0 %v10231_v45  ;;  %v10257_v45 = vpack.c.bf16 %v5897_v41, %v5893_v34  ;;  %v10259_v5 = vpack.c.bf16 %v5844_v24, %v5840_v52  ;;  %v5892_v34 = vld [vmem:[#allocation10 + $0x13b8] sm:$0xff]  ;;  %v5887_v24 = vld [vmem:[#allocation10 + $0x1390] sm:$0xff] }
 0x6b6   : > { %5823 = vmatmul.mubr.f32.gmra.mrb[6].mxu0 %v3804_v22  ;;  %v10247_v22 = vpack.c.bf16 %v5882_v26, %v5878_v4  ;;  %v5863_v26 = vld [vmem:[#allocation10 + $0x12d0] sm:$0xff] }
 0x6b7   : > { %10234 = vmatpush1.bf16.msra.mxu0 %v10233_v7  ;;  %5965 = vmatprep.mubr.f32.mxu0 %v11516_v58  ;;  %v5852_v7 = vld [vmem:[#allocation10 + $0x1278] sm:$0xff] }
 0x6b8   : > { %10236 = vmatprep.subr.bf16.mxu0 %v10235_v43  ;;  %v10261_v43 = vpack.c.bf16 %v5843_v14, %v5839_v35  ;;  %v10263_v42 = vpack.c.bf16 %v5852_v7, %v5848_v17  ;;  %v5900_v35 = vld [vmem:[#allocation10 + $0x13f8] sm:$0xff]  ;;  %v5895_v7 = vld [vmem:[#allocation10 + $0x13d0] sm:$0xff] }
 0x6bb   : > { %10238 = vmatpush1.bf16.msra.mxu0 %v10237_v11  ;;  %v5856_v11 = vld [vmem:[#allocation10 + $0x1298] sm:$0xff] }
 0x6bc   : > { %10240 = vmatprep.subr.bf16.mxu0 %v10239_v59  ;;  %v5860_v59 = vld [vmem:[#allocation10 + $0x12b8] sm:$0xff] }
 0x6bd   : > { %v10267_v31 = vpack.c.bf16 %v5860_v59, %v5856_v11  ;;  %v6063_v59 = vld [vmem:[#allocation10 + $0x1400] sm:$0xff] }
 0x6bf   : > { %10242 = vmatpush1.bf16.msra.mxu0 %v10241_v49  ;;  %v5859_v49 = vld [vmem:[#allocation10 + $0x12b0] sm:$0xff] }
 0x6c0   : > { %10244 = vmatprep.subr.bf16.mxu0 %v10243_v29  ;;  %v5864_v29 = vld [vmem:[#allocation10 + $0x12d8] sm:$0xff]  ;;  %v10269_v28 = vpack.c.bf16 %v5859_v49, %v5855_v23  ;;  %v6076_v23 = vld [vmem:[#allocation10 + $0x1468] sm:$0xff] }
 0x6c1   : > { %v10271_v4 = vpack.c.bf16 %v5868_v9, %v5864_v29  ;;  %v6071_v9 = vld [vmem:[#allocation10 + $0x1440] sm:$0xff] }
 0x6c3   : > { %10246 = vmatpush1.bf16.msra.mxu0 %v10245_v27  ;;  %v5867_v27 = vld [vmem:[#allocation10 + $0x12f0] sm:$0xff] }
 0x6c4   : > { %10248 = vmatprep.subr.bf16.mxu0 %v10247_v22  ;;  %v5872_v22 = vld [vmem:[#allocation10 + $0x1318] sm:$0xff]  ;;  %v10273_v38 = vpack.c.bf16 %v5867_v27, %v5863_v26  ;;  %v6084_v26 = vld [vmem:[#allocation10 + $0x14a8] sm:$0xff] }
 0x6c5   : > { %v10275_v36 = vpack.c.bf16 %v5876_v51, %v5872_v22  ;;  %v6079_v51 = vld [vmem:[#allocation10 + $0x1480] sm:$0xff] }
 0x6c7   : > { %10250 = vmatpush1.bf16.msra.mxu0 %v10249_v20  ;;  %v5875_v20 = vld [vmem:[#allocation10 + $0x1330] sm:$0xff] }
 0x6c8   : > { %10252 = vmatprep.subr.bf16.mxu0 %v10251_v37  ;;  %v5880_v37 = vld [vmem:[#allocation10 + $0x1358] sm:$0xff]  ;;  %v10277_v18 = vpack.c.bf16 %v5875_v20, %v5871_v16  ;;  %v6092_v16 = vld [vmem:[#allocation10 + $0x14e8] sm:$0xff] }
 0x6c9   : > { %v10279_v3 = vpack.c.bf16 %v5884_v15, %v5880_v37  ;;  %v6091_v37 = vld [vmem:[#allocation10 + $0x14e0] sm:$0xff]  ;;  %v6096_v15 = vld [vmem:[#allocation10 + $0x1508] sm:$0xff] }
 0x6cb   : > { %10254 = vmatpush1.bf16.msra.mxu0 %v10253_v39  ;;  %v5883_v39 = vld [vmem:[#allocation10 + $0x1370] sm:$0xff] }
 0x6cc   : > { %10256 = vmatprep.subr.bf16.mxu0 %v10255_v46  ;;  %v5888_v46 = vld [vmem:[#allocation10 + $0x1398] sm:$0xff]  ;;  %v10281_v41 = vpack.c.bf16 %v5883_v39, %v5879_v8  ;;  %v6095_v39 = vld [vmem:[#allocation10 + $0x1500] sm:$0xff] }
 0x6cd   : > { %v10283_v52 = vpack.c.bf16 %v5892_v34, %v5888_v46  ;;  %v6099_v46 = vld [vmem:[#allocation10 + $0x1520] sm:$0xff]  ;;  %v6104_v34 = vld [vmem:[#allocation10 + $0x1548] sm:$0xff] }
 0x6ce   : > { %v10309_v33 = vpack.c.bf16 %v6099_v46, %v6095_v39  ;;  %v6089_v46 = vld [vmem:[#allocation10 + $0x14d0] sm:$0xff] }
 0x6cf   : > { %10258 = vmatpush1.bf16.msra.mxu0 %v10257_v45  ;;  %v5891_v45 = vld [vmem:[#allocation10 + $0x13b0] sm:$0xff] }
 0x6d0   : > { %10260 = vmatprep.subr.bf16.mxu0 %v10259_v5  ;;  %v5896_v5 = vld [vmem:[#allocation10 + $0x13d8] sm:$0xff]  ;;  %v10285_v14 = vpack.c.bf16 %v5891_v45, %v5887_v24  ;;  %v6107_v24 = vld [vmem:[#allocation10 + $0x1560] sm:$0xff]  ;;  %v6112_v45 = vld [vmem:[#allocation10 + $0x1588] sm:$0xff] }
 0x6d1   : > { %v10287_v17 = vpack.c.bf16 %v5900_v35, %v5896_v5  ;;  %v6116_v5 = vld [vmem:[#allocation10 + $0x15a8] sm:$0xff] }
 0x6d2   : > { %5966 = vmatmul.mubr.f32.vlgmr.msra.gmra.mrb[0].mxu0 %v3805_v1 }
 0x6d3   : > { %10262 = vmatpush1.bf16.msra.mxu0 %v10261_v43  ;;  %5971 = vmatprep.mubr.f32.mxu0 %v11516_v58  ;;  %v5899_v43 = vld [vmem:[#allocation10 + $0x13f0] sm:$0xff] }
 0x6d4   : > { %10264 = vmatprep.subr.bf16.mxu0 %v10263_v42  ;;  %v6064_v42 = vld [vmem:[#allocation10 + $0x1408] sm:$0xff]  ;;  %v10289_v50 = vpack.c.bf16 %v5899_v43, %v5895_v7  ;;  %v6115_v7 = vld [vmem:[#allocation10 + $0x15a0] sm:$0xff] }
 0x6d5   : > { %v10291_v11 = vpack.c.bf16 %v6068_v32, %v6064_v42  ;;  %v6120_v43 = vld [vmem:[#allocation10 + $0x15c8] sm:$0xff] }
 0x6d6   : > { %5972 = vmatmul.mubr.f32.gmra.mrb[2].mxu0 %v3806_v53  ;;  %v6124_v42 = vld [vmem:[#allocation10 + $0x15e8] sm:$0xff] }
 0x6d7   : > { %10266 = vmatpush1.bf16.msra.mxu0 %v10265_v6  ;;  %6042 = vmatprep.mubr.f32.mxu0 %v11516_v58  ;;  %v6067_v6 = vld [vmem:[#allocation10 + $0x1420] sm:$0xff] }
 0x6d8   : > { %10268 = vmatprep.subr.bf16.mxu0 %v10267_v31  ;;  %v6072_v31 = vld [vmem:[#allocation10 + $0x1448] sm:$0xff]  ;;  %v10293_v49 = vpack.c.bf16 %v6067_v6, %v6063_v59  ;;  %v6123_v59 = vld [vmem:[#allocation10 + $0x15e0] sm:$0xff]  ;;  %v6066_v6 = vld [vmem:[#allocation10 + $0x1418] sm:$0xff] }
 0x6d9   : > { %v10295_v29 = vpack.c.bf16 %v6076_v23, %v6072_v31  ;;  %v6070_v31 = vld [vmem:[#allocation10 + $0x1438] sm:$0xff] }
 0x6db   : > { %10270 = vmatpush1.bf16.msra.mxu0 %v10269_v28  ;;  %v6075_v28 = vld [vmem:[#allocation10 + $0x1460] sm:$0xff] }
 0x6dc   : > { %10272 = vmatprep.subr.bf16.mxu0 %v10271_v4  ;;  %v6080_v4 = vld [vmem:[#allocation10 + $0x1488] sm:$0xff]  ;;  %v10297_v27 = vpack.c.bf16 %v6075_v28, %v6071_v9  ;;  %v6069_v9 = vld [vmem:[#allocation10 + $0x1430] sm:$0xff]  ;;  %v6074_v28 = vld [vmem:[#allocation10 + $0x1458] sm:$0xff] }
 0x6dd   : > { %v10299_v22 = vpack.c.bf16 %v6084_v26, %v6080_v4  ;;  %v6078_v4 = vld [vmem:[#allocation10 + $0x1478] sm:$0xff] }
 0x6df   : > { %10274 = vmatpush1.bf16.msra.mxu0 %v10273_v38  ;;  %v6083_v38 = vld [vmem:[#allocation10 + $0x14a0] sm:$0xff] }
 0x6e0   : > { %10276 = vmatprep.subr.bf16.mxu0 %v10275_v36  ;;  %v6088_v36 = vld [vmem:[#allocation10 + $0x14c8] sm:$0xff]  ;;  %v10301_v20 = vpack.c.bf16 %v6083_v38, %v6079_v51  ;;  %v6073_v51 = vld [vmem:[#allocation10 + $0x1450] sm:$0xff] }
 0x6e1   : > { %v10303_v56 = vpack.c.bf16 %v6092_v16, %v6088_v36  ;;  %v6077_v38 = vld [vmem:[#allocation10 + $0x1470] sm:$0xff]  ;;  %v6082_v36 = vld [vmem:[#allocation10 + $0x1498] sm:$0xff] }
 0x6e2   : > { %v6086_v16 = vld [vmem:[#allocation10 + $0x14b8] sm:$0xff] }
 0x6e3   : > { %10278 = vmatpush1.bf16.msra.mxu0 %v10277_v18  ;;  %v6100_v18 = vld [vmem:[#allocation10 + $0x1528] sm:$0xff] }
 0x6e4   : > { %10280 = vmatprep.subr.bf16.mxu0 %v10279_v3  ;;  %v10307_v8 = vpack.c.bf16 %v6100_v18, %v6096_v15  ;;  %v6085_v15 = vld [vmem:[#allocation10 + $0x14b0] sm:$0xff]  ;;  %v6090_v18 = vld [vmem:[#allocation10 + $0x14d8] sm:$0xff] }
 0x6e7   : > { %10282 = vmatpush1.bf16.msra.mxu0 %v10281_v41  ;;  %v6108_v41 = vld [vmem:[#allocation10 + $0x1568] sm:$0xff] }
 0x6e8   : > { %10284 = vmatprep.subr.bf16.mxu0 %v10283_v52  ;;  %v6103_v52 = vld [vmem:[#allocation10 + $0x1540] sm:$0xff] }
 0x6e9   : > { %v10313_v35 = vpack.c.bf16 %v6107_v24, %v6103_v52  ;;  %v6097_v24 = vld [vmem:[#allocation10 + $0x1510] sm:$0xff] }
 0x6eb   : > { %10286 = vmatpush1.bf16.msra.mxu0 %v10285_v14  ;;  %v10315_v14 = vpack.c.bf16 %v6116_v5, %v6112_v45  ;;  %v6101_v45 = vld [vmem:[#allocation10 + $0x1530] sm:$0xff]  ;;  %v6106_v5 = vld [vmem:[#allocation10 + $0x1558] sm:$0xff] }
 0x6ec   : > { %10288 = vmatprep.subr.bf16.mxu0 %v10287_v17  ;;  %v6111_v17 = vld [vmem:[#allocation10 + $0x1580] sm:$0xff] }
 0x6ed   : > { %v10317_v32 = vpack.c.bf16 %v6115_v7, %v6111_v17  ;;  %v6105_v7 = vld [vmem:[#allocation10 + $0x1550] sm:$0xff] }
 0x6ef   : > { %10290 = vmatpush1.bf16.msra.mxu0 %v10289_v50  ;;  %v10319_v50 = vpack.c.bf16 %v6124_v42, %v6120_v43  ;;  %v6109_v43 = vld [vmem:[#allocation10 + $0x1570] sm:$0xff]  ;;  %v6114_v42 = vld [vmem:[#allocation10 + $0x1598] sm:$0xff] }
 0x6f0   : > { %10292 = vmatprep.subr.bf16.mxu0 %v10291_v11  ;;  %v6119_v11 = vld [vmem:[#allocation10 + $0x15c0] sm:$0xff] }
 0x6f1   : > { %v10321_v23 = vpack.c.bf16 %v6123_v59, %v6119_v11  ;;  %v6113_v59 = vld [vmem:[#allocation10 + $0x1590] sm:$0xff] }
 0x6f2   : > { %6043 = vmatmul.mubr.f32.vlgmr.msra.gmra.mrb[4].mxu0 %v3805_v1  ;;  %v6087_v1 = vld [vmem:[#allocation10 + $0x14c0] sm:$0xff] }
 0x6f3   : > { %10294 = vmatpush1.bf16.msra.mxu0 %v10293_v49  ;;  %6048 = vmatprep.mubr.f32.mxu0 %v11516_v58  ;;  %v10305_v3 = vpack.c.bf16 %v6091_v37, %v6087_v1  ;;  %v10323_v49 = vpack.c.bf16 %v6070_v31, %v6066_v6  ;;  %v10331_v1 = vpack.c.bf16 %v6086_v16, %v6082_v36  ;;  %v6081_v37 = vld [vmem:[#allocation10 + $0x1490] sm:$0xff]  ;;  %v6122_v31 = vld [vmem:[#allocation10 + $0x15d8] sm:$0xff]  ;;  %v6293_v36 = vld [vmem:[#allocation10 + $0x1620] sm:$0xff] }
 0x6f4   : > { %10296 = vmatprep.subr.bf16.mxu0 %v10295_v29  ;;  %v6065_v29 = vld [vmem:[#allocation10 + $0x1410] sm:$0xff]  ;;  %v6298_v16 = vld [vmem:[#allocation10 + $0x1648] sm:$0xff] }
 0x6f5   : > { %v10325_v26 = vpack.c.bf16 %v6069_v9, %v6065_v29  ;;  %v6117_v6 = vld [vmem:[#allocation10 + $0x15b0] sm:$0xff] }
 0x6f6   : > { %6049 = vmatmul.mubr.f32.gmra.mrb[6].mxu0 %v3806_v53  ;;  %v10311_v53 = vpack.c.bf16 %v6108_v41, %v6104_v34  ;;  %v6093_v34 = vld [vmem:[#allocation10 + $0x14f0] sm:$0xff]  ;;  %v6098_v41 = vld [vmem:[#allocation10 + $0x1518] sm:$0xff] }
 0x6f7   : > { %10298 = vmatpush1.bf16.msra.mxu0 %v10297_v27  ;;  %6191 = vmatprep.mubr.f32.mxu0 %v11516_v58  ;;  %v3807_v27 = vmax.f32 %v12801_v47, 0.0  ;;  %v6121_v9 = vld [vmem:[#allocation10 + $0x15d0] sm:$0xff] }
 0x6f8   : > { %10300 = vmatprep.subr.bf16.mxu0 %v10299_v22  ;;  %v10327_v22 = vpack.c.bf16 %v6078_v4, %v6074_v28  ;;  %v6125_v28 = vld [vmem:[#allocation10 + $0x15f0] sm:$0xff]  ;;  %v6290_v4 = vld [vmem:[#allocation10 + $0x1608] sm:$0xff] }
 0x6fb   : > { %10302 = vmatpush1.bf16.msra.mxu0 %v10301_v20  ;;  %v10329_v20 = vpack.c.bf16 %v6077_v38, %v6073_v51  ;;  %v6289_v38 = vld [vmem:[#allocation10 + $0x1600] sm:$0xff] }
 0x6fc   : > { %10304 = vmatprep.subr.bf16.mxu0 %v10303_v56  ;;  %v3808_v56 = vmax.f32 %v12798_v21, 0.0 }
 0x6ff   : > { %10306 = vmatpush1.bf16.msra.mxu0 %v10305_v3  ;;  %v6094_v3 = vld [vmem:[#allocation10 + $0x14f8] sm:$0xff] }
 0x700   : > { %10308 = vmatprep.subr.bf16.mxu0 %v10307_v8  ;;  %v10333_v8 = vpack.c.bf16 %v6085_v15, %v6081_v37  ;;  %v10335_v39 = vpack.c.bf16 %v6094_v3, %v6090_v18  ;;  %v6297_v15 = vld [vmem:[#allocation10 + $0x1640] sm:$0xff]  ;;  %v6306_v3 = vld [vmem:[#allocation10 + $0x1688] sm:$0xff] }
 0x701   : > { %v6301_v18 = vld [vmem:[#allocation10 + $0x1660] sm:$0xff] }
 0x703   : > { %10310 = vmatpush1.bf16.msra.mxu0 %v10309_v33  ;;  %v6102_v33 = vld [vmem:[#allocation10 + $0x1538] sm:$0xff] }
 0x704   : > { %10312 = vmatprep.subr.bf16.mxu0 %v10311_v53  ;;  %v10337_v53 = vpack.c.bf16 %v6093_v34, %v6089_v46  ;;  %v10339_v52 = vpack.c.bf16 %v6102_v33, %v6098_v41  ;;  %v6305_v34 = vld [vmem:[#allocation10 + $0x1680] sm:$0xff]  ;;  %v6314_v33 = vld [vmem:[#allocation10 + $0x16c8] sm:$0xff] }
 0x705   : > { %v6309_v41 = vld [vmem:[#allocation10 + $0x16a0] sm:$0xff] }
 0x707   : > { %10314 = vmatpush1.bf16.msra.mxu0 %v10313_v35  ;;  %v6110_v35 = vld [vmem:[#allocation10 + $0x1578] sm:$0xff] }
 0x708   : > { %10316 = vmatprep.subr.bf16.mxu0 %v10315_v14  ;;  %v10341_v14 = vpack.c.bf16 %v6101_v45, %v6097_v24  ;;  %v10343_v17 = vpack.c.bf16 %v6110_v35, %v6106_v5  ;;  %v6317_v24 = vld [vmem:[#allocation10 + $0x16e0] sm:$0xff]  ;;  %v6322_v45 = vld [vmem:[#allocation10 + $0x1708] sm:$0xff] }
 0x709   : > { %v6326_v5 = vld [vmem:[#allocation10 + $0x1728] sm:$0xff] }
 0x70b   : > { %10318 = vmatpush1.bf16.msra.mxu0 %v10317_v32  ;;  %v6118_v32 = vld [vmem:[#allocation10 + $0x15b8] sm:$0xff] }
 0x70c   : > { %10320 = vmatprep.subr.bf16.mxu0 %v10319_v50  ;;  %v10345_v50 = vpack.c.bf16 %v6109_v43, %v6105_v7  ;;  %v10347_v11 = vpack.c.bf16 %v6118_v32, %v6114_v42  ;;  %v6325_v7 = vld [vmem:[#allocation10 + $0x1720] sm:$0xff]  ;;  %v6330_v43 = vld [vmem:[#allocation10 + $0x1748] sm:$0xff] }
 0x70d   : > { %v6334_v42 = vld [vmem:[#allocation10 + $0x1768] sm:$0xff]  ;;  %v6329_v32 = vld [vmem:[#allocation10 + $0x1740] sm:$0xff] }
 0x70f   : > { %10322 = vmatpush1.bf16.msra.mxu0 %v10321_v23  ;;  %v6126_v23 = vld [vmem:[#allocation10 + $0x15f8] sm:$0xff] }
 0x710   : > { %10324 = vmatprep.subr.bf16.mxu0 %v10323_v49  ;;  %v10349_v49 = vpack.c.bf16 %v6117_v6, %v6113_v59  ;;  %v10351_v29 = vpack.c.bf16 %v6126_v23, %v6122_v31  ;;  %v6342_v59 = vld [vmem:[#allocation10 + $0x17a8] sm:$0xff]  ;;  %v6337_v23 = vld [vmem:[#allocation10 + $0x1780] sm:$0xff] }
 0x712   : > { %6192 = vmatmul.mubr.f32.vlgmr.msra.gmra.mrb[0].mxu0 %v3807_v27 }
 0x713   : > { %10326 = vmatpush1.bf16.msra.mxu0 %v10325_v26  ;;  %6197 = vmatprep.mubr.f32.mxu0 %v11516_v58  ;;  %v6294_v26 = vld [vmem:[#allocation10 + $0x1628] sm:$0xff] }
 0x714   : > { %10328 = vmatprep.subr.bf16.mxu0 %v10327_v22  ;;  %v10353_v22 = vpack.c.bf16 %v6125_v28, %v6121_v9  ;;  %v10355_v51 = vpack.c.bf16 %v6294_v26, %v6290_v4  ;;  %v6350_v9 = vld [vmem:[#allocation10 + $0x17e8] sm:$0xff]  ;;  %v6345_v26 = vld [vmem:[#allocation10 + $0x17c0] sm:$0xff] }
 0x716   : > { %6198 = vmatmul.mubr.f32.gmra.mrb[2].mxu0 %v3808_v56 }
 0x717   : > { %10330 = vmatpush1.bf16.msra.mxu0 %v10329_v20  ;;  %6268 = vmatprep.mubr.f32.mxu0 %v11516_v58  ;;  %v6302_v20 = vld [vmem:[#allocation10 + $0x1668] sm:$0xff] }
 0x718   : > { %10332 = vmatprep.subr.bf16.mxu0 %v10331_v1  ;;  %v10357_v1 = vpack.c.bf16 %v6293_v36, %v6289_v38  ;;  %v10359_v37 = vpack.c.bf16 %v6302_v20, %v6298_v16  ;;  %v6296_v38 = vld [vmem:[#allocation10 + $0x1638] sm:$0xff]  ;;  %v6291_v20 = vld [vmem:[#allocation10 + $0x1610] sm:$0xff] }
 0x71b   : > { %10334 = vmatpush1.bf16.msra.mxu0 %v10333_v8  ;;  %v6310_v8 = vld [vmem:[#allocation10 + $0x16a8] sm:$0xff] }
 0x71c   : > { %10336 = vmatprep.subr.bf16.mxu0 %v10335_v39  ;;  %v10361_v39 = vpack.c.bf16 %v6301_v18, %v6297_v15  ;;  %v10363_v46 = vpack.c.bf16 %v6310_v8, %v6306_v3  ;;  %v6304_v15 = vld [vmem:[#allocation10 + $0x1678] sm:$0xff]  ;;  %v3809_v3 = vmax.f32 %v12810_v30, 0.0 }
 0x71f   : > { %10338 = vmatpush1.bf16.msra.mxu0 %v10337_v53  ;;  %v6318_v53 = vld [vmem:[#allocation10 + $0x16e8] sm:$0xff] }
 0x720   : > { %10340 = vmatprep.subr.bf16.mxu0 %v10339_v52  ;;  %v10365_v52 = vpack.c.bf16 %v6309_v41, %v6305_v34  ;;  %v10367_v47 = vpack.c.bf16 %v6318_v53, %v6314_v33  ;;  %v6308_v34 = vld [vmem:[#allocation10 + $0x1698] sm:$0xff]  ;;  %v3810_v53 = vmax.f32 %v12807_v44, 0.0 }
 0x721   : > { %v6312_v41 = vld [vmem:[#allocation10 + $0x16b8] sm:$0xff] }
 0x723   : > { %10342 = vmatpush1.bf16.msra.mxu0 %v10341_v14  ;;  %v10371_v14 = vpack.c.bf16 %v6326_v5, %v6322_v45  ;;  %v6320_v45 = vld [vmem:[#allocation10 + $0x16f8] sm:$0xff] }
 0x724   : > { %10344 = vmatprep.subr.bf16.mxu0 %v10343_v17  ;;  %v6321_v17 = vld [vmem:[#allocation10 + $0x1700] sm:$0xff] }
 0x725   : > { %v10373_v21 = vpack.c.bf16 %v6325_v7, %v6321_v17  ;;  %v6319_v17 = vld [vmem:[#allocation10 + $0x16f0] sm:$0xff]  ;;  %v6324_v7 = vld [vmem:[#allocation10 + $0x1718] sm:$0xff] }
 0x727   : > { %10346 = vmatpush1.bf16.msra.mxu0 %v10345_v50  ;;  %v6333_v50 = vld [vmem:[#allocation10 + $0x1760] sm:$0xff] }
 0x728   : > { %10348 = vmatprep.subr.bf16.mxu0 %v10347_v11  ;;  %v6338_v11 = vld [vmem:[#allocation10 + $0x1788] sm:$0xff]  ;;  %v10377_v6 = vpack.c.bf16 %v6333_v50, %v6329_v32  ;;  %v6327_v32 = vld [vmem:[#allocation10 + $0x1730] sm:$0xff]  ;;  %v6332_v50 = vld [vmem:[#allocation10 + $0x1758] sm:$0xff] }
 0x729   : > { %v10379_v31 = vpack.c.bf16 %v6342_v59, %v6338_v11  ;;  %v6336_v11 = vld [vmem:[#allocation10 + $0x1778] sm:$0xff] }
 0x72b   : > { %10350 = vmatpush1.bf16.msra.mxu0 %v10349_v49  ;;  %v6341_v49 = vld [vmem:[#allocation10 + $0x17a0] sm:$0xff] }
 0x72c   : > { %10352 = vmatprep.subr.bf16.mxu0 %v10351_v29  ;;  %v6346_v29 = vld [vmem:[#allocation10 + $0x17c8] sm:$0xff]  ;;  %v10381_v28 = vpack.c.bf16 %v6341_v49, %v6337_v23  ;;  %v6335_v23 = vld [vmem:[#allocation10 + $0x1770] sm:$0xff]  ;;  %v6340_v49 = vld [vmem:[#allocation10 + $0x1798] sm:$0xff] }
 0x72d   : > { %v10383_v4 = vpack.c.bf16 %v6350_v9, %v6346_v29  ;;  %v6344_v29 = vld [vmem:[#allocation10 + $0x17b8] sm:$0xff] }
 0x72f   : > { %10354 = vmatpush1.bf16.msra.mxu0 %v10353_v22  ;;  %v6349_v22 = vld [vmem:[#allocation10 + $0x17e0] sm:$0xff] }
 0x730   : > { %10356 = vmatprep.subr.bf16.mxu0 %v10355_v51  ;;  %v6292_v51 = vld [vmem:[#allocation10 + $0x1618] sm:$0xff]  ;;  %v10385_v36 = vpack.c.bf16 %v6349_v22, %v6345_v26  ;;  %v6343_v26 = vld [vmem:[#allocation10 + $0x17b0] sm:$0xff] }
 0x731   : > { %v10387_v16 = vpack.c.bf16 %v6296_v38, %v6292_v51  ;;  %v6348_v22 = vld [vmem:[#allocation10 + $0x17d8] sm:$0xff] }
 0x732   : > { %6269 = vmatmul.mubr.f32.vlgmr.msra.gmra.mrb[4].mxu0 %v3807_v27  ;;  %v6313_v27 = vld [vmem:[#allocation10 + $0x16c0] sm:$0xff]  ;;  %v6352_v51 = vld [vmem:[#allocation10 + $0x17f8] sm:$0xff] }
 0x733   : > { %10358 = vmatpush1.bf16.msra.mxu0 %v10357_v1  ;;  %6274 = vmatprep.mubr.f32.mxu0 %v11516_v58  ;;  %v10369_v35 = vpack.c.bf16 %v6317_v24, %v6313_v27  ;;  %v6295_v1 = vld [vmem:[#allocation10 + $0x1630] sm:$0xff]  ;;  %v6316_v24 = vld [vmem:[#allocation10 + $0x16d8] sm:$0xff] }
 0x734   : > { %10360 = vmatprep.subr.bf16.mxu0 %v10359_v37  ;;  %v6300_v37 = vld [vmem:[#allocation10 + $0x1658] sm:$0xff]  ;;  %v10389_v18 = vpack.c.bf16 %v6295_v1, %v6291_v20  ;;  %v6311_v27 = vld [vmem:[#allocation10 + $0x16b0] sm:$0xff]  ;;  %v6516_v1 = vld [vmem:[#allocation10 + $0x1808] sm:$0xff] }
 0x735   : > { %v10391_v8 = vpack.c.bf16 %v6304_v15, %v6300_v37  ;;  %v6351_v20 = vld [vmem:[#allocation10 + $0x17f0] sm:$0xff]  ;;  %v6520_v37 = vld [vmem:[#allocation10 + $0x1828] sm:$0xff] }
 0x736   : > { %6275 = vmatmul.mubr.f32.gmra.mrb[6].mxu0 %v3808_v56  ;;  %v10375_v56 = vpack.c.bf16 %v6334_v42, %v6330_v43  ;;  %v6328_v43 = vld [vmem:[#allocation10 + $0x1738] sm:$0xff] }
 0x737   : > { %10362 = vmatpush1.bf16.msra.mxu0 %v10361_v39  ;;  %6417 = vmatprep.mubr.f32.mxu0 %v11516_v58  ;;  %v6299_v39 = vld [vmem:[#allocation10 + $0x1650] sm:$0xff] }
 0x738   : > { %10364 = vmatprep.subr.bf16.mxu0 %v10363_v46  ;;  %v6303_v46 = vld [vmem:[#allocation10 + $0x1670] sm:$0xff] }
 0x739   : > { %v10393_v33 = vpack.c.bf16 %v6303_v46, %v6299_v39  ;;  %v6519_v39 = vld [vmem:[#allocation10 + $0x1820] sm:$0xff]  ;;  %v6524_v46 = vld [vmem:[#allocation10 + $0x1848] sm:$0xff] }
 0x73b   : > { %10366 = vmatpush1.bf16.msra.mxu0 %v10365_v52  ;;  %v10395_v52 = vpack.c.bf16 %v6312_v41, %v6308_v34  ;;  %v6528_v34 = vld [vmem:[#allocation10 + $0x1868] sm:$0xff] }
 0x73c   : > { %10368 = vmatprep.subr.bf16.mxu0 %v10367_v47  ;;  %v6307_v47 = vld [vmem:[#allocation10 + $0x1690] sm:$0xff] }
 0x73d   : > { %v10397_v5 = vpack.c.bf16 %v6311_v27, %v6307_v47  ;;  %v6527_v47 = vld [vmem:[#allocation10 + $0x1860] sm:$0xff]  ;;  %v6532_v27 = vld [vmem:[#allocation10 + $0x1888] sm:$0xff] }
 0x73f   : > { %10370 = vmatpush1.bf16.msra.mxu0 %v10369_v35  ;;  %v10399_v35 = vpack.c.bf16 %v6320_v45, %v6316_v24  ;;  %v6536_v24 = vld [vmem:[#allocation10 + $0x18a8] sm:$0xff] }
 0x740   : > { %10372 = vmatprep.subr.bf16.mxu0 %v10371_v14  ;;  %v6315_v14 = vld [vmem:[#allocation10 + $0x16d0] sm:$0xff] }
 0x741   : > { %v10401_v42 = vpack.c.bf16 %v6319_v17, %v6315_v14  ;;  %v6535_v14 = vld [vmem:[#allocation10 + $0x18a0] sm:$0xff]  ;;  %v6540_v17 = vld [vmem:[#allocation10 + $0x18c8] sm:$0xff] }
 0x743   : > { %10374 = vmatpush1.bf16.msra.mxu0 %v10373_v21  ;;  %v10403_v21 = vpack.c.bf16 %v6328_v43, %v6324_v7  ;;  %v6544_v7 = vld [vmem:[#allocation10 + $0x18e8] sm:$0xff] }
 0x744   : > { %10376 = vmatprep.subr.bf16.mxu0 %v10375_v56  ;;  %v6323_v56 = vld [vmem:[#allocation10 + $0x1710] sm:$0xff]  ;;  %v10431_v30 = vpack.c.bf16 %v6544_v7, %v6540_v17 }
 0x745   : > { %v10405_v59 = vpack.c.bf16 %v6327_v32, %v6323_v56  ;;  %v6552_v56 = vld [vmem:[#allocation10 + $0x1928] sm:$0xff]  ;;  %v6533_v7 = vld [vmem:[#allocation10 + $0x1890] sm:$0xff] }
 0x747   : > { %10378 = vmatpush1.bf16.msra.mxu0 %v10377_v6  ;;  %v10407_v6 = vpack.c.bf16 %v6336_v11, %v6332_v50  ;;  %v6547_v11 = vld [vmem:[#allocation10 + $0x1900] sm:$0xff] }
 0x748   : > { %10380 = vmatprep.subr.bf16.mxu0 %v10379_v31  ;;  %v6331_v31 = vld [vmem:[#allocation10 + $0x1750] sm:$0xff] }
 0x749   : > { %v10409_v9 = vpack.c.bf16 %v6335_v23, %v6331_v31  ;;  %v6560_v31 = vld [vmem:[#allocation10 + $0x1968] sm:$0xff]  ;;  %v6555_v23 = vld [vmem:[#allocation10 + $0x1940] sm:$0xff] }
 0x74b   : > { %10382 = vmatpush1.bf16.msra.mxu0 %v10381_v28  ;;  %v10411_v28 = vpack.c.bf16 %v6344_v29, %v6340_v49  ;;  %v6559_v49 = vld [vmem:[#allocation10 + $0x1960] sm:$0xff]  ;;  %v6564_v29 = vld [vmem:[#allocation10 + $0x1988] sm:$0xff] }
 0x74c   : > { %10384 = vmatprep.subr.bf16.mxu0 %v10383_v4  ;;  %v6339_v4 = vld [vmem:[#allocation10 + $0x1790] sm:$0xff] }
 0x74d   : > { %v10413_v38 = vpack.c.bf16 %v6343_v26, %v6339_v4  ;;  %v6563_v26 = vld [vmem:[#allocation10 + $0x1980] sm:$0xff] }
 0x74f   : > { %10386 = vmatpush1.bf16.msra.mxu0 %v10385_v36  ;;  %v10415_v36 = vpack.c.bf16 %v6352_v51, %v6348_v22  ;;  %v6567_v22 = vld [vmem:[#allocation10 + $0x19a0] sm:$0xff]  ;;  %v6572_v51 = vld [vmem:[#allocation10 + $0x19c8] sm:$0xff] }
 0x750   : > { %10388 = vmatprep.subr.bf16.mxu0 %v10387_v16  ;;  %v6347_v16 = vld [vmem:[#allocation10 + $0x17d0] sm:$0xff] }
 0x751   : > { %v10417_v15 = vpack.c.bf16 %v6351_v20, %v6347_v16  ;;  %v6571_v20 = vld [vmem:[#allocation10 + $0x19c0] sm:$0xff] }
 0x752   : > { %6418 = vmatmul.mubr.f32.vlgmr.msra.gmra.mrb[0].mxu0 %v3809_v3 }
 0x753   : > { %10390 = vmatpush1.bf16.msra.mxu0 %v10389_v18  ;;  %6423 = vmatprep.mubr.f32.mxu0 %v11516_v58  ;;  %v10419_v18 = vpack.c.bf16 %v6520_v37, %v6516_v1  ;;  %v6575_v1 = vld [vmem:[#allocation10 + $0x19e0] sm:$0xff]  ;;  %v6518_v37 = vld [vmem:[#allocation10 + $0x1818] sm:$0xff] }
 0x754   : > { %10392 = vmatprep.subr.bf16.mxu0 %v10391_v8  ;;  %v6515_v8 = vld [vmem:[#allocation10 + $0x1800] sm:$0xff] }
 0x755   : > { %v10421_v41 = vpack.c.bf16 %v6519_v39, %v6515_v8  ;;  %v6517_v39 = vld [vmem:[#allocation10 + $0x1810] sm:$0xff] }
 0x756   : > { %6424 = vmatmul.mubr.f32.gmra.mrb[2].mxu0 %v3810_v53 }
 0x757   : > { %10394 = vmatpush1.bf16.msra.mxu0 %v10393_v33  ;;  %6494 = vmatprep.mubr.f32.mxu0 %v11516_v58  ;;  %v10423_v33 = vpack.c.bf16 %v6528_v34, %v6524_v46  ;;  %v6521_v46 = vld [vmem:[#allocation10 + $0x1830] sm:$0xff]  ;;  %v6526_v34 = vld [vmem:[#allocation10 + $0x1858] sm:$0xff] }
 0x758   : > { %10396 = vmatprep.subr.bf16.mxu0 %v10395_v52  ;;  %v6523_v52 = vld [vmem:[#allocation10 + $0x1840] sm:$0xff] }
 0x759   : > { %v10425_v45 = vpack.c.bf16 %v6527_v47, %v6523_v52  ;;  %v3811_v52 = vmax.f32 %v12822_v13, 0.0 }
 0x75b   : > { %10398 = vmatpush1.bf16.msra.mxu0 %v10397_v5  ;;  %v10427_v5 = vpack.c.bf16 %v6536_v24, %v6532_v27  ;;  %v6525_v27 = vld [vmem:[#allocation10 + $0x1850] sm:$0xff] }
 0x75c   : > { %10400 = vmatprep.subr.bf16.mxu0 %v10399_v35  ;;  %v6531_v35 = vld [vmem:[#allocation10 + $0x1880] sm:$0xff]  ;;  %v6529_v24 = vld [vmem:[#allocation10 + $0x1870] sm:$0xff] }
 0x75d   : > { %v10429_v43 = vpack.c.bf16 %v6535_v14, %v6531_v35  ;;  %v10457_v35 = vpack.c.bf16 %v6529_v24, %v6525_v27  ;;  %v3812_v14 = vmax.f32 %v12818_v19, 0.0  ;;  %v6754_v27 = vld [vmem:[#allocation10 + $0x1a68] sm:$0xff] }
 0x75f   : > { %10402 = vmatpush1.bf16.msra.mxu0 %v10401_v42  ;;  %v6543_v42 = vld [vmem:[#allocation10 + $0x18e0] sm:$0xff] }
 0x760   : > { %10404 = vmatprep.subr.bf16.mxu0 %v10403_v21  ;;  %v6548_v21 = vld [vmem:[#allocation10 + $0x1908] sm:$0xff] }
 0x761   : > { %v10435_v50 = vpack.c.bf16 %v6552_v56, %v6548_v21  ;;  %v6541_v56 = vld [vmem:[#allocation10 + $0x18d0] sm:$0xff] }
 0x763   : > { %10406 = vmatpush1.bf16.msra.mxu0 %v10405_v59  ;;  %v6551_v59 = vld [vmem:[#allocation10 + $0x1920] sm:$0xff] }
 0x764   : > { %10408 = vmatprep.subr.bf16.mxu0 %v10407_v6  ;;  %v6556_v6 = vld [vmem:[#allocation10 + $0x1948] sm:$0xff]  ;;  %v10437_v44 = vpack.c.bf16 %v6551_v59, %v6547_v11  ;;  %v6554_v11 = vld [vmem:[#allocation10 + $0x1938] sm:$0xff] }
 0x767   : > { %10410 = vmatpush1.bf16.msra.mxu0 %v10409_v9  ;;  %v6568_v9 = vld [vmem:[#allocation10 + $0x19a8] sm:$0xff] }
 0x768   : > { %10412 = vmatprep.subr.bf16.mxu0 %v10411_v28  ;;  %v10441_v28 = vpack.c.bf16 %v6559_v49, %v6555_v23  ;;  %v10443_v4 = vpack.c.bf16 %v6568_v9, %v6564_v29  ;;  %v6562_v23 = vld [vmem:[#allocation10 + $0x1978] sm:$0xff]  ;;  %v6557_v9 = vld [vmem:[#allocation10 + $0x1950] sm:$0xff] }
 0x76b   : > { %10414 = vmatpush1.bf16.msra.mxu0 %v10413_v38  ;;  %v6576_v38 = vld [vmem:[#allocation10 + $0x19e8] sm:$0xff] }
 0x76c   : > { %10416 = vmatprep.subr.bf16.mxu0 %v10415_v36  ;;  %v10445_v36 = vpack.c.bf16 %v6567_v22, %v6563_v26  ;;  %v10447_v16 = vpack.c.bf16 %v6576_v38, %v6572_v51  ;;  %v6570_v26 = vld [vmem:[#allocation10 + $0x19b8] sm:$0xff]  ;;  %v6565_v38 = vld [vmem:[#allocation10 + $0x1990] sm:$0xff] }
 0x76f   : > { %10418 = vmatpush1.bf16.msra.mxu0 %v10417_v15  ;;  %v6522_v15 = vld [vmem:[#allocation10 + $0x1838] sm:$0xff] }
 0x770   : > { %10420 = vmatprep.subr.bf16.mxu0 %v10419_v18  ;;  %v10449_v18 = vpack.c.bf16 %v6575_v1, %v6571_v20  ;;  %v10451_v8 = vpack.c.bf16 %v6522_v15, %v6518_v37  ;;  %v6578_v20 = vld [vmem:[#allocation10 + $0x19f8] sm:$0xff]  ;;  %v6573_v15 = vld [vmem:[#allocation10 + $0x19d0] sm:$0xff] }
 0x772   : > { %6495 = vmatmul.mubr.f32.vlgmr.msra.gmra.mrb[4].mxu0 %v3809_v3  ;;  %v6539_v3 = vld [vmem:[#allocation10 + $0x18c0] sm:$0xff] }
 0x773   : > { %10422 = vmatpush1.bf16.msra.mxu0 %v10421_v41  ;;  %6500 = vmatprep.mubr.f32.mxu0 %v11516_v58  ;;  %v10433_v32 = vpack.c.bf16 %v6543_v42, %v6539_v3  ;;  %v6530_v41 = vld [vmem:[#allocation10 + $0x1878] sm:$0xff] }
 0x774   : > { %10424 = vmatprep.subr.bf16.mxu0 %v10423_v33  ;;  %v10453_v33 = vpack.c.bf16 %v6521_v46, %v6517_v39  ;;  %v10455_v47 = vpack.c.bf16 %v6530_v41, %v6526_v34  ;;  %v6546_v3 = vld [vmem:[#allocation10 + $0x18f8] sm:$0xff]  ;;  %v6746_v39 = vld [vmem:[#allocation10 + $0x1a28] sm:$0xff]  ;;  %v6741_v41 = vld [vmem:[#allocation10 + $0x1a00] sm:$0xff] }
 0x776   : > { %6501 = vmatmul.mubr.f32.gmra.mrb[6].mxu0 %v3810_v53  ;;  %v10439_v53 = vpack.c.bf16 %v6560_v31, %v6556_v6  ;;  %v6549_v31 = vld [vmem:[#allocation10 + $0x1910] sm:$0xff] }
 0x777   : > { %10426 = vmatpush1.bf16.msra.mxu0 %v10425_v45  ;;  %6643 = vmatprep.mubr.f32.mxu0 %v11516_v58  ;;  %v6534_v45 = vld [vmem:[#allocation10 + $0x1898] sm:$0xff] }
 0x778   : > { %10428 = vmatprep.subr.bf16.mxu0 %v10427_v5  ;;  %v6538_v5 = vld [vmem:[#allocation10 + $0x18b8] sm:$0xff] }
 0x779   : > { %v10459_v17 = vpack.c.bf16 %v6538_v5, %v6534_v45  ;;  %v6749_v5 = vld [vmem:[#allocation10 + $0x1a40] sm:$0xff] }
 0x77b   : > { %10430 = vmatpush1.bf16.msra.mxu0 %v10429_v43  ;;  %v6537_v43 = vld [vmem:[#allocation10 + $0x18b0] sm:$0xff] }
 0x77c   : > { %10432 = vmatprep.subr.bf16.mxu0 %v10431_v30  ;;  %v6542_v30 = vld [vmem:[#allocation10 + $0x18d8] sm:$0xff]  ;;  %v10461_v42 = vpack.c.bf16 %v6537_v43, %v6533_v7  ;;  %v6762_v7 = vld [vmem:[#allocation10 + $0x1aa8] sm:$0xff] }
 0x77d   : > { %v10463_v21 = vpack.c.bf16 %v6546_v3, %v6542_v30  ;;  %v6757_v3 = vld [vmem:[#allocation10 + $0x1a80] sm:$0xff] }
 0x77f   : > { %10434 = vmatpush1.bf16.msra.mxu0 %v10433_v32  ;;  %v6545_v32 = vld [vmem:[#allocation10 + $0x18f0] sm:$0xff] }
 0x780   : > { %10436 = vmatprep.subr.bf16.mxu0 %v10435_v50  ;;  %v6550_v50 = vld [vmem:[#allocation10 + $0x1918] sm:$0xff]  ;;  %v10465_v59 = vpack.c.bf16 %v6545_v32, %v6541_v56  ;;  %v6770_v56 = vld [vmem:[#allocation10 + $0x1ae8] sm:$0xff] }
 0x781   : > { %v10467_v6 = vpack.c.bf16 %v6554_v11, %v6550_v50  ;;  %v6769_v50 = vld [vmem:[#allocation10 + $0x1ae0] sm:$0xff]  ;;  %v6774_v11 = vld [vmem:[#allocation10 + $0x1b08] sm:$0xff] }
 0x783   : > { %10438 = vmatpush1.bf16.msra.mxu0 %v10437_v44  ;;  %v6553_v44 = vld [vmem:[#allocation10 + $0x1930] sm:$0xff] }
 0x784   : > { %10440 = vmatprep.subr.bf16.mxu0 %v10439_v53  ;;  %v6558_v53 = vld [vmem:[#allocation10 + $0x1958] sm:$0xff]  ;;  %v10469_v49 = vpack.c.bf16 %v6553_v44, %v6549_v31  ;;  %v6773_v44 = vld [vmem:[#allocation10 + $0x1b00] sm:$0xff] }
 0x785   : > { %v10471_v29 = vpack.c.bf16 %v6562_v23, %v6558_v53  ;;  %v6777_v53 = vld [vmem:[#allocation10 + $0x1b20] sm:$0xff]  ;;  %v6782_v23 = vld [vmem:[#allocation10 + $0x1b48] sm:$0xff] }
 0x786   : > { %v10501_v19 = vpack.c.bf16 %v6777_v53, %v6773_v44  ;;  %v6775_v53 = vld [vmem:[#allocation10 + $0x1b10] sm:$0xff] }
 0x787   : > { %10442 = vmatpush1.bf16.msra.mxu0 %v10441_v28  ;;  %v6561_v28 = vld [vmem:[#allocation10 + $0x1970] sm:$0xff] }
 0x788   : > { %10444 = vmatprep.subr.bf16.mxu0 %v10443_v4  ;;  %v6566_v4 = vld [vmem:[#allocation10 + $0x1998] sm:$0xff]  ;;  %v10473_v22 = vpack.c.bf16 %v6561_v28, %v6557_v9  ;;  %v6785_v9 = vld [vmem:[#allocation10 + $0x1b60] sm:$0xff]  ;;  %v6790_v28 = vld [vmem:[#allocation10 + $0x1b88] sm:$0xff] }
 0x789   : > { %v10475_v51 = vpack.c.bf16 %v6570_v26, %v6566_v4  ;;  %v6794_v4 = vld [vmem:[#allocation10 + $0x1ba8] sm:$0xff] }
 0x78b   : > { %10446 = vmatpush1.bf16.msra.mxu0 %v10445_v36  ;;  %v6569_v36 = vld [vmem:[#allocation10 + $0x19b0] sm:$0xff] }
 0x78c   : > { %10448 = vmatprep.subr.bf16.mxu0 %v10447_v16  ;;  %v6574_v16 = vld [vmem:[#allocation10 + $0x19d8] sm:$0xff]  ;;  %v10477_v1 = vpack.c.bf16 %v6569_v36, %v6565_v38  ;;  %v6793_v38 = vld [vmem:[#allocation10 + $0x1ba0] sm:$0xff]  ;;  %v6798_v36 = vld [vmem:[#allocation10 + $0x1bc8] sm:$0xff] }
 0x78d   : > { %v10479_v37 = vpack.c.bf16 %v6578_v20, %v6574_v16  ;;  %v6802_v16 = vld [vmem:[#allocation10 + $0x1be8] sm:$0xff] }
 0x78f   : > { %10450 = vmatpush1.bf16.msra.mxu0 %v10449_v18  ;;  %v6577_v18 = vld [vmem:[#allocation10 + $0x19f0] sm:$0xff] }
 0x790   : > { %10452 = vmatprep.subr.bf16.mxu0 %v10451_v8  ;;  %v6742_v8 = vld [vmem:[#allocation10 + $0x1a08] sm:$0xff]  ;;  %v10481_v46 = vpack.c.bf16 %v6577_v18, %v6573_v15  ;;  %v6801_v15 = vld [vmem:[#allocation10 + $0x1be0] sm:$0xff]  ;;  %v6744_v18 = vld [vmem:[#allocation10 + $0x1a18] sm:$0xff] }
 0x791   : > { %v10483_v34 = vpack.c.bf16 %v6746_v39, %v6742_v8  ;;  %v6748_v8 = vld [vmem:[#allocation10 + $0x1a38] sm:$0xff] }
 0x792   : > { %6644 = vmatmul.mubr.f32.vlgmr.msra.gmra.mrb[0].mxu0 %v3811_v52 }
 0x793   : > { %10454 = vmatpush1.bf16.msra.mxu0 %v10453_v33  ;;  %6649 = vmatprep.mubr.f32.mxu0 %v11516_v58  ;;  %v6745_v33 = vld [vmem:[#allocation10 + $0x1a20] sm:$0xff] }
 0x794   : > { %10456 = vmatprep.subr.bf16.mxu0 %v10455_v47  ;;  %v6750_v47 = vld [vmem:[#allocation10 + $0x1a48] sm:$0xff]  ;;  %v10485_v24 = vpack.c.bf16 %v6745_v33, %v6741_v41  ;;  %v6747_v41 = vld [vmem:[#allocation10 + $0x1a30] sm:$0xff]  ;;  %v6752_v33 = vld [vmem:[#allocation10 + $0x1a58] sm:$0xff] }
 0x795   : > { %v10487_v45 = vpack.c.bf16 %v6754_v27, %v6750_v47  ;;  %v6756_v47 = vld [vmem:[#allocation10 + $0x1a78] sm:$0xff] }
 0x796   : > { %6650 = vmatmul.mubr.f32.gmra.mrb[2].mxu0 %v3812_v14 }
 0x797   : > { %10458 = vmatpush1.bf16.msra.mxu0 %v10457_v35  ;;  %6720 = vmatprep.mubr.f32.mxu0 %v11516_v58  ;;  %v6753_v35 = vld [vmem:[#allocation10 + $0x1a60] sm:$0xff] }
 0x798   : > { %10460 = vmatprep.subr.bf16.mxu0 %v10459_v17  ;;  %v6758_v17 = vld [vmem:[#allocation10 + $0x1a88] sm:$0xff]  ;;  %v10489_v43 = vpack.c.bf16 %v6753_v35, %v6749_v5  ;;  %v6751_v5 = vld [vmem:[#allocation10 + $0x1a50] sm:$0xff] }
 0x799   : > { %v10491_v30 = vpack.c.bf16 %v6762_v7, %v6758_v17  ;;  %v6755_v35 = vld [vmem:[#allocation10 + $0x1a70] sm:$0xff]  ;;  %v6760_v17 = vld [vmem:[#allocation10 + $0x1a98] sm:$0xff] }
 0x79a   : > { %v6764_v7 = vld [vmem:[#allocation10 + $0x1ab8] sm:$0xff] }
 0x79b   : > { %10462 = vmatpush1.bf16.msra.mxu0 %v10461_v42  ;;  %v6761_v42 = vld [vmem:[#allocation10 + $0x1aa0] sm:$0xff] }
 0x79c   : > { %10464 = vmatprep.subr.bf16.mxu0 %v10463_v21  ;;  %v6766_v21 = vld [vmem:[#allocation10 + $0x1ac8] sm:$0xff]  ;;  %v10493_v32 = vpack.c.bf16 %v6761_v42, %v6757_v3  ;;  %v10523_v3 = vpack.c.bf16 %v6764_v7, %v6760_v17  ;;  %v6759_v42 = vld [vmem:[#allocation10 + $0x1a90] sm:$0xff]  ;;  %v6979_v17 = vld [vmem:[#allocation10 + $0x1c60] sm:$0xff] }
 0x79d   : > { %v10495_v13 = vpack.c.bf16 %v6770_v56, %v6766_v21  ;;  %v6763_v21 = vld [vmem:[#allocation10 + $0x1ab0] sm:$0xff]  ;;  %v6768_v56 = vld [vmem:[#allocation10 + $0x1ad8] sm:$0xff]  ;;  %v6984_v7 = vld [vmem:[#allocation10 + $0x1c88] sm:$0xff] }
 0x79f   : > { %10466 = vmatpush1.bf16.msra.mxu0 %v10465_v59  ;;  %v6778_v59 = vld [vmem:[#allocation10 + $0x1b28] sm:$0xff] }
 0x7a0   : > { %10468 = vmatprep.subr.bf16.mxu0 %v10467_v6  ;;  %v10499_v31 = vpack.c.bf16 %v6778_v59, %v6774_v11  ;;  %v6771_v11 = vld [vmem:[#allocation10 + $0x1af0] sm:$0xff]  ;;  %v6776_v59 = vld [vmem:[#allocation10 + $0x1b18] sm:$0xff] }
 0x7a3   : > { %10470 = vmatpush1.bf16.msra.mxu0 %v10469_v49  ;;  %v6786_v49 = vld [vmem:[#allocation10 + $0x1b68] sm:$0xff] }
 0x7a4   : > { %10472 = vmatprep.subr.bf16.mxu0 %v10471_v29  ;;  %v6781_v29 = vld [vmem:[#allocation10 + $0x1b40] sm:$0xff] }
 0x7a5   : > { %v10505_v26 = vpack.c.bf16 %v6785_v9, %v6781_v29  ;;  %v6783_v9 = vld [vmem:[#allocation10 + $0x1b50] sm:$0xff] }
 0x7a7   : > { %10474 = vmatpush1.bf16.msra.mxu0 %v10473_v22  ;;  %v10507_v22 = vpack.c.bf16 %v6794_v4, %v6790_v28  ;;  %v6787_v28 = vld [vmem:[#allocation10 + $0x1b70] sm:$0xff]  ;;  %v6792_v4 = vld [vmem:[#allocation10 + $0x1b98] sm:$0xff] }
 0x7a8   : > { %10476 = vmatprep.subr.bf16.mxu0 %v10475_v51  ;;  %v6789_v51 = vld [vmem:[#allocation10 + $0x1b80] sm:$0xff] }
 0x7a9   : > { %v10509_v20 = vpack.c.bf16 %v6793_v38, %v6789_v51  ;;  %v6791_v38 = vld [vmem:[#allocation10 + $0x1b90] sm:$0xff] }
 0x7ab   : > { %10478 = vmatpush1.bf16.msra.mxu0 %v10477_v1  ;;  %v10511_v1 = vpack.c.bf16 %v6802_v16, %v6798_v36  ;;  %v6795_v36 = vld [vmem:[#allocation10 + $0x1bb0] sm:$0xff]  ;;  %v6800_v16 = vld [vmem:[#allocation10 + $0x1bd8] sm:$0xff] }
 0x7ac   : > { %10480 = vmatprep.subr.bf16.mxu0 %v10479_v37  ;;  %v6797_v37 = vld [vmem:[#allocation10 + $0x1bc0] sm:$0xff] }
 0x7ad   : > { %v10513_v39 = vpack.c.bf16 %v6801_v15, %v6797_v37  ;;  %v6799_v15 = vld [vmem:[#allocation10 + $0x1bd0] sm:$0xff] }
 0x7af   : > { %10482 = vmatpush1.bf16.msra.mxu0 %v10481_v46  ;;  %v10515_v46 = vpack.c.bf16 %v6748_v8, %v6744_v18  ;;  %v6803_v18 = vld [vmem:[#allocation10 + $0x1bf0] sm:$0xff]  ;;  %v6968_v8 = vld [vmem:[#allocation10 + $0x1c08] sm:$0xff] }
 0x7b0   : > { %10484 = vmatprep.subr.bf16.mxu0 %v10483_v34  ;;  %v6743_v34 = vld [vmem:[#allocation10 + $0x1a10] sm:$0xff] }
 0x7b1   : > { %v10517_v27 = vpack.c.bf16 %v6747_v41, %v6743_v34  ;;  %v6967_v41 = vld [vmem:[#allocation10 + $0x1c00] sm:$0xff] }
 0x7b2   : > { %6721 = vmatmul.mubr.f32.vlgmr.msra.gmra.mrb[4].mxu0 %v3811_v52  ;;  %v6765_v52 = vld [vmem:[#allocation10 + $0x1ac0] sm:$0xff] }
 0x7b3   : > { %10486 = vmatpush1.bf16.msra.mxu0 %v10485_v24  ;;  %6726 = vmatprep.mubr.f32.mxu0 %v11516_v58  ;;  %v10497_v6 = vpack.c.bf16 %v6769_v50, %v6765_v52  ;;  %v3813_v24 = vmax.f32 %v12831_v61, 0.0  ;;  %v6767_v50 = vld [vmem:[#allocation10 + $0x1ad0] sm:$0xff] }
 0x7b4   : > { %10488 = vmatprep.subr.bf16.mxu0 %v10487_v45  ;;  %v10519_v45 = vpack.c.bf16 %v6756_v47, %v6752_v33  ;;  %v6971_v33 = vld [vmem:[#allocation10 + $0x1c20] sm:$0xff]  ;;  %v6976_v47 = vld [vmem:[#allocation10 + $0x1c48] sm:$0xff] }
 0x7b6   : > { %6727 = vmatmul.mubr.f32.gmra.mrb[6].mxu0 %v3812_v14  ;;  %v10503_v14 = vpack.c.bf16 %v6786_v49, %v6782_v23  ;;  %v6779_v23 = vld [vmem:[#allocation10 + $0x1b30] sm:$0xff]  ;;  %v6784_v49 = vld [vmem:[#allocation10 + $0x1b58] sm:$0xff] }
 0x7b7   : > { %10490 = vmatpush1.bf16.msra.mxu0 %v10489_v43  ;;  %6869 = vmatprep.mubr.f32.mxu0 %v11516_v58  ;;  %v10521_v43 = vpack.c.bf16 %v6755_v35, %v6751_v5  ;;  %v6975_v35 = vld [vmem:[#allocation10 + $0x1c40] sm:$0xff] }
 0x7b8   : > { %10492 = vmatprep.subr.bf16.mxu0 %v10491_v30  ;;  %v3814_v30 = vmax.f32 %v12827_v57, 0.0  ;;  %v7460_v57 = vld [vmem:[#allocation13 + $0x18] sm:$0xff] }
 0x7bb   : > { %10494 = vmatpush1.bf16.msra.mxu0 %v10493_v32  ;;  %v6772_v32 = vld [vmem:[#allocation10 + $0x1af8] sm:$0xff] }
 0x7bc   : > { %10496 = vmatprep.subr.bf16.mxu0 %v10495_v13  ;;  %v10525_v13 = vpack.c.bf16 %v6763_v21, %v6759_v42  ;;  %v10527_v52 = vpack.c.bf16 %v6772_v32, %v6768_v56  ;;  %v6983_v21 = vld [vmem:[#allocation10 + $0x1c80] sm:$0xff]  ;;  %v6992_v32 = vld [vmem:[#allocation10 + $0x1cc8] sm:$0xff] }
 0x7bd   : > { %v6987_v56 = vld [vmem:[#allocation10 + $0x1ca0] sm:$0xff] }
 0x7be   : > { %v10557_v61 = vpack.c.bf16 %v6987_v56, %v6983_v21  ;;  %v7465_v21 = vld [vmem:[#allocation13 + $0x40] sm:$0xff]  ;;  %v7466_v56 = vld [vmem:[#allocation13 + $0x48] sm:$0xff] }
 0x7bf   : > { %10498 = vmatpush1.bf16.msra.mxu0 %v10497_v6  ;;  %v6780_v6 = vld [vmem:[#allocation10 + $0x1b38] sm:$0xff] }
 0x7c0   : > { %10500 = vmatprep.subr.bf16.mxu0 %v10499_v31  ;;  %v10529_v31 = vpack.c.bf16 %v6771_v11, %v6767_v50  ;;  %v10531_v44 = vpack.c.bf16 %v6780_v6, %v6776_v59  ;;  %v6995_v50 = vld [vmem:[#allocation10 + $0x1ce0] sm:$0xff]  ;;  %v7474_v59 = vld [vmem:[#allocation13 + $0x88] sm:$0xff] }
 0x7c1   : > { %v7473_v11 = vld [vmem:[#allocation13 + $0x80] sm:$0xff] }
 0x7c2   : > { %v7457_v6 = vld [vmem:[#allocation13] sm:$0xff] }
 0x7c3   : > { %10502 = vmatpush1.bf16.msra.mxu0 %v10501_v19  ;;  %v6788_v19 = vld [vmem:[#allocation10 + $0x1b78] sm:$0xff] }
 0x7c4   : > { %10504 = vmatprep.subr.bf16.mxu0 %v10503_v14  ;;  %v10533_v14 = vpack.c.bf16 %v6779_v23, %v6775_v53  ;;  %v10535_v29 = vpack.c.bf16 %v6788_v19, %v6784_v49  ;;  %v7476_v53 = vld [vmem:[#allocation13 + $0x98] sm:$0xff] }
 0x7c7   : > { %10506 = vmatpush1.bf16.msra.mxu0 %v10505_v26  ;;  %v6796_v26 = vld [vmem:[#allocation10 + $0x1bb8] sm:$0xff] }
 0x7c8   : > { %10508 = vmatprep.subr.bf16.mxu0 %v10507_v22  ;;  %v10537_v22 = vpack.c.bf16 %v6787_v28, %v6783_v9  ;;  %v10539_v51 = vpack.c.bf16 %v6796_v26, %v6792_v4  ;;  %v7004_v9 = vld [vmem:[#allocation10 + $0x1d28] sm:$0xff] }
 0x7c9   : > { %v7478_v28 = vld [vmem:[#allocation13 + $0xa8] sm:$0xff] }
 0x7cb   : > { %10510 = vmatpush1.bf16.msra.mxu0 %v10509_v20  ;;  %v6804_v20 = vld [vmem:[#allocation10 + $0x1bf8] sm:$0xff] }
 0x7cc   : > { %10512 = vmatprep.subr.bf16.mxu0 %v10511_v1  ;;  %v10541_v1 = vpack.c.bf16 %v6795_v36, %v6791_v38  ;;  %v10543_v37 = vpack.c.bf16 %v6804_v20, %v6800_v16  ;;  %v7461_v38 = vld [vmem:[#allocation13 + $0x20] sm:$0xff]  ;;  %v7462_v36 = vld [vmem:[#allocation13 + $0x28] sm:$0xff] }
 0x7cd   : > { %v7003_v20 = vld [vmem:[#allocation10 + $0x1d20] sm:$0xff] }
 0x7cf   : > { %10514 = vmatpush1.bf16.msra.mxu0 %v10513_v39  ;;  %v6972_v39 = vld [vmem:[#allocation10 + $0x1c28] sm:$0xff] }
 0x7d0   : > { %10516 = vmatprep.subr.bf16.mxu0 %v10515_v46  ;;  %v10545_v46 = vpack.c.bf16 %v6803_v18, %v6799_v15  ;;  %v10547_v34 = vpack.c.bf16 %v6972_v39, %v6968_v8  ;;  %v7008_v15 = vld [vmem:[#allocation10 + $0x1d48] sm:$0xff]  ;;  %v10685_v8 = vpack.c.bf16 %v7462_v36, %v7461_v38  ;;  %v6977_v36 = vld [vmem:[#allocation10 + $0x1c50] sm:$0xff] }
 0x7d1   : > { %v7012_v18 = vld [vmem:[#allocation10 + $0x1d68] sm:$0xff] }
 0x7d2   : > { %6870 = vmatmul.mubr.f32.vlgmr.msra.gmra.mrb[0].mxu0 %v3813_v24 }
 0x7d3   : > { %10518 = vmatpush1.bf16.msra.mxu0 %v10517_v27  ;;  %6875 = vmatprep.mubr.f32.mxu0 %v11516_v58  ;;  %v6980_v27 = vld [vmem:[#allocation10 + $0x1c68] sm:$0xff] }
 0x7d4   : > { %10520 = vmatprep.subr.bf16.mxu0 %v10519_v45  ;;  %v10549_v45 = vpack.c.bf16 %v6971_v33, %v6967_v41  ;;  %v10551_v5 = vpack.c.bf16 %v6980_v27, %v6976_v47  ;;  %v7463_v41 = vld [vmem:[#allocation13 + $0x30] sm:$0xff]  ;;  %v7464_v33 = vld [vmem:[#allocation13 + $0x38] sm:$0xff]  ;;  %v10567_v47 = vpack.c.bf16 %v7012_v18, %v7008_v15  ;;  %v3816_v15 = vmax.f32 %v12834_v55, 0.0 }
 0x7d5   : > { %v7011_v27 = vld [vmem:[#allocation10 + $0x1d60] sm:$0xff] }
 0x7d6   : > { %6876 = vmatmul.mubr.f32.gmra.mrb[2].mxu0 %v3814_v30 }
 0x7d7   : > { %10522 = vmatpush1.bf16.msra.mxu0 %v10521_v43  ;;  %6946 = vmatprep.mubr.f32.mxu0 %v11516_v58  ;;  %v6988_v43 = vld [vmem:[#allocation10 + $0x1ca8] sm:$0xff] }
 0x7d8   : > { %10524 = vmatprep.subr.bf16.mxu0 %v10523_v3  ;;  %v10553_v3 = vpack.c.bf16 %v6979_v17, %v6975_v35  ;;  %v10555_v42 = vpack.c.bf16 %v6988_v43, %v6984_v7  ;;  %v7016_v35 = vld [vmem:[#allocation10 + $0x1d88] sm:$0xff]  ;;  %v10689_v7 = vpack.c.bf16 %v7464_v33, %v7463_v41 }
 0x7d9   : > { %v7020_v17 = vld [vmem:[#allocation10 + $0x1da8] sm:$0xff] }
 0x7db   : > { %10526 = vmatpush1.bf16.msra.mxu0 %v10525_v13  ;;  %v6996_v13 = vld [vmem:[#allocation10 + $0x1ce8] sm:$0xff] }
 0x7dc   : > { %10528 = vmatprep.subr.bf16.mxu0 %v10527_v52  ;;  %v6991_v52 = vld [vmem:[#allocation10 + $0x1cc0] sm:$0xff]  ;;  %v10559_v23 = vpack.c.bf16 %v6996_v13, %v6992_v32  ;;  %v10571_v32 = vpack.c.bf16 %v7020_v17, %v7016_v35 }
 0x7dd   : > { %v10561_v26 = vpack.c.bf16 %v6995_v50, %v6991_v52  ;;  %v7019_v13 = vld [vmem:[#allocation10 + $0x1da0] sm:$0xff]  ;;  %v7483_v52 = vld [vmem:[#allocation13 + $0xd0] sm:$0xff] }
 0x7de   : > { %v7484_v50 = vld [vmem:[#allocation13 + $0xd8] sm:$0xff] }
 0x7df   : > { %10530 = vmatpush1.bf16.msra.mxu0 %v10529_v31  ;;  %v7458_v31 = vld [vmem:[#allocation13 + $0x8] sm:$0xff] }
 0x7e0   : > { %10532 = vmatprep.subr.bf16.mxu0 %v10531_v44  ;;  %v7475_v44 = vld [vmem:[#allocation13 + $0x90] sm:$0xff]  ;;  %v10677_v49 = vpack.c.bf16 %v7458_v31, %v7457_v6  ;;  %v10693_v6 = vpack.c.bf16 %v7466_v56, %v7465_v21 }
 0x7e1   : > { %v10679_v19 = vpack.c.bf16 %v7476_v53, %v7475_v44  ;;  %v7467_v31 = vld [vmem:[#allocation13 + $0x50] sm:$0xff]  ;;  %v7468_v44 = vld [vmem:[#allocation13 + $0x58] sm:$0xff] }
 0x7e3   : > { %10534 = vmatpush1.bf16.msra.mxu0 %v10533_v14  ;;  %v7459_v14 = vld [vmem:[#allocation13 + $0x10] sm:$0xff] }
 0x7e4   : > { %10536 = vmatprep.subr.bf16.mxu0 %v10535_v29  ;;  %v7000_v29 = vld [vmem:[#allocation10 + $0x1d08] sm:$0xff]  ;;  %v10681_v4 = vpack.c.bf16 %v7460_v57, %v7459_v14  ;;  %v6974_v14 = vld [vmem:[#allocation10 + $0x1c38] sm:$0xff]  ;;  %v10697_v57 = vpack.c.bf16 %v7468_v44, %v7467_v31 }
 0x7e5   : > { %v10563_v16 = vpack.c.bf16 %v7004_v9, %v7000_v29  ;;  %v6969_v9 = vld [vmem:[#allocation10 + $0x1c10] sm:$0xff]  ;;  %v7030_v31 = vld [vmem:[#allocation10 + $0x1df8] sm:$0xff] }
 0x7e7   : > { %10538 = vmatpush1.bf16.msra.mxu0 %v10537_v22  ;;  %v6999_v22 = vld [vmem:[#allocation10 + $0x1d00] sm:$0xff] }
 0x7e8   : > { %10540 = vmatprep.subr.bf16.mxu0 %v10539_v51  ;;  %v10565_v39 = vpack.c.bf16 %v7003_v20, %v6999_v22  ;;  %v6986_v20 = vld [vmem:[#allocation10 + $0x1c98] sm:$0xff] }
 0x7eb   : > { %10542 = vmatpush1.bf16.msra.mxu0 %v10541_v1  ;;  %v7479_v1 = vld [vmem:[#allocation13 + $0xb0] sm:$0xff] }
 0x7ec   : > { %10544 = vmatprep.subr.bf16.mxu0 %v10543_v37  ;;  %v7480_v37 = vld [vmem:[#allocation13 + $0xb8] sm:$0xff] }
 0x7ef   : > { %10546 = vmatpush1.bf16.msra.mxu0 %v10545_v46  ;;  %v7007_v46 = vld [vmem:[#allocation10 + $0x1d40] sm:$0xff] }
 0x7f0   : > { %10548 = vmatprep.subr.bf16.mxu0 %v10547_v34  ;;  %v10687_v34 = vpack.c.bf16 %v7480_v37, %v7479_v1  ;;  %v10569_v43 = vpack.c.bf16 %v7011_v27, %v7007_v46  ;;  %v6990_v1 = vld [vmem:[#allocation10 + $0x1cb8] sm:$0xff]  ;;  %v6997_v27 = vld [vmem:[#allocation10 + $0x1cf0] sm:$0xff] }
 0x7f1   : > { %v10587_v18 = vpack.c.bf16 %v6990_v1, %v6986_v20  ;;  %v6994_v46 = vld [vmem:[#allocation10 + $0x1cd8] sm:$0xff]  ;;  %v7214_v20 = vld [vmem:[#allocation10 + $0x1ea8] sm:$0xff] }
 0x7f2   : > { %6947 = vmatmul.mubr.f32.vlgmr.msra.gmra.mrb[4].mxu0 %v3813_v24  ;;  %v10675_v24 = vpack.c.bf16 %v7474_v59, %v7473_v11  ;;  %v7024_v11 = vld [vmem:[#allocation10 + $0x1dc8] sm:$0xff] }
 0x7f3   : > { %10550 = vmatpush1.bf16.msra.mxu0 %v10549_v45  ;;  %6952 = vmatprep.mubr.f32.mxu0 %v11516_v58  ;;  %v7481_v45 = vld [vmem:[#allocation13 + $0xc0] sm:$0xff] }
 0x7f4   : > { %10552 = vmatprep.subr.bf16.mxu0 %v10551_v5  ;;  %10676 = vmatprep.subr.bf16.mxu1 %v10675_v24  ;;  %v7482_v5 = vld [vmem:[#allocation13 + $0xc8] sm:$0xff]  ;;  %v10695_v24 = vpack.c.bf16 %v7484_v50, %v7483_v52  ;;  %v7018_v52 = vld [vmem:[#allocation10 + $0x1d98] sm:$0xff] }
 0x7f5   : > { %10678 = vmatpush3.bf16.msra.mxu1 %v10677_v49  ;;  %v7028_v59 = vld [vmem:[#allocation10 + $0x1de8] sm:$0xff]  ;;  %v7027_v49 = vld [vmem:[#allocation10 + $0x1de0] sm:$0xff]  ;;  %v7022_v50 = vld [vmem:[#allocation10 + $0x1db8] sm:$0xff] }
 0x7f6   : > { %6953 = vmatmul.mubr.f32.gmra.mrb[6].mxu0 %v3814_v30  ;;  %v7477_v30 = vld [vmem:[#allocation13 + $0xa0] sm:$0xff]  ;;  %10680 = vmatprep.subr.bf16.mxu1 %v10679_v19  ;;  %v10575_v53 = vpack.c.bf16 %v7028_v59, %v7024_v11  ;;  %v6970_v19 = vld [vmem:[#allocation10 + $0x1c18] sm:$0xff]  ;;  %v10603_v59 = vpack.c.bf16 %v7022_v50, %v7018_v52 }
 0x7f7   : > { %10554 = vmatpush1.bf16.msra.mxu0 %v10553_v3  ;;  %7095 = vmatprep.mubr.f32.mxu0 %v11516_v58  ;;  %v10683_v51 = vpack.c.bf16 %v7478_v28, %v7477_v30  ;;  %v7015_v3 = vld [vmem:[#allocation10 + $0x1d80] sm:$0xff]  ;;  %v10579_v29 = vpack.c.bf16 %v6974_v14, %v6970_v19  ;;  %v6973_v28 = vld [vmem:[#allocation10 + $0x1c30] sm:$0xff]  ;;  %v7194_v19 = vld [vmem:[#allocation10 + $0x1e08] sm:$0xff] }
 0x7f8   : > { %10556 = vmatprep.subr.bf16.mxu0 %v10555_v42  ;;  %v10691_v42 = vpack.c.bf16 %v7482_v5, %v7481_v45  ;;  %v10581_v22 = vpack.c.bf16 %v6973_v28, %v6969_v9  ;;  %v7002_v45 = vld [vmem:[#allocation10 + $0x1d18] sm:$0xff]  ;;  %v7198_v14 = vld [vmem:[#allocation10 + $0x1e28] sm:$0xff]  ;;  %v7197_v9 = vld [vmem:[#allocation10 + $0x1e20] sm:$0xff] }
 0x7f9   : > { %10682 = vmatpush3.bf16.msra.mxu1 %v10681_v4  ;;  %v6978_v4 = vld [vmem:[#allocation10 + $0x1c58] sm:$0xff]  ;;  %v7202_v28 = vld [vmem:[#allocation10 + $0x1e48] sm:$0xff]  ;;  %v7245_v52 = vld [vmem:[#allocation10 + $0x1fa0] sm:$0xff] }
 0x7fa   : > { %10684 = vmatprep.subr.bf16.mxu1 %v10683_v51  ;;  %v3815_v51 = vmax.f32 %v12837_v25, 0.0  ;;  %v7006_v5 = vld [vmem:[#allocation10 + $0x1d38] sm:$0xff]  ;;  %v7250_v50 = vld [vmem:[#allocation10 + $0x1fc8] sm:$0xff] }
 0x7fb   : > { %10558 = vmatpush1.bf16.msra.mxu0 %v10557_v61  ;;  %v10573_v61 = vpack.c.bf16 %v7019_v13, %v7015_v3  ;;  %v10595_v17 = vpack.c.bf16 %v7006_v5, %v7002_v45  ;;  %v7010_v3 = vld [vmem:[#allocation10 + $0x1d58] sm:$0xff]  ;;  %v7013_v13 = vld [vmem:[#allocation10 + $0x1d70] sm:$0xff]  ;;  %v7225_v5 = vld [vmem:[#allocation10 + $0x1f00] sm:$0xff] }
 0x7fc   : > { %10560 = vmatprep.subr.bf16.mxu0 %v10559_v23  ;;  %v7023_v23 = vld [vmem:[#allocation10 + $0x1dc0] sm:$0xff] }
 0x7fd   : > { %10686 = vmatpush3.bf16.msra.mxu1 %v10685_v8  ;;  %v10577_v30 = vpack.c.bf16 %v7027_v49, %v7023_v23  ;;  %v6985_v8 = vld [vmem:[#allocation10 + $0x1c90] sm:$0xff] }
 0x7fe   : > { %10688 = vmatprep.subr.bf16.mxu1 %v10687_v34  ;;  %v6998_v34 = vld [vmem:[#allocation10 + $0x1cf8] sm:$0xff]  ;;  %v7025_v23 = vld [vmem:[#allocation10 + $0x1dd0] sm:$0xff] }
 0x7ff   : > { %10562 = vmatpush1.bf16.msra.mxu0 %v10561_v26  ;;  %v6982_v26 = vld [vmem:[#allocation10 + $0x1c78] sm:$0xff]  ;;  %v10591_v33 = vpack.c.bf16 %v6998_v34, %v6994_v46  ;;  %v7029_v49 = vld [vmem:[#allocation10 + $0x1df0] sm:$0xff]  ;;  %v7222_v46 = vld [vmem:[#allocation10 + $0x1ee8] sm:$0xff] }
 0x800   : > { %10564 = vmatprep.subr.bf16.mxu0 %v10563_v16  ;;  %v10583_v38 = vpack.c.bf16 %v6982_v26, %v6978_v4  ;;  %v6981_v16 = vld [vmem:[#allocation10 + $0x1c70] sm:$0xff]  ;;  %v7206_v4 = vld [vmem:[#allocation10 + $0x1e68] sm:$0xff] }
 0x801   : > { %10690 = vmatpush3.bf16.msra.mxu1 %v10689_v7  ;;  %v10585_v37 = vpack.c.bf16 %v6981_v16, %v6977_v36  ;;  %v7001_v7 = vld [vmem:[#allocation10 + $0x1d10] sm:$0xff]  ;;  %v7205_v36 = vld [vmem:[#allocation10 + $0x1e60] sm:$0xff]  ;;  %v7210_v16 = vld [vmem:[#allocation10 + $0x1e88] sm:$0xff] }
 0x802   : > { %10692 = vmatprep.subr.bf16.mxu1 %v10691_v42  ;;  %v7014_v42 = vld [vmem:[#allocation10 + $0x1d78] sm:$0xff] }
 0x803   : > { %10566 = vmatpush1.bf16.msra.mxu0 %v10565_v39  ;;  %v6989_v39 = vld [vmem:[#allocation10 + $0x1cb0] sm:$0xff]  ;;  %v10599_v56 = vpack.c.bf16 %v7014_v42, %v7010_v3  ;;  %v7237_v3 = vld [vmem:[#allocation10 + $0x1f60] sm:$0xff]  ;;  %v7242_v42 = vld [vmem:[#allocation10 + $0x1f88] sm:$0xff] }
 0x804   : > { %10568 = vmatprep.subr.bf16.mxu0 %v10567_v47  ;;  %v10589_v41 = vpack.c.bf16 %v6989_v39, %v6985_v8  ;;  %v6993_v47 = vld [vmem:[#allocation10 + $0x1cd0] sm:$0xff]  ;;  %v7213_v8 = vld [vmem:[#allocation10 + $0x1ea0] sm:$0xff]  ;;  %v7218_v39 = vld [vmem:[#allocation10 + $0x1ec8] sm:$0xff] }
 0x805   : > { %10694 = vmatpush3.bf16.msra.mxu1 %v10693_v6  ;;  %v10593_v35 = vpack.c.bf16 %v6997_v27, %v6993_v47  ;;  %v7017_v6 = vld [vmem:[#allocation10 + $0x1d90] sm:$0xff]  ;;  %v10623_v25 = vpack.c.bf16 %v7222_v46, %v7218_v39  ;;  %v7230_v47 = vld [vmem:[#allocation10 + $0x1f28] sm:$0xff] }
 0x806   : > { %10696 = vmatprep.subr.bf16.mxu1 %v10695_v24  ;;  %v7026_v24 = vld [vmem:[#allocation10 + $0x1dd8] sm:$0xff]  ;;  %v7219_v39 = vld [vmem:[#allocation10 + $0x1ed0] sm:$0xff] }
 0x807   : > { %10570 = vmatpush1.bf16.msra.mxu0 %v10569_v43  ;;  %v7005_v43 = vld [vmem:[#allocation10 + $0x1d30] sm:$0xff] }
 0x808   : > { %10572 = vmatprep.subr.bf16.mxu0 %v10571_v32  ;;  %v10597_v21 = vpack.c.bf16 %v7005_v43, %v7001_v7  ;;  %v7009_v32 = vld [vmem:[#allocation10 + $0x1d50] sm:$0xff]  ;;  %v7238_v7 = vld [vmem:[#allocation10 + $0x1f68] sm:$0xff]  ;;  %v7233_v43 = vld [vmem:[#allocation10 + $0x1f40] sm:$0xff] }
 0x809   : > { %10698 = vmatpush3.bf16.msra.mxu1 %v10697_v57  ;;  %v10601_v11 = vpack.c.bf16 %v7013_v13, %v7009_v32  ;;  %v10609_v57 = vpack.c.bf16 %v7029_v49, %v7025_v23  ;;  %v7241_v13 = vld [vmem:[#allocation10 + $0x1f80] sm:$0xff]  ;;  %v7195_v49 = vld [vmem:[#allocation10 + $0x1e10] sm:$0xff] }
 0x80a   : > { %v7223_v46 = vld [vmem:[#allocation10 + $0x1ef0] sm:$0xff] }
 0x80b   : > { %10574 = vmatpush1.bf16.msra.mxu0 %v10573_v61  ;;  %v7021_v61 = vld [vmem:[#allocation10 + $0x1db0] sm:$0xff] }
 0x80c   : > { %10576 = vmatprep.subr.bf16.mxu0 %v10575_v53  ;;  %v10605_v44 = vpack.c.bf16 %v7021_v61, %v7017_v6  ;;  %v10607_v53 = vpack.c.bf16 %v7030_v31, %v7026_v24  ;;  %v7249_v61 = vld [vmem:[#allocation10 + $0x1fc0] sm:$0xff]  ;;  %v7196_v31 = vld [vmem:[#allocation10 + $0x1e18] sm:$0xff] }
 0x80d   : > { %v7253_v24 = vld [vmem:[#allocation10 + $0x1fe0] sm:$0xff] }
 0x80f   : > { %10578 = vmatpush1.bf16.msra.mxu0 %v10577_v30  ;;  %v10611_v30 = vpack.c.bf16 %v7198_v14, %v7194_v19  ;;  %v7199_v19 = vld [vmem:[#allocation10 + $0x1e30] sm:$0xff]  ;;  %v7204_v14 = vld [vmem:[#allocation10 + $0x1e58] sm:$0xff] }
 0x810   : > { %10580 = vmatprep.subr.bf16.mxu0 %v10579_v29  ;;  %v7193_v29 = vld [vmem:[#allocation10 + $0x1e00] sm:$0xff] }
 0x811   : > { %v10613_v26 = vpack.c.bf16 %v7197_v9, %v7193_v29  ;;  %v3817_v29 = vmax.f32 %v12843_v10, 0.0 }
 0x812   : > { %7096 = vmatmul.mubr.f32.vlgmr.msra.gmra.mrb[0].mxu0 %v3815_v51 }
 0x813   : > { %10582 = vmatpush1.bf16.msra.mxu0 %v10581_v22  ;;  %7101 = vmatprep.mubr.f32.mxu0 %v11516_v58  ;;  %v10615_v22 = vpack.c.bf16 %v7206_v4, %v7202_v28  ;;  %v7203_v28 = vld [vmem:[#allocation10 + $0x1e50] sm:$0xff] }
 0x814   : > { %10584 = vmatprep.subr.bf16.mxu0 %v10583_v38  ;;  %v7201_v38 = vld [vmem:[#allocation10 + $0x1e40] sm:$0xff]  ;;  %v7207_v4 = vld [vmem:[#allocation10 + $0x1e70] sm:$0xff] }
 0x815   : > { %v10617_v1 = vpack.c.bf16 %v7205_v36, %v7201_v38  ;;  %v10649_v38 = vpack.c.bf16 %v7207_v4, %v7203_v28  ;;  %v3818_v36 = vmax.f32 %v12840_v12, 0.0 }
 0x816   : > { %7102 = vmatmul.mubr.f32.gmra.mrb[2].mxu0 %v3816_v15 }
 0x817   : > { %10586 = vmatpush1.bf16.msra.mxu0 %v10585_v37  ;;  %7172 = vmatprep.mubr.f32.mxu0 %v11516_v58  ;;  %v10619_v37 = vpack.c.bf16 %v7214_v20, %v7210_v16  ;;  %v7211_v20 = vld [vmem:[#allocation10 + $0x1e90] sm:$0xff] }
 0x818   : > { %10588 = vmatprep.subr.bf16.mxu0 %v10587_v18  ;;  %v7209_v18 = vld [vmem:[#allocation10 + $0x1e80] sm:$0xff] }
 0x819   : > { %v10621_v34 = vpack.c.bf16 %v7213_v8, %v7209_v18  ;;  %v7224_v18 = vld [vmem:[#allocation10 + $0x1ef8] sm:$0xff] }
 0x81b   : > { %10590 = vmatpush1.bf16.msra.mxu0 %v10589_v41  ;;  %v7221_v41 = vld [vmem:[#allocation10 + $0x1ee0] sm:$0xff] }
 0x81c   : > { %10592 = vmatprep.subr.bf16.mxu0 %v10591_v33  ;;  %v7226_v33 = vld [vmem:[#allocation10 + $0x1f08] sm:$0xff] }
 0x81d   : > { %v10627_v45 = vpack.c.bf16 %v7230_v47, %v7226_v33  ;;  %v7231_v33 = vld [vmem:[#allocation10 + $0x1f30] sm:$0xff]  ;;  %v7236_v47 = vld [vmem:[#allocation10 + $0x1f58] sm:$0xff] }
 0x81f   : > { %10594 = vmatpush1.bf16.msra.mxu0 %v10593_v35  ;;  %v7229_v35 = vld [vmem:[#allocation10 + $0x1f20] sm:$0xff] }
 0x820   : > { %10596 = vmatprep.subr.bf16.mxu0 %v10595_v17  ;;  %v7234_v17 = vld [vmem:[#allocation10 + $0x1f48] sm:$0xff]  ;;  %v10629_v55 = vpack.c.bf16 %v7229_v35, %v7225_v5  ;;  %v7235_v35 = vld [vmem:[#allocation10 + $0x1f50] sm:$0xff] }
 0x823   : > { %10598 = vmatpush1.bf16.msra.mxu0 %v10597_v21  ;;  %v7246_v21 = vld [vmem:[#allocation10 + $0x1fa8] sm:$0xff] }
 0x824   : > { %10600 = vmatprep.subr.bf16.mxu0 %v10599_v56  ;;  %v10633_v56 = vpack.c.bf16 %v7237_v3, %v7233_v43  ;;  %v10635_v32 = vpack.c.bf16 %v7246_v21, %v7242_v42  ;;  %v7243_v3 = vld [vmem:[#allocation10 + $0x1f90] sm:$0xff]  ;;  %v7252_v21 = vld [vmem:[#allocation10 + $0x1fd8] sm:$0xff] }
 0x825   : > { %v7247_v42 = vld [vmem:[#allocation10 + $0x1fb0] sm:$0xff] }
 0x827   : > { %10602 = vmatpush1.bf16.msra.mxu0 %v10601_v11  ;;  %v7254_v11 = vld [vmem:[#allocation10 + $0x1fe8] sm:$0xff] }
 0x828   : > { %10604 = vmatprep.subr.bf16.mxu0 %v10603_v59  ;;  %v10637_v59 = vpack.c.bf16 %v7245_v52, %v7241_v13  ;;  %v10639_v6 = vpack.c.bf16 %v7254_v11, %v7250_v50  ;;  %v7251_v52 = vld [vmem:[#allocation10 + $0x1fd0] sm:$0xff] }
 0x829   : > { %v7255_v50 = vld [vmem:[#allocation10 + $0x1ff0] sm:$0xff] }
 0x82a   : > { %v10673_v11 = vpack.c.bf16 %v7255_v50, %v7251_v52  ;;  %v7496_v52 = vld [vmem:[#allocation13 + $0x138] sm:$0xff]  ;;  %v7513_v50 = vld [vmem:[#allocation13 + $0x1c0] sm:$0xff] }
 0x82b   : > { %10606 = vmatpush1.bf16.msra.mxu0 %v10605_v44  ;;  %v7200_v44 = vld [vmem:[#allocation10 + $0x1e38] sm:$0xff] }
 0x82c   : > { %10608 = vmatprep.subr.bf16.mxu0 %v10607_v53  ;;  %v10641_v53 = vpack.c.bf16 %v7253_v24, %v7249_v61  ;;  %v10643_v23 = vpack.c.bf16 %v7200_v44, %v7196_v31  ;;  %v7469_v24 = vld [vmem:[#allocation13 + $0x60] sm:$0xff]  ;;  %v7470_v31 = vld [vmem:[#allocation13 + $0x68] sm:$0xff] }
 0x82d   : > { %v10701_v44 = vpack.c.bf16 %v7470_v31, %v7469_v24  ;;  %v7498_v24 = vld [vmem:[#allocation13 + $0x148] sm:$0xff]  ;;  %v7515_v31 = vld [vmem:[#allocation13 + $0x1d0] sm:$0xff] }
 0x82f   : > { %10610 = vmatpush1.bf16.msra.mxu0 %v10609_v57  ;;  %v7208_v57 = vld [vmem:[#allocation10 + $0x1e78] sm:$0xff] }
 0x830   : > { %10612 = vmatprep.subr.bf16.mxu0 %v10611_v30  ;;  %v10645_v30 = vpack.c.bf16 %v7199_v19, %v7195_v49  ;;  %v10647_v9 = vpack.c.bf16 %v7208_v57, %v7204_v14  ;;  %v7471_v19 = vld [vmem:[#allocation13 + $0x70] sm:$0xff]  ;;  %v7472_v14 = vld [vmem:[#allocation13 + $0x78] sm:$0xff] }
 0x831   : > { %v10705_v57 = vpack.c.bf16 %v7472_v14, %v7471_v19  ;;  %v7500_v19 = vld [vmem:[#allocation13 + $0x158] sm:$0xff]  ;;  %v7517_v14 = vld [vmem:[#allocation13 + $0x1e0] sm:$0xff] }
 0x832   : > { %7173 = vmatmul.mubr.f32.vlgmr.msra.gmra.mrb[4].mxu0 %v3815_v51  ;;  %v7217_v51 = vld [vmem:[#allocation10 + $0x1ec0] sm:$0xff] }
 0x833   : > { %10614 = vmatpush1.bf16.msra.mxu0 %v10613_v26  ;;  %7178 = vmatprep.mubr.f32.mxu0 %v11516_v58  ;;  %v10625_v27 = vpack.c.bf16 %v7221_v41, %v7217_v51  ;;  %v7212_v26 = vld [vmem:[#allocation10 + $0x1e98] sm:$0xff]  ;;  %v10657_v51 = vpack.c.bf16 %v7223_v46, %v7219_v39  ;;  %v7227_v41 = vld [vmem:[#allocation10 + $0x1f10] sm:$0xff] }
 0x834   : > { %10616 = vmatprep.subr.bf16.mxu0 %v10615_v22  ;;  %v7216_v22 = vld [vmem:[#allocation10 + $0x1eb8] sm:$0xff] }
 0x835   : > { %v10651_v16 = vpack.c.bf16 %v7216_v22, %v7212_v26  ;;  %v13051_v26 = vld [vmem:[#allocation11] sm:$0xf] }
 0x836   : > { %7179 = vmatmul.mubr.f32.gmra.mrb[6].mxu0 %v3816_v15  ;;  %v10631_v15 = vpack.c.bf16 %v7238_v7, %v7234_v17  ;;  %v7239_v17 = vld [vmem:[#allocation10 + $0x1f70] sm:$0xff]  ;;  %v7244_v7 = vld [vmem:[#allocation10 + $0x1f98] sm:$0xff] }
 0x837   : > { %10618 = vmatpush1.bf16.msra.mxu0 %v10617_v1  ;;  %7321 = vmatprep.mubr.f32.mxu0 %v11516_v58  ;;  %v7215_v1 = vld [vmem:[#allocation10 + $0x1eb0] sm:$0xff] }
 0x838   : > { %10620 = vmatprep.subr.bf16.mxu0 %v10619_v37  ;;  %v7220_v37 = vld [vmem:[#allocation10 + $0x1ed8] sm:$0xff]  ;;  %v10653_v10 = vpack.c.bf16 %v7215_v1, %v7211_v20 }
 0x839   : > { %v10655_v8 = vpack.c.bf16 %v7224_v18, %v7220_v37 }
 0x83b   : > { %10622 = vmatpush1.bf16.msra.mxu0 %v10621_v34  ;;  %v7228_v34 = vld [vmem:[#allocation10 + $0x1f18] sm:$0xff] }
 0x83c   : > { %10624 = vmatprep.subr.bf16.mxu0 %v10623_v25  ;;  %v7232_v25 = vld [vmem:[#allocation10 + $0x1f38] sm:$0xff] }
 0x83d   : > { %v10659_v12 = vpack.c.bf16 %v7232_v25, %v7228_v34  ;;  %v7507_v34 = vld [vmem:[#allocation13 + $0x190] sm:$0xff]  ;;  %v7508_v25 = vld [vmem:[#allocation13 + $0x198] sm:$0xff] }
 0x83f   : > { %10626 = vmatpush1.bf16.msra.mxu0 %v10625_v27  ;;  %v7240_v27 = vld [vmem:[#allocation10 + $0x1f78] sm:$0xff] }
 0x840   : > { %10628 = vmatprep.subr.bf16.mxu0 %v10627_v45  ;;  %v10661_v45 = vpack.c.bf16 %v7231_v33, %v7227_v41  ;;  %v10663_v5 = vpack.c.bf16 %v7240_v27, %v7236_v47 }
 0x843   : > { %10630 = vmatpush1.bf16.msra.mxu0 %v10629_v55  ;;  %v7248_v55 = vld [vmem:[#allocation10 + $0x1fb8] sm:$0xff] }
 0x844   : > { %10632 = vmatprep.subr.bf16.mxu0 %v10631_v15  ;;  %v10665_v15 = vpack.c.bf16 %v7239_v17, %v7235_v35  ;;  %v10667_v43 = vpack.c.bf16 %v7248_v55, %v7244_v7  ;;  %v7492_v35 = vld [vmem:[#allocation13 + $0x118] sm:$0xff]  ;;  %v7509_v17 = vld [vmem:[#allocation13 + $0x1a0] sm:$0xff]  ;;  %v7510_v7 = vld [vmem:[#allocation13 + $0x1a8] sm:$0xff] }
 0x847   : > { %10634 = vmatpush1.bf16.msra.mxu0 %v10633_v56  ;;  %v7256_v56 = vld [vmem:[#allocation10 + $0x1ff8] sm:$0xff] }
 0x848   : > { %10636 = vmatprep.subr.bf16.mxu0 %v10635_v32  ;;  %v10669_v32 = vpack.c.bf16 %v7247_v42, %v7243_v3  ;;  %v10671_v13 = vpack.c.bf16 %v7256_v56, %v7252_v21  ;;  %v7493_v3 = vld [vmem:[#allocation13 + $0x120] sm:$0xff]  ;;  %v7494_v42 = vld [vmem:[#allocation13 + $0x128] sm:$0xff]  ;;  %v7512_v21 = vld [vmem:[#allocation13 + $0x1b8] sm:$0xff] }
 0x849   : > { %v10717_v56 = vpack.c.bf16 %v7494_v42, %v7493_v3 }
 0x84b   : > { %10638 = vmatpush1.bf16.msra.mxu0 %v10637_v59  ;;  %v7485_v59 = vld [vmem:[#allocation13 + $0xe0] sm:$0xff] }
 0x84c   : > { %10640 = vmatprep.subr.bf16.mxu0 %v10639_v6  ;;  %v7486_v6 = vld [vmem:[#allocation13 + $0xe8] sm:$0xff] }
 0x84d   : > { %v10699_v61 = vpack.c.bf16 %v7486_v6, %v7485_v59 }
 0x84f   : > { %10642 = vmatpush1.bf16.msra.mxu0 %v10641_v53  ;;  %10700 = vmatprep.subr.bf16.mxu1 %v10699_v61  ;;  %v7487_v53 = vld [vmem:[#allocation13 + $0xf0] sm:$0xff]  ;;  %v7497_v61 = vld [vmem:[#allocation13 + $0x140] sm:$0xff] }
 0x850   : > { %10644 = vmatprep.subr.bf16.mxu0 %v10643_v23  ;;  %10702 = vmatpush3.bf16.msra.mxu1 %v10701_v44  ;;  %v7488_v23 = vld [vmem:[#allocation13 + $0xf8] sm:$0xff] }
 0x851   : > { %v10703_v49 = vpack.c.bf16 %v7488_v23, %v7487_v53  ;;  %v7516_v44 = vld [vmem:[#allocation13 + $0x1d8] sm:$0xff]  ;;  %v10725_v53 = vpack.c.bf16 %v7498_v24, %v7497_v61 }
 0x852   : > { %7322 = vmatmul.mubr.f32.vlgmr.msra.gmra.mrb[0].mxu0 %v3817_v29  ;;  %v10727_v23 = vpack.c.bf16 %v7516_v44, %v7515_v31 }
 0x853   : > { %10646 = vmatpush1.bf16.msra.mxu0 %v10645_v30  ;;  %7327 = vmatprep.mubr.f32.mxu0 %v11516_v58  ;;  %v7505_v30 = vld [vmem:[#allocation13 + $0x180] sm:$0xff] }
 0x854   : > { %10648 = vmatprep.subr.bf16.mxu0 %v10647_v9  ;;  %10704 = vmatprep.subr.bf16.mxu1 %v10703_v49  ;;  %v7421_v9 = vlaneseq  ;;  %v7499_v49 = vld [vmem:[#allocation13 + $0x150] sm:$0xff] }
 0x855   : > { %10706 = vmatpush3.bf16.msra.mxu1 %v10705_v57  ;;  %v7518_v57 = vld [vmem:[#allocation13 + $0x1e8] sm:$0xff] }
 0x856   : > { %7328 = vmatmul.mubr.f32.gmra.mrb[2].mxu0 %v3818_v36  ;;  %v13048_v28 = vshrl.u32 %v7421_v9, 7 }
 0x857   : > { %10650 = vmatpush1.bf16.msra.mxu0 %v10649_v38  ;;  %7398 = vmatprep.mubr.f32.mxu0 %v11516_v58 }
 0x858   : > { %10652 = vmatprep.subr.bf16.mxu0 %v10651_v16  ;;  %v7423_v4 = vsub.s32 0, %v13048_v28  ;;  %v7427_v22 = vsub.s32 1, %v13048_v28 }
 0x85a   : > { %v7424_v38 = vrot.slane %v13051_v26, %v7423_v4  ;;  %v7428_v16 = vrot.slane %v13051_v26, %v7427_v22  ;;  %v7501_v4 = vld [vmem:[#allocation13 + $0x160] sm:$0xff]  ;;  %v7502_v22 = vld [vmem:[#allocation13 + $0x168] sm:$0xff] }
 0x85b   : > { %10654 = vmatpush1.bf16.msra.mxu0 %v10653_v10  ;;  %v7489_v10 = vld [vmem:[#allocation13 + $0x100] sm:$0xff] }
 0x85c   : > { %10656 = vmatprep.subr.bf16.mxu0 %v10655_v8  ;;  %v7490_v8 = vld [vmem:[#allocation13 + $0x108] sm:$0xff] }
 0x85d   : > { %v10709_v47 = vpack.c.bf16 %v7490_v8, %v7489_v10  ;;  %v7504_v10 = vld [vmem:[#allocation13 + $0x178] sm:$0xff] }
 0x85f   : > { %10658 = vmatpush1.bf16.msra.mxu0 %v10657_v51 }
 0x860   : > { %10660 = vmatprep.subr.bf16.mxu0 %v10659_v12 }
 0x863   : > { %10662 = vmatpush1.bf16.msra.mxu0 %v10661_v45 }
 0x864   : > { %10664 = vmatprep.subr.bf16.mxu0 %v10663_v5  ;;  %v7491_v5 = vld [vmem:[#allocation13 + $0x110] sm:$0xff] }
 0x867   : > { %10666 = vmatpush1.bf16.msra.mxu0 %v10665_v15  ;;  %v10713_v15 = vpack.c.bf16 %v7492_v35, %v7491_v5 }
 0x868   : > { %10668 = vmatprep.subr.bf16.mxu0 %v10667_v43 }
 0x86b   : > { %10670 = vmatpush1.bf16.msra.mxu0 %v10669_v32 }
 0x86c   : > { %10672 = vmatprep.subr.bf16.mxu0 %v10671_v13  ;;  %v7495_v13 = vld [vmem:[#allocation13 + $0x130] sm:$0xff] }
 0x86d   : > { %v10721_v59 = vpack.c.bf16 %v7496_v52, %v7495_v13 }
 0x86f   : > { %10674 = vmatpush1.bf16.msra.mxu0 %v10673_v11  ;;  %v7514_v11 = vld [vmem:[#allocation13 + $0x1c8] sm:$0xff] }
 0x870   : > { %v10723_v6 = vpack.c.bf16 %v7514_v11, %v7513_v50 }
 0x872   : > { %7399 = vmatmul.mubr.f32.vlgmr.msra.gmra.mrb[4].mxu0 %v3817_v29  ;;  %v7506_v29 = vld [vmem:[#allocation13 + $0x188] sm:$0xff] }
 0x873   : > { %7404 = vmatprep.mubr.f32.mxu0 %v11516_v58  ;;  %v10707_v58 = vpack.c.bf16 %v7506_v29, %v7505_v30  ;;  %v10729_v30 = vpack.c.bf16 %v7500_v19, %v7499_v49  ;;  %v7431_v29 = vsub.s32 2, %v13048_v28 }
 0x875   : > { %10708 = vmatprep.subr.bf16.mxu1 %v10707_v58  ;;  %v10731_v58 = vpack.c.bf16 %v7518_v57, %v7517_v14 }
 0x876   : > { %7405 = vmatmul.mubr.f32.gmra.mrb[6].mxu0 %v3818_v36 }
 0x925   : > { %v7323_v36 = vpop.f32.mrb[0].mxu0 }
 0x926   : > { %v10739_v20 = vadd.f32 %v7323_v36, %v12908_v60  ;;  %v7325_v1 = vpop.f32.mrb[1].mxu0  ;;  %v10711_v60 = vpack.c.bf16 %v7508_v25, %v7507_v34  ;;  %v7519_v36 = vld [vmem:[#allocation13 + $0x1f0] sm:$0xff] }
 0x927   : > { %v10740_v37 = vadd.f32 %v7325_v1, %v12910_v62  ;;  %v7432_v1 = vrot.slane %v13051_v26, %v7431_v29 }
 0x928   : > { %v7441_v18 = vadd.f32 %v10739_v20, %v7424_v38  ;;  %v10733_v20 = vpack.c.bf16 %v7502_v22, %v7501_v4 }
 0x929   : > { %v7442_v39 = vadd.f32 %v10740_v37, %v7428_v16  ;;  %v7329_v46 = vpop.f32.mrb[2].mxu0 }
 0x92a   : > { %v10741_v51 = vadd.f32 %v7329_v46, %v12912_v63  ;;  %v7331_v12 = vpop.f32.mrb[3].mxu0  ;;  %v7449_v27 = vmax.f32 %v7441_v18, 0.0  ;;  %v10715_v63 = vpack.c.bf16 %v7510_v7, %v7509_v17  ;;  %v7503_v18 = vld [vmem:[#allocation13 + $0x170] sm:$0xff] }
 0x92b   : > { %v7450_v41 = vmax.f32 %v7442_v39, 0.0  ;;  %v10742_v33 = vadd.f32 %v7331_v12, %v12914_v40  ;;  %v7511_v40 = vld [vmem:[#allocation13 + $0x1b0] sm:$0xff] }
 0x92c   : > { %v7445_v45 = vadd.f32 %v10741_v51, %v7424_v38  ;;  %v10719_v32 = vpack.c.bf16 %v7512_v21, %v7511_v40  ;;  %v7435_v38 = vsub.s32 3, %v13048_v28  ;;  %v10737_v28 = vpack.c.bf16 %v7504_v10, %v7503_v18 }
 0x92d   : > { %v7446_v62 = vadd.f32 %v10742_v33, %v7428_v16  ;;  %7592 = vmatprep.mubr.f32.mxu1 %v7450_v41  ;;  %v7520_v16 = vld [vmem:[#allocation13 + $0x1f8] sm:$0xff] }
 0x92e   : > { %7593 = vmatmul.mubr.f32.vlgmr.msra.gmra.mrb[112].mxu1 %v7449_v27  ;;  %v7453_v43 = vmax.f32 %v7445_v45, 0.0  ;;  %v10735_v37 = vpack.c.bf16 %v7520_v16, %v7519_v36  ;;  %v7436_v39 = vrot.slane %v13051_v26, %v7435_v38 }
 0x92f   : > { %v7454_v55 = vmax.f32 %v7446_v62, 0.0  ;;  %10710 = vmatpush3.bf16.msra.mxu1 %v10709_v47 }
 0x930   : > { %10712 = vmatprep.subr.bf16.mxu1 %v10711_v60 }
 0x931   : > { %7597 = vmatprep.mubr.f32.mxu1 %v7454_v55 }
 0x932   : > { %7598 = vmatmul.mubr.f32.gmra.mrb[114].mxu1 %v7453_v43  ;;  %v7679_v43 = vand.u32 127, %v7421_v9 }
 0x933   : > { %10714 = vmatpush3.bf16.msra.mxu1 %v10713_v15  ;;  %v7871_v15 = vld [vmem:[#allocation14] ss:$0 sm:$0xff] }
 0x934   : > { %10716 = vmatprep.subr.bf16.mxu1 %v10715_v63  ;;  %vm7680_vm0 = vcmp.lt.s32.totalorder %v7679_v43, 8 }
 0x937   : > { %10718 = vmatpush3.bf16.msra.mxu1 %v10717_v56 }
 0x938   : > { %10720 = vmatprep.subr.bf16.mxu1 %v10719_v32 }
 0x93b   : > { %10722 = vmatpush3.bf16.msra.mxu1 %v10721_v59 }
 0x93c   : > { %10724 = vmatprep.subr.bf16.mxu1 %v10723_v6 }
 0x93f   : > { %10726 = vmatpush3.bf16.msra.mxu1 %v10725_v53 }
 0x940   : > { %10728 = vmatprep.subr.bf16.mxu1 %v10727_v23 }
 0x943   : > { %10730 = vmatpush3.bf16.msra.mxu1 %v10729_v30 }
 0x944   : > { %10732 = vmatprep.subr.bf16.mxu1 %v10731_v58 }
 0x945   : > { %v7400_v8 = vpop.f32.mrb[4].mxu0 }
 0x946   : > { %v10743_v46 = vadd.f32 %v7400_v8, %v12922_v0  ;;  %v7402_v34 = vpop.f32.mrb[5].mxu0 }
 0x947   : > { %v10744_v25 = vadd.f32 %v7402_v34, %v12924_v2  ;;  %10734 = vmatpush3.bf16.msra.mxu1 %v10733_v20 }
 0x948   : > { %v7443_v51 = vadd.f32 %v10743_v46, %v7432_v1  ;;  %10736 = vmatprep.subr.bf16.mxu1 %v10735_v37 }
 0x949   : > { %v7444_v12 = vadd.f32 %v10744_v25, %v7436_v39  ;;  %v7406_v41 = vpop.f32.mrb[6].mxu0 }
 0x94a   : > { %v10745_v33 = vadd.f32 %v7406_v41, %v12926_v48  ;;  %v7408_v47 = vpop.f32.mrb[7].mxu0  ;;  %v7451_v60 = vmax.f32 %v7443_v51, 0.0 }
 0x94b   : > { %v7452_v27 = vmax.f32 %v7444_v12, 0.0  ;;  %v10746_v45 = vadd.f32 %v7408_v47, %v12928_v54  ;;  %10738 = vmatpush3.bf16.msra.mxu1 %v10737_v28 }
 0x94c   : > { %v7447_v26 = vadd.f32 %v10745_v33, %v7432_v1 }
 0x94d   : > { %v7448_v5 = vadd.f32 %v10746_v45, %v7436_v39  ;;  %7667 = vmatprep.mubr.f32.mxu1 %v7452_v27 }
 0x94e   : > { %7668 = vmatmul.mubr.f32.vlgmr.msra.gmra.mrb[116].mxu1 %v7451_v60  ;;  %v7455_v2 = vmax.f32 %v7447_v26, 0.0 }
 0x94f   : > { %v7456_v0 = vmax.f32 %v7448_v5, 0.0 }
 0x951   : > { %7672 = vmatprep.mubr.f32.mxu1 %v7456_v0 }
 0x952   : > { %7673 = vmatmul.mubr.f32.gmra.mrb[118].mxu1 %v7455_v2 }
 0xa01   : > { %v8427_v35 = vpop.f32.mrb[112].mxu1 }
 0xa02   : > { %v8428_v62 = vpop.f32.mrb[113].mxu1 }
 0xa03   : > { %v8429_v17 = vadd.f32 %v8428_v62, %v8427_v35 }
 0xa05   : > { %v8430_v7 = vpop.f32.mrb[114].mxu1  ;;  %v7595_v3 = vadd.f32 %v8429_v17, %v7871_v15 }
 0xa06   : > { %v8431_v55 = vpop.f32.mrb[115].mxu1 }
 0xa07   : > { %v8432_v48 = vadd.f32 %v8431_v55, %v8430_v7 }
 0xa09   : > { %v7600_v32 = vadd.f32 %v8432_v48, %v7871_v15 }
 0xa21   : > { %v8465_v54 = vpop.f32.mrb[116].mxu1 }
 0xa22   : > { %v8466_v63 = vpop.f32.mrb[117].mxu1 }
 0xa23   : > { %v8467_v42 = vadd.f32 %v8466_v63, %v8465_v54 }
 0xa25   : > { %v8468_v40 = vpop.f32.mrb[118].mxu1  ;;  %v7670_v21 = vadd.f32 %v8467_v42, %v7595_v3 }
 0xa26   : > { %v8469_v56 = vpop.f32.mrb[119].mxu1 }
 0xa27   : > { %v8470_v13 = vadd.f32 %v8469_v56, %v8468_v40  ;;  %v7681_v52 = vsel %vm7680_vm0, %v7670_v21, -1e+30 }
 0xa28   : > { %7683 = vmax.xlane.f32.xlu0 %v7681_v52 }
 0xa29   : > { %v7675_v50 = vadd.f32 %v8470_v13, %v7600_v32 }
 0xa2b   : > { %v7682_v11 = vsel %vm7680_vm0, %v7675_v50, -1e+30 }
 0xa2c   : > { %7685 = vmax.xlane.f32.xlu0 %v7682_v11 }
 0xab5   : > { %v7684_v59 = vpop.xlane.xlu0 %7683 }
 0xab6   : > { %v7687_v6 = vsub.f32 %v7681_v52, %v7684_v59 }
 0xab8   : > { %v7689_v61 = vmul.f32 1.442695, %v7687_v6 }
 0xab9   : > { %v7686_v9 = vpop.xlane.xlu0 %7685 }
 0xaba   : > { %11227 = vpow2.f32 %v7689_v61  ;;  %v7688_v24 = vsub.f32 %v7682_v11, %v7686_v9 }
 0xabc   : > { %v7691_v31 = vmul.f32 1.442695, %v7688_v24 }
 0xabe   : > { %11229 = vpow2.f32 %v7691_v31 }
 0xac4   : > { %v11228_v44 = vpop.eup %11227 }
 0xac5   : > { %7693 = vadd.xlane.f32.xlu1 %v11228_v44 }
 0xac8   : > { %v11230_v53 = vpop.eup %11229 }
 0xac9   : > { %7695 = vadd.xlane.f32.xlu1 %v11230_v53 }
 0xb52   : > { %v7694_v23 = vpop.xlane.xlu1 %7693 }
 0xb53   : > { %11231 = vrcp.f32 %v7694_v23 }
 0xb56   : > { %v7696_v49 = vpop.xlane.xlu1 %7695 }
 0xb57   : > { %11233 = vrcp.f32 %v7696_v49 }
 0xb5d   : > { %v11232_v19 = vpop.eup %11231 }
 0xb5e   : > { %v7698_v14 = vmul.f32 %v11232_v19, %v11228_v44 }
 0xb60   : > { %7701 = vst [vmem:[%s761_s28] sm:$0xff] %v7698_v14 }
 0xb61   : > { %v11234_v57 = vpop.eup %11233 }
 0xb62   : > { %v7700_v30 = vmul.f32 %v11234_v57, %v11230_v53 }
 0xb64   : > { %7702 = vst [vmem:[%s761_s28 + $0x8] sm:$0xff] %v7700_v30 }
 0xb65 PF: > { %s13156_s11 = sld [smem:[#allocation21_spill]]  ;;  %p21_p4 = scmp.ge.s32.totalorder %s11584_s13, 4  }
 0xb66   : > { %s13157_s30 = smov %s11498_s10 }
 0xb67   :  { %23 = sbr.rel (!%p21_p4) target bundleno = 9 (0x9), region = 162 }
 0xb6b   : > { %s13158_s10 = smov %s13156_s11  ;;  %s13159_s11 = smov %s11584_s13 }
 0xb6e   :  { %7725 = vsyncpa [#allocation4], 1 }
 0xb6f   :  { %7727 = vsyncpa [#allocation4 + $0x1], 1 }
 0xb70   :  { %7728 = vsyncpa [#allocation6], 1 }
 0xb71   :  { %7729 = vsyncpa [#allocation9], 1 }
 0xb72   :  { %7730 = vsyncpa [#allocation12], 1 }
 0xb73   :  { %7731 = vsyncpa [#allocation15], 1 }

</bundles_post_ra>
